<compile_context>
chip_gen: v7x
topology: tpu7x:2x2x1
jax: 0.10.0
libtpu: 0.0.40
codegen_flags: <defaults>
</compile_context>

<pallas_src>
import functools

import jax
import jax.numpy as jnp
import numpy as np
from jax import lax
from jax.experimental import pallas as pl
from jax.experimental.pallas import tpu as pltpu

EPS = 1e-5
C = 64            # trunk channel width
C2 = 2 * C        # two images packed per 128-lane vreg
NUM_LAYERS = 4    # layer1..layer4
NC_PAD = 128      # lane width of the fc / output block (== C2)


# ----------------------------------------------------------------------------- kernel
def _dscnn_kernel(xe_ref, xo_ref, pool_ref, dww_ref, shift_ref, pw_ref,
                  fcw_ref, fcb_ref, out_ref, act_ref, *,
                  R, Wrow, pad, ncls, inv_count):
    # Lane-half selector (constant per step).
    lo_half = lax.broadcasted_iota(jnp.int32, (1, C2), 1) < C

    # Stage the image pair: broadcast each scalar image column across its 64-lane half,
    # compose with one lane-select, single canvas store.  Zero the tail pad rows that
    # out-of-image taps of the last pair read (keeps everything finite through the
    # masked pooling matmul).
    xe = jnp.broadcast_to(xe_ref[...], (R, C2))
    xo = jnp.broadcast_to(xo_ref[...], (R, C2))
    act_ref[pl.ds(0, R), :] = jnp.where(lo_half, xe, xo)
    act_ref[pl.ds(R, pad), :] = jnp.zeros((pad, C2), jnp.float32)

    # Tap offsets on the fixed H x W canvas.  Valid outputs never wrap rows/images;
    # positions that do wrap only ever feed other invalid positions (masked at pool).
    offs = tuple(kh * Wrow + kw for kh in range(3) for kw in range(3))

    def dw3x3_relu(w9, shift):
        # 9 constant-offset shifted reads of the flat [R, 128] canvas (VPU mul/add).
        # BN scale is pre-folded into the taps, so only +shift and relu remain.
        acc = act_ref[pl.ds(offs[0], R), :] * w9[0]
        for t in range(1, 9):
            acc = acc + act_ref[pl.ds(offs[t], R), :] * w9[t]
        return jnp.maximum(acc + shift, 0.0)

    # conv1 (1 -> 64, 3x3 VALID) + bn1 + relu: with the channel-broadcast input this is
    # exactly a depthwise step.
    act_ref[pl.ds(0, R), :] = dw3x3_relu(dww_ref[0], shift_ref[0])

    # 4 depthwise-separable blocks: dw conv + bn + relu, then 1x1 conv + bn + relu.
    # Pointwise weights are block-diagonal [128,128] (one 64x64 block per lane half).
    for l in range(NUM_LAYERS):
        z = dw3x3_relu(dww_ref[l + 1], shift_ref[1 + 2 * l])
        zz = jnp.dot(z.astype(jnp.bfloat16), pw_ref[l],             # MXU, bf16 in
                     preferred_element_type=jnp.float32)             # f32 accumulate
        y = jnp.maximum(zz + shift_ref[2 + 2 * l], 0.0)
        if l < NUM_LAYERS - 1:
            act_ref[pl.ds(0, R), :] = y

    # Masked global average pool over each pair's valid output window (MXU matmul with
    # a 0/1 row-selection matrix).  bn2 / fc / bn3 are pre-folded into fcw / fcb.
    pooled = jnp.dot(pool_ref[...], y.astype(jnp.bfloat16),
                     preferred_element_type=jnp.float32) * inv_count          # [Btp, 128]
    logits = jnp.dot(pooled.astype(jnp.bfloat16), fcw_ref[...],
                     preferred_element_type=jnp.float32) + fcb_ref[...]       # [Btp, 128]

    # Per-half (per-image) log_softmax over the first `ncls` lanes of each 64-lane half.
    lane = lax.broadcasted_iota(jnp.int32, logits.shape, 1)
    in_hi = lane >= C
    valid = jnp.bitwise_and(lane, C - 1) < ncls
    neg = jnp.where(valid, logits, -1e30)
    neg_lo = jnp.where(in_hi, -1e30, neg)
    neg_hi = jnp.where(in_hi, neg, -1e30)
    m_lo = jnp.max(neg_lo, axis=-1, keepdims=True)
    m_hi = jnp.max(neg_hi, axis=-1, keepdims=True)
    lse_lo = jnp.log(jnp.sum(jnp.exp(neg_lo - m_lo), axis=-1, keepdims=True))
    lse_hi = jnp.log(jnp.sum(jnp.exp(neg_hi - m_hi), axis=-1, keepdims=True))
    m = jnp.where(in_hi, m_hi, m_lo)
    lse = jnp.where(in_hi, lse_hi, lse_lo)
    out_ref[...] = logits - m - lse


# --------------------------------------------------------------------- param folding
def _fold_bn(bn, pre_bias):
    """Fold eval-mode BN (gamma, beta, mean, var) + preceding bias into (scale, shift)."""
    s = bn['gamma'] / jnp.sqrt(bn['var'] + EPS)
    t = bn['beta'] + (pre_bias - bn['mean']) * s
    return s, t


def fold_params(params, num_classes):
    assert num_classes <= C  # TODO(synk): unpacked head needed for num_classes > 64

    s1, t1 = _fold_bn(params['bn1'], params['conv1_b'])
    dw_rows = [params['conv1_w'].reshape(C, 9).T * s1[None, :]]     # [9, C], scale folded
    shift_rows = [t1]
    pw_blocks = []
    for l in range(NUM_LAYERS):
        s, t = _fold_bn(params['bn_dw'][l], params['dw_b'][l])
        dw_rows.append(params['dw_w'][l].reshape(C, 9).T * s[None, :])
        shift_rows.append(t)
        s, t = _fold_bn(params['bn_pw'][l], params['pw_b'][l])
        pw_blocks.append(params['pw_w'][l].reshape(C, C).T * s[None, :])   # [Cin, Cout]
        shift_rows.append(t)

    # bn2 + fc + bn3 collapsed into one affine on the raw pooled features.
    s2, t2 = _fold_bn(params['bn2'], jnp.zeros((C,), jnp.float32))
    s3, t3 = _fold_bn(params['bn3'], params['fc_b'])
    wfc = params['fc_w'].T * s3[None, :]                              # [C, ncls]
    w_final = s2[:, None] * wfc                                       # [C, ncls]
    b_final = t3 + t2 @ wfc                                           # [ncls]

    # Lane-pack for two images per vreg: tile per-channel vectors x2, block-diagonal
    # pack the matrices.
    def tile2(v):                      # [.., C] -> [.., 2C]
        return jnp.concatenate([v, v], axis=-1)

    def blkdiag(w):                    # [C, C] -> [2C, 2C]
        z = jnp.zeros((C2, C2), w.dtype)
        return z.at[:C, :C].set(w).at[C:, C:].set(w)

    dww = jnp.stack([tile2(w) for w in dw_rows]).astype(jnp.float32)        # [5, 9, 128]
    shifts = jnp.stack([tile2(t) for t in shift_rows]).astype(jnp.float32)  # [9, 128]
    pw = jnp.stack([blkdiag(w) for w in pw_blocks]).astype(jnp.bfloat16)    # [4, 128, 128]

    fcw = jnp.zeros((C2, NC_PAD), jnp.float32)
    fcw = fcw.at[:C, :num_classes].set(w_final).at[C:, C:C + num_classes].set(w_final)
    fcb = jnp.zeros((1, NC_PAD), jnp.float32)
    fcb = fcb.at[0, :num_classes].set(b_final).at[0, C:C + num_classes].set(b_final)

    return dict(dww=dww, shifts=shifts, pw=pw,
                fcw=fcw.astype(jnp.bfloat16), fcb=fcb)


# ------------------------------------------------------------------------- wrapper
def dscnn_forward(x_nchw, kp, num_classes):
    B, Cin, H, W = x_nchw.shape
    assert Cin == 1
    assert num_classes <= C
    HW = H * W
    Hout = H - 2 * (NUM_LAYERS + 1)
    Wout = W - 2 * (NUM_LAYERS + 1)
    assert Hout > 0 and Wout > 0

    # Pad the batch to even so images pack two-per-vreg along the lane axis.
    Bp = B + (B % 2)
    if Bp != B:
        x_nchw = jnp.concatenate(
            [x_nchw, jnp.zeros((1, 1, H, W), x_nchw.dtype)], axis=0)

    Bt = 2
    for cand in (16, 8, 4, 2):
        if Bp % cand == 0:
            Bt = cand
            break
    Btp = Bt // 2                       # image pairs per grid step
    R = Btp * HW                        # canvas rows per step
    PAD = ((2 * W + 2 + 7) // 8) * 8    # >= max tap offset, sublane aligned

    xi = x_nchw.reshape(Bp, HW)
    x_even = xi[0::2].reshape(Bp // 2 * HW, 1)   # images 0,2,4,... -> lanes 0..63
    x_odd = xi[1::2].reshape(Bp // 2 * HW, 1)    # images 1,3,5,... -> lanes 64..127

    # 0/1 row-selection matrix for the per-pair masked mean pool (MXU reduction).
    mask2d = np.zeros((H, W), np.float32)
    mask2d[:Hout, :Wout] = 1.0
    pool = np.zeros((Btp, R), np.float32)
    for p in range(Btp):
        pool[p, p * HW:(p + 1) * HW] = mask2d.reshape(-1)
    pool_mat = jnp.asarray(pool, jnp.bfloat16)

    kernel = functools.partial(
        _dscnn_kernel, R=R, Wrow=W, pad=PAD, ncls=num_classes,
        inv_count=1.0 / float(Hout * Wout))

    out = pl.pallas_call(
        kernel,
        grid=(Bp // Bt,),
        in_specs=[
            pl.BlockSpec((R, 1), lambda b: (b, 0)),
            pl.BlockSpec((R, 1), lambda b: (b, 0)),
            pl.BlockSpec(pool_mat.shape, lambda b: (0, 0)),
            pl.BlockSpec(kp['dww'].shape, lambda b: (0, 0, 0)),
            pl.BlockSpec(kp['shifts'].shape, lambda b: (0, 0)),
            pl.BlockSpec(kp['pw'].shape, lambda b: (0, 0, 0)),
            pl.BlockSpec(kp['fcw'].shape, lambda b: (0, 0)),
            pl.BlockSpec(kp['fcb'].shape, lambda b: (0, 0)),
        ],
        out_specs=pl.BlockSpec((Btp, NC_PAD), lambda b: (b, 0)),
        out_shape=jax.ShapeDtypeStruct((Bp // 2, NC_PAD), jnp.float32),
        scratch_shapes=[pltpu.VMEM((R + PAD, C2), jnp.float32)],
        compiler_params=pltpu.CompilerParams(
            dimension_semantics=("parallel",)),   # batch blocks shard across TCs (v7x)
    )(x_even, x_odd, pool_mat, kp['dww'], kp['shifts'], kp['pw'], kp['fcw'], kp['fcb'])

    # Unpack lane halves back to batch rows; drop padding lanes / padded image.
    out = out.reshape(Bp // 2, 2, C)[:, :, :num_classes].reshape(Bp, num_classes)
    return out[:B]


# ----------------------------------------------------------------- pure-JAX reference
def _bn2d_eval(x, p):
    g, b, m, v = (p[k][None, :, None, None] for k in ('gamma', 'beta', 'mean', 'var'))
    return g * (x - m) / jnp.sqrt(v + EPS) + b


def reference_forward(x_nchw, params):
    dn = ('NCHW', 'OIHW', 'NCHW')
    hp = lax.Precision.HIGHEST
    y = lax.conv_general_dilated(x_nchw, params['conv1_w'], (1, 1), 'VALID',
                                 dimension_numbers=dn, precision=hp)
    y = y + params['conv1_b'][None, :, None, None]
    y = jnp.maximum(_bn2d_eval(y, params['bn1']), 0.0)
    for l in range(NUM_LAYERS):
        y = lax.conv_general_dilated(y, params['dw_w'][l], (1, 1), 'VALID',
                                     dimension_numbers=dn, feature_group_count=C,
                                     precision=hp)
        y = y + params['dw_b'][l][None, :, None, None]
        y = jnp.maximum(_bn2d_eval(y, params['bn_dw'][l]), 0.0)
        y = lax.conv_general_dilated(y, params['pw_w'][l], (1, 1), 'VALID',
                                     dimension_numbers=dn, precision=hp)
        y = y + params['pw_b'][l][None, :, None, None]
        y = jnp.maximum(_bn2d_eval(y, params['bn_pw'][l]), 0.0)
    y = jnp.mean(y, axis=(2, 3), keepdims=True)
    y = _bn2d_eval(y, params['bn2'])
    flat = y.reshape(y.shape[0], C)
    logits = flat @ params['fc_w'].T + params['fc_b']
    bn3 = params['bn3']
    logits = bn3['gamma'] * (logits - bn3['mean']) / jnp.sqrt(bn3['var'] + EPS) + bn3['beta']
    return jax.nn.log_softmax(logits, axis=1)


# ----------------------------------------------------------------------------- main
if __name__ == "__main__":
    B, H, W, NUM_CLASSES = 2, 16, 16, 10

    keys = list(jax.random.split(jax.random.PRNGKey(0), 128))
    kit = iter(keys)

    def randn(shape, scale):
        return (scale * jax.random.normal(next(kit), shape)).astype(jnp.float32)

    def bn_init(n):
        return dict(gamma=1.0 + randn((n,), 0.1), beta=randn((n,), 0.05),
                    mean=randn((n,), 0.05), var=1.0 + jnp.abs(randn((n,), 0.1)))

    # Kaiming-ish scales so activations stay O(1) through the 4 blocks.
    params = dict(
        conv1_w=randn((C, 1, 3, 3), 0.45), conv1_b=randn((C,), 0.05),
        bn1=bn_init(C),
        dw_w=[randn((C, 1, 3, 3), 0.45) for _ in range(NUM_LAYERS)],
        dw_b=[randn((C,), 0.05) for _ in range(NUM_LAYERS)],
        bn_dw=[bn_init(C) for _ in range(NUM_LAYERS)],
        pw_w=[randn((C, C, 1, 1), 0.17) for _ in range(NUM_LAYERS)],
        pw_b=[randn((C,), 0.05) for _ in range(NUM_LAYERS)],
        bn_pw=[bn_init(C) for _ in range(NUM_LAYERS)],
        bn2=bn_init(C),
        fc_w=randn((NUM_CLASSES, C), 0.17), fc_b=randn((NUM_CLASSES,), 0.05),
        bn3=bn_init(NUM_CLASSES),
    )
    x = jax.random.normal(next(kit), (B, 1, H, W), dtype=jnp.float32)  # NCHW like torch

    kp = fold_params(params, NUM_CLASSES)
    out = jax.block_until_ready(dscnn_forward(x, kp, NUM_CLASSES))

    ref = reference_forward(x, params)
    # Kernel uses bf16 MXU inputs (f32 accumulation); reference is all-f32 HIGHEST,
    # so tolerance reflects expected bf16 rounding through 5 small matmuls.
    np.testing.assert_allclose(np.asarray(out), np.asarray(ref), atol=1e-1, rtol=1e-1)
    print("KERNEL_OK")
</pallas_src>

<mosaic_0001>
module attributes {stable_mosaic.version = 11 : i64} {
  func.func @_dscnn_kernel(%arg0: i32, %arg1: memref<256x1xf32, #tpu.memory_space<vmem>>, %arg2: memref<256x1xf32, #tpu.memory_space<vmem>>, %arg3: memref<1x256xbf16, #tpu.memory_space<vmem>>, %arg4: memref<5x9x128xf32, #tpu.memory_space<vmem>>, %arg5: memref<9x128xf32, #tpu.memory_space<vmem>>, %arg6: memref<4x128x128xbf16, #tpu.memory_space<vmem>>, %arg7: memref<128x128xbf16, #tpu.memory_space<vmem>>, %arg8: memref<1x128xf32, #tpu.memory_space<vmem>>, %arg9: memref<1x128xf32, #tpu.memory_space<vmem>>, %arg10: memref<296x128xf32, #tpu.memory_space<vmem>>) attributes {dimension_semantics = [#tpu.dimension_semantics<parallel>], iteration_bounds = array<i64: 1>, scalar_prefetch = 0 : i64, scratch_operands = 1 : i64, tpu.core_type = #tpu.core_type<tc>, window_params = [{transform_indices = @transform_0, window_bounds = array<i64: 256, 1>}, {transform_indices = @transform_1, window_bounds = array<i64: 256, 1>}, {pipeline_mode = #tpu.pipeline_mode<synchronous>, transform_indices = @transform_2, window_bounds = array<i64: 1, 256>}, {pipeline_mode = #tpu.pipeline_mode<synchronous>, transform_indices = @transform_3, window_bounds = array<i64: 5, 9, 128>}, {pipeline_mode = #tpu.pipeline_mode<synchronous>, transform_indices = @transform_4, window_bounds = array<i64: 9, 128>}, {pipeline_mode = #tpu.pipeline_mode<synchronous>, transform_indices = @transform_5, window_bounds = array<i64: 4, 128, 128>}, {pipeline_mode = #tpu.pipeline_mode<synchronous>, transform_indices = @transform_6, window_bounds = array<i64: 128, 128>}, {pipeline_mode = #tpu.pipeline_mode<synchronous>, transform_indices = @transform_7, window_bounds = array<i64: 1, 128>}, {transform_indices = @transform_8, window_bounds = array<i64: 1, 128>}]} {
    %0 = tpu.iota {dimensions = array<i32: 1>} : vector<1x128xi32>
    %c64_i32 = arith.constant 64 : i32
    %1 = vector.broadcast %c64_i32 : i32 to vector<1x128xi32>
    %2 = arith.cmpi slt, %0, %1 : vector<1x128xi32>
    %c0 = arith.constant 0 : index
    %c0_0 = arith.constant 0 : index
    %3 = vector.load %arg1[%c0, %c0_0] : memref<256x1xf32, #tpu.memory_space<vmem>>, vector<256x1xf32>
    %4 = vector.shape_cast %3 : vector<256x1xf32> to vector<256x1xf32>
    %5 = vector.broadcast %4 : vector<256x1xf32> to vector<256x128xf32>
    %c0_1 = arith.constant 0 : index
    %c0_2 = arith.constant 0 : index
    %6 = vector.load %arg2[%c0_1, %c0_2] : memref<256x1xf32, #tpu.memory_space<vmem>>, vector<256x1xf32>
    %7 = vector.shape_cast %6 : vector<256x1xf32> to vector<256x1xf32>
    %8 = vector.broadcast %7 : vector<256x1xf32> to vector<256x128xf32>
    %9 = vector.shape_cast %2 : vector<1x128xi1> to vector<1x128xi1>
    %10 = vector.broadcast %9 : vector<1x128xi1> to vector<256x128xi1>
    %11 = arith.select %10, %5, %8 : vector<256x128xi1>, vector<256x128xf32>
    %c0_3 = arith.constant 0 : index
    %c0_4 = arith.constant 0 : index
    %12 = vector.load %arg10[%c0_3, %c0_4] : memref<296x128xf32, #tpu.memory_space<vmem>>, vector<256x128xf32>
    tpu.vector_store %arg10[%c0_3, %c0_4], %11 {strides = array<i32>} : memref<296x128xf32, #tpu.memory_space<vmem>>, vector<256x128xf32>,
    %cst = arith.constant 0.000000e+00 : f32
    %13 = vector.broadcast %cst : f32 to vector<40x128xf32>
    %c256 = arith.constant 256 : index
    %c0_5 = arith.constant 0 : index
    %14 = vector.load %arg10[%c256, %c0_5] : memref<296x128xf32, #tpu.memory_space<vmem>>, vector<40x128xf32>
    tpu.vector_store %arg10[%c256, %c0_5], %13 {strides = array<i32>} : memref<296x128xf32, #tpu.memory_space<vmem>>, vector<40x128xf32>,
    %c0_6 = arith.constant 0 : index
    %c0_7 = arith.constant 0 : index
    %c0_8 = arith.constant 0 : index
    %15 = vector.load %arg4[%c0_6, %c0_7, %c0_8] : memref<5x9x128xf32, #tpu.memory_space<vmem>>, vector<1x9x128xf32>
    %16 = vector.shape_cast %15 : vector<1x9x128xf32> to vector<9x128xf32>
    %c0_9 = arith.constant 0 : index
    %c0_10 = arith.constant 0 : index
    %17 = vector.load %arg5[%c0_9, %c0_10] : memref<9x128xf32, #tpu.memory_space<vmem>>, vector<1x128xf32>
    %18 = vector.shape_cast %17 : vector<1x128xf32> to vector<128xf32>
    %c0_11 = arith.constant 0 : index
    %c0_12 = arith.constant 0 : index
    %19 = vector.load %arg10[%c0_11, %c0_12] : memref<296x128xf32, #tpu.memory_space<vmem>>, vector<256x128xf32>
    %20 = vector.extract_strided_slice %16 {offsets = [0, 0], sizes = [1, 128], strides = [1, 1]} : vector<9x128xf32> to vector<1x128xf32>
    %21 = vector.shape_cast %20 : vector<1x128xf32> to vector<128xf32>
    %22 = vector.shape_cast %21 : vector<128xf32> to vector<1x128xf32>
    %23 = vector.broadcast %22 : vector<1x128xf32> to vector<256x128xf32>
    %24 = arith.mulf %19, %23 : vector<256x128xf32>
    %c1 = arith.constant 1 : index
    %c0_13 = arith.constant 0 : index
    %25 = vector.load %arg10[%c1, %c0_13] : memref<296x128xf32, #tpu.memory_space<vmem>>, vector<256x128xf32>
    %26 = vector.extract_strided_slice %16 {offsets = [1, 0], sizes = [1, 128], strides = [1, 1]} : vector<9x128xf32> to vector<1x128xf32>
    %27 = vector.shape_cast %26 : vector<1x128xf32> to vector<128xf32>
    %28 = vector.shape_cast %27 : vector<128xf32> to vector<1x128xf32>
    %29 = vector.broadcast %28 : vector<1x128xf32> to vector<256x128xf32>
    %30 = arith.mulf %25, %29 : vector<256x128xf32>
    %31 = arith.addf %24, %30 : vector<256x128xf32>
    %c2 = arith.constant 2 : index
    %c0_14 = arith.constant 0 : index
    %32 = vector.load %arg10[%c2, %c0_14] : memref<296x128xf32, #tpu.memory_space<vmem>>, vector<256x128xf32>
    %33 = vector.extract_strided_slice %16 {offsets = [2, 0], sizes = [1, 128], strides = [1, 1]} : vector<9x128xf32> to vector<1x128xf32>
    %34 = vector.shape_cast %33 : vector<1x128xf32> to vector<128xf32>
    %35 = vector.shape_cast %34 : vector<128xf32> to vector<1x128xf32>
    %36 = vector.broadcast %35 : vector<1x128xf32> to vector<256x128xf32>
    %37 = arith.mulf %32, %36 : vector<256x128xf32>
    %38 = arith.addf %31, %37 : vector<256x128xf32>
    %c16 = arith.constant 16 : index
    %c0_15 = arith.constant 0 : index
    %39 = vector.load %arg10[%c16, %c0_15] : memref<296x128xf32, #tpu.memory_space<vmem>>, vector<256x128xf32>
    %40 = vector.extract_strided_slice %16 {offsets = [3, 0], sizes = [1, 128], strides = [1, 1]} : vector<9x128xf32> to vector<1x128xf32>
    %41 = vector.shape_cast %40 : vector<1x128xf32> to vector<128xf32>
    %42 = vector.shape_cast %41 : vector<128xf32> to vector<1x128xf32>
    %43 = vector.broadcast %42 : vector<1x128xf32> to vector<256x128xf32>
    %44 = arith.mulf %39, %43 : vector<256x128xf32>
    %45 = arith.addf %38, %44 : vector<256x128xf32>
    %c17 = arith.constant 17 : index
    %c0_16 = arith.constant 0 : index
    %46 = vector.load %arg10[%c17, %c0_16] : memref<296x128xf32, #tpu.memory_space<vmem>>, vector<256x128xf32>
    %47 = vector.extract_strided_slice %16 {offsets = [4, 0], sizes = [1, 128], strides = [1, 1]} : vector<9x128xf32> to vector<1x128xf32>
    %48 = vector.shape_cast %47 : vector<1x128xf32> to vector<128xf32>
    %49 = vector.shape_cast %48 : vector<128xf32> to vector<1x128xf32>
    %50 = vector.broadcast %49 : vector<1x128xf32> to vector<256x128xf32>
    %51 = arith.mulf %46, %50 : vector<256x128xf32>
    %52 = arith.addf %45, %51 : vector<256x128xf32>
    %c18 = arith.constant 18 : index
    %c0_17 = arith.constant 0 : index
    %53 = vector.load %arg10[%c18, %c0_17] : memref<296x128xf32, #tpu.memory_space<vmem>>, vector<256x128xf32>
    %54 = vector.extract_strided_slice %16 {offsets = [5, 0], sizes = [1, 128], strides = [1, 1]} : vector<9x128xf32> to vector<1x128xf32>
    %55 = vector.shape_cast %54 : vector<1x128xf32> to vector<128xf32>
    %56 = vector.shape_cast %55 : vector<128xf32> to vector<1x128xf32>
    %57 = vector.broadcast %56 : vector<1x128xf32> to vector<256x128xf32>
    %58 = arith.mulf %53, %57 : vector<256x128xf32>
    %59 = arith.addf %52, %58 : vector<256x128xf32>
    %c32 = arith.constant 32 : index
    %c0_18 = arith.constant 0 : index
    %60 = vector.load %arg10[%c32, %c0_18] : memref<296x128xf32, #tpu.memory_space<vmem>>, vector<256x128xf32>
    %61 = vector.extract_strided_slice %16 {offsets = [6, 0], sizes = [1, 128], strides = [1, 1]} : vector<9x128xf32> to vector<1x128xf32>
    %62 = vector.shape_cast %61 : vector<1x128xf32> to vector<128xf32>
    %63 = vector.shape_cast %62 : vector<128xf32> to vector<1x128xf32>
    %64 = vector.broadcast %63 : vector<1x128xf32> to vector<256x128xf32>
    %65 = arith.mulf %60, %64 : vector<256x128xf32>
    %66 = arith.addf %59, %65 : vector<256x128xf32>
    %c33 = arith.constant 33 : index
    %c0_19 = arith.constant 0 : index
    %67 = vector.load %arg10[%c33, %c0_19] : memref<296x128xf32, #tpu.memory_space<vmem>>, vector<256x128xf32>
    %68 = vector.extract_strided_slice %16 {offsets = [7, 0], sizes = [1, 128], strides = [1, 1]} : vector<9x128xf32> to vector<1x128xf32>
    %69 = vector.shape_cast %68 : vector<1x128xf32> to vector<128xf32>
    %70 = vector.shape_cast %69 : vector<128xf32> to vector<1x128xf32>
    %71 = vector.broadcast %70 : vector<1x128xf32> to vector<256x128xf32>
    %72 = arith.mulf %67, %71 : vector<256x128xf32>
    %73 = arith.addf %66, %72 : vector<256x128xf32>
    %c34 = arith.constant 34 : index
    %c0_20 = arith.constant 0 : index
    %74 = vector.load %arg10[%c34, %c0_20] : memref<296x128xf32, #tpu.memory_space<vmem>>, vector<256x128xf32>
    %75 = vector.extract_strided_slice %16 {offsets = [8, 0], sizes = [1, 128], strides = [1, 1]} : vector<9x128xf32> to vector<1x128xf32>
    %76 = vector.shape_cast %75 : vector<1x128xf32> to vector<128xf32>
    %77 = vector.shape_cast %76 : vector<128xf32> to vector<1x128xf32>
    %78 = vector.broadcast %77 : vector<1x128xf32> to vector<256x128xf32>
    %79 = arith.mulf %74, %78 : vector<256x128xf32>
    %80 = arith.addf %73, %79 : vector<256x128xf32>
    %81 = vector.shape_cast %18 : vector<128xf32> to vector<1x128xf32>
    %82 = vector.broadcast %81 : vector<1x128xf32> to vector<256x128xf32>
    %83 = arith.addf %80, %82 : vector<256x128xf32>
    %cst_21 = arith.constant 0.000000e+00 : f32
    %84 = vector.broadcast %cst_21 : f32 to vector<256x128xf32>
    %85 = arith.maximumf %83, %84 : vector<256x128xf32>
    %c0_22 = arith.constant 0 : index
    %c0_23 = arith.constant 0 : index
    %86 = vector.load %arg10[%c0_22, %c0_23] : memref<296x128xf32, #tpu.memory_space<vmem>>, vector<256x128xf32>
    tpu.vector_store %arg10[%c0_22, %c0_23], %85 {strides = array<i32>} : memref<296x128xf32, #tpu.memory_space<vmem>>, vector<256x128xf32>,
    %c1_24 = arith.constant 1 : index
    %c0_25 = arith.constant 0 : index
    %c0_26 = arith.constant 0 : index
    %87 = vector.load %arg4[%c1_24, %c0_25, %c0_26] : memref<5x9x128xf32, #tpu.memory_space<vmem>>, vector<1x9x128xf32>
    %88 = vector.shape_cast %87 : vector<1x9x128xf32> to vector<9x128xf32>
    %c1_27 = arith.constant 1 : index
    %c0_28 = arith.constant 0 : index
    %89 = vector.load %arg5[%c1_27, %c0_28] : memref<9x128xf32, #tpu.memory_space<vmem>>, vector<1x128xf32>
    %90 = vector.shape_cast %89 : vector<1x128xf32> to vector<128xf32>
    %c0_29 = arith.constant 0 : index
    %c0_30 = arith.constant 0 : index
    %91 = vector.load %arg10[%c0_29, %c0_30] : memref<296x128xf32, #tpu.memory_space<vmem>>, vector<256x128xf32>
    %92 = vector.extract_strided_slice %88 {offsets = [0, 0], sizes = [1, 128], strides = [1, 1]} : vector<9x128xf32> to vector<1x128xf32>
    %93 = vector.shape_cast %92 : vector<1x128xf32> to vector<128xf32>
    %94 = vector.shape_cast %93 : vector<128xf32> to vector<1x128xf32>
    %95 = vector.broadcast %94 : vector<1x128xf32> to vector<256x128xf32>
    %96 = arith.mulf %91, %95 : vector<256x128xf32>
    %c1_31 = arith.constant 1 : index
    %c0_32 = arith.constant 0 : index
    %97 = vector.load %arg10[%c1_31, %c0_32] : memref<296x128xf32, #tpu.memory_space<vmem>>, vector<256x128xf32>
    %98 = vector.extract_strided_slice %88 {offsets = [1, 0], sizes = [1, 128], strides = [1, 1]} : vector<9x128xf32> to vector<1x128xf32>
    %99 = vector.shape_cast %98 : vector<1x128xf32> to vector<128xf32>
    %100 = vector.shape_cast %99 : vector<128xf32> to vector<1x128xf32>
    %101 = vector.broadcast %100 : vector<1x128xf32> to vector<256x128xf32>
    %102 = arith.mulf %97, %101 : vector<256x128xf32>
    %103 = arith.addf %96, %102 : vector<256x128xf32>
    %c2_33 = arith.constant 2 : index
    %c0_34 = arith.constant 0 : index
    %104 = vector.load %arg10[%c2_33, %c0_34] : memref<296x128xf32, #tpu.memory_space<vmem>>, vector<256x128xf32>
    %105 = vector.extract_strided_slice %88 {offsets = [2, 0], sizes = [1, 128], strides = [1, 1]} : vector<9x128xf32> to vector<1x128xf32>
    %106 = vector.shape_cast %105 : vector<1x128xf32> to vector<128xf32>
    %107 = vector.shape_cast %106 : vector<128xf32> to vector<1x128xf32>
    %108 = vector.broadcast %107 : vector<1x128xf32> to vector<256x128xf32>
    %109 = arith.mulf %104, %108 : vector<256x128xf32>
    %110 = arith.addf %103, %109 : vector<256x128xf32>
    %c16_35 = arith.constant 16 : index
    %c0_36 = arith.constant 0 : index
    %111 = vector.load %arg10[%c16_35, %c0_36] : memref<296x128xf32, #tpu.memory_space<vmem>>, vector<256x128xf32>
    %112 = vector.extract_strided_slice %88 {offsets = [3, 0], sizes = [1, 128], strides = [1, 1]} : vector<9x128xf32> to vector<1x128xf32>
    %113 = vector.shape_cast %112 : vector<1x128xf32> to vector<128xf32>
    %114 = vector.shape_cast %113 : vector<128xf32> to vector<1x128xf32>
    %115 = vector.broadcast %114 : vector<1x128xf32> to vector<256x128xf32>
    %116 = arith.mulf %111, %115 : vector<256x128xf32>
    %117 = arith.addf %110, %116 : vector<256x128xf32>
    %c17_37 = arith.constant 17 : index
    %c0_38 = arith.constant 0 : index
    %118 = vector.load %arg10[%c17_37, %c0_38] : memref<296x128xf32, #tpu.memory_space<vmem>>, vector<256x128xf32>
    %119 = vector.extract_strided_slice %88 {offsets = [4, 0], sizes = [1, 128], strides = [1, 1]} : vector<9x128xf32> to vector<1x128xf32>
    %120 = vector.shape_cast %119 : vector<1x128xf32> to vector<128xf32>
    %121 = vector.shape_cast %120 : vector<128xf32> to vector<1x128xf32>
    %122 = vector.broadcast %121 : vector<1x128xf32> to vector<256x128xf32>
    %123 = arith.mulf %118, %122 : vector<256x128xf32>
    %124 = arith.addf %117, %123 : vector<256x128xf32>
    %c18_39 = arith.constant 18 : index
    %c0_40 = arith.constant 0 : index
    %125 = vector.load %arg10[%c18_39, %c0_40] : memref<296x128xf32, #tpu.memory_space<vmem>>, vector<256x128xf32>
    %126 = vector.extract_strided_slice %88 {offsets = [5, 0], sizes = [1, 128], strides = [1, 1]} : vector<9x128xf32> to vector<1x128xf32>
    %127 = vector.shape_cast %126 : vector<1x128xf32> to vector<128xf32>
    %128 = vector.shape_cast %127 : vector<128xf32> to vector<1x128xf32>
    %129 = vector.broadcast %128 : vector<1x128xf32> to vector<256x128xf32>
    %130 = arith.mulf %125, %129 : vector<256x128xf32>
    %131 = arith.addf %124, %130 : vector<256x128xf32>
    %c32_41 = arith.constant 32 : index
    %c0_42 = arith.constant 0 : index
    %132 = vector.load %arg10[%c32_41, %c0_42] : memref<296x128xf32, #tpu.memory_space<vmem>>, vector<256x128xf32>
    %133 = vector.extract_strided_slice %88 {offsets = [6, 0], sizes = [1, 128], strides = [1, 1]} : vector<9x128xf32> to vector<1x128xf32>
    %134 = vector.shape_cast %133 : vector<1x128xf32> to vector<128xf32>
    %135 = vector.shape_cast %134 : vector<128xf32> to vector<1x128xf32>
    %136 = vector.broadcast %135 : vector<1x128xf32> to vector<256x128xf32>
    %137 = arith.mulf %132, %136 : vector<256x128xf32>
    %138 = arith.addf %131, %137 : vector<256x128xf32>
    %c33_43 = arith.constant 33 : index
    %c0_44 = arith.constant 0 : index
    %139 = vector.load %arg10[%c33_43, %c0_44] : memref<296x128xf32, #tpu.memory_space<vmem>>, vector<256x128xf32>
    %140 = vector.extract_strided_slice %88 {offsets = [7, 0], sizes = [1, 128], strides = [1, 1]} : vector<9x128xf32> to vector<1x128xf32>
    %141 = vector.shape_cast %140 : vector<1x128xf32> to vector<128xf32>
    %142 = vector.shape_cast %141 : vector<128xf32> to vector<1x128xf32>
    %143 = vector.broadcast %142 : vector<1x128xf32> to vector<256x128xf32>
    %144 = arith.mulf %139, %143 : vector<256x128xf32>
    %145 = arith.addf %138, %144 : vector<256x128xf32>
    %c34_45 = arith.constant 34 : index
    %c0_46 = arith.constant 0 : index
    %146 = vector.load %arg10[%c34_45, %c0_46] : memref<296x128xf32, #tpu.memory_space<vmem>>, vector<256x128xf32>
    %147 = vector.extract_strided_slice %88 {offsets = [8, 0], sizes = [1, 128], strides = [1, 1]} : vector<9x128xf32> to vector<1x128xf32>
    %148 = vector.shape_cast %147 : vector<1x128xf32> to vector<128xf32>
    %149 = vector.shape_cast %148 : vector<128xf32> to vector<1x128xf32>
    %150 = vector.broadcast %149 : vector<1x128xf32> to vector<256x128xf32>
    %151 = arith.mulf %146, %150 : vector<256x128xf32>
    %152 = arith.addf %145, %151 : vector<256x128xf32>
    %153 = vector.shape_cast %90 : vector<128xf32> to vector<1x128xf32>
    %154 = vector.broadcast %153 : vector<1x128xf32> to vector<256x128xf32>
    %155 = arith.addf %152, %154 : vector<256x128xf32>
    %cst_47 = arith.constant 0.000000e+00 : f32
    %156 = vector.broadcast %cst_47 : f32 to vector<256x128xf32>
    %157 = arith.maximumf %155, %156 : vector<256x128xf32>
    %158 = arith.truncf %157 : vector<256x128xf32> to vector<256x128xbf16>
    %c0_48 = arith.constant 0 : index
    %c0_49 = arith.constant 0 : index
    %c0_50 = arith.constant 0 : index
    %159 = vector.load %arg6[%c0_48, %c0_49, %c0_50] : memref<4x128x128xbf16, #tpu.memory_space<vmem>>, vector<1x128x128xbf16>
    %160 = vector.shape_cast %159 : vector<1x128x128xbf16> to vector<128x128xbf16>
    %cst_51 = arith.constant dense<0.000000e+00> : vector<256x128xf32>
    %161 = tpu.matmul %158, %160, %cst_51 {dimension_numbers = #tpu.dot_dimension_numbers<[1], [0], [0], [1], [0, 0, 1, 1], [], []>} : vector<256x128xbf16>, vector<128x128xbf16>, vector<256x128xf32> -> vector<256x128xf32>
    %c2_52 = arith.constant 2 : index
    %c0_53 = arith.constant 0 : index
    %162 = vector.load %arg5[%c2_52, %c0_53] : memref<9x128xf32, #tpu.memory_space<vmem>>, vector<1x128xf32>
    %163 = vector.shape_cast %162 : vector<1x128xf32> to vector<128xf32>
    %164 = vector.shape_cast %163 : vector<128xf32> to vector<1x128xf32>
    %165 = vector.broadcast %164 : vector<1x128xf32> to vector<256x128xf32>
    %166 = arith.addf %161, %165 : vector<256x128xf32>
    %cst_54 = arith.constant 0.000000e+00 : f32
    %167 = vector.broadcast %cst_54 : f32 to vector<256x128xf32>
    %168 = arith.maximumf %166, %167 : vector<256x128xf32>
    %c0_55 = arith.constant 0 : index
    %c0_56 = arith.constant 0 : index
    %169 = vector.load %arg10[%c0_55, %c0_56] : memref<296x128xf32, #tpu.memory_space<vmem>>, vector<256x128xf32>
    tpu.vector_store %arg10[%c0_55, %c0_56], %168 {strides = array<i32>} : memref<296x128xf32, #tpu.memory_space<vmem>>, vector<256x128xf32>,
    %c2_57 = arith.constant 2 : index
    %c0_58 = arith.constant 0 : index
    %c0_59 = arith.constant 0 : index
    %170 = vector.load %arg4[%c2_57, %c0_58, %c0_59] : memref<5x9x128xf32, #tpu.memory_space<vmem>>, vector<1x9x128xf32>
    %171 = vector.shape_cast %170 : vector<1x9x128xf32> to vector<9x128xf32>
    %c3 = arith.constant 3 : index
    %c0_60 = arith.constant 0 : index
    %172 = vector.load %arg5[%c3, %c0_60] : memref<9x128xf32, #tpu.memory_space<vmem>>, vector<1x128xf32>
    %173 = vector.shape_cast %172 : vector<1x128xf32> to vector<128xf32>
    %c0_61 = arith.constant 0 : index
    %c0_62 = arith.constant 0 : index
    %174 = vector.load %arg10[%c0_61, %c0_62] : memref<296x128xf32, #tpu.memory_space<vmem>>, vector<256x128xf32>
    %175 = vector.extract_strided_slice %171 {offsets = [0, 0], sizes = [1, 128], strides = [1, 1]} : vector<9x128xf32> to vector<1x128xf32>
    %176 = vector.shape_cast %175 : vector<1x128xf32> to vector<128xf32>
    %177 = vector.shape_cast %176 : vector<128xf32> to vector<1x128xf32>
    %178 = vector.broadcast %177 : vector<1x128xf32> to vector<256x128xf32>
    %179 = arith.mulf %174, %178 : vector<256x128xf32>
    %c1_63 = arith.constant 1 : index
    %c0_64 = arith.constant 0 : index
    %180 = vector.load %arg10[%c1_63, %c0_64] : memref<296x128xf32, #tpu.memory_space<vmem>>, vector<256x128xf32>
    %181 = vector.extract_strided_slice %171 {offsets = [1, 0], sizes = [1, 128], strides = [1, 1]} : vector<9x128xf32> to vector<1x128xf32>
    %182 = vector.shape_cast %181 : vector<1x128xf32> to vector<128xf32>
    %183 = vector.shape_cast %182 : vector<128xf32> to vector<1x128xf32>
    %184 = vector.broadcast %183 : vector<1x128xf32> to vector<256x128xf32>
    %185 = arith.mulf %180, %184 : vector<256x128xf32>
    %186 = arith.addf %179, %185 : vector<256x128xf32>
    %c2_65 = arith.constant 2 : index
    %c0_66 = arith.constant 0 : index
    %187 = vector.load %arg10[%c2_65, %c0_66] : memref<296x128xf32, #tpu.memory_space<vmem>>, vector<256x128xf32>
    %188 = vector.extract_strided_slice %171 {offsets = [2, 0], sizes = [1, 128], strides = [1, 1]} : vector<9x128xf32> to vector<1x128xf32>
    %189 = vector.shape_cast %188 : vector<1x128xf32> to vector<128xf32>
    %190 = vector.shape_cast %189 : vector<128xf32> to vector<1x128xf32>
    %191 = vector.broadcast %190 : vector<1x128xf32> to vector<256x128xf32>
    %192 = arith.mulf %187, %191 : vector<256x128xf32>
    %193 = arith.addf %186, %192 : vector<256x128xf32>
    %c16_67 = arith.constant 16 : index
    %c0_68 = arith.constant 0 : index
    %194 = vector.load %arg10[%c16_67, %c0_68] : memref<296x128xf32, #tpu.memory_space<vmem>>, vector<256x128xf32>
    %195 = vector.extract_strided_slice %171 {offsets = [3, 0], sizes = [1, 128], strides = [1, 1]} : vector<9x128xf32> to vector<1x128xf32>
    %196 = vector.shape_cast %195 : vector<1x128xf32> to vector<128xf32>
    %197 = vector.shape_cast %196 : vector<128xf32> to vector<1x128xf32>
    %198 = vector.broadcast %197 : vector<1x128xf32> to vector<256x128xf32>
    %199 = arith.mulf %194, %198 : vector<256x128xf32>
    %200 = arith.addf %193, %199 : vector<256x128xf32>
    %c17_69 = arith.constant 17 : index
    %c0_70 = arith.constant 0 : index
    %201 = vector.load %arg10[%c17_69, %c0_70] : memref<296x128xf32, #tpu.memory_space<vmem>>, vector<256x128xf32>
    %202 = vector.extract_strided_slice %171 {offsets = [4, 0], sizes = [1, 128], strides = [1, 1]} : vector<9x128xf32> to vector<1x128xf32>
    %203 = vector.shape_cast %202 : vector<1x128xf32> to vector<128xf32>
    %204 = vector.shape_cast %203 : vector<128xf32> to vector<1x128xf32>
    %205 = vector.broadcast %204 : vector<1x128xf32> to vector<256x128xf32>
    %206 = arith.mulf %201, %205 : vector<256x128xf32>
    %207 = arith.addf %200, %206 : vector<256x128xf32>
    %c18_71 = arith.constant 18 : index
    %c0_72 = arith.constant 0 : index
    %208 = vector.load %arg10[%c18_71, %c0_72] : memref<296x128xf32, #tpu.memory_space<vmem>>, vector<256x128xf32>
    %209 = vector.extract_strided_slice %171 {offsets = [5, 0], sizes = [1, 128], strides = [1, 1]} : vector<9x128xf32> to vector<1x128xf32>
    %210 = vector.shape_cast %209 : vector<1x128xf32> to vector<128xf32>
    %211 = vector.shape_cast %210 : vector<128xf32> to vector<1x128xf32>
    %212 = vector.broadcast %211 : vector<1x128xf32> to vector<256x128xf32>
    %213 = arith.mulf %208, %212 : vector<256x128xf32>
    %214 = arith.addf %207, %213 : vector<256x128xf32>
    %c32_73 = arith.constant 32 : index
    %c0_74 = arith.constant 0 : index
    %215 = vector.load %arg10[%c32_73, %c0_74] : memref<296x128xf32, #tpu.memory_space<vmem>>, vector<256x128xf32>
    %216 = vector.extract_strided_slice %171 {offsets = [6, 0], sizes = [1, 128], strides = [1, 1]} : vector<9x128xf32> to vector<1x128xf32>
    %217 = vector.shape_cast %216 : vector<1x128xf32> to vector<128xf32>
    %218 = vector.shape_cast %217 : vector<128xf32> to vector<1x128xf32>
    %219 = vector.broadcast %218 : vector<1x128xf32> to vector<256x128xf32>
    %220 = arith.mulf %215, %219 : vector<256x128xf32>
    %221 = arith.addf %214, %220 : vector<256x128xf32>
    %c33_75 = arith.constant 33 : index
    %c0_76 = arith.constant 0 : index
    %222 = vector.load %arg10[%c33_75, %c0_76] : memref<296x128xf32, #tpu.memory_space<vmem>>, vector<256x128xf32>
    %223 = vector.extract_strided_slice %171 {offsets = [7, 0], sizes = [1, 128], strides = [1, 1]} : vector<9x128xf32> to vector<1x128xf32>
    %224 = vector.shape_cast %223 : vector<1x128xf32> to vector<128xf32>
    %225 = vector.shape_cast %224 : vector<128xf32> to vector<1x128xf32>
    %226 = vector.broadcast %225 : vector<1x128xf32> to vector<256x128xf32>
    %227 = arith.mulf %222, %226 : vector<256x128xf32>
    %228 = arith.addf %221, %227 : vector<256x128xf32>
    %c34_77 = arith.constant 34 : index
    %c0_78 = arith.constant 0 : index
    %229 = vector.load %arg10[%c34_77, %c0_78] : memref<296x128xf32, #tpu.memory_space<vmem>>, vector<256x128xf32>
    %230 = vector.extract_strided_slice %171 {offsets = [8, 0], sizes = [1, 128], strides = [1, 1]} : vector<9x128xf32> to vector<1x128xf32>
    %231 = vector.shape_cast %230 : vector<1x128xf32> to vector<128xf32>
    %232 = vector.shape_cast %231 : vector<128xf32> to vector<1x128xf32>
    %233 = vector.broadcast %232 : vector<1x128xf32> to vector<256x128xf32>
    %234 = arith.mulf %229, %233 : vector<256x128xf32>
    %235 = arith.addf %228, %234 : vector<256x128xf32>
    %236 = vector.shape_cast %173 : vector<128xf32> to vector<1x128xf32>
    %237 = vector.broadcast %236 : vector<1x128xf32> to vector<256x128xf32>
    %238 = arith.addf %235, %237 : vector<256x128xf32>
    %cst_79 = arith.constant 0.000000e+00 : f32
    %239 = vector.broadcast %cst_79 : f32 to vector<256x128xf32>
    %240 = arith.maximumf %238, %239 : vector<256x128xf32>
    %241 = arith.truncf %240 : vector<256x128xf32> to vector<256x128xbf16>
    %c1_80 = arith.constant 1 : index
    %c0_81 = arith.constant 0 : index
    %c0_82 = arith.constant 0 : index
    %242 = vector.load %arg6[%c1_80, %c0_81, %c0_82] : memref<4x128x128xbf16, #tpu.memory_space<vmem>>, vector<1x128x128xbf16>
    %243 = vector.shape_cast %242 : vector<1x128x128xbf16> to vector<128x128xbf16>
    %cst_83 = arith.constant dense<0.000000e+00> : vector<256x128xf32>
    %244 = tpu.matmul %241, %243, %cst_83 {dimension_numbers = #tpu.dot_dimension_numbers<[1], [0], [0], [1], [0, 0, 1, 1], [], []>} : vector<256x128xbf16>, vector<128x128xbf16>, vector<256x128xf32> -> vector<256x128xf32>
    %c4 = arith.constant 4 : index
    %c0_84 = arith.constant 0 : index
    %245 = vector.load %arg5[%c4, %c0_84] : memref<9x128xf32, #tpu.memory_space<vmem>>, vector<1x128xf32>
    %246 = vector.shape_cast %245 : vector<1x128xf32> to vector<128xf32>
    %247 = vector.shape_cast %246 : vector<128xf32> to vector<1x128xf32>
    %248 = vector.broadcast %247 : vector<1x128xf32> to vector<256x128xf32>
    %249 = arith.addf %244, %248 : vector<256x128xf32>
    %cst_85 = arith.constant 0.000000e+00 : f32
    %250 = vector.broadcast %cst_85 : f32 to vector<256x128xf32>
    %251 = arith.maximumf %249, %250 : vector<256x128xf32>
    %c0_86 = arith.constant 0 : index
    %c0_87 = arith.constant 0 : index
    %252 = vector.load %arg10[%c0_86, %c0_87] : memref<296x128xf32, #tpu.memory_space<vmem>>, vector<256x128xf32>
    tpu.vector_store %arg10[%c0_86, %c0_87], %251 {strides = array<i32>} : memref<296x128xf32, #tpu.memory_space<vmem>>, vector<256x128xf32>,
    %c3_88 = arith.constant 3 : index
    %c0_89 = arith.constant 0 : index
    %c0_90 = arith.constant 0 : index
    %253 = vector.load %arg4[%c3_88, %c0_89, %c0_90] : memref<5x9x128xf32, #tpu.memory_space<vmem>>, vector<1x9x128xf32>
    %254 = vector.shape_cast %253 : vector<1x9x128xf32> to vector<9x128xf32>
    %c5 = arith.constant 5 : index
    %c0_91 = arith.constant 0 : index
    %255 = vector.load %arg5[%c5, %c0_91] : memref<9x128xf32, #tpu.memory_space<vmem>>, vector<1x128xf32>
    %256 = vector.shape_cast %255 : vector<1x128xf32> to vector<128xf32>
    %c0_92 = arith.constant 0 : index
    %c0_93 = arith.constant 0 : index
    %257 = vector.load %arg10[%c0_92, %c0_93] : memref<296x128xf32, #tpu.memory_space<vmem>>, vector<256x128xf32>
    %258 = vector.extract_strided_slice %254 {offsets = [0, 0], sizes = [1, 128], strides = [1, 1]} : vector<9x128xf32> to vector<1x128xf32>
    %259 = vector.shape_cast %258 : vector<1x128xf32> to vector<128xf32>
    %260 = vector.shape_cast %259 : vector<128xf32> to vector<1x128xf32>
    %261 = vector.broadcast %260 : vector<1x128xf32> to vector<256x128xf32>
    %262 = arith.mulf %257, %261 : vector<256x128xf32>
    %c1_94 = arith.constant 1 : index
    %c0_95 = arith.constant 0 : index
    %263 = vector.load %arg10[%c1_94, %c0_95] : memref<296x128xf32, #tpu.memory_space<vmem>>, vector<256x128xf32>
    %264 = vector.extract_strided_slice %254 {offsets = [1, 0], sizes = [1, 128], strides = [1, 1]} : vector<9x128xf32> to vector<1x128xf32>
    %265 = vector.shape_cast %264 : vector<1x128xf32> to vector<128xf32>
    %266 = vector.shape_cast %265 : vector<128xf32> to vector<1x128xf32>
    %267 = vector.broadcast %266 : vector<1x128xf32> to vector<256x128xf32>
    %268 = arith.mulf %263, %267 : vector<256x128xf32>
    %269 = arith.addf %262, %268 : vector<256x128xf32>
    %c2_96 = arith.constant 2 : index
    %c0_97 = arith.constant 0 : index
    %270 = vector.load %arg10[%c2_96, %c0_97] : memref<296x128xf32, #tpu.memory_space<vmem>>, vector<256x128xf32>
    %271 = vector.extract_strided_slice %254 {offsets = [2, 0], sizes = [1, 128], strides = [1, 1]} : vector<9x128xf32> to vector<1x128xf32>
    %272 = vector.shape_cast %271 : vector<1x128xf32> to vector<128xf32>
    %273 = vector.shape_cast %272 : vector<128xf32> to vector<1x128xf32>
    %274 = vector.broadcast %273 : vector<1x128xf32> to vector<256x128xf32>
    %275 = arith.mulf %270, %274 : vector<256x128xf32>
    %276 = arith.addf %269, %275 : vector<256x128xf32>
    %c16_98 = arith.constant 16 : index
    %c0_99 = arith.constant 0 : index
    %277 = vector.load %arg10[%c16_98, %c0_99] : memref<296x128xf32, #tpu.memory_space<vmem>>, vector<256x128xf32>
    %278 = vector.extract_strided_slice %254 {offsets = [3, 0], sizes = [1, 128], strides = [1, 1]} : vector<9x128xf32> to vector<1x128xf32>
    %279 = vector.shape_cast %278 : vector<1x128xf32> to vector<128xf32>
    %280 = vector.shape_cast %279 : vector<128xf32> to vector<1x128xf32>
    %281 = vector.broadcast %280 : vector<1x128xf32> to vector<256x128xf32>
    %282 = arith.mulf %277, %281 : vector<256x128xf32>
    %283 = arith.addf %276, %282 : vector<256x128xf32>
    %c17_100 = arith.constant 17 : index
    %c0_101 = arith.constant 0 : index
    %284 = vector.load %arg10[%c17_100, %c0_101] : memref<296x128xf32, #tpu.memory_space<vmem>>, vector<256x128xf32>
    %285 = vector.extract_strided_slice %254 {offsets = [4, 0], sizes = [1, 128], strides = [1, 1]} : vector<9x128xf32> to vector<1x128xf32>
    %286 = vector.shape_cast %285 : vector<1x128xf32> to vector<128xf32>
    %287 = vector.shape_cast %286 : vector<128xf32> to vector<1x128xf32>
    %288 = vector.broadcast %287 : vector<1x128xf32> to vector<256x128xf32>
    %289 = arith.mulf %284, %288 : vector<256x128xf32>
    %290 = arith.addf %283, %289 : vector<256x128xf32>
    %c18_102 = arith.constant 18 : index
    %c0_103 = arith.constant 0 : index
    %291 = vector.load %arg10[%c18_102, %c0_103] : memref<296x128xf32, #tpu.memory_space<vmem>>, vector<256x128xf32>
    %292 = vector.extract_strided_slice %254 {offsets = [5, 0], sizes = [1, 128], strides = [1, 1]} : vector<9x128xf32> to vector<1x128xf32>
    %293 = vector.shape_cast %292 : vector<1x128xf32> to vector<128xf32>
    %294 = vector.shape_cast %293 : vector<128xf32> to vector<1x128xf32>
    %295 = vector.broadcast %294 : vector<1x128xf32> to vector<256x128xf32>
    %296 = arith.mulf %291, %295 : vector<256x128xf32>
    %297 = arith.addf %290, %296 : vector<256x128xf32>
    %c32_104 = arith.constant 32 : index
    %c0_105 = arith.constant 0 : index
    %298 = vector.load %arg10[%c32_104, %c0_105] : memref<296x128xf32, #tpu.memory_space<vmem>>, vector<256x128xf32>
    %299 = vector.extract_strided_slice %254 {offsets = [6, 0], sizes = [1, 128], strides = [1, 1]} : vector<9x128xf32> to vector<1x128xf32>
    %300 = vector.shape_cast %299 : vector<1x128xf32> to vector<128xf32>
    %301 = vector.shape_cast %300 : vector<128xf32> to vector<1x128xf32>
    %302 = vector.broadcast %301 : vector<1x128xf32> to vector<256x128xf32>
    %303 = arith.mulf %298, %302 : vector<256x128xf32>
    %304 = arith.addf %297, %303 : vector<256x128xf32>
    %c33_106 = arith.constant 33 : index
    %c0_107 = arith.constant 0 : index
    %305 = vector.load %arg10[%c33_106, %c0_107] : memref<296x128xf32, #tpu.memory_space<vmem>>, vector<256x128xf32>
    %306 = vector.extract_strided_slice %254 {offsets = [7, 0], sizes = [1, 128], strides = [1, 1]} : vector<9x128xf32> to vector<1x128xf32>
    %307 = vector.shape_cast %306 : vector<1x128xf32> to vector<128xf32>
    %308 = vector.shape_cast %307 : vector<128xf32> to vector<1x128xf32>
    %309 = vector.broadcast %308 : vector<1x128xf32> to vector<256x128xf32>
    %310 = arith.mulf %305, %309 : vector<256x128xf32>
    %311 = arith.addf %304, %310 : vector<256x128xf32>
    %c34_108 = arith.constant 34 : index
    %c0_109 = arith.constant 0 : index
    %312 = vector.load %arg10[%c34_108, %c0_109] : memref<296x128xf32, #tpu.memory_space<vmem>>, vector<256x128xf32>
    %313 = vector.extract_strided_slice %254 {offsets = [8, 0], sizes = [1, 128], strides = [1, 1]} : vector<9x128xf32> to vector<1x128xf32>
    %314 = vector.shape_cast %313 : vector<1x128xf32> to vector<128xf32>
    %315 = vector.shape_cast %314 : vector<128xf32> to vector<1x128xf32>
    %316 = vector.broadcast %315 : vector<1x128xf32> to vector<256x128xf32>
    %317 = arith.mulf %312, %316 : vector<256x128xf32>
    %318 = arith.addf %311, %317 : vector<256x128xf32>
    %319 = vector.shape_cast %256 : vector<128xf32> to vector<1x128xf32>
    %320 = vector.broadcast %319 : vector<1x128xf32> to vector<256x128xf32>
    %321 = arith.addf %318, %320 : vector<256x128xf32>
    %cst_110 = arith.constant 0.000000e+00 : f32
    %322 = vector.broadcast %cst_110 : f32 to vector<256x128xf32>
    %323 = arith.maximumf %321, %322 : vector<256x128xf32>
    %324 = arith.truncf %323 : vector<256x128xf32> to vector<256x128xbf16>
    %c2_111 = arith.constant 2 : index
    %c0_112 = arith.constant 0 : index
    %c0_113 = arith.constant 0 : index
    %325 = vector.load %arg6[%c2_111, %c0_112, %c0_113] : memref<4x128x128xbf16, #tpu.memory_space<vmem>>, vector<1x128x128xbf16>
    %326 = vector.shape_cast %325 : vector<1x128x128xbf16> to vector<128x128xbf16>
    %cst_114 = arith.constant dense<0.000000e+00> : vector<256x128xf32>
    %327 = tpu.matmul %324, %326, %cst_114 {dimension_numbers = #tpu.dot_dimension_numbers<[1], [0], [0], [1], [0, 0, 1, 1], [], []>} : vector<256x128xbf16>, vector<128x128xbf16>, vector<256x128xf32> -> vector<256x128xf32>
    %c6 = arith.constant 6 : index
    %c0_115 = arith.constant 0 : index
    %328 = vector.load %arg5[%c6, %c0_115] : memref<9x128xf32, #tpu.memory_space<vmem>>, vector<1x128xf32>
    %329 = vector.shape_cast %328 : vector<1x128xf32> to vector<128xf32>
    %330 = vector.shape_cast %329 : vector<128xf32> to vector<1x128xf32>
    %331 = vector.broadcast %330 : vector<1x128xf32> to vector<256x128xf32>
    %332 = arith.addf %327, %331 : vector<256x128xf32>
    %cst_116 = arith.constant 0.000000e+00 : f32
    %333 = vector.broadcast %cst_116 : f32 to vector<256x128xf32>
    %334 = arith.maximumf %332, %333 : vector<256x128xf32>
    %c0_117 = arith.constant 0 : index
    %c0_118 = arith.constant 0 : index
    %335 = vector.load %arg10[%c0_117, %c0_118] : memref<296x128xf32, #tpu.memory_space<vmem>>, vector<256x128xf32>
    tpu.vector_store %arg10[%c0_117, %c0_118], %334 {strides = array<i32>} : memref<296x128xf32, #tpu.memory_space<vmem>>, vector<256x128xf32>,
    %c4_119 = arith.constant 4 : index
    %c0_120 = arith.constant 0 : index
    %c0_121 = arith.constant 0 : index
    %336 = vector.load %arg4[%c4_119, %c0_120, %c0_121] : memref<5x9x128xf32, #tpu.memory_space<vmem>>, vector<1x9x128xf32>
    %337 = vector.shape_cast %336 : vector<1x9x128xf32> to vector<9x128xf32>
    %c7 = arith.constant 7 : index
    %c0_122 = arith.constant 0 : index
    %338 = vector.load %arg5[%c7, %c0_122] : memref<9x128xf32, #tpu.memory_space<vmem>>, vector<1x128xf32>
    %339 = vector.shape_cast %338 : vector<1x128xf32> to vector<128xf32>
    %c0_123 = arith.constant 0 : index
    %c0_124 = arith.constant 0 : index
    %340 = vector.load %arg10[%c0_123, %c0_124] : memref<296x128xf32, #tpu.memory_space<vmem>>, vector<256x128xf32>
    %341 = vector.extract_strided_slice %337 {offsets = [0, 0], sizes = [1, 128], strides = [1, 1]} : vector<9x128xf32> to vector<1x128xf32>
    %342 = vector.shape_cast %341 : vector<1x128xf32> to vector<128xf32>
    %343 = vector.shape_cast %342 : vector<128xf32> to vector<1x128xf32>
    %344 = vector.broadcast %343 : vector<1x128xf32> to vector<256x128xf32>
    %345 = arith.mulf %340, %344 : vector<256x128xf32>
    %c1_125 = arith.constant 1 : index
    %c0_126 = arith.constant 0 : index
    %346 = vector.load %arg10[%c1_125, %c0_126] : memref<296x128xf32, #tpu.memory_space<vmem>>, vector<256x128xf32>
    %347 = vector.extract_strided_slice %337 {offsets = [1, 0], sizes = [1, 128], strides = [1, 1]} : vector<9x128xf32> to vector<1x128xf32>
    %348 = vector.shape_cast %347 : vector<1x128xf32> to vector<128xf32>
    %349 = vector.shape_cast %348 : vector<128xf32> to vector<1x128xf32>
    %350 = vector.broadcast %349 : vector<1x128xf32> to vector<256x128xf32>
    %351 = arith.mulf %346, %350 : vector<256x128xf32>
    %352 = arith.addf %345, %351 : vector<256x128xf32>
    %c2_127 = arith.constant 2 : index
    %c0_128 = arith.constant 0 : index
    %353 = vector.load %arg10[%c2_127, %c0_128] : memref<296x128xf32, #tpu.memory_space<vmem>>, vector<256x128xf32>
    %354 = vector.extract_strided_slice %337 {offsets = [2, 0], sizes = [1, 128], strides = [1, 1]} : vector<9x128xf32> to vector<1x128xf32>
    %355 = vector.shape_cast %354 : vector<1x128xf32> to vector<128xf32>
    %356 = vector.shape_cast %355 : vector<128xf32> to vector<1x128xf32>
    %357 = vector.broadcast %356 : vector<1x128xf32> to vector<256x128xf32>
    %358 = arith.mulf %353, %357 : vector<256x128xf32>
    %359 = arith.addf %352, %358 : vector<256x128xf32>
    %c16_129 = arith.constant 16 : index
    %c0_130 = arith.constant 0 : index
    %360 = vector.load %arg10[%c16_129, %c0_130] : memref<296x128xf32, #tpu.memory_space<vmem>>, vector<256x128xf32>
    %361 = vector.extract_strided_slice %337 {offsets = [3, 0], sizes = [1, 128], strides = [1, 1]} : vector<9x128xf32> to vector<1x128xf32>
    %362 = vector.shape_cast %361 : vector<1x128xf32> to vector<128xf32>
    %363 = vector.shape_cast %362 : vector<128xf32> to vector<1x128xf32>
    %364 = vector.broadcast %363 : vector<1x128xf32> to vector<256x128xf32>
    %365 = arith.mulf %360, %364 : vector<256x128xf32>
    %366 = arith.addf %359, %365 : vector<256x128xf32>
    %c17_131 = arith.constant 17 : index
    %c0_132 = arith.constant 0 : index
    %367 = vector.load %arg10[%c17_131, %c0_132] : memref<296x128xf32, #tpu.memory_space<vmem>>, vector<256x128xf32>
    %368 = vector.extract_strided_slice %337 {offsets = [4, 0], sizes = [1, 128], strides = [1, 1]} : vector<9x128xf32> to vector<1x128xf32>
    %369 = vector.shape_cast %368 : vector<1x128xf32> to vector<128xf32>
    %370 = vector.shape_cast %369 : vector<128xf32> to vector<1x128xf32>
    %371 = vector.broadcast %370 : vector<1x128xf32> to vector<256x128xf32>
    %372 = arith.mulf %367, %371 : vector<256x128xf32>
    %373 = arith.addf %366, %372 : vector<256x128xf32>
    %c18_133 = arith.constant 18 : index
    %c0_134 = arith.constant 0 : index
    %374 = vector.load %arg10[%c18_133, %c0_134] : memref<296x128xf32, #tpu.memory_space<vmem>>, vector<256x128xf32>
    %375 = vector.extract_strided_slice %337 {offsets = [5, 0], sizes = [1, 128], strides = [1, 1]} : vector<9x128xf32> to vector<1x128xf32>
    %376 = vector.shape_cast %375 : vector<1x128xf32> to vector<128xf32>
    %377 = vector.shape_cast %376 : vector<128xf32> to vector<1x128xf32>
    %378 = vector.broadcast %377 : vector<1x128xf32> to vector<256x128xf32>
    %379 = arith.mulf %374, %378 : vector<256x128xf32>
    %380 = arith.addf %373, %379 : vector<256x128xf32>
    %c32_135 = arith.constant 32 : index
    %c0_136 = arith.constant 0 : index
    %381 = vector.load %arg10[%c32_135, %c0_136] : memref<296x128xf32, #tpu.memory_space<vmem>>, vector<256x128xf32>
    %382 = vector.extract_strided_slice %337 {offsets = [6, 0], sizes = [1, 128], strides = [1, 1]} : vector<9x128xf32> to vector<1x128xf32>
    %383 = vector.shape_cast %382 : vector<1x128xf32> to vector<128xf32>
    %384 = vector.shape_cast %383 : vector<128xf32> to vector<1x128xf32>
    %385 = vector.broadcast %384 : vector<1x128xf32> to vector<256x128xf32>
    %386 = arith.mulf %381, %385 : vector<256x128xf32>
    %387 = arith.addf %380, %386 : vector<256x128xf32>
    %c33_137 = arith.constant 33 : index
    %c0_138 = arith.constant 0 : index
    %388 = vector.load %arg10[%c33_137, %c0_138] : memref<296x128xf32, #tpu.memory_space<vmem>>, vector<256x128xf32>
    %389 = vector.extract_strided_slice %337 {offsets = [7, 0], sizes = [1, 128], strides = [1, 1]} : vector<9x128xf32> to vector<1x128xf32>
    %390 = vector.shape_cast %389 : vector<1x128xf32> to vector<128xf32>
    %391 = vector.shape_cast %390 : vector<128xf32> to vector<1x128xf32>
    %392 = vector.broadcast %391 : vector<1x128xf32> to vector<256x128xf32>
    %393 = arith.mulf %388, %392 : vector<256x128xf32>
    %394 = arith.addf %387, %393 : vector<256x128xf32>
    %c34_139 = arith.constant 34 : index
    %c0_140 = arith.constant 0 : index
    %395 = vector.load %arg10[%c34_139, %c0_140] : memref<296x128xf32, #tpu.memory_space<vmem>>, vector<256x128xf32>
    %396 = vector.extract_strided_slice %337 {offsets = [8, 0], sizes = [1, 128], strides = [1, 1]} : vector<9x128xf32> to vector<1x128xf32>
    %397 = vector.shape_cast %396 : vector<1x128xf32> to vector<128xf32>
    %398 = vector.shape_cast %397 : vector<128xf32> to vector<1x128xf32>
    %399 = vector.broadcast %398 : vector<1x128xf32> to vector<256x128xf32>
    %400 = arith.mulf %395, %399 : vector<256x128xf32>
    %401 = arith.addf %394, %400 : vector<256x128xf32>
    %402 = vector.shape_cast %339 : vector<128xf32> to vector<1x128xf32>
    %403 = vector.broadcast %402 : vector<1x128xf32> to vector<256x128xf32>
    %404 = arith.addf %401, %403 : vector<256x128xf32>
    %cst_141 = arith.constant 0.000000e+00 : f32
    %405 = vector.broadcast %cst_141 : f32 to vector<256x128xf32>
    %406 = arith.maximumf %404, %405 : vector<256x128xf32>
    %407 = arith.truncf %406 : vector<256x128xf32> to vector<256x128xbf16>
    %c3_142 = arith.constant 3 : index
    %c0_143 = arith.constant 0 : index
    %c0_144 = arith.constant 0 : index
    %408 = vector.load %arg6[%c3_142, %c0_143, %c0_144] : memref<4x128x128xbf16, #tpu.memory_space<vmem>>, vector<1x128x128xbf16>
    %409 = vector.shape_cast %408 : vector<1x128x128xbf16> to vector<128x128xbf16>
    %cst_145 = arith.constant dense<0.000000e+00> : vector<256x128xf32>
    %410 = tpu.matmul %407, %409, %cst_145 {dimension_numbers = #tpu.dot_dimension_numbers<[1], [0], [0], [1], [0, 0, 1, 1], [], []>} : vector<256x128xbf16>, vector<128x128xbf16>, vector<256x128xf32> -> vector<256x128xf32>
    %c8 = arith.constant 8 : index
    %c0_146 = arith.constant 0 : index
    %411 = vector.load %arg5[%c8, %c0_146] : memref<9x128xf32, #tpu.memory_space<vmem>>, vector<1x128xf32>
    %412 = vector.shape_cast %411 : vector<1x128xf32> to vector<128xf32>
    %413 = vector.shape_cast %412 : vector<128xf32> to vector<1x128xf32>
    %414 = vector.broadcast %413 : vector<1x128xf32> to vector<256x128xf32>
    %415 = arith.addf %410, %414 : vector<256x128xf32>
    %cst_147 = arith.constant 0.000000e+00 : f32
    %416 = vector.broadcast %cst_147 : f32 to vector<256x128xf32>
    %417 = arith.maximumf %415, %416 : vector<256x128xf32>
    %c0_148 = arith.constant 0 : index
    %c0_149 = arith.constant 0 : index
    %418 = vector.load %arg3[%c0_148, %c0_149] : memref<1x256xbf16, #tpu.memory_space<vmem>>, vector<1x256xbf16>
    %419 = arith.truncf %417 : vector<256x128xf32> to vector<256x128xbf16>
    %cst_150 = arith.constant dense<0.000000e+00> : vector<1x128xf32>
    %420 = tpu.matmul %418, %419, %cst_150 {dimension_numbers = #tpu.dot_dimension_numbers<[1], [0], [0], [1], [0, 0, 1, 1], [], []>} : vector<1x256xbf16>, vector<256x128xbf16>, vector<1x128xf32> -> vector<1x128xf32>
    %cst_151 = arith.constant 0.027777778 : f32
    %421 = vector.broadcast %cst_151 : f32 to vector<1x128xf32>
    %422 = arith.mulf %420, %421 : vector<1x128xf32>
    %423 = arith.truncf %422 : vector<1x128xf32> to vector<1x128xbf16>
    %c0_152 = arith.constant 0 : index
    %c0_153 = arith.constant 0 : index
    %424 = vector.load %arg7[%c0_152, %c0_153] : memref<128x128xbf16, #tpu.memory_space<vmem>>, vector<128x128xbf16>
    %cst_154 = arith.constant dense<0.000000e+00> : vector<1x128xf32>
    %425 = tpu.matmul %423, %424, %cst_154 {dimension_numbers = #tpu.dot_dimension_numbers<[1], [0], [0], [1], [0, 0, 1, 1], [], []>} : vector<1x128xbf16>, vector<128x128xbf16>, vector<1x128xf32> -> vector<1x128xf32>
    %c0_155 = arith.constant 0 : index
    %c0_156 = arith.constant 0 : index
    %426 = vector.load %arg8[%c0_155, %c0_156] : memref<1x128xf32, #tpu.memory_space<vmem>>, vector<1x128xf32>
    %427 = arith.addf %425, %426 : vector<1x128xf32>
    %428 = tpu.iota {dimensions = array<i32: 1>} : vector<1x128xi32>
    %c64_i32_157 = arith.constant 64 : i32
    %429 = vector.broadcast %c64_i32_157 : i32 to vector<1x128xi32>
    %430 = arith.cmpi sge, %428, %429 : vector<1x128xi32>
    %c63_i32 = arith.constant 63 : i32
    %431 = vector.broadcast %c63_i32 : i32 to vector<1x128xi32>
    %432 = arith.andi %428, %431 : vector<1x128xi32>
    %c10_i32 = arith.constant 10 : i32
    %433 = vector.broadcast %c10_i32 : i32 to vector<1x128xi32>
    %434 = arith.cmpi slt, %432, %433 : vector<1x128xi32>
    %cst_158 = arith.constant -1.000000e+30 : f32
    %435 = vector.broadcast %cst_158 : f32 to vector<1x128xf32>
    %436 = arith.select %434, %427, %435 : vector<1x128xi1>, vector<1x128xf32>
    %cst_159 = arith.constant -1.000000e+30 : f32
    %437 = vector.broadcast %cst_159 : f32 to vector<1x128xf32>
    %438 = arith.select %430, %437, %436 : vector<1x128xi1>, vector<1x128xf32>
    %cst_160 = arith.constant -1.000000e+30 : f32
    %439 = vector.broadcast %cst_160 : f32 to vector<1x128xf32>
    %440 = arith.select %430, %436, %439 : vector<1x128xi1>, vector<1x128xf32>
    %cst_161 = arith.constant dense<0xFF800000> : vector<1xf32>
    %441 = vector.multi_reduction <maximumf>, %438, %cst_161 [1] : vector<1x128xf32> to vector<1xf32>
    %442 = vector.shape_cast %441 : vector<1xf32> to vector<1x1xf32>
    %cst_162 = arith.constant dense<0xFF800000> : vector<1xf32>
    %443 = vector.multi_reduction <maximumf>, %440, %cst_162 [1] : vector<1x128xf32> to vector<1xf32>
    %444 = vector.shape_cast %443 : vector<1xf32> to vector<1x1xf32>
    %445 = vector.broadcast %442 : vector<1x1xf32> to vector<1x128xf32>
    %446 = arith.subf %438, %445 : vector<1x128xf32>
    %447 = math.exp %446 : vector<1x128xf32>
    %cst_163 = arith.constant dense<0.000000e+00> : vector<1xf32>
    %448 = vector.multi_reduction <add>, %447, %cst_163 [1] : vector<1x128xf32> to vector<1xf32>
    %449 = vector.shape_cast %448 : vector<1xf32> to vector<1x1xf32>
    %450 = math.log %449 : vector<1x1xf32>
    %451 = vector.broadcast %444 : vector<1x1xf32> to vector<1x128xf32>
    %452 = arith.subf %440, %451 : vector<1x128xf32>
    %453 = math.exp %452 : vector<1x128xf32>
    %cst_164 = arith.constant dense<0.000000e+00> : vector<1xf32>
    %454 = vector.multi_reduction <add>, %453, %cst_164 [1] : vector<1x128xf32> to vector<1xf32>
    %455 = vector.shape_cast %454 : vector<1xf32> to vector<1x1xf32>
    %456 = math.log %455 : vector<1x1xf32>
    %457 = vector.shape_cast %444 : vector<1x1xf32> to vector<1x1xf32>
    %458 = vector.broadcast %457 : vector<1x1xf32> to vector<1x128xf32>
    %459 = vector.shape_cast %442 : vector<1x1xf32> to vector<1x1xf32>
    %460 = vector.broadcast %459 : vector<1x1xf32> to vector<1x128xf32>
    %461 = arith.select %430, %458, %460 : vector<1x128xi1>, vector<1x128xf32>
    %462 = vector.shape_cast %456 : vector<1x1xf32> to vector<1x1xf32>
    %463 = vector.broadcast %462 : vector<1x1xf32> to vector<1x128xf32>
    %464 = vector.shape_cast %450 : vector<1x1xf32> to vector<1x1xf32>
    %465 = vector.broadcast %464 : vector<1x1xf32> to vector<1x128xf32>
    %466 = arith.select %430, %463, %465 : vector<1x128xi1>, vector<1x128xf32>
    %467 = arith.subf %427, %461 : vector<1x128xf32>
    %468 = arith.subf %467, %466 : vector<1x128xf32>
    %c0_165 = arith.constant 0 : index
    %c0_166 = arith.constant 0 : index
    %469 = vector.load %arg9[%c0_165, %c0_166] : memref<1x128xf32, #tpu.memory_space<vmem>>, vector<1x128xf32>
    tpu.vector_store %arg9[%c0_165, %c0_166], %468 {strides = array<i32>} : memref<1x128xf32, #tpu.memory_space<vmem>>, vector<1x128xf32>,
    return
  }
  func.func @transform_0(%arg0: i32) -> (i32, i32) {
    %c0_i32 = arith.constant 0 : i32
    %c0_i32_0 = arith.constant 0 : i32
    return %arg0, %c0_i32 : i32, i32
  }
  func.func @transform_1(%arg0: i32) -> (i32, i32) {
    %c0_i32 = arith.constant 0 : i32
    %c0_i32_0 = arith.constant 0 : i32
    return %arg0, %c0_i32 : i32, i32
  }
  func.func @transform_2(%arg0: i32) -> (i32, i32) {
    %c0_i32 = arith.constant 0 : i32
    %c0_i32_0 = arith.constant 0 : i32
    %c0_i32_1 = arith.constant 0 : i32
    return %c0_i32, %c0_i32_0 : i32, i32
  }
  func.func @transform_3(%arg0: i32) -> (i32, i32, i32) {
    %c0_i32 = arith.constant 0 : i32
    %c0_i32_0 = arith.constant 0 : i32
    %c0_i32_1 = arith.constant 0 : i32
    %c0_i32_2 = arith.constant 0 : i32
    return %c0_i32, %c0_i32_0, %c0_i32_1 : i32, i32, i32
  }
  func.func @transform_4(%arg0: i32) -> (i32, i32) {
    %c0_i32 = arith.constant 0 : i32
    %c0_i32_0 = arith.constant 0 : i32
    %c0_i32_1 = arith.constant 0 : i32
    return %c0_i32, %c0_i32_0 : i32, i32
  }
  func.func @transform_5(%arg0: i32) -> (i32, i32, i32) {
    %c0_i32 = arith.constant 0 : i32
    %c0_i32_0 = arith.constant 0 : i32
    %c0_i32_1 = arith.constant 0 : i32
    %c0_i32_2 = arith.constant 0 : i32
    return %c0_i32, %c0_i32_0, %c0_i32_1 : i32, i32, i32
  }
  func.func @transform_6(%arg0: i32) -> (i32, i32) {
    %c0_i32 = arith.constant 0 : i32
    %c0_i32_0 = arith.constant 0 : i32
    %c0_i32_1 = arith.constant 0 : i32
    return %c0_i32, %c0_i32_0 : i32, i32
  }
  func.func @transform_7(%arg0: i32) -> (i32, i32) {
    %c0_i32 = arith.constant 0 : i32
    %c0_i32_0 = arith.constant 0 : i32
    %c0_i32_1 = arith.constant 0 : i32
    return %c0_i32, %c0_i32_0 : i32, i32
  }
  func.func @transform_8(%arg0: i32) -> (i32, i32) {
    %c0_i32 = arith.constant 0 : i32
    %c0_i32_0 = arith.constant 0 : i32
    return %arg0, %c0_i32 : i32, i32
  }
}

</mosaic_0001>

<bundles_post_ra>
// kernel: tpu_custom_call.1
= control target key start
LH: loop header
LB: loop body
LE: loop exit
PB: predicated region body
PF: predicated region fallthrough
CT: control target
= control target key end

     0   :  { %v6314_v2 = vmov 0   ;;  %s10315_s0 = inlined_call_operand.vmem [shape: f32[256,1], index: 0, kind: input, shape index: {}]   ;;  %s10316_s1 = inlined_call_operand.vmem [shape: f32[256,1], index: 1, kind: input, shape index: {}]   ;;  %s10317_s2 = inlined_call_operand.vmem [shape: bf16[1,256], index: 2, kind: input, shape index: {}]   ;;  %s10318_s3 = inlined_call_operand.vmem [shape: f32[5,9,128], index: 3, kind: input, shape index: {}]   ;;  %s10319_s4 = inlined_call_operand.vmem [shape: f32[9,128], index: 4, kind: input, shape index: {}]   ;;  %s10320_s5 = inlined_call_operand.vmem [shape: bf16[4,128,128], index: 5, kind: input, shape index: {}]   ;;  %s10321_s6 = inlined_call_operand.vmem [shape: bf16[128,128], index: 6, kind: input, shape index: {}]   ;;  %s10322_s7 = inlined_call_operand.vmem [shape: f32[1,128], index: 7, kind: input, shape index: {}]   ;;  %s10323_s8 = inlined_call_operand.hbm [shape: f32[1,128], index: 8, kind: output, shape index: {}]  }
   0x1   :  { %v36_v0 = vld [vmem:[%s10315_s0 + $0x10] sm:$0xff]  ;;  %v34_v1 = vld [vmem:[%s10315_s0] sm:$0xff]  ;;  %6224 = vset.pattern.permute.xlu1 %v6314_v2  ;;  %6223 = vset.pattern.permute.xlu0 %v6314_v2  ;;  %v37_v3 = vld [vmem:[%s10315_s0 + $0x18] sm:$0xff] }
   0x2   :  { %78 = vperm.xlu1 %6224, %v36_v0   ;;  %68 = vperm.xlu0 %6223, %v34_v1   ;;  %v35_v4 = vld [vmem:[%s10315_s0 + $0x8] sm:$0xff]  ;;  %v226_v6 = vld [vmem:[%s10316_s1] sm:$0xff]  ;;  %v229_v7 = vld [vmem:[%s10316_s1 + $0x18] sm:$0xff] }
   0x3   :  { %v227_v5 = vld [vmem:[%s10316_s1 + $0x8] sm:$0xff]  ;;  %v228_v8 = vld [vmem:[%s10316_s1 + $0x10] sm:$0xff]  ;;  %v38_v10 = vld [vmem:[%s10315_s0 + $0x20] sm:$0xff] }
   0x4   :  { %v39_v9 = vld [vmem:[%s10315_s0 + $0x28] sm:$0xff]  ;;  %v230_v12 = vld [vmem:[%s10316_s1 + $0x20] sm:$0xff]  ;;  %v232_v13 = vld [vmem:[%s10316_s1 + $0x30] sm:$0xff] }
   0x5   :  { %v231_v11 = vld [vmem:[%s10316_s1 + $0x28] sm:$0xff]  ;;  %v40_v14 = vld [vmem:[%s10315_s0 + $0x30] sm:$0xff]  ;;  %v233_v15 = vld [vmem:[%s10316_s1 + $0x38] sm:$0xff] }
   0x6   :  { %83 = vperm.xlu1 %6224, %v37_v3   ;;  %73 = vperm.xlu0 %6223, %v35_v4   ;;  %v41_v16 = vld [vmem:[%s10315_s0 + $0x38] sm:$0xff]  ;;  %v43_v17 = vld [vmem:[%s10315_s0 + $0x48] sm:$0xff]  ;;  %v42_v18 = vld [vmem:[%s10315_s0 + $0x40] sm:$0xff] }
   0x7   :  { %v235_v19 = vld [vmem:[%s10316_s1 + $0x48] sm:$0xff]  ;;  %v234_v20 = vld [vmem:[%s10316_s1 + $0x40] sm:$0xff]  ;;  %v236_v21 = vld [vmem:[%s10316_s1 + $0x50] sm:$0xff] }
   0x8   :  { %v44_v22 = vld [vmem:[%s10315_s0 + $0x50] sm:$0xff]  ;;  %v237_v23 = vld [vmem:[%s10316_s1 + $0x58] sm:$0xff]  ;;  %v47_v25 = vld [vmem:[%s10315_s0 + $0x68] sm:$0xff] }
   0x9   :  { %v45_v24 = vld [vmem:[%s10315_s0 + $0x58] sm:$0xff]  ;;  %v46_v26 = vld [vmem:[%s10315_s0 + $0x60] sm:$0xff] }
   0xa   :  { %265 = vperm.xlu1 %6224, %v227_v5   ;;  %260 = vperm.xlu0 %6223, %v226_v6  }
   0xe   :  { %275 = vperm.xlu1 %6224, %v229_v7   ;;  %270 = vperm.xlu0 %6223, %v228_v8  }
  0x12   :  { %93 = vperm.xlu1 %6224, %v39_v9   ;;  %88 = vperm.xlu0 %6223, %v38_v10  }
  0x16   :  { %285 = vperm.xlu1 %6224, %v231_v11   ;;  %280 = vperm.xlu0 %6223, %v230_v12  }
  0x1a   :  { %290 = vperm.xlu1 %6224, %v232_v13   ;;  %98 = vperm.xlu0 %6223, %v40_v14  }
  0x1e   :  { %295 = vperm.xlu1 %6224, %v233_v15   ;;  %103 = vperm.xlu0 %6223, %v41_v16  }
  0x22   :  { %113 = vperm.xlu1 %6224, %v43_v17   ;;  %108 = vperm.xlu0 %6223, %v42_v18  }
  0x26   :  { %305 = vperm.xlu1 %6224, %v235_v19   ;;  %300 = vperm.xlu0 %6223, %v234_v20  }
  0x2a   :  { %310 = vperm.xlu1 %6224, %v236_v21   ;;  %118 = vperm.xlu0 %6223, %v44_v22  }
  0x2e   :  { %315 = vperm.xlu1 %6224, %v237_v23   ;;  %123 = vperm.xlu0 %6223, %v45_v24  }
  0x2f   :  { %13 = vsyncpa [#allocation4], 0  ;;  %v239_v27 = vld [vmem:[%s10316_s1 + $0x68] sm:$0xff]  ;;  %v238_v28 = vld [vmem:[%s10316_s1 + $0x60] sm:$0xff]  ;;  %v31_v9 = vlaneseq  ;;  %vm6317_vm1 = vmmov 0   ;;  %vm5726_vm4 = vcmask 1040384  }
  0x30   :  { %v240_v29 = vld [vmem:[%s10316_s1 + $0x70] sm:$0xff]  ;;  %v241_v31 = vld [vmem:[%s10316_s1 + $0x78] sm:$0xff]  ;;  %v51_v33 = vld [vmem:[%s10315_s0 + $0x88] sm:$0xff] }
  0x31   :  { %v48_v30 = vld [vmem:[%s10315_s0 + $0x70] sm:$0xff]  ;;  %v49_v32 = vld [vmem:[%s10315_s0 + $0x78] sm:$0xff]  ;;  %v50_v34 = vld [vmem:[%s10315_s0 + $0x80] sm:$0xff]  ;;  %v6574_v10 = vand.u32 127, %v31_v9  ;;  %v6577_v13 = vshrl.u32 %v31_v9, 7 }
  0x32   :  { %133 = vperm.xlu1 %6224, %v47_v25   ;;  %128 = vperm.xlu0 %6223, %v46_v26   ;;  %v243_v35 = vld [vmem:[%s10316_s1 + $0x88] sm:$0xff]  ;;  %v242_v36 = vld [vmem:[%s10316_s1 + $0x80] sm:$0xff]  ;;  %v244_v37 = vld [vmem:[%s10316_s1 + $0x90] sm:$0xff] }
  0x33   :  { %v52_v38 = vld [vmem:[%s10315_s0 + $0x90] sm:$0xff]  ;;  %v6225_v39 = vld [vmem:[%s10320_s5] sm:$0xff]   ;;  %v245_v40 = vld [vmem:[%s10316_s1 + $0x98] sm:$0xff]  ;;  %10376 = vst [vmem:[#allocation6_spill] sm:$0xff] %v6574_v10  ;;  %vm33_vm0 = vcmp.lt.s32.totalorder %v6574_v10, 64  ;;  %v6584_v18 = vsub.s32 0, %v6577_v13 }
  0x34   :  { %v53_v41 = vld [vmem:[%s10315_s0 + $0x98] sm:$0xff]  ;;  %6006 = vmatprep.subr.bf16.mxu0 %v6225_v39  ;;  %v6226_v42 = vld [vmem:[%s10320_s5 + $0x8] sm:$0xff]   ;;  %v54_v44 = vld [vmem:[%s10315_s0 + $0xa0] sm:$0xff]  ;;  %10377 = vst [vmem:[#allocation7_spill] sm:$0xff] %v6577_v13  ;;  %v6587_v19 = vsub.s32 1, %v6577_v13  ;;  %v6596_v22 = vsub.s32 2, %v6577_v13 }
  0x35   :  { %6007 = vmatpush3.bf16.msra.mxu0 %v6225_v39  ;;  %v55_v43 = vld [vmem:[%s10315_s0 + $0xa8] sm:$0xff]  ;;  %v6227_v45 = vld [vmem:[%s10320_s5 + $0x10] sm:$0xff]   ;;  %v246_v47 = vld [vmem:[%s10316_s1 + $0xa0] sm:$0xff]  ;;  %10378 = vst [vmem:[#allocation8_spill] sm:$0xff] %v6584_v18 }
  0x36   :  { %325 = vperm.xlu1 %6224, %v239_v27   ;;  %320 = vperm.xlu0 %6223, %v238_v28   ;;  %v247_v46 = vld [vmem:[%s10316_s1 + $0xa8] sm:$0xff]  ;;  %v6228_v48 = vld [vmem:[%s10320_s5 + $0x18] sm:$0xff]   ;;  %v248_v49 = vld [vmem:[%s10316_s1 + $0xb0] sm:$0xff]  ;;  %10379 = vst [vmem:[#allocation9_spill] sm:$0xff] %v6587_v19 }
  0x37   :  { %6008 = vmatprep.subr.bf16.mxu0 %v6226_v42  ;;  %v56_v50 = vld [vmem:[%s10315_s0 + $0xb0] sm:$0xff]  ;;  %v249_v51 = vld [vmem:[%s10316_s1 + $0xb8] sm:$0xff]  ;;  %v6229_v53 = vld [vmem:[%s10320_s5 + $0x20] sm:$0xff]   ;;  %10380 = vst [vmem:[#allocation10_spill] sm:$0xff] %v6596_v22 }
  0x38   :  { %v57_v52 = vld [vmem:[%s10315_s0 + $0xb8] sm:$0xff]  ;;  %v59_v54 = vld [vmem:[%s10315_s0 + $0xc8] sm:$0xff]  ;;  %v58_v55 = vld [vmem:[%s10315_s0 + $0xc0] sm:$0xff] }
  0x39   :  { %6009 = vmatpush3.bf16.msra.mxu0 %v6226_v42  ;;  %v6230_v56 = vld [vmem:[%s10320_s5 + $0x28] sm:$0xff]   ;;  %v250_v58 = vld [vmem:[%s10316_s1 + $0xc0] sm:$0xff]  ;;  %v252_v59 = vld [vmem:[%s10316_s1 + $0xd0] sm:$0xff] }
  0x3a   :  { %330 = vperm.xlu1 %6224, %v240_v29   ;;  %138 = vperm.xlu0 %6223, %v48_v30   ;;  %v251_v57 = vld [vmem:[%s10316_s1 + $0xc8] sm:$0xff]  ;;  %v60_v60 = vld [vmem:[%s10315_s0 + $0xd0] sm:$0xff]  ;;  %v253_v61 = vld [vmem:[%s10316_s1 + $0xd8] sm:$0xff]  ;;  %v6615_v30 = vsub.s32 3, %v6577_v13 }
  0x3b   :  { %6010 = vmatprep.subr.bf16.mxu0 %v6227_v45  ;;  %v61_v62 = vld [vmem:[%s10315_s0 + $0xd8] sm:$0xff]  ;;  %v63_v63 = vld [vmem:[%s10315_s0 + $0xe8] sm:$0xff]  ;;  %v62_v0 = vld [vmem:[%s10315_s0 + $0xe0] sm:$0xff] }
  0x3c   :  { %v255_v1 = vld [vmem:[%s10316_s1 + $0xe8] sm:$0xff]  ;;  %v254_v2 = vld [vmem:[%s10316_s1 + $0xe0] sm:$0xff]  ;;  %v256_v3 = vld [vmem:[%s10316_s1 + $0xf0] sm:$0xff]  ;;  %10381 = vst [vmem:[#allocation11_spill] sm:$0xff] %v6615_v30 }
  0x3d   :  { %6011 = vmatpush3.bf16.msra.mxu0 %v6227_v45  ;;  %v64_v4 = vld [vmem:[%s10315_s0 + $0xf0] sm:$0xff]  ;;  %v257_v5 = vld [vmem:[%s10316_s1 + $0xf8] sm:$0xff]  ;;  %v489_v21 = vld [vmem:[%s10318_s3] sm:$0xff] }
  0x3e   :  { %335 = vperm.xlu1 %6224, %v241_v31   ;;  %143 = vperm.xlu0 %6223, %v49_v32   ;;  %v65_v6 = vld [vmem:[%s10315_s0 + $0xf8] sm:$0xff]  ;;  %v6231_v20 = vld [vmem:[%s10320_s5 + $0x30] sm:$0xff]   ;;  %v6608_v28 = vrot.slane %v489_v21, %v6584_v18  ;;  %v6611_v29 = vrot.slane %v489_v21, %v6587_v19  ;;  %v6618_v31 = vsub.s32 4, %v6577_v13  ;;  %v6621_v32 = vsub.s32 6, %v6577_v13 }
  0x3f   :  { %6012 = vmatprep.subr.bf16.mxu0 %v6228_v48  ;;  %v6232_v25 = vld [vmem:[%s10320_s5 + $0x38] sm:$0xff]  }
  0x40   :  { %10382 = vst [vmem:[#allocation12_spill] sm:$0xff] %v6618_v31  ;;  %10383 = vst [vmem:[#allocation13_spill] sm:$0xff] %v6621_v32  ;;  %v6644_v45 = vrot.slane %v489_v21, %v6621_v32 }
  0x41   :  { %6013 = vmatpush3.bf16.msra.mxu0 %v6228_v48 }
  0x42   :  { %153 = vperm.xlu1 %6224, %v51_v33   ;;  %148 = vperm.xlu0 %6223, %v50_v34   ;;  %v6624_v33 = vsub.s32 5, %v6577_v13  ;;  %v6627_v34 = vsub.s32 7, %v6577_v13 }
  0x43   :  { %6014 = vmatprep.subr.bf16.mxu0 %v6229_v53 }
  0x44   :  { %10384 = vst [vmem:[#allocation14_spill] sm:$0xff] %v6624_v33  ;;  %10385 = vst [vmem:[#allocation15_spill] sm:$0xff] %v6627_v34 }
  0x45   :  { %6015 = vmatpush3.bf16.msra.mxu0 %v6229_v53 }
  0x46   :  { %345 = vperm.xlu1 %6224, %v243_v35   ;;  %340 = vperm.xlu0 %6223, %v242_v36   ;;  %v6630_v35 = vrot.slane %v489_v21, %v6596_v22 }
  0x47   :  { %6016 = vmatprep.subr.bf16.mxu0 %v6230_v56 }
  0x49   :  { %6017 = vmatpush3.bf16.msra.mxu0 %v6230_v56 }
  0x4a   :  { %350 = vperm.xlu1 %6224, %v244_v37   ;;  %158 = vperm.xlu0 %6223, %v52_v38  }
  0x4b   :  { %6018 = vmatprep.subr.bf16.mxu0 %v6231_v20 }
  0x4d   :  { %6019 = vmatpush3.bf16.msra.mxu0 %v6231_v20 }
  0x4e   :  { %355 = vperm.xlu1 %6224, %v245_v40   ;;  %163 = vperm.xlu0 %6223, %v53_v41   ;;  %v5770_v40 = vld [vmem:[%s10318_s3 + $0x10] sm:$0xff] }
  0x4f   :  { %6020 = vmatprep.subr.bf16.mxu0 %v6232_v25  ;;  %v6657_v53 = vrot.slane %v5770_v40, %v6615_v30 }
  0x51   :  { %6021 = vmatpush3.bf16.msra.mxu0 %v6232_v25  ;;  %10387 = vst [vmem:[#allocation17_spill] sm:$0xff] %v6657_v53 }
  0x52   :  { %173 = vperm.xlu1 %6224, %v55_v43   ;;  %168 = vperm.xlu0 %6223, %v54_v44   ;;  %v6638_v43 = vrot.slane %v489_v21, %v6615_v30  ;;  %v6641_v44 = vrot.slane %v489_v21, %v6618_v31 }
  0x56   :  { %365 = vperm.xlu1 %6224, %v247_v46   ;;  %360 = vperm.xlu0 %6223, %v246_v47   ;;  %v6647_v46 = vrot.slane %v489_v21, %v6624_v33  ;;  %v6650_v47 = vrot.slane %v489_v21, %v6627_v34 }
  0x5a   :  { %370 = vperm.xlu1 %6224, %v248_v49   ;;  %178 = vperm.xlu0 %6223, %v56_v50  }
  0x5e   :  { %375 = vperm.xlu1 %6224, %v249_v51   ;;  %183 = vperm.xlu0 %6223, %v57_v52   ;;  %v6654_v52 = vrot.slane %v5770_v40, %v6584_v18 }
  0x60   :  { %10386 = vst [vmem:[#allocation16_spill] sm:$0xff] %v6654_v52 }
  0x62   :  { %193 = vperm.xlu1 %6224, %v59_v54   ;;  %188 = vperm.xlu0 %6223, %v58_v55  }
  0x66   :  { %385 = vperm.xlu1 %6224, %v251_v57   ;;  %380 = vperm.xlu0 %6223, %v250_v58  }
  0x6a   :  { %390 = vperm.xlu1 %6224, %v252_v59   ;;  %198 = vperm.xlu0 %6223, %v60_v60  }
  0x6e   :  { %395 = vperm.xlu1 %6224, %v253_v61   ;;  %203 = vperm.xlu0 %6223, %v61_v62  }
  0x72   :  { %213 = vperm.xlu1 %6224, %v63_v63   ;;  %208 = vperm.xlu0 %6223, %v62_v0  }
  0x76   :  { %405 = vperm.xlu1 %6224, %v255_v1   ;;  %400 = vperm.xlu0 %6223, %v254_v2  }
  0x7a   :  { %410 = vperm.xlu1 %6224, %v256_v3   ;;  %218 = vperm.xlu0 %6223, %v64_v4   ;;  %v6671_v4 = vrot.slane %v5770_v40, %v6587_v19 }
  0x7c   :  { %10388 = vst [vmem:[#allocation18_spill] sm:$0xff] %v6671_v4 }
  0x7e   :  { %415 = vperm.xlu1 %6224, %v257_v5   ;;  %223 = vperm.xlu0 %6223, %v65_v6   ;;  %v6674_v5 = vrot.slane %v5770_v40, %v6596_v22 }
  0x80   :  { %10389 = vst [vmem:[#allocation19_spill] sm:$0xff] %v6674_v5 }
  0x81   :  { %v79_v7 = vpop.permute.xlu1 %78  ;;  %v69_v8 = vpop.permute.xlu0 %68 }
  0x85   :  { %v84_v11 = vpop.permute.xlu1 %83  ;;  %v74_v12 = vpop.permute.xlu0 %73 }
  0x89   :  { %v266_v14 = vpop.permute.xlu1 %265  ;;  %v261_v15 = vpop.permute.xlu0 %260 }
  0x8a   :  { %v421_v16 = vsel %vm33_vm0, %v74_v12, %v266_v14  ;;  %v420_v17 = vsel %vm33_vm0, %v69_v8, %v261_v15  ;;  %v6679_v15 = vrot.slane %v5770_v40, %v6618_v31 }
  0x8b   :  { %453 = vst [vmem:[#allocation2 + $0x8] sm:$0xff] %v421_v16  ;;  %452 = vst [vmem:[#allocation2] sm:$0xff] %v420_v17  ;;  %v528_v41 = vmul.f32 %v6608_v28, %v420_v17  ;;  %v529_v54 = vmul.f32 %v6608_v28, %v421_v16  ;;  %v6682_v16 = vrot.slane %v5770_v40, %v6624_v33 }
  0x8c   :  { %10390 = vst [vmem:[#allocation20_spill] sm:$0xff] %v6679_v15  ;;  %v6685_v17 = vrot.slane %v5770_v40, %v6621_v32 }
  0x8d   :  { %v276_v23 = vpop.permute.xlu1 %275  ;;  %v271_v24 = vpop.permute.xlu0 %270 }
  0x8e   :  { %v6603_v26 = vsel %vm33_vm0, %v84_v11, %v276_v23  ;;  %v422_v27 = vsel %vm33_vm0, %v79_v7, %v271_v24  ;;  %10391 = vst [vmem:[#allocation21_spill] sm:$0xff] %v6685_v17 }
  0x8f   :  { %455 = vst [vmem:[#allocation2 + $0x18] sm:$0xff] %v6603_v26  ;;  %454 = vst [vmem:[#allocation2 + $0x10] sm:$0xff] %v422_v27  ;;  %v530_v55 = vmul.f32 %v6608_v28, %v422_v27  ;;  %v766_v1 = vmul.f32 %v6638_v43, %v422_v27  ;;  %v531_v25 = vmul.f32 %v6608_v28, %v6603_v26 }
  0x90   :  { %v767_v27 = vmul.f32 %v6638_v43, %v6603_v26 }
  0x91   :  { %v94_v36 = vpop.permute.xlu1 %93  ;;  %v89_v37 = vpop.permute.xlu0 %88 }
  0x92   :  { %v560_v38 = vld [vmem:[#allocation2 + $0x1] sm:$0xff] }
  0x93   :  { %v660_v39 = vld [vmem:[#allocation2 + $0x2] sm:$0xff]  ;;  %v596_v42 = vmul.f32 %v6611_v29, %v560_v38 }
  0x94   :  { %v696_v49 = vmul.f32 %v6630_v35, %v660_v39 }
  0x95   :  { %v628_v48 = vadd.f32 %v596_v42, %v528_v41  ;;  %v286_v50 = vpop.permute.xlu1 %285  ;;  %v281_v51 = vpop.permute.xlu0 %280 }
  0x96   :  { %v561_v56 = vld [vmem:[#allocation2 + $0x9] sm:$0xff]  ;;  %v562_v57 = vld [vmem:[#allocation2 + $0x11] sm:$0xff]  ;;  %v425_v59 = vsel %vm33_vm0, %v94_v36, %v286_v50  ;;  %v424_v60 = vsel %vm33_vm0, %v89_v37, %v281_v51  ;;  %v6695_v37 = vrot.slane %v5770_v40, %v6627_v34 }
  0x97   :  { %v661_v58 = vld [vmem:[#allocation2 + $0xa] sm:$0xff]  ;;  %v728_v61 = vadd.f32 %v696_v49, %v628_v48  ;;  %v597_v62 = vmul.f32 %v6611_v29, %v561_v56  ;;  %v598_v63 = vmul.f32 %v6611_v29, %v562_v57  ;;  %v662_v0 = vld [vmem:[#allocation2 + $0x12] sm:$0xff]  ;;  %457 = vst [vmem:[#allocation2 + $0x28] sm:$0xff] %v425_v59  ;;  %456 = vst [vmem:[#allocation2 + $0x20] sm:$0xff] %v424_v60 }
  0x98   :  { %v697_v2 = vmul.f32 %v6630_v35, %v661_v58  ;;  %v698_v3 = vmul.f32 %v6630_v35, %v662_v0  ;;  %v836_v9 = vmul.f32 %v6641_v44, %v562_v57  ;;  %v906_v14 = vmul.f32 %v6647_v46, %v662_v0  ;;  %10392 = vst [vmem:[#allocation22_spill] sm:$0xff] %v6695_v37  ;;  %v6711_v57 = vld [vmem:[%s10318_s3 + $0x8] ss:$0 sm:$0xff] }
  0x99   :  { %v629_v6 = vadd.f32 %v597_v62, %v529_v54  ;;  %v630_v7 = vadd.f32 %v598_v63, %v530_v55  ;;  %v798_v8 = vadd.f32 %v766_v1, %v728_v61  ;;  %v291_v11 = vpop.permute.xlu1 %290  ;;  %v99_v12 = vpop.permute.xlu0 %98  ;;  %v533_v36 = vmul.f32 %v6608_v28, %v425_v59 }
  0x9a   :  { %v426_v24 = vsel %vm33_vm0, %v99_v12, %v291_v11  ;;  %v6698_v38 = vmul.f32 %v6638_v43, %v425_v59  ;;  %v977_v39 = vmul.f32 %v6644_v45, %v425_v59  ;;  %v768_v41 = vmul.f32 %v6638_v43, %v424_v60 }
  0x9b   :  { %v729_v20 = vadd.f32 %v697_v2, %v629_v6  ;;  %v730_v21 = vadd.f32 %v698_v3, %v630_v7  ;;  %v868_v23 = vadd.f32 %v836_v9, %v798_v8  ;;  %458 = vst [vmem:[#allocation2 + $0x30] sm:$0xff] %v426_v24  ;;  %v532_v51 = vmul.f32 %v6608_v28, %v424_v60 }
  0x9c   :  { %v976_v56 = vmul.f32 %v6644_v45, %v424_v60  ;;  %v6720_v2 = vmul.f32 %v6608_v28, %v426_v24 }
  0x9d   :  { %v938_v42 = vadd.f32 %v906_v14, %v868_v23  ;;  %v296_v48 = vpop.permute.xlu1 %295  ;;  %v104_v49 = vpop.permute.xlu0 %103  ;;  %v799_v50 = vadd.f32 %v767_v27, %v729_v20  ;;  %v800_v61 = vadd.f32 %v768_v41, %v730_v21  ;;  %v770_v20 = vmul.f32 %v6638_v43, %v426_v24  ;;  %v6729_v23 = vld [vmem:[%s10319_s4] ss:$0 sm:$0xff] }
  0x9e   :  { %v563_v26 = vld [vmem:[#allocation2 + $0x19] sm:$0xff]  ;;  %v564_v54 = vld [vmem:[#allocation2 + $0x21] sm:$0xff]  ;;  %v6706_v40 = vsel %vm33_vm0, %v104_v49, %v296_v48 }
  0x9f   :  { %v663_v55 = vld [vmem:[#allocation2 + $0x1a] sm:$0xff]  ;;  %v600_v58 = vmul.f32 %v6611_v29, %v564_v54  ;;  %v664_v59 = vld [vmem:[#allocation2 + $0x22] sm:$0xff]  ;;  %v837_v62 = vmul.f32 %v6641_v44, %v563_v26  ;;  %v838_v63 = vmul.f32 %v6641_v44, %v564_v54  ;;  %459 = vst [vmem:[#allocation2 + $0x38] sm:$0xff] %v6706_v40  ;;  %v1008_v0 = vadd.f32 %v976_v56, %v938_v42 }
  0xa0   :  { %v907_v60 = vmul.f32 %v6647_v46, %v663_v55  ;;  %v1046_v1 = vmul.f32 %v6650_v47, %v564_v54  ;;  %v908_v8 = vmul.f32 %v6647_v46, %v664_v59  ;;  %v1116_v14 = vmul.f32 %v6711_v57, %v664_v59 }
  0xa1   :  { %v632_v3 = vadd.f32 %v600_v58, %v532_v51  ;;  %v869_v6 = vadd.f32 %v837_v62, %v799_v50  ;;  %v870_v7 = vadd.f32 %v838_v63, %v800_v61  ;;  %v114_v9 = vpop.permute.xlu1 %113  ;;  %v109_v11 = vpop.permute.xlu0 %108  ;;  %v599_v21 = vmul.f32 %v6611_v29, %v563_v26 }
  0xa2   :  { %v1078_v12 = vadd.f32 %v1046_v1, %v1008_v0  ;;  %v565_v41 = vld [vmem:[#allocation2 + $0x29] sm:$0xff]  ;;  %v700_v48 = vmul.f32 %v6630_v35, %v664_v59  ;;  %v978_v50 = vmul.f32 %v6644_v45, %v426_v24  ;;  %v6735_v54 = vmul.f32 %v6608_v28, %v6706_v40 }
  0xa3   :  { %v939_v27 = vadd.f32 %v907_v60, %v869_v6  ;;  %v665_v42 = vld [vmem:[#allocation2 + $0x2a] sm:$0xff]  ;;  %v940_v49 = vadd.f32 %v908_v8, %v870_v7  ;;  %v601_v26 = vmul.f32 %v6611_v29, %v565_v41  ;;  %v699_v56 = vmul.f32 %v6630_v35, %v663_v55 }
  0xa4   :  { %v1148_v51 = vadd.f32 %v1116_v14, %v1078_v12  ;;  %v732_v61 = vadd.f32 %v700_v48, %v632_v3  ;;  %v1047_v62 = vmul.f32 %v6650_v47, %v565_v41  ;;  %v631_v63 = vadd.f32 %v599_v21, %v531_v25 }
  0xa5   :  { %v1009_v58 = vadd.f32 %v977_v39, %v939_v27  ;;  %v306_v60 = vpop.permute.xlu1 %305  ;;  %v301_v0 = vpop.permute.xlu0 %300  ;;  %v633_v1 = vadd.f32 %v601_v26, %v533_v36  ;;  %v701_v6 = vmul.f32 %v6630_v35, %v665_v42  ;;  %v771_v7 = vmul.f32 %v6638_v43, %v6706_v40 }
  0xa6   :  { %v6741_v59 = vadd.f32 %v6729_v23, %v1148_v51  ;;  %v566_v24 = vld [vmem:[#allocation2 + $0x31] sm:$0xff]  ;;  %v1010_v8 = vadd.f32 %v978_v50, %v940_v49  ;;  %v1117_v39 = vmul.f32 %v6711_v57, %v665_v42  ;;  %v731_v3 = vadd.f32 %v699_v56, %v631_v63 }
  0xa7   :  { %v1079_v12 = vadd.f32 %v1047_v62, %v1009_v58  ;;  %v666_v55 = vld [vmem:[#allocation2 + $0x32] sm:$0xff]  ;;  %v733_v14 = vadd.f32 %v701_v6, %v633_v1  ;;  %v839_v21 = vmul.f32 %v6641_v44, %v565_v41  ;;  %v1048_v27 = vmul.f32 %v6650_v47, %v566_v24 }
  0xa8   :  { %v10325_v25 = vmax.f32 %v6741_v59, 0.0  ;;  %v801_v36 = vadd.f32 %v6698_v38, %v731_v3  ;;  %v429_v51 = vsel %vm33_vm0, %v114_v9, %v306_v60  ;;  %v428_v49 = vsel %vm33_vm0, %v109_v11, %v301_v0 }
  0xa9   :  { %v1149_v48 = vadd.f32 %v1117_v39, %v1079_v12  ;;  %v311_v50 = vpop.permute.xlu1 %310  ;;  %v119_v26 = vpop.permute.xlu0 %118  ;;  %v802_v56 = vadd.f32 %v770_v20, %v732_v61  ;;  %v909_v58 = vmul.f32 %v6647_v46, %v665_v42  ;;  %v1080_v41 = vadd.f32 %v1048_v27, %v1010_v8  ;;  %461 = vst [vmem:[#allocation2 + $0x48] sm:$0xff] %v429_v51 }
  0xaa   :  { %1248 = vst [vmem:[#allocation2] sm:$0xff] %v10325_v25  ;;  %v1118_v62 = vmul.f32 %v6711_v57, %v666_v55  ;;  %460 = vst [vmem:[#allocation2 + $0x40] sm:$0xff] %v428_v49  ;;  %v803_v9 = vadd.f32 %v771_v7, %v733_v14  ;;  %v871_v63 = vadd.f32 %v839_v21, %v801_v36 }
  0xab   :  { %v6760_v38 = vadd.f32 %v6729_v23, %v1149_v48  ;;  %v979_v11 = vmul.f32 %v6644_v45, %v6706_v40  ;;  %v6765_v0 = vmul.f32 %v6608_v28, %v429_v51  ;;  %v6768_v20 = vmul.f32 %v6638_v43, %v429_v51 }
  0xac   :  { %v1150_v60 = vadd.f32 %v1118_v62, %v1080_v41  ;;  %v602_v42 = vmul.f32 %v6611_v29, %v566_v24  ;;  %v941_v1 = vadd.f32 %v909_v58, %v871_v63  ;;  %v981_v6 = vmul.f32 %v6644_v45, %v429_v51 }
  0xad   :  { %v10324_v61 = vmax.f32 %v6760_v38, 0.0  ;;  %v840_v7 = vmul.f32 %v6641_v44, %v566_v24  ;;  %v316_v8 = vpop.permute.xlu1 %315  ;;  %v124_v12 = vpop.permute.xlu0 %123  ;;  %v702_v3 = vmul.f32 %v6630_v35, %v666_v55  ;;  %v430_v14 = vsel %vm33_vm0, %v119_v26, %v311_v50 }
  0xae   :  { %v1186_v40 = vadd.f32 %v6729_v23, %v1150_v60  ;;  %v634_v39 = vadd.f32 %v602_v42, %v6720_v2  ;;  %v536_v21 = vmul.f32 %v6608_v28, %v428_v49  ;;  %v772_v27 = vmul.f32 %v6638_v43, %v428_v49  ;;  %462 = vst [vmem:[#allocation2 + $0x50] sm:$0xff] %v430_v14 }
  0xaf   :  { %1249 = vst [vmem:[#allocation2 + $0x8] sm:$0xff] %v10324_v61  ;;  %v872_v48 = vadd.f32 %v840_v7, %v802_v56  ;;  %v910_v24 = vmul.f32 %v6647_v46, %v666_v55  ;;  %v980_v2 = vmul.f32 %v6644_v45, %v428_v49  ;;  %v6789_v58 = vsel %vm33_vm0, %v124_v12, %v316_v8 }
  0xb0   :  { %v6784_v36 = vmax.f32 %v1186_v40, 0.0  ;;  %v734_v51 = vadd.f32 %v702_v3, %v634_v39  ;;  %v1011_v50 = vadd.f32 %v979_v11, %v941_v1  ;;  %v6792_v60 = vmul.f32 %v6608_v28, %v430_v14  ;;  %463 = vst [vmem:[#allocation2 + $0x58] sm:$0xff] %v6789_v58 }
  0xb1   :  { %v567_v26 = vld [vmem:[#allocation2 + $0x39] sm:$0xff]  ;;  %v568_v41 = vld [vmem:[#allocation2 + $0x41] sm:$0xff]  ;;  %v942_v63 = vadd.f32 %v910_v24, %v872_v48  ;;  %v6795_v55 = vmul.f32 %v6638_v43, %v430_v14  ;;  %v134_v56 = vpop.permute.xlu1 %133  ;;  %v129_v42 = vpop.permute.xlu0 %128  ;;  %v982_v8 = vmul.f32 %v6644_v45, %v430_v14 }
  0xb2   :  { %v667_v62 = vld [vmem:[#allocation2 + $0x3a] sm:$0xff]  ;;  %1250 = vst [vmem:[#allocation2 + $0x10] sm:$0xff] %v6784_v36  ;;  %v668_v49 = vld [vmem:[#allocation2 + $0x42] sm:$0xff]  ;;  %v804_v7 = vadd.f32 %v772_v27, %v734_v51  ;;  %v841_v11 = vmul.f32 %v6641_v44, %v567_v26  ;;  %v842_v1 = vmul.f32 %v6641_v44, %v568_v41  ;;  %v604_v12 = vmul.f32 %v6611_v29, %v568_v41 }
  0xb3   :  { %v1012_v40 = vadd.f32 %v980_v2, %v942_v63  ;;  %v1049_v39 = vmul.f32 %v6650_v47, %v567_v26  ;;  %v1050_v3 = vmul.f32 %v6650_v47, %v568_v41  ;;  %v911_v61 = vmul.f32 %v6647_v46, %v667_v62 }
  0xb4   :  { %v873_v48 = vadd.f32 %v841_v11, %v803_v9  ;;  %v874_v24 = vadd.f32 %v842_v1, %v804_v7  ;;  %v6808_v27 = vmul.f32 %v6608_v28, %v6789_v58  ;;  %v1119_v13 = vmul.f32 %v6711_v57, %v667_v62 }
  0xb5   :  { %v1081_v51 = vadd.f32 %v1049_v39, %v1011_v50  ;;  %v1082_v25 = vadd.f32 %v1050_v3, %v1012_v40  ;;  %v1120_v14 = vmul.f32 %v6711_v57, %v668_v49  ;;  %v326_v34 = vpop.permute.xlu1 %325  ;;  %v321_v2 = vpop.permute.xlu0 %320  ;;  %v569_v32 = vld [vmem:[#allocation2 + $0x49] sm:$0xff]  ;;  %v912_v41 = vmul.f32 %v6647_v46, %v668_v49 }
  0xb6   :  { %v943_v63 = vadd.f32 %v911_v61, %v873_v48  ;;  %v603_v9 = vmul.f32 %v6611_v29, %v567_v26  ;;  %v775_v7 = vmul.f32 %v6638_v43, %v6789_v58  ;;  %v636_v11 = vadd.f32 %v604_v12, %v536_v21  ;;  %v669_v50 = vld [vmem:[#allocation2 + $0x4a] sm:$0xff] }
  0xb7   :  { %v1151_v1 = vadd.f32 %v1119_v13, %v1081_v51  ;;  %v1152_v33 = vadd.f32 %v1120_v14, %v1082_v25  ;;  %v704_v40 = vmul.f32 %v6630_v35, %v668_v49  ;;  %v944_v39 = vadd.f32 %v912_v41, %v874_v24  ;;  %v570_v26 = vld [vmem:[#allocation2 + $0x51] sm:$0xff] }
  0xb8   :  { %v1013_v3 = vadd.f32 %v981_v6, %v943_v63  ;;  %v1051_v31 = vmul.f32 %v6650_v47, %v569_v32  ;;  %v605_v61 = vmul.f32 %v6611_v29, %v569_v32  ;;  %v635_v22 = vadd.f32 %v603_v9, %v6735_v54 }
  0xb9   :  { %v1187_v48 = vadd.f32 %v6729_v23, %v1151_v1  ;;  %v1188_v30 = vadd.f32 %v6729_v23, %v1152_v33  ;;  %v703_v21 = vmul.f32 %v6630_v35, %v667_v62  ;;  %v331_v13 = vpop.permute.xlu1 %330  ;;  %v139_v25 = vpop.permute.xlu0 %138  ;;  %v1121_v49 = vmul.f32 %v6711_v57, %v669_v50  ;;  %v670_v33 = vld [vmem:[#allocation2 + $0x52] sm:$0xff] }
  0xba   :  { %v1083_v12 = vadd.f32 %v1051_v31, %v1013_v3  ;;  %v637_v6 = vadd.f32 %v605_v61, %v6765_v0  ;;  %v705_v24 = vmul.f32 %v6630_v35, %v669_v50  ;;  %v736_v63 = vadd.f32 %v704_v40, %v636_v11 }
  0xbb   :  { %v6826_v51 = vmax.f32 %v1187_v48, 0.0  ;;  %v6828_v14 = vmax.f32 %v1188_v30, 0.0  ;;  %v735_v41 = vadd.f32 %v703_v21, %v635_v22  ;;  %v1014_v1 = vadd.f32 %v982_v8, %v944_v39 }
  0xbc   :  { %v1153_v54 = vadd.f32 %v1121_v49, %v1083_v12  ;;  %v737_v9 = vadd.f32 %v705_v24, %v637_v6  ;;  %v1052_v62 = vmul.f32 %v6650_v47, %v570_v26  ;;  %v843_v0 = vmul.f32 %v6641_v44, %v569_v32 }
  0xbd   :  { %1251 = vst [vmem:[#allocation2 + $0x18] sm:$0xff] %v6826_v51  ;;  %1252 = vst [vmem:[#allocation2 + $0x20] sm:$0xff] %v6828_v14  ;;  %v805_v31 = vadd.f32 %v6768_v20, %v735_v41  ;;  %v433_v30 = vsel %vm33_vm0, %v134_v56, %v326_v34  ;;  %v432_v11 = vsel %vm33_vm0, %v129_v42, %v321_v2  ;;  %v336_v22 = vpop.permute.xlu1 %335  ;;  %v144_v8 = vpop.permute.xlu0 %143 }
  0xbe   :  { %v1189_v40 = vadd.f32 %v6729_v23, %v1153_v54  ;;  %v983_v39 = vmul.f32 %v6644_v45, %v6789_v58  ;;  %v1084_v3 = vadd.f32 %v1052_v62, %v1014_v1  ;;  %v1122_v61 = vmul.f32 %v6711_v57, %v670_v33  ;;  %465 = vst [vmem:[#allocation2 + $0x68] sm:$0xff] %v433_v30 }
  0xbf   :  { %464 = vst [vmem:[#allocation2 + $0x60] sm:$0xff] %v432_v11  ;;  %v806_v32 = vadd.f32 %v6795_v55, %v736_v63  ;;  %v807_v20 = vadd.f32 %v775_v7, %v737_v9  ;;  %v875_v48 = vadd.f32 %v843_v0, %v805_v31  ;;  %v913_v34 = vmul.f32 %v6647_v46, %v669_v50 }
  0xc0   :  { %v6845_v56 = vmax.f32 %v1189_v40, 0.0  ;;  %v1154_v42 = vadd.f32 %v1122_v61, %v1084_v3  ;;  %v6848_v2 = vmul.f32 %v6608_v28, %v433_v30  ;;  %v606_v21 = vmul.f32 %v6611_v29, %v570_v26 }
  0xc1   :  { %v945_v58 = vadd.f32 %v913_v34, %v875_v48  ;;  %v6852_v12 = vmul.f32 %v6638_v43, %v433_v30  ;;  %v985_v49 = vmul.f32 %v6644_v45, %v433_v30  ;;  %v844_v55 = vmul.f32 %v6641_v44, %v570_v26  ;;  %v6865_v26 = vpop.permute.xlu1 %153  ;;  %v6867_v9 = vpop.permute.xlu0 %148 }
  0xc2   :  { %1253 = vst [vmem:[#allocation2 + $0x28] sm:$0xff] %v6845_v56  ;;  %v1190_v7 = vadd.f32 %v6729_v23, %v1154_v42  ;;  %v638_v50 = vadd.f32 %v606_v21, %v6792_v60  ;;  %v706_v6 = vmul.f32 %v6630_v35, %v670_v33  ;;  %v434_v24 = vsel %vm33_vm0, %v139_v25, %v331_v13 }
  0xc3   :  { %v540_v63 = vmul.f32 %v6608_v28, %v432_v11  ;;  %v776_v41 = vmul.f32 %v6638_v43, %v432_v11  ;;  %v876_v1 = vadd.f32 %v844_v55, %v806_v32  ;;  %v914_v54 = vmul.f32 %v6647_v46, %v670_v33  ;;  %466 = vst [vmem:[#allocation2 + $0x70] sm:$0xff] %v434_v24 }
  0xc4   :  { %v6869_v62 = vmax.f32 %v1190_v7, 0.0  ;;  %v738_v60 = vadd.f32 %v706_v6, %v638_v50  ;;  %v984_v31 = vmul.f32 %v6644_v45, %v432_v11  ;;  %v6874_v13 = vsel %vm33_vm0, %v144_v8, %v336_v22 }
  0xc5   :  { %v1015_v25 = vadd.f32 %v983_v39, %v945_v58  ;;  %v946_v3 = vadd.f32 %v914_v54, %v876_v1  ;;  %v6877_v33 = vmul.f32 %v6608_v28, %v434_v24  ;;  %v6880_v61 = vmul.f32 %v6638_v43, %v434_v24  ;;  %467 = vst [vmem:[#allocation2 + $0x78] sm:$0xff] %v6874_v13  ;;  %v346_v54 = vpop.permute.xlu1 %345 }
  0xc6   :  { %10393 = vst [vmem:[#allocation23_spill] sm:$0xff] %v6869_v62  ;;  %v571_v0 = vld [vmem:[#allocation2 + $0x59] sm:$0xff]  ;;  %v572_v30 = vld [vmem:[#allocation2 + $0x61] sm:$0xff]  ;;  %1254 = vst [vmem:[#allocation2 + $0x30] sm:$0xff] %v6869_v62  ;;  %v808_v32 = vadd.f32 %v776_v41, %v738_v60  ;;  %v986_v39 = vmul.f32 %v6644_v45, %v434_v24  ;;  %v6893_v50 = vmul.f32 %v6608_v28, %v6874_v13  ;;  %v341_v60 = vpop.permute.xlu0 %340 }
  0xc7   :  { %v671_v40 = vld [vmem:[#allocation2 + $0x5a] sm:$0xff]  ;;  %v672_v11 = vld [vmem:[#allocation2 + $0x62] sm:$0xff]  ;;  %v845_v22 = vmul.f32 %v6641_v44, %v571_v0  ;;  %v846_v8 = vmul.f32 %v6641_v44, %v572_v30  ;;  %v608_v48 = vmul.f32 %v6611_v29, %v572_v30  ;;  %v1016_v34 = vadd.f32 %v984_v31, %v946_v3 }
  0xc8   :  { %v1053_v42 = vmul.f32 %v6650_v47, %v571_v0  ;;  %v1054_v21 = vmul.f32 %v6650_v47, %v572_v30  ;;  %v915_v7 = vmul.f32 %v6647_v46, %v671_v40  ;;  %v1123_v1 = vmul.f32 %v6711_v57, %v671_v40 }
  0xc9   :  { %v877_v58 = vadd.f32 %v845_v22, %v807_v20  ;;  %v878_v55 = vadd.f32 %v846_v8, %v808_v32  ;;  %v1124_v24 = vmul.f32 %v6711_v57, %v672_v11  ;;  %v916_v30 = vmul.f32 %v6647_v46, %v672_v11 }
  0xca   :  { %v1085_v6 = vadd.f32 %v1053_v42, %v1015_v25  ;;  %v1086_v41 = vadd.f32 %v1054_v21, %v1016_v34  ;;  %v573_v3 = vld [vmem:[#allocation2 + $0x69] sm:$0xff]  ;;  %v607_v20 = vmul.f32 %v6611_v29, %v571_v0  ;;  %v779_v32 = vmul.f32 %v6638_v43, %v6874_v13 }
  0xcb   :  { %v947_v31 = vadd.f32 %v915_v7, %v877_v58  ;;  %v640_v22 = vadd.f32 %v608_v48, %v540_v63  ;;  %v673_v25 = vld [vmem:[#allocation2 + $0x6a] sm:$0xff]  ;;  %v708_v34 = vmul.f32 %v6630_v35, %v672_v11  ;;  %v948_v42 = vadd.f32 %v916_v30, %v878_v55  ;;  %v351_v30 = vpop.permute.xlu1 %350 }
  0xcc   :  { %v1155_v8 = vadd.f32 %v1123_v1, %v1085_v6  ;;  %v1156_v19 = vadd.f32 %v1124_v24, %v1086_v41  ;;  %v1055_v18 = vmul.f32 %v6650_v47, %v573_v3  ;;  %v609_v58 = vmul.f32 %v6611_v29, %v573_v3  ;;  %v574_v0 = vld [vmem:[#allocation2 + $0x71] sm:$0xff] }
  0xcd   :  { %v1017_v21 = vadd.f32 %v985_v49, %v947_v31  ;;  %v639_v37 = vadd.f32 %v607_v20, %v6808_v27  ;;  %v707_v63 = vmul.f32 %v6630_v35, %v671_v40  ;;  %v1125_v6 = vmul.f32 %v6711_v57, %v673_v25  ;;  %v674_v24 = vld [vmem:[#allocation2 + $0x72] sm:$0xff] }
  0xce   :  { %v1191_v7 = vadd.f32 %v6729_v23, %v1155_v8  ;;  %v1192_v62 = vadd.f32 %v6729_v23, %v1156_v19  ;;  %v641_v11 = vadd.f32 %v609_v58, %v6848_v2  ;;  %v709_v49 = vmul.f32 %v6630_v35, %v673_v25  ;;  %v159_v19 = vpop.permute.xlu0 %158 }
  0xcf   :  { %v1087_v48 = vadd.f32 %v1055_v18, %v1017_v21  ;;  %v740_v1 = vadd.f32 %v708_v34, %v640_v22  ;;  %v739_v31 = vadd.f32 %v707_v63, %v639_v37  ;;  %v1018_v8 = vadd.f32 %v986_v39, %v948_v42 }
  0xd0   :  { %v6911_v55 = vmax.f32 %v1191_v7, 0.0  ;;  %v1224_v41 = vmax.f32 %v1192_v62, 0.0  ;;  %v741_v27 = vadd.f32 %v709_v49, %v641_v11  ;;  %v1056_v40 = vmul.f32 %v6650_v47, %v574_v0 }
  0xd1   :  { %v1157_v17 = vadd.f32 %v1125_v6, %v1087_v48  ;;  %v809_v18 = vadd.f32 %v6852_v12, %v739_v31  ;;  %v847_v2 = vmul.f32 %v6641_v44, %v573_v3  ;;  %v437_v62 = vsel %vm33_vm0, %v6865_v26, %v346_v54 }
  0xd2   :  { %1255 = vst [vmem:[#allocation2 + $0x38] sm:$0xff] %v6911_v55  ;;  %1256 = vst [vmem:[#allocation2 + $0x40] sm:$0xff] %v1224_v41  ;;  %v436_v37 = vsel %vm33_vm0, %v6867_v9, %v341_v60  ;;  %v987_v20 = vmul.f32 %v6644_v45, %v6874_v13  ;;  %v1088_v22 = vadd.f32 %v1056_v40, %v1018_v8  ;;  %v164_v7 = vpop.permute.xlu0 %163 }
  0xd3   :  { %v1193_v39 = vadd.f32 %v6729_v23, %v1157_v17  ;;  %v1126_v34 = vmul.f32 %v6711_v57, %v674_v24  ;;  %469 = vst [vmem:[#allocation2 + $0x88] sm:$0xff] %v437_v62  ;;  %468 = vst [vmem:[#allocation2 + $0x80] sm:$0xff] %v436_v37  ;;  %v810_v12 = vadd.f32 %v6880_v61, %v740_v1 }
  0xd4   :  { %v811_v3 = vadd.f32 %v779_v32, %v741_v27  ;;  %v879_v42 = vadd.f32 %v847_v2, %v809_v18  ;;  %v917_v26 = vmul.f32 %v6647_v46, %v673_v25  ;;  %v6932_v9 = vmul.f32 %v6608_v28, %v437_v62  ;;  %v356_v32 = vpop.permute.xlu1 %355 }
  0xd5   :  { %v6929_v54 = vmax.f32 %v1193_v39, 0.0  ;;  %v1158_v21 = vadd.f32 %v1126_v34, %v1088_v22  ;;  %v610_v17 = vmul.f32 %v6611_v29, %v574_v0  ;;  %v6936_v60 = vmul.f32 %v6638_v43, %v437_v62 }
  0xd6   :  { %v949_v13 = vadd.f32 %v917_v26, %v879_v42  ;;  %v989_v58 = vmul.f32 %v6644_v45, %v437_v62  ;;  %v848_v61 = vmul.f32 %v6641_v44, %v574_v0  ;;  %v710_v48 = vmul.f32 %v6630_v35, %v674_v24 }
  0xd7   :  { %10394 = vst [vmem:[#allocation24_spill] sm:$0xff] %v6929_v54  ;;  %1257 = vst [vmem:[#allocation2 + $0x48] sm:$0xff] %v6929_v54  ;;  %v1194_v25 = vadd.f32 %v6729_v23, %v1158_v21  ;;  %v642_v63 = vadd.f32 %v610_v17, %v6877_v33  ;;  %v438_v6 = vsel %vm33_vm0, %v159_v19, %v351_v30 }
  0xd8   :  { %v544_v11 = vmul.f32 %v6608_v28, %v436_v37  ;;  %v780_v49 = vmul.f32 %v6638_v43, %v436_v37  ;;  %v880_v41 = vadd.f32 %v848_v61, %v810_v12  ;;  %v918_v0 = vmul.f32 %v6647_v46, %v674_v24  ;;  %470 = vst [vmem:[#allocation2 + $0x90] sm:$0xff] %v438_v6 }
  0xd9   :  { %v1226_v1 = vmax.f32 %v1194_v25, 0.0  ;;  %v742_v31 = vadd.f32 %v710_v48, %v642_v63  ;;  %v988_v8 = vmul.f32 %v6644_v45, %v436_v37  ;;  %v6952_v33 = vsel %vm33_vm0, %v164_v7, %v356_v32  ;;  %v174_v32 = vpop.permute.xlu1 %173  ;;  %v169_v7 = vpop.permute.xlu0 %168 }
  0xda   :  { %v1019_v27 = vadd.f32 %v987_v20, %v949_v13  ;;  %v575_v40 = vld [vmem:[#allocation2 + $0x79] sm:$0xff]  ;;  %v576_v18 = vld [vmem:[#allocation2 + $0x81] sm:$0xff]  ;;  %v950_v19 = vadd.f32 %v918_v0, %v880_v41  ;;  %v6955_v2 = vmul.f32 %v6608_v28, %v438_v6  ;;  %v6958_v62 = vmul.f32 %v6638_v43, %v438_v6  ;;  %471 = vst [vmem:[#allocation2 + $0x98] sm:$0xff] %v6952_v33 }
  0xdb   :  { %v675_v30 = vld [vmem:[#allocation2 + $0x7a] sm:$0xff]  ;;  %1258 = vst [vmem:[#allocation2 + $0x50] sm:$0xff] %v1226_v1  ;;  %v676_v24 = vld [vmem:[#allocation2 + $0x82] sm:$0xff]  ;;  %v812_v37 = vadd.f32 %v780_v49, %v742_v31  ;;  %v849_v39 = vmul.f32 %v6641_v44, %v575_v40  ;;  %v850_v22 = vmul.f32 %v6641_v44, %v576_v18  ;;  %v990_v20 = vmul.f32 %v6644_v45, %v438_v6 }
  0xdc   :  { %v612_v34 = vmul.f32 %v6611_v29, %v576_v18  ;;  %v1020_v12 = vadd.f32 %v988_v8, %v950_v19  ;;  %v1057_v42 = vmul.f32 %v6650_v47, %v575_v40  ;;  %v1058_v26 = vmul.f32 %v6650_v47, %v576_v18 }
  0xdd   :  { %v881_v21 = vadd.f32 %v849_v39, %v811_v3  ;;  %v882_v17 = vadd.f32 %v850_v22, %v812_v37  ;;  %v919_v13 = vmul.f32 %v6647_v46, %v675_v30  ;;  %v6970_v61 = vmul.f32 %v6608_v28, %v6952_v33 }
  0xde   :  { %v1089_v25 = vadd.f32 %v1057_v42, %v1019_v27  ;;  %v1090_v63 = vadd.f32 %v1058_v26, %v1020_v12  ;;  %v1127_v48 = vmul.f32 %v6711_v57, %v675_v30  ;;  %v1128_v6 = vmul.f32 %v6711_v57, %v676_v24 }
  0xdf   :  { %v951_v49 = vadd.f32 %v919_v13, %v881_v21  ;;  %v577_v41 = vld [vmem:[#allocation2 + $0x89] sm:$0xff]  ;;  %v920_v0 = vmul.f32 %v6647_v46, %v676_v24  ;;  %v611_v3 = vmul.f32 %v6611_v29, %v575_v40  ;;  %v783_v1 = vmul.f32 %v6638_v43, %v6952_v33 }
  0xe0   :  { %v644_v31 = vadd.f32 %v612_v34, %v544_v11  ;;  %v1159_v8 = vadd.f32 %v1127_v48, %v1089_v25  ;;  %v1160_v18 = vadd.f32 %v1128_v6, %v1090_v63  ;;  %v677_v19 = vld [vmem:[#allocation2 + $0x8a] sm:$0xff]  ;;  %v712_v27 = vmul.f32 %v6630_v35, %v676_v24  ;;  %v361_v25 = vpop.permute.xlu0 %360 }
  0xe1   :  { %v952_v37 = vadd.f32 %v920_v0, %v882_v17  ;;  %v1021_v39 = vadd.f32 %v989_v58, %v951_v49  ;;  %v1059_v22 = vmul.f32 %v6650_v47, %v577_v41  ;;  %v613_v12 = vmul.f32 %v6611_v29, %v577_v41  ;;  %v578_v40 = vld [vmem:[#allocation2 + $0x91] sm:$0xff]  ;;  %v366_v17 = vpop.permute.xlu1 %365 }
  0xe2   :  { %v1195_v42 = vadd.f32 %v6729_v23, %v1159_v8  ;;  %v1196_v26 = vadd.f32 %v6729_v23, %v1160_v18  ;;  %v643_v21 = vadd.f32 %v611_v3, %v6893_v50  ;;  %v711_v11 = vmul.f32 %v6630_v35, %v675_v30  ;;  %v678_v49 = vld [vmem:[#allocation2 + $0x92] sm:$0xff] }
  0xe3   :  { %v1091_v34 = vadd.f32 %v1059_v22, %v1021_v39  ;;  %v1129_v13 = vmul.f32 %v6711_v57, %v677_v19  ;;  %v645_v24 = vadd.f32 %v613_v12, %v6932_v9  ;;  %v713_v58 = vmul.f32 %v6630_v35, %v677_v19 }
  0xe4   :  { %v6988_v63 = vmax.f32 %v1195_v42, 0.0  ;;  %v1228_v48 = vmax.f32 %v1196_v26, 0.0  ;;  %v744_v6 = vadd.f32 %v712_v27, %v644_v31  ;;  %v743_v0 = vadd.f32 %v711_v11, %v643_v21 }
  0xe5   :  { %v1022_v8 = vadd.f32 %v990_v20, %v952_v37  ;;  %v1161_v18 = vadd.f32 %v1129_v13, %v1091_v34  ;;  %v745_v50 = vadd.f32 %v713_v58, %v645_v24  ;;  %v1060_v30 = vmul.f32 %v6650_v47, %v578_v40 }
  0xe6   :  { %10395 = vst [vmem:[#allocation25_spill] sm:$0xff] %v6988_v63  ;;  %1259 = vst [vmem:[#allocation2 + $0x58] sm:$0xff] %v6988_v63  ;;  %v813_v9 = vadd.f32 %v6936_v60, %v743_v0  ;;  %v851_v3 = vmul.f32 %v6641_v44, %v577_v41  ;;  %v441_v39 = vsel %vm33_vm0, %v174_v32, %v366_v17  ;;  %v1353_v0 = vld [vmem:[#allocation2 + $0x9] sm:$0xff] }
  0xe7   :  { %1260 = vst [vmem:[#allocation2 + $0x60] sm:$0xff] %v1228_v48  ;;  %v440_v31 = vsel %vm33_vm0, %v169_v7, %v361_v25  ;;  %v1197_v27 = vadd.f32 %v6729_v23, %v1161_v18  ;;  %v991_v20 = vmul.f32 %v6644_v45, %v6952_v33  ;;  %v1092_v37 = vadd.f32 %v1060_v30, %v1022_v8 }
  0xe8   :  { %v1130_v22 = vmul.f32 %v6711_v57, %v678_v49  ;;  %473 = vst [vmem:[#allocation2 + $0xa8] sm:$0xff] %v441_v39  ;;  %472 = vst [vmem:[#allocation2 + $0xa0] sm:$0xff] %v440_v31  ;;  %v814_v60 = vadd.f32 %v6958_v62, %v744_v6  ;;  %v815_v12 = vadd.f32 %v783_v1, %v745_v50  ;;  %v1352_v6 = vld [vmem:[#allocation2 + $0x1] sm:$0xff]  ;;  %v10396_v50 = vmax.f32 %v6741_v59, 0.0 }
  0xe9   :  { %v883_v41 = vadd.f32 %v851_v3, %v813_v9  ;;  %v921_v42 = vmul.f32 %v6647_v46, %v677_v19  ;;  %v1229_v32 = vmax.f32 %v1197_v27, 0.0  ;;  %v7005_v7 = vmul.f32 %v6608_v28, %v441_v39 }
  0xea   :  { %v1162_v26 = vadd.f32 %v1130_v22, %v1092_v37  ;;  %v614_v21 = vmul.f32 %v6611_v29, %v578_v40  ;;  %v7009_v33 = vmul.f32 %v6638_v43, %v441_v39  ;;  %v7012_v34 = vmul.f32 %v6644_v45, %v441_v39 }
  0xeb   :  { %v953_v11 = vadd.f32 %v921_v42, %v883_v41  ;;  %v852_v62 = vmul.f32 %v6641_v44, %v578_v40  ;;  %1261 = vst [vmem:[#allocation2 + $0x68] sm:$0xff] %v1229_v32  ;;  %v548_v19 = vmul.f32 %v6608_v28, %v440_v31  ;;  %v714_v24 = vmul.f32 %v6630_v35, %v678_v49 }
  0xec   :  { %v1198_v1 = vadd.f32 %v6729_v23, %v1162_v26  ;;  %v646_v13 = vadd.f32 %v614_v21, %v6955_v2  ;;  %v784_v58 = vmul.f32 %v6638_v43, %v440_v31  ;;  %v922_v25 = vmul.f32 %v6647_v46, %v678_v49 }
  0xed   :  { %v884_v17 = vadd.f32 %v852_v62, %v814_v60  ;;  %v992_v48 = vmul.f32 %v6644_v45, %v440_v31  ;;  %v1023_v8 = vadd.f32 %v991_v20, %v953_v11  ;;  %v1320_v30 = vmul.f32 %v6654_v52, %v10396_v50 }
  0xee   :  { %v1230_v40 = vmax.f32 %v1198_v1, 0.0  ;;  %v746_v18 = vadd.f32 %v714_v24, %v646_v13  ;;  %v10397_v39 = vmax.f32 %v6760_v38, 0.0  ;;  %v7032_v49 = vmul.f32 %v6654_v52, %v6784_v36  ;;  %v7055_v13 = vld [vmem:[#allocation2 + $0x21] sm:$0xff] }
  0xef   :  { %v7025_v9 = vld [vmem:[#allocation2 + $0x99] sm:$0xff]  ;;  %v580_v2 = vld [vmem:[#allocation2 + $0xa1] sm:$0xff]  ;;  %v954_v3 = vadd.f32 %v922_v25, %v884_v17  ;;  %v7036_v31 = vmul.f32 %v6654_v52, %v6826_v51  ;;  %v1388_v22 = vmul.f32 %v6671_v4, %v1352_v6  ;;  %v1389_v60 = vmul.f32 %v6671_v4, %v1353_v0  ;;  %v7061_v0 = vld [vmem:[#allocation2 + $0x29] sm:$0xff] }
  0xf0   :  { %v1321_v27 = vmul.f32 %v6654_v52, %v10397_v39  ;;  %1262 = vst [vmem:[#allocation2 + $0x70] sm:$0xff] %v1230_v40  ;;  %v616_v59 = vmul.f32 %v6611_v29, %v580_v2  ;;  %v7039_v20 = vld [vmem:[#allocation2 + $0x9a] sm:$0xff]  ;;  %v7041_v37 = vld [vmem:[#allocation2 + $0xa2] sm:$0xff]  ;;  %v853_v38 = vmul.f32 %v6641_v44, %v7025_v9  ;;  %v1061_v42 = vmul.f32 %v6650_v47, %v7025_v9  ;;  %v7065_v39 = vld [vmem:[#allocation2 + $0x11] sm:$0xff] }
  0xf1   :  { %v1024_v41 = vadd.f32 %v992_v48, %v954_v3  ;;  %v1062_v32 = vmul.f32 %v6650_v47, %v580_v2  ;;  %v1324_v26 = vmul.f32 %v6654_v52, %v6828_v14  ;;  %v816_v21 = vadd.f32 %v784_v58, %v746_v18  ;;  %v1452_v24 = vld [vmem:[#allocation2 + $0x2] sm:$0xff]  ;;  %v1453_v58 = vld [vmem:[#allocation2 + $0xa] sm:$0xff] }
  0xf2   :  { %v854_v11 = vmul.f32 %v6641_v44, %v580_v2  ;;  %v885_v62 = vadd.f32 %v853_v38, %v815_v12  ;;  %v1325_v1 = vmul.f32 %v6654_v52, %v6845_v56  ;;  %v1093_v17 = vadd.f32 %v1061_v42, %v1023_v8  ;;  %v7067_v8 = vld [vmem:[#allocation2 + $0x19] sm:$0xff] }
  0xf3   :  { %v1094_v25 = vadd.f32 %v1062_v32, %v1024_v41  ;;  %v1131_v48 = vmul.f32 %v6711_v57, %v7039_v20  ;;  %v1132_v6 = vmul.f32 %v6711_v57, %v7041_v37  ;;  %v648_v40 = vadd.f32 %v616_v59, %v548_v19 }
  0xf4   :  { %v923_v12 = vmul.f32 %v6647_v46, %v7039_v20  ;;  %v1420_v18 = vadd.f32 %v1388_v22, %v1320_v30  ;;  %v1421_v50 = vadd.f32 %v1389_v60, %v1321_v27  ;;  %v1392_v38 = vmul.f32 %v6671_v4, %v7055_v13  ;;  %v371_v30 = vpop.permute.xlu1 %370  ;;  %v179_v27 = vpop.permute.xlu0 %178 }
  0xf5   :  { %v1163_v2 = vadd.f32 %v1131_v48, %v1093_v17  ;;  %v1164_v3 = vadd.f32 %v1132_v6, %v1094_v25  ;;  %v1488_v57 = vmul.f32 %v6674_v5, %v1452_v24  ;;  %v886_v41 = vadd.f32 %v854_v11, %v816_v21  ;;  %v7079_v25 = vld [vmem:[#allocation2 + $0x12] sm:$0xff]  ;;  %v7081_v24 = vld [vmem:[#allocation2 + $0x1a] sm:$0xff] }
  0xf6   :  { %v955_v42 = vadd.f32 %v923_v12, %v885_v62  ;;  %v1393_v19 = vmul.f32 %v6671_v4, %v7061_v0  ;;  %v1489_v59 = vmul.f32 %v6674_v5, %v1453_v58  ;;  %v1558_v17 = vmul.f32 %v6657_v53, %v6784_v36 }
  0xf7   :  { %v1199_v22 = vadd.f32 %v6729_v23, %v1163_v2  ;;  %v1200_v60 = vadd.f32 %v6729_v23, %v1164_v3  ;;  %v1520_v32 = vadd.f32 %v1488_v57, %v1420_v18  ;;  %v1559_v11 = vmul.f32 %v6657_v53, %v6826_v51  ;;  %v7104_v2 = vld [vmem:[%s10318_s3 + $0x18] ss:$0 sm:$0xff] }
  0xf8   :  { %v1521_v21 = vadd.f32 %v1489_v59, %v1421_v50  ;;  %v1628_v62 = vmul.f32 %v6679_v15, %v7065_v39  ;;  %v1629_v48 = vmul.f32 %v6679_v15, %v7067_v8  ;;  %v7089_v58 = vadd.f32 %v1392_v38, %v1324_v26  ;;  %v7106_v26 = vld [vmem:[#allocation2 + $0x22] sm:$0xff] }
  0xf9   :  { %v1231_v6 = vmax.f32 %v1199_v22, 0.0  ;;  %v1232_v23 = vmax.f32 %v1200_v60, 0.0  ;;  %v1590_v12 = vadd.f32 %v1558_v17, %v1520_v32  ;;  %v7091_v36 = vadd.f32 %v1393_v19, %v1325_v1  ;;  %v7108_v1 = vld [vmem:[#allocation2 + $0x2a] sm:$0xff]  ;;  %v10399_v19 = vld [vmem:[#allocation21_spill] sm:$0xff] }
  0xfa   :  { %v7095_v18 = vmul.f32 %v6657_v53, %v6828_v14  ;;  %v7099_v51 = vmul.f32 %v6657_v53, %v6845_v56  ;;  %v1591_v50 = vadd.f32 %v1559_v11, %v1521_v21  ;;  %v1698_v38 = vmul.f32 %v6682_v16, %v7079_v25  ;;  %v376_v21 = vpop.permute.xlu1 %375  ;;  %v184_v11 = vpop.permute.xlu0 %183 }
  0xfb   :  { %10398 = vst [vmem:[#allocation26_spill] sm:$0xff] %v7091_v36  ;;  %1263 = vst [vmem:[#allocation2 + $0x78] sm:$0xff] %v1231_v6  ;;  %v1660_v3 = vadd.f32 %v1628_v62, %v1590_v12  ;;  %v1699_v57 = vmul.f32 %v6682_v16, %v7081_v24  ;;  %v1768_v59 = vmul.f32 %v10399_v19, %v6828_v14  ;;  %v10400_v6 = vld [vmem:[#allocation22_spill] sm:$0xff] }
  0xfc   :  { %1264 = vst [vmem:[#allocation2 + $0x80] sm:$0xff] %v1232_v23  ;;  %v1661_v22 = vadd.f32 %v1629_v48, %v1591_v50  ;;  %v1769_v60 = vmul.f32 %v10399_v19, %v6845_v56  ;;  %v442_v32 = vsel %vm33_vm0, %v179_v27, %v371_v30  ;;  %v716_v17 = vmul.f32 %v6630_v35, %v7041_v37 }
  0xfd   :  { %v1730_v62 = vadd.f32 %v1698_v38, %v1660_v3  ;;  %v1838_v23 = vmul.f32 %v10400_v6, %v7055_v13  ;;  %v1839_v12 = vmul.f32 %v10400_v6, %v7061_v0  ;;  %474 = vst [vmem:[#allocation2 + $0xb0] sm:$0xff] %v442_v32  ;;  %v924_v14 = vmul.f32 %v6647_v46, %v7041_v37 }
  0xfe   :  { %v1731_v56 = vadd.f32 %v1699_v57, %v1661_v22  ;;  %v1908_v30 = vmul.f32 %v7104_v2, %v7106_v26  ;;  %v1909_v27 = vmul.f32 %v7104_v2, %v7108_v1  ;;  %v748_v48 = vadd.f32 %v716_v17, %v648_v40 }
  0xff   :  { %v1800_v50 = vadd.f32 %v1768_v59, %v1730_v62  ;;  %v956_v3 = vadd.f32 %v924_v14, %v886_v41  ;;  %v443_v38 = vsel %vm33_vm0, %v184_v11, %v376_v21  ;;  %v615_v63 = vmul.f32 %v6611_v29, %v7025_v9  ;;  %v7148_v9 = vld [vmem:[%s10319_s4 + $0x1] ss:$0 sm:$0xff] }
 0x100   :  { %v1801_v54 = vadd.f32 %v1769_v60, %v1731_v56  ;;  %v7137_v36 = vmul.f32 %v6608_v28, %v442_v32  ;;  %v786_v37 = vmul.f32 %v6638_v43, %v442_v32  ;;  %v994_v57 = vmul.f32 %v6644_v45, %v442_v32  ;;  %475 = vst [vmem:[#allocation2 + $0xb8] sm:$0xff] %v443_v38 }
 0x101   :  { %v1870_v22 = vadd.f32 %v1838_v23, %v1800_v50  ;;  %v1025_v40 = vadd.f32 %v7012_v34, %v955_v42  ;;  %v647_v41 = vadd.f32 %v615_v63, %v6970_v61  ;;  %v715_v59 = vmul.f32 %v6630_v35, %v7039_v20 }
 0x102   :  { %v1871_v60 = vadd.f32 %v1839_v12, %v1801_v54  ;;  %v7150_v17 = vadd.f32 %v786_v37, %v748_v48  ;;  %v1026_v21 = vadd.f32 %v994_v57, %v956_v3  ;;  %v7153_v32 = vmul.f32 %v6608_v28, %v443_v38 }
 0x103   :  { %v1940_v11 = vadd.f32 %v1908_v30, %v1870_v22  ;;  %v747_v62 = vadd.f32 %v715_v59, %v647_v41  ;;  %v787_v34 = vmul.f32 %v6638_v43, %v443_v38  ;;  %v1390_v61 = vmul.f32 %v6671_v4, %v7065_v39  ;;  %v194_v41 = vpop.permute.xlu1 %193  ;;  %v189_v59 = vpop.permute.xlu0 %188 }
 0x104   :  { %v1941_v63 = vadd.f32 %v1909_v27, %v1871_v60  ;;  %v581_v20 = vld [vmem:[#allocation2 + $0xa9] sm:$0xff]  ;;  %v1391_v23 = vmul.f32 %v6671_v4, %v7067_v8  ;;  %v1490_v54 = vmul.f32 %v6674_v5, %v7079_v25  ;;  %v1491_v12 = vmul.f32 %v6674_v5, %v7081_v24  ;;  %v7173_v8 = vld [vmem:[%s10318_s3 + $0x8] ss:$0 sm:$0xff] }
 0x105   :  { %v681_v42 = vld [vmem:[#allocation2 + $0xaa] sm:$0xff]  ;;  %v1976_v14 = vadd.f32 %v7148_v9, %v1940_v11  ;;  %v1063_v56 = vmul.f32 %v6650_v47, %v581_v20  ;;  %v617_v30 = vmul.f32 %v6611_v29, %v581_v20  ;;  %v1630_v39 = vmul.f32 %v6679_v15, %v7055_v13 }
 0x106   :  { %v1977_v27 = vadd.f32 %v7148_v9, %v1941_v63  ;;  %v1133_v25 = vmul.f32 %v7173_v8, %v681_v42  ;;  %v817_v24 = vadd.f32 %v7009_v33, %v747_v62  ;;  %v855_v48 = vmul.f32 %v6641_v44, %v581_v20 }
 0x107   :  { %v2008_v50 = vmax.f32 %v1976_v14, 0.0  ;;  %v1095_v3 = vadd.f32 %v1063_v56, %v1025_v40  ;;  %v7178_v37 = vld [vmem:[#allocation2 + $0xb1] sm:$0xff]  ;;  %v649_v57 = vadd.f32 %v617_v30, %v7005_v7  ;;  %v717_v22 = vmul.f32 %v6630_v35, %v681_v42 }
 0x108   :  { %v7181_v13 = vld [vmem:[#allocation2 + $0xb2] sm:$0xff]  ;;  %v2009_v60 = vmax.f32 %v1977_v27, 0.0  ;;  %v887_v11 = vadd.f32 %v855_v48, %v817_v24  ;;  %v925_v63 = vmul.f32 %v6647_v46, %v681_v42  ;;  %v1064_v33 = vmul.f32 %v6650_v47, %v7178_v37  ;;  %v7194_v27 = vld [vmem:[%s10319_s4] ss:$0 sm:$0xff] }
 0x109   :  { %v1165_v62 = vadd.f32 %v1133_v25, %v1095_v3  ;;  %v749_v20 = vadd.f32 %v717_v22, %v649_v57  ;;  %v1422_v40 = vadd.f32 %v1390_v61, %v7032_v49  ;;  %v1423_v14 = vadd.f32 %v1391_v23, %v7036_v31  ;;  %v381_v57 = vpop.permute.xlu0 %380 }
 0x10a   :  { %v2040_v7 = vpack.c.bf16 %v2009_v60, %v2008_v50  ;;  %v957_v56 = vadd.f32 %v925_v63, %v887_v11  ;;  %v1096_v30 = vadd.f32 %v1064_v33, %v1026_v21  ;;  %v1134_v4 = vmul.f32 %v7173_v8, %v7181_v13  ;;  %v10401_v21 = vld [vmem:[#allocation23_spill] sm:$0xff] }
 0x10b   :  { %v1201_v42 = vadd.f32 %v7194_v27, %v1165_v62  ;;  %v1522_v24 = vadd.f32 %v1490_v54, %v1422_v40  ;;  %v1523_v25 = vadd.f32 %v1491_v12, %v1423_v14  ;;  %v1631_v49 = vmul.f32 %v6679_v15, %v7061_v0  ;;  %v386_v0 = vpop.permute.xlu1 %385  ;;  %v7217_v60 = vld [vmem:[#allocation2 + $0x39] sm:$0xff] }
 0x10c   :  { %6022 = vmatprep.mubr.bf16.mxu0 %v2040_v7  ;;  %v995_v31 = vmul.f32 %v6644_v45, %v443_v38  ;;  %v1166_v61 = vadd.f32 %v1134_v4, %v1096_v30  ;;  %v7202_v23 = vmul.f32 %v6654_v52, %v10401_v21  ;;  %v7206_v48 = vmul.f32 %v6654_v52, %v6911_v55  ;;  %v7215_v38 = vld [vmem:[#allocation2 + $0x31] sm:$0xff] }
 0x10d   :  { %v1233_v50 = vmax.f32 %v1201_v42, 0.0  ;;  %v7208_v3 = vadd.f32 %v787_v34, %v749_v20  ;;  %v1592_v54 = vadd.f32 %v7095_v18, %v1522_v24  ;;  %v1593_v12 = vadd.f32 %v7099_v51, %v1523_v25  ;;  %v7223_v18 = vld [vmem:[#allocation2 + $0x32] sm:$0xff]  ;;  %v7225_v51 = vld [vmem:[#allocation2 + $0x3a] sm:$0xff] }
 0x10e   :  { %10402 = vst [vmem:[#allocation21_spill] sm:$0xff] %v7206_v48  ;;  %v7212_v22 = vadd.f32 %v995_v31, %v957_v56  ;;  %v1202_v4 = vadd.f32 %v7194_v27, %v1166_v61  ;;  %v1700_v11 = vmul.f32 %v6682_v16, %v7106_v26  ;;  %v1701_v34 = vmul.f32 %v6682_v16, %v7108_v1 }
 0x10f   :  { %1265 = vst [vmem:[#allocation2 + $0x88] sm:$0xff] %v1233_v50  ;;  %v1662_v63 = vadd.f32 %v1630_v39, %v1592_v54  ;;  %v1663_v33 = vadd.f32 %v1631_v49, %v1593_v12  ;;  %v1770_v62 = vmul.f32 %v10399_v19, %v10401_v21  ;;  %v1771_v20 = vmul.f32 %v10399_v19, %v6911_v55  ;;  %v7253_v12 = vld [vmem:[#allocation2 + $0x40] sm:$0xff] }
 0x110   :  { %v1234_v40 = vmax.f32 %v1202_v4, 0.0  ;;  %v445_v14 = vsel %vm33_vm0, %v194_v41, %v386_v0  ;;  %v444_v7 = vsel %vm33_vm0, %v189_v59, %v381_v57  ;;  %v618_v56 = vmul.f32 %v6611_v29, %v7178_v37 }
 0x111   :  { %v1732_v30 = vadd.f32 %v1700_v11, %v1662_v63  ;;  %v1733_v42 = vadd.f32 %v1701_v34, %v1663_v33  ;;  %v1840_v39 = vmul.f32 %v10400_v6, %v7215_v38  ;;  %v1841_v24 = vmul.f32 %v10400_v6, %v7217_v60  ;;  %477 = vst [vmem:[#allocation2 + $0xc8] sm:$0xff] %v445_v14 }
 0x112   :  { %476 = vst [vmem:[#allocation2 + $0xc0] sm:$0xff] %v444_v7  ;;  %1266 = vst [vmem:[#allocation2 + $0x90] sm:$0xff] %v1234_v40  ;;  %v1910_v41 = vmul.f32 %v7104_v2, %v7223_v18  ;;  %v1911_v59 = vmul.f32 %v7104_v2, %v7225_v51  ;;  %v650_v25 = vadd.f32 %v618_v56, %v7137_v36 }
 0x113   :  { %v718_v49 = vmul.f32 %v6630_v35, %v7181_v13  ;;  %v1802_v31 = vadd.f32 %v1770_v62, %v1732_v30  ;;  %v1803_v61 = vadd.f32 %v1771_v20, %v1733_v42  ;;  %v7249_v50 = vmul.f32 %v6608_v28, %v445_v14 }
 0x114   :  { %v856_v54 = vmul.f32 %v6641_v44, %v7178_v37  ;;  %v7256_v0 = vmul.f32 %v6638_v43, %v445_v14  ;;  %v7259_v57 = vmul.f32 %v6644_v45, %v445_v14  ;;  %v552_v36 = vmul.f32 %v6608_v28, %v444_v7 }
 0x115   :  { %v750_v4 = vadd.f32 %v718_v49, %v650_v25  ;;  %v1872_v11 = vadd.f32 %v1840_v39, %v1802_v31  ;;  %v1873_v34 = vadd.f32 %v1841_v24, %v1803_v61  ;;  %v788_v63 = vmul.f32 %v6638_v43, %v444_v7  ;;  %v10404_v61 = vld [vmem:[#allocation26_spill] sm:$0xff] }
 0x116   :  { %v888_v33 = vadd.f32 %v856_v54, %v7150_v17  ;;  %v926_v37 = vmul.f32 %v6647_v46, %v7181_v13  ;;  %v996_v62 = vmul.f32 %v6644_v45, %v444_v7  ;;  %v7269_v20 = vmul.f32 %v6654_v52, %v7253_v12 }
 0x117   :  { %v1492_v40 = vmul.f32 %v6674_v5, %v7106_v26  ;;  %v1942_v14 = vadd.f32 %v1910_v41, %v1872_v11  ;;  %v1943_v56 = vadd.f32 %v1911_v59, %v1873_v34  ;;  %v820_v30 = vadd.f32 %v788_v63, %v750_v4 }
 0x118   :  { %10403 = vst [vmem:[#allocation23_spill] sm:$0xff] %v7269_v20  ;;  %v1493_v42 = vmul.f32 %v6674_v5, %v7108_v1  ;;  %v958_v13 = vadd.f32 %v926_v37, %v888_v33  ;;  %v1562_v25 = vmul.f32 %v6657_v53, %v10401_v21  ;;  %v1563_v26 = vmul.f32 %v6657_v53, %v6911_v55  ;;  %v7305_v5 = vld [vmem:[#allocation2 + $0x41] sm:$0xff] }
 0x119   :  { %v7275_v39 = vld [vmem:[#allocation2 + $0xb9] sm:$0xff]  ;;  %v584_v17 = vld [vmem:[#allocation2 + $0xc1] sm:$0xff]  ;;  %v1524_v7 = vadd.f32 %v1492_v40, %v7089_v58  ;;  %v1978_v41 = vadd.f32 %v7148_v9, %v1942_v14  ;;  %v1979_v59 = vadd.f32 %v7148_v9, %v1943_v56  ;;  %v1632_v21 = vmul.f32 %v6679_v15, %v7215_v38  ;;  %v391_v56 = vpop.permute.xlu1 %390 }
 0x11a   :  { %v7277_v24 = vld [vmem:[#allocation2 + $0xba] sm:$0xff]  ;;  %v620_v1 = vmul.f32 %v6611_v29, %v584_v17  ;;  %v857_v49 = vmul.f32 %v6641_v44, %v7275_v39  ;;  %v1065_v31 = vmul.f32 %v6650_v47, %v7275_v39  ;;  %v1525_v58 = vadd.f32 %v1493_v42, %v10404_v61  ;;  %v684_v11 = vld [vmem:[#allocation2 + $0xc2] sm:$0xff]  ;;  %v199_v42 = vpop.permute.xlu0 %198 }
 0x11b   :  { %v1633_v55 = vmul.f32 %v6679_v15, %v7217_v60  ;;  %v2010_v54 = vmax.f32 %v1978_v41, 0.0  ;;  %v2011_v4 = vmax.f32 %v1979_v59, 0.0  ;;  %v858_v34 = vmul.f32 %v6641_v44, %v584_v17 }
 0x11c   :  { %v927_v63 = vmul.f32 %v6647_v46, %v7277_v24  ;;  %v1028_v33 = vadd.f32 %v996_v62, %v958_v13  ;;  %v1066_v37 = vmul.f32 %v6650_v47, %v584_v17  ;;  %v1097_v40 = vadd.f32 %v1065_v31, %v7212_v22  ;;  %v7307_v62 = vld [vmem:[#allocation2 + $0x49] sm:$0xff] }
 0x11d   :  { %v1135_v14 = vmul.f32 %v7173_v8, %v7277_v24  ;;  %v2041_v61 = vpack.c.bf16 %v2011_v4, %v2010_v54  ;;  %v652_v20 = vadd.f32 %v620_v1, %v552_v36  ;;  %v889_v41 = vadd.f32 %v857_v49, %v7208_v3  ;;  %v7316_v49 = vld [vmem:[#allocation2 + $0x42] sm:$0xff] }
 0x11e   :  { %v1594_v59 = vadd.f32 %v1562_v25, %v1524_v7  ;;  %v1098_v15 = vadd.f32 %v1066_v37, %v1028_v33  ;;  %v1136_v53 = vmul.f32 %v7173_v8, %v684_v11  ;;  %v1595_v17 = vadd.f32 %v1563_v26, %v1525_v58  ;;  %v10405_v26 = vld [vmem:[#allocation24_spill] sm:$0xff]  ;;  %v204_v33 = vpop.permute.xlu0 %203 }
 0x11f   :  { %v1167_v48 = vadd.f32 %v1135_v14, %v1097_v40  ;;  %6023 = vmatmul.mubr.bf16.vlgmr.msra.gmra.mrb[0].mxu0 %v2041_v61  ;;  %v890_v22 = vadd.f32 %v858_v34, %v820_v30  ;;  %v1702_v31 = vmul.f32 %v6682_v16, %v7223_v18  ;;  %v1703_v36 = vmul.f32 %v6682_v16, %v7225_v51  ;;  %v396_v34 = vpop.permute.xlu1 %395 }
 0x120   :  { %v1664_v13 = vadd.f32 %v1632_v21, %v1594_v59  ;;  %v1168_v3 = vadd.f32 %v1136_v53, %v1098_v15  ;;  %v1665_v25 = vadd.f32 %v1633_v55, %v1595_v17  ;;  %v1772_v1 = vmul.f32 %v10399_v19, %v7253_v12 }
 0x121   :  { %v1203_v7 = vadd.f32 %v7194_v27, %v1167_v48  ;;  %v1773_v30 = vmul.f32 %v10399_v19, %v10405_v26  ;;  %v1842_v58 = vmul.f32 %v10400_v6, %v7305_v5  ;;  %v1843_v21 = vmul.f32 %v10400_v6, %v7307_v62  ;;  %v7327_v48 = vld [vmem:[#allocation2 + $0x4a] sm:$0xff] }
 0x122   :  { %v1734_v54 = vadd.f32 %v1702_v31, %v1664_v13  ;;  %v1204_v53 = vadd.f32 %v7194_v27, %v1168_v3  ;;  %v1735_v55 = vadd.f32 %v1703_v36, %v1665_v25  ;;  %v446_v4 = vsel %vm33_vm0, %v199_v42, %v391_v56 }
 0x123   :  { %v7325_v15 = vmax.f32 %v1203_v7, 0.0  ;;  %v959_v37 = vadd.f32 %v927_v63, %v889_v41  ;;  %v7333_v40 = vmul.f32 %v6654_v52, %v10405_v26  ;;  %478 = vst [vmem:[#allocation2 + $0xd0] sm:$0xff] %v446_v4  ;;  %v720_v61 = vmul.f32 %v6630_v35, %v684_v11 }
 0x124   :  { %v1804_v14 = vadd.f32 %v1772_v1, %v1734_v54  ;;  %v1236_v59 = vmax.f32 %v1204_v53, 0.0  ;;  %v1805_v17 = vadd.f32 %v1773_v30, %v1735_v55  ;;  %v1912_v13 = vmul.f32 %v7104_v2, %v7316_v49  ;;  %v7358_v53 = vld [vmem:[#allocation2 + $0x50] sm:$0xff] }
 0x125   :  { %10406 = vst [vmem:[#allocation26_spill] sm:$0xff] %v7325_v15  ;;  %1267 = vst [vmem:[#allocation2 + $0x98] sm:$0xff] %v7325_v15  ;;  %v928_v56 = vmul.f32 %v6647_v46, %v684_v11  ;;  %v1913_v63 = vmul.f32 %v7104_v2, %v7327_v48  ;;  %v752_v41 = vadd.f32 %v720_v61, %v652_v20 }
 0x126   :  { %v1874_v42 = vadd.f32 %v1842_v58, %v1804_v14  ;;  %v447_v31 = vsel %vm33_vm0, %v204_v33, %v396_v34  ;;  %1268 = vst [vmem:[#allocation2 + $0xa0] sm:$0xff] %v1236_v59  ;;  %v1875_v36 = vadd.f32 %v1843_v21, %v1805_v17  ;;  %v7345_v3 = vmul.f32 %v6608_v28, %v446_v4 }
 0x127   :  { %v960_v7 = vadd.f32 %v928_v56, %v890_v22  ;;  %479 = vst [vmem:[#allocation2 + $0xd8] sm:$0xff] %v447_v31  ;;  %v619_v25 = vmul.f32 %v6611_v29, %v7275_v39  ;;  %v790_v11 = vmul.f32 %v6638_v43, %v446_v4  ;;  %v998_v54 = vmul.f32 %v6644_v45, %v446_v4 }
 0x128   :  { %v1944_v1 = vadd.f32 %v1912_v13, %v1874_v42  ;;  %v1029_v20 = vadd.f32 %v7259_v57, %v959_v37  ;;  %v1945_v30 = vadd.f32 %v1913_v63, %v1875_v36  ;;  %v7353_v58 = vmul.f32 %v6608_v28, %v447_v31  ;;  %v10407_v57 = vld [vmem:[#allocation18_spill] sm:$0xff] }
 0x129   :  { %v651_v21 = vadd.f32 %v619_v25, %v7153_v32  ;;  %v719_v22 = vmul.f32 %v6630_v35, %v7277_v24  ;;  %v7361_v55 = vadd.f32 %v790_v11, %v752_v41  ;;  %v7364_v34 = vmul.f32 %v6638_v43, %v447_v31  ;;  %v10408_v41 = vld [vmem:[#allocation25_spill] sm:$0xff] }
 0x12a   :  { %v1980_v39 = vadd.f32 %v7148_v9, %v1944_v1  ;;  %v1394_v4 = vmul.f32 %v10407_v57, %v7215_v38  ;;  %v1981_v33 = vadd.f32 %v7148_v9, %v1945_v30  ;;  %v585_v37 = vld [vmem:[#allocation2 + $0xc9] sm:$0xff]  ;;  %v1030_v32 = vadd.f32 %v998_v54, %v960_v7 }
 0x12b   :  { %v685_v14 = vld [vmem:[#allocation2 + $0xca] sm:$0xff]  ;;  %v751_v61 = vadd.f32 %v719_v22, %v651_v21  ;;  %v7370_v24 = vmul.f32 %v6644_v45, %v447_v31  ;;  %v1067_v59 = vmul.f32 %v6650_v47, %v585_v37  ;;  %v621_v17 = vmul.f32 %v6611_v29, %v585_v37  ;;  %v10409_v21 = vld [vmem:[#allocation19_spill] sm:$0xff] }
 0x12c   :  { %v7376_v13 = vmul.f32 %v6654_v52, %v7358_v53  ;;  %v1395_v38 = vmul.f32 %v10407_v57, %v7217_v60  ;;  %v2012_v56 = vmax.f32 %v1980_v39, 0.0  ;;  %v2013_v42 = vmax.f32 %v1981_v33, 0.0  ;;  %v209_v39 = vpop.permute.xlu0 %208 }
 0x12d   :  { %v821_v63 = vadd.f32 %v7256_v0, %v751_v61  ;;  %v7383_v36 = vmul.f32 %v6654_v52, %v10408_v41  ;;  %v1099_v31 = vadd.f32 %v1067_v59, %v1029_v20  ;;  %v1137_v7 = vmul.f32 %v7173_v8, %v685_v14  ;;  %v214_v20 = vpop.permute.xlu1 %213  ;;  %v10410_v59 = vld [vmem:[#allocation21_spill] sm:$0xff] }
 0x12e   :  { %v7386_v25 = vld [vmem:[#allocation2 + $0xd1] sm:$0xff]  ;;  %v859_v11 = vmul.f32 %v6641_v44, %v585_v37  ;;  %v1426_v54 = vadd.f32 %v1394_v4, %v7202_v23  ;;  %v2042_v60 = vpack.c.bf16 %v2013_v42, %v2012_v56  ;;  %v653_v30 = vadd.f32 %v621_v17, %v7249_v50  ;;  %v10411_v17 = vld [vmem:[#allocation17_spill] sm:$0xff] }
 0x12f   :  { %v7388_v1 = vld [vmem:[#allocation2 + $0xd2] sm:$0xff]  ;;  %v1068_v0 = vmul.f32 %v6650_v47, %v7386_v25  ;;  %v1494_v22 = vmul.f32 %v10409_v21, %v7223_v18  ;;  %v1169_v33 = vadd.f32 %v1137_v7, %v1099_v31  ;;  %v1427_v15 = vadd.f32 %v1395_v38, %v10410_v59  ;;  %v7504_v52 = vld [vmem:[#allocation2 + $0x60] sm:$0xff] }
 0x130   :  { %v891_v61 = vadd.f32 %v859_v11, %v821_v63  ;;  %v1495_v37 = vmul.f32 %v10409_v21, %v7225_v51  ;;  %6026 = vmatprep.mubr.bf16.mxu0 %v2042_v60  ;;  %v1138_v50 = vmul.f32 %v7173_v8, %v7388_v1  ;;  %v1564_v56 = vmul.f32 %v10411_v17, %v7253_v12  ;;  %v7415_v12 = vld [vmem:[#allocation2 + $0x59] sm:$0xff] }
 0x131   :  { %v1100_v23 = vadd.f32 %v1068_v0, %v1030_v32  ;;  %v1526_v4 = vadd.f32 %v1494_v22, %v1426_v54  ;;  %v1205_v18 = vadd.f32 %v7194_v27, %v1169_v33  ;;  %v721_v42 = vmul.f32 %v6630_v35, %v685_v14  ;;  %v10412_v32 = vld [vmem:[#allocation20_spill] sm:$0xff]  ;;  %v7413_v0 = vld [vmem:[#allocation2 + $0x51] sm:$0xff] }
 0x132   :  { %v1527_v31 = vadd.f32 %v1495_v37, %v1427_v15  ;;  %v1565_v38 = vmul.f32 %v10411_v17, %v10405_v26  ;;  %v929_v63 = vmul.f32 %v6647_v46, %v685_v14  ;;  %v1634_v11 = vmul.f32 %v10412_v32, %v7305_v5  ;;  %v406_v37 = vpop.permute.xlu1 %405 }
 0x133   :  { %v1170_v51 = vadd.f32 %v1138_v50, %v1100_v23  ;;  %v1596_v7 = vadd.f32 %v1564_v56, %v1526_v4  ;;  %v7411_v60 = vmax.f32 %v1205_v18, 0.0  ;;  %v753_v54 = vadd.f32 %v721_v42, %v653_v30  ;;  %v401_v23 = vpop.permute.xlu0 %400  ;;  %v7423_v30 = vld [vmem:[#allocation2 + $0x52] sm:$0xff]  ;;  %v7433_v42 = vld [vmem:[#allocation2 + $0x5a] sm:$0xff] }
 0x134   :  { %v1597_v22 = vadd.f32 %v1565_v38, %v1527_v31  ;;  %v1635_v15 = vmul.f32 %v10412_v32, %v7307_v62  ;;  %v961_v33 = vadd.f32 %v929_v63, %v891_v61  ;;  %v1704_v59 = vmul.f32 %v6682_v16, %v7316_v49 }
 0x135   :  { %10413 = vst [vmem:[#allocation24_spill] sm:$0xff] %v7411_v60  ;;  %v1206_v26 = vadd.f32 %v7194_v27, %v1170_v51  ;;  %v1666_v14 = vadd.f32 %v1634_v11, %v1596_v7  ;;  %1269 = vst [vmem:[#allocation2 + $0xa8] sm:$0xff] %v7411_v60  ;;  %v1705_v4 = vmul.f32 %v6682_v16, %v7327_v48 }
 0x136   :  { %v1667_v50 = vadd.f32 %v1635_v15, %v1597_v22  ;;  %v1774_v56 = vmul.f32 %v10399_v19, %v7358_v53  ;;  %v1775_v61 = vmul.f32 %v10399_v19, %v10408_v41  ;;  %v1844_v38 = vmul.f32 %v10400_v6, %v7413_v0 }
 0x137   :  { %v7431_v18 = vmax.f32 %v1206_v26, 0.0  ;;  %v1736_v31 = vadd.f32 %v1704_v59, %v1666_v14  ;;  %v1845_v63 = vmul.f32 %v10400_v6, %v7415_v12  ;;  %v449_v7 = vsel %vm33_vm0, %v214_v20, %v406_v37 }
 0x138   :  { %v1737_v51 = vadd.f32 %v1705_v4, %v1667_v50  ;;  %v448_v11 = vsel %vm33_vm0, %v209_v39, %v401_v23  ;;  %v622_v22 = vmul.f32 %v6611_v29, %v7386_v25  ;;  %v823_v15 = vadd.f32 %v7364_v34, %v753_v54  ;;  %481 = vst [vmem:[#allocation2 + $0xe8] sm:$0xff] %v449_v7 }
 0x139   :  { %10414 = vst [vmem:[#allocation18_spill] sm:$0xff] %v7431_v18  ;;  %v1031_v26 = vadd.f32 %v7370_v24, %v961_v33  ;;  %1270 = vst [vmem:[#allocation2 + $0xb0] sm:$0xff] %v7431_v18  ;;  %v1806_v14 = vadd.f32 %v1774_v56, %v1736_v31  ;;  %v1914_v59 = vmul.f32 %v7104_v2, %v7423_v30 }
 0x13a   :  { %480 = vst [vmem:[#allocation2 + $0xe0] sm:$0xff] %v448_v11  ;;  %v1807_v50 = vadd.f32 %v1775_v61, %v1737_v51  ;;  %v1915_v20 = vmul.f32 %v7104_v2, %v7433_v42  ;;  %v654_v39 = vadd.f32 %v622_v22, %v7345_v3  ;;  %v722_v37 = vmul.f32 %v6630_v35, %v7388_v1 }
 0x13b   :  { %v1876_v34 = vadd.f32 %v1844_v38, %v1806_v14  ;;  %v7456_v24 = vmul.f32 %v6608_v28, %v449_v7  ;;  %v7459_v54 = vmul.f32 %v6638_v43, %v449_v7  ;;  %v860_v33 = vmul.f32 %v6641_v44, %v7386_v25 }
 0x13c   :  { %v1877_v23 = vadd.f32 %v1845_v63, %v1807_v50  ;;  %v7464_v4 = vmul.f32 %v6644_v45, %v449_v7  ;;  %v754_v56 = vadd.f32 %v722_v37, %v654_v39  ;;  %v792_v3 = vmul.f32 %v6638_v43, %v448_v11  ;;  %v10415_v37 = vld [vmem:[#allocation23_spill] sm:$0xff] }
 0x13d   :  { %v1946_v61 = vadd.f32 %v1914_v59, %v1876_v34  ;;  %v892_v31 = vadd.f32 %v860_v33, %v7361_v55  ;;  %v930_v38 = vmul.f32 %v6647_v46, %v7388_v1  ;;  %v1396_v51 = vmul.f32 %v10407_v57, %v7305_v5 }
 0x13e   :  { %v1947_v22 = vadd.f32 %v1915_v20, %v1877_v23  ;;  %v556_v14 = vmul.f32 %v6608_v28, %v448_v11  ;;  %v1000_v25 = vmul.f32 %v6644_v45, %v448_v11  ;;  %v1397_v63 = vmul.f32 %v10407_v57, %v7307_v62 }
 0x13f   :  { %v1982_v7 = vadd.f32 %v7148_v9, %v1946_v61  ;;  %v824_v50 = vadd.f32 %v792_v3, %v754_v56  ;;  %v962_v59 = vadd.f32 %v930_v38, %v892_v31  ;;  %v1496_v55 = vmul.f32 %v10409_v21, %v7316_v49 }
 0x140   :  { %v1983_v1 = vadd.f32 %v7148_v9, %v1947_v22  ;;  %v1428_v34 = vadd.f32 %v1396_v51, %v10415_v37  ;;  %v1429_v11 = vadd.f32 %v1397_v63, %v7333_v40  ;;  %v1497_v62 = vmul.f32 %v10409_v21, %v7327_v48 }
 0x141   :  { %v7480_v39 = vld [vmem:[#allocation2 + $0xd9] sm:$0xff]  ;;  %v588_v5 = vld [vmem:[#allocation2 + $0xe1] sm:$0xff]  ;;  %v2014_v33 = vmax.f32 %v1982_v7, 0.0  ;;  %v1566_v56 = vmul.f32 %v10411_v17, %v7358_v53  ;;  %v1567_v40 = vmul.f32 %v10411_v17, %v10408_v41  ;;  %v1032_v22 = vadd.f32 %v1000_v25, %v962_v59 }
 0x142   :  { %v7482_v20 = vld [vmem:[#allocation2 + $0xda] sm:$0xff]  ;;  %v624_v23 = vmul.f32 %v6611_v29, %v588_v5  ;;  %v861_v49 = vmul.f32 %v6641_v44, %v7480_v39  ;;  %v2015_v3 = vmax.f32 %v1983_v1, 0.0  ;;  %v688_v61 = vld [vmem:[#allocation2 + $0xe2] sm:$0xff]  ;;  %v862_v31 = vmul.f32 %v6641_v44, %v588_v5 }
 0x143   :  { %v1069_v38 = vmul.f32 %v6650_v47, %v7480_v39  ;;  %v931_v51 = vmul.f32 %v6647_v46, %v7482_v20  ;;  %v1070_v63 = vmul.f32 %v6650_v47, %v588_v5  ;;  %v1139_v1 = vmul.f32 %v7173_v8, %v7482_v20  ;;  %v7506_v59 = vld [vmem:[#allocation2 + $0x68] sm:$0xff] }
 0x144   :  { %v893_v48 = vadd.f32 %v861_v49, %v823_v15  ;;  %v2043_v7 = vpack.c.bf16 %v2015_v3, %v2014_v33  ;;  %v656_v37 = vadd.f32 %v624_v23, %v556_v14  ;;  %v1140_v60 = vmul.f32 %v7173_v8, %v688_v61  ;;  %v411_v15 = vpop.permute.xlu1 %410  ;;  %v219_v49 = vpop.permute.xlu0 %218  ;;  %v7512_v23 = vld [vmem:[#allocation2 + $0x61] sm:$0xff]  ;;  %v7514_v3 = vld [vmem:[#allocation2 + $0x69] sm:$0xff] }
 0x145   :  { %v1101_v53 = vadd.f32 %v1069_v38, %v1031_v26  ;;  %v1102_v18 = vadd.f32 %v1070_v63, %v1032_v22  ;;  %v1528_v21 = vadd.f32 %v1496_v55, %v1428_v34  ;;  %v1529_v41 = vadd.f32 %v1497_v62, %v1429_v11 }
 0x146   :  { %6027 = vmatmul.mubr.bf16.gmra.mrb[4].mxu0 %v2043_v7  ;;  %v894_v17 = vadd.f32 %v862_v31, %v824_v50  ;;  %v1636_v26 = vmul.f32 %v10412_v32, %v7413_v0  ;;  %v1637_v14 = vmul.f32 %v10412_v32, %v7415_v12  ;;  %v963_v5 = vadd.f32 %v931_v51, %v893_v48  ;;  %v7517_v50 = vld [vmem:[#allocation2 + $0x62] sm:$0xff] }
 0x147   :  { %v1171_v25 = vadd.f32 %v1139_v1, %v1101_v53  ;;  %v1172_v33 = vadd.f32 %v1140_v60, %v1102_v18  ;;  %v1598_v55 = vadd.f32 %v1566_v56, %v1528_v21  ;;  %v1599_v34 = vadd.f32 %v1567_v40, %v1529_v41  ;;  %v7526_v18 = vld [vmem:[#allocation2 + $0x6a] sm:$0xff] }
 0x148   :  { %v1706_v62 = vmul.f32 %v6682_v16, %v7423_v30  ;;  %v1707_v31 = vmul.f32 %v6682_v16, %v7433_v42  ;;  %v1776_v38 = vmul.f32 %v10399_v19, %v7504_v52  ;;  %v1777_v56 = vmul.f32 %v10399_v19, %v7506_v59 }
 0x149   :  { %v1207_v11 = vadd.f32 %v7194_v27, %v1171_v25  ;;  %v1208_v60 = vadd.f32 %v7194_v27, %v1172_v33  ;;  %v1668_v48 = vadd.f32 %v1636_v26, %v1598_v55  ;;  %v1669_v21 = vadd.f32 %v1637_v14, %v1599_v34  ;;  %v416_v25 = vpop.permute.xlu1 %415  ;;  %v224_v26 = vpop.permute.xlu0 %223 }
 0x14a   :  { %v1846_v51 = vmul.f32 %v10400_v6, %v7512_v23  ;;  %v1847_v22 = vmul.f32 %v10400_v6, %v7514_v3  ;;  %v450_v63 = vsel %vm33_vm0, %v219_v49, %v411_v15  ;;  %v1916_v41 = vmul.f32 %v7104_v2, %v7517_v50 }
 0x14b   :  { %v7530_v40 = vmax.f32 %v1207_v11, 0.0  ;;  %v7538_v7 = vmax.f32 %v1208_v60, 0.0  ;;  %v1738_v53 = vadd.f32 %v1706_v62, %v1668_v48  ;;  %v1739_v1 = vadd.f32 %v1707_v31, %v1669_v21  ;;  %482 = vst [vmem:[#allocation2 + $0xf0] sm:$0xff] %v450_v63 }
 0x14c   :  { %v1917_v14 = vmul.f32 %v7104_v2, %v7526_v18  ;;  %v7546_v33 = vmul.f32 %v6608_v28, %v450_v63  ;;  %v724_v15 = vmul.f32 %v6630_v35, %v688_v61  ;;  %v932_v49 = vmul.f32 %v6647_v46, %v688_v61 }
 0x14d   :  { %10416 = vst [vmem:[#allocation25_spill] sm:$0xff] %v7530_v40  ;;  %10417 = vst [vmem:[#allocation21_spill] sm:$0xff] %v7538_v7  ;;  %v1808_v55 = vadd.f32 %v1776_v38, %v1738_v53  ;;  %v1809_v34 = vadd.f32 %v1777_v56, %v1739_v1  ;;  %v794_v11 = vmul.f32 %v6638_v43, %v450_v63  ;;  %v6315_v60 = vmov 0.0  }
 0x14e   :  { %1271 = vst [vmem:[#allocation2 + $0xb8] sm:$0xff] %v7530_v40  ;;  %1272 = vst [vmem:[#allocation2 + $0xc0] sm:$0xff] %v7538_v7  ;;  %v756_v62 = vadd.f32 %v724_v15, %v656_v37  ;;  %v964_v31 = vadd.f32 %v932_v49, %v894_v17  ;;  %v451_v2 = vsel %vm33_vm0, %v224_v26, %v416_v25 }
 0x14f   :  { %484 = vst [vmem:[#allocation2 + $0x100] sm:$0xff] %v6315_v60  ;;  %485 = vst [vmem:[#allocation2 + $0x108] sm:$0xff] %v6315_v60  ;;  %v623_v61 = vmul.f32 %v6611_v29, %v7480_v39  ;;  %v1878_v48 = vadd.f32 %v1846_v51, %v1808_v55  ;;  %v1879_v21 = vadd.f32 %v1847_v22, %v1809_v34 }
 0x150   :  { %486 = vst [vmem:[#allocation2 + $0x110] sm:$0xff] %v6315_v60  ;;  %487 = vst [vmem:[#allocation2 + $0x118] sm:$0xff] %v6315_v60  ;;  %v1002_v38 = vmul.f32 %v6644_v45, %v450_v63  ;;  %v1033_v56 = vadd.f32 %v7464_v4, %v963_v5  ;;  %v826_v17 = vadd.f32 %v794_v11, %v756_v62  ;;  %v7566_v4 = vmul.f32 0.0, %v6638_v43 }
 0x151   :  { %488 = vst [vmem:[#allocation2 + $0x120] sm:$0xff] %v6315_v60  ;;  %483 = vst [vmem:[#allocation2 + $0xf8] sm:$0xff] %v451_v2  ;;  %v559_v37 = vmul.f32 %v6608_v28, %v451_v2  ;;  %v655_v53 = vadd.f32 %v623_v61, %v7353_v58  ;;  %v723_v1 = vmul.f32 %v6630_v35, %v7482_v20  ;;  %v7572_v28 = vmul.f32 0.0, %v6644_v45 }
 0x152   :  { %v1948_v15 = vadd.f32 %v1916_v41, %v1878_v48  ;;  %v1949_v25 = vadd.f32 %v1917_v14, %v1879_v21  ;;  %v7562_v26 = vadd.f32 %v1002_v38, %v964_v31  ;;  %v795_v39 = vmul.f32 %v6638_v43, %v451_v2  ;;  %v589_v51 = vld [vmem:[#allocation2 + $0xe9] sm:$0xff] }
 0x153   :  { %v689_v22 = vld [vmem:[#allocation2 + $0xea] sm:$0xff]  ;;  %v755_v63 = vadd.f32 %v723_v1, %v655_v53  ;;  %v7569_v5 = vmul.f32 %v6644_v45, %v451_v2  ;;  %v1071_v41 = vmul.f32 %v6650_v47, %v589_v51  ;;  %v625_v49 = vmul.f32 %v6611_v29, %v589_v51 }
 0x154   :  { %v1984_v58 = vadd.f32 %v7148_v9, %v1948_v15  ;;  %v1985_v20 = vadd.f32 %v7148_v9, %v1949_v25  ;;  %v1141_v14 = vmul.f32 %v7173_v8, %v689_v22  ;;  %v725_v55 = vmul.f32 %v6630_v35, %v689_v22 }
 0x155   :  { %v825_v43 = vadd.f32 %v7459_v54, %v755_v63  ;;  %v863_v34 = vmul.f32 %v6641_v44, %v589_v51  ;;  %v1103_v45 = vadd.f32 %v1071_v41, %v1033_v56  ;;  %v933_v9 = vmul.f32 %v6647_v46, %v689_v22 }
 0x156   :  { %v2016_v11 = vmax.f32 %v1984_v58, 0.0  ;;  %v2017_v62 = vmax.f32 %v1985_v20, 0.0  ;;  %v830_v31 = vld [vmem:[#allocation2 + $0x101] sm:$0xff]  ;;  %v657_v21 = vadd.f32 %v625_v49, %v7456_v24 }
 0x157   :  { %v831_v60 = vld [vmem:[#allocation2 + $0x109] sm:$0xff]  ;;  %v866_v38 = vmul.f32 %v6641_v44, %v830_v31  ;;  %v1173_v1 = vadd.f32 %v1141_v14, %v1103_v45  ;;  %v1110_v15 = vld [vmem:[#allocation2 + $0x112] sm:$0xff]  ;;  %v895_v63 = vadd.f32 %v863_v34, %v825_v43 }
 0x158   :  { %v900_v2 = vld [vmem:[#allocation2 + $0x102] sm:$0xff]  ;;  %v901_v61 = vld [vmem:[#allocation2 + $0x10a] sm:$0xff]  ;;  %v867_v54 = vmul.f32 %v6641_v44, %v831_v60  ;;  %v2044_v53 = vpack.c.bf16 %v2017_v62, %v2016_v11  ;;  %v1111_v25 = vld [vmem:[#allocation2 + $0x11a] sm:$0xff]  ;;  %v7591_v22 = vmul.f32 %v7173_v8, %v1110_v15  ;;  %v757_v10 = vadd.f32 %v725_v55, %v657_v21 }
 0x159   :  { %v7584_v48 = vmul.f32 %v7173_v8, %v900_v2  ;;  %v1145_v56 = vmul.f32 %v7173_v8, %v901_v61  ;;  %v590_v51 = vld [vmem:[#allocation2 + $0xf1] sm:$0xff]  ;;  %v7594_v58 = vmul.f32 %v7173_v8, %v1111_v25  ;;  %v591_v20 = vld [vmem:[#allocation2 + $0xf9] sm:$0xff]  ;;  %v1209_v14 = vadd.f32 %v7194_v27, %v1173_v1 }
 0x15a   :  { %v626_v24 = vmul.f32 %v6611_v29, %v590_v51  ;;  %v690_v41 = vld [vmem:[#allocation2 + $0xf2] sm:$0xff]  ;;  %v691_v49 = vld [vmem:[#allocation2 + $0xfa] sm:$0xff]  ;;  %6030 = vmatprep.mubr.bf16.mxu0 %v2044_v53  ;;  %v627_v11 = vmul.f32 %v6611_v29, %v591_v20  ;;  %v827_v45 = vadd.f32 %v795_v39, %v757_v10  ;;  %v864_v15 = vmul.f32 %v6641_v44, %v590_v51 }
 0x15b   :  { %v726_v62 = vmul.f32 %v6630_v35, %v690_v41  ;;  %v727_v43 = vmul.f32 %v6630_v35, %v691_v49  ;;  %v865_v25 = vmul.f32 %v6641_v44, %v591_v20  ;;  %v7604_v7 = vmax.f32 %v1209_v14, 0.0  ;;  %v1040_v35 = vld [vmem:[#allocation2 + $0x111] sm:$0xff] }
 0x15c   :  { %v658_v34 = vadd.f32 %v626_v24, %v7546_v33  ;;  %v659_v40 = vadd.f32 %v627_v11, %v559_v37  ;;  %v934_v55 = vmul.f32 %v6647_v46, %v690_v41  ;;  %v935_v21 = vmul.f32 %v6647_v46, %v691_v49  ;;  %v1041_v24 = vld [vmem:[#allocation2 + $0x119] sm:$0xff] }
 0x15d   :  { %v896_v29 = vadd.f32 %v864_v15, %v826_v17  ;;  %v897_v1 = vadd.f32 %v865_v25, %v827_v45  ;;  %v936_v6 = vmul.f32 %v6647_v46, %v900_v2  ;;  %1273 = vst [vmem:[#allocation2 + $0xc8] sm:$0xff] %v7604_v7  ;;  %v937_v33 = vmul.f32 %v6647_v46, %v901_v61 }
 0x15e   :  { %v758_v53 = vadd.f32 %v726_v62, %v658_v34  ;;  %v759_v10 = vadd.f32 %v727_v43, %v659_v40  ;;  %v965_v39 = vadd.f32 %v933_v9, %v895_v63  ;;  %v1072_v44 = vmul.f32 %v6650_v47, %v590_v51 }
 0x15f   :  { %v966_v14 = vadd.f32 %v934_v55, %v896_v29  ;;  %v967_v11 = vadd.f32 %v935_v21, %v897_v1  ;;  %v1073_v62 = vmul.f32 %v6650_v47, %v591_v20  ;;  %v1074_v34 = vmul.f32 %v6650_v47, %v830_v31 }
 0x160   :  { %v828_v37 = vadd.f32 %v7566_v4, %v758_v53  ;;  %v829_v17 = vadd.f32 %v7566_v4, %v759_v10  ;;  %v1035_v2 = vadd.f32 %v7569_v5, %v965_v39  ;;  %v1075_v40 = vmul.f32 %v6650_v47, %v831_v60 }
 0x161   :  { %v1036_v46 = vadd.f32 %v7572_v28, %v966_v14  ;;  %v1037_v9 = vadd.f32 %v7572_v28, %v967_v11  ;;  %v1076_v61 = vmul.f32 %v6650_v47, %v1040_v35  ;;  %v1077_v63 = vmul.f32 %v6650_v47, %v1041_v24 }
 0x162   :  { %v898_v43 = vadd.f32 %v866_v38, %v828_v37  ;;  %v899_v51 = vadd.f32 %v867_v54, %v829_v17  ;;  %v1104_v20 = vadd.f32 %v1072_v44, %v7562_v26  ;;  %v1105_v45 = vadd.f32 %v1073_v62, %v1035_v2  ;;  %v10420_v17 = vld [vmem:[#allocation16_spill] sm:$0xff] }
 0x163   :  { %v1106_v15 = vadd.f32 %v1074_v34, %v1036_v46  ;;  %v1107_v5 = vadd.f32 %v1075_v40, %v1037_v9  ;;  %v1142_v31 = vmul.f32 %v7173_v8, %v690_v41  ;;  %v1143_v60 = vmul.f32 %v7173_v8, %v691_v49  ;;  %v1366_v9 = vld [vmem:[#allocation2 + $0x71] sm:$0xff] }
 0x164   :  { %v968_v4 = vadd.f32 %v936_v6, %v898_v43  ;;  %v969_v25 = vadd.f32 %v937_v33, %v899_v51  ;;  %v1398_v38 = vmul.f32 %v10407_v57, %v7413_v0  ;;  %v1399_v55 = vmul.f32 %v10407_v57, %v7415_v12 }
 0x165   :  { %v1174_v47 = vadd.f32 %v1142_v31, %v1104_v20  ;;  %v1176_v26 = vadd.f32 %v7584_v48, %v1106_v15  ;;  %v1177_v21 = vadd.f32 %v1145_v56, %v1107_v5  ;;  %v1175_v53 = vadd.f32 %v1143_v60, %v1105_v45  ;;  %v10418_v48 = vld [vmem:[#allocation19_spill] sm:$0xff] }
 0x166   :  { %v1038_v54 = vadd.f32 %v7572_v28, %v968_v4  ;;  %v1039_v6 = vadd.f32 %v7572_v28, %v969_v25  ;;  %v1430_v41 = vadd.f32 %v1398_v38, %v7376_v13  ;;  %v1431_v29 = vadd.f32 %v1399_v55, %v7383_v36  ;;  %v1466_v31 = vld [vmem:[#allocation2 + $0x72] sm:$0xff]  ;;  %v1467_v25 = vld [vmem:[#allocation2 + $0x7a] sm:$0xff]  ;;  %v10421_v38 = vld [vmem:[#allocation22_spill] sm:$0xff] }
 0x167   :  { %v1210_v49 = vadd.f32 %v7194_v27, %v1174_v47  ;;  %v1212_v0 = vadd.f32 %v7194_v27, %v1176_v26  ;;  %v1213_v12 = vadd.f32 %v7194_v27, %v1177_v21  ;;  %v1211_v35 = vadd.f32 %v7194_v27, %v1175_v53 }
 0x168   :  { %v1108_v8 = vadd.f32 %v1076_v61, %v1038_v54  ;;  %v1109_v1 = vadd.f32 %v1077_v63, %v1039_v6  ;;  %v1498_v56 = vmul.f32 %v10418_v48, %v7423_v30  ;;  %v1499_v28 = vmul.f32 %v10418_v48, %v7433_v42  ;;  %v1298_v30 = vld [vmem:[#allocation2 + $0x70] sm:$0xff]  ;;  %v1299_v42 = vld [vmem:[#allocation2 + $0x78] sm:$0xff] }
 0x169   :  { %v7643_v10 = vmax.f32 %v1210_v49, 0.0  ;;  %v7645_v36 = vmax.f32 %v1212_v0, 0.0  ;;  %v7647_v33 = vmax.f32 %v1213_v12, 0.0  ;;  %v7650_v44 = vmax.f32 %v1211_v35, 0.0  ;;  %v1300_v35 = vld [vmem:[#allocation2 + $0x80] sm:$0xff] }
 0x16a   :  { %v1178_v13 = vadd.f32 %v7591_v22, %v1108_v8  ;;  %v1179_v39 = vadd.f32 %v7594_v58, %v1109_v1  ;;  %v1530_v24 = vadd.f32 %v1498_v56, %v1430_v41  ;;  %v1531_v37 = vadd.f32 %v1499_v28, %v1431_v29  ;;  %v10419_v22 = vld [vmem:[#allocation17_spill] sm:$0xff] }
 0x16b   :  { %1274 = vst [vmem:[#allocation2 + $0xd0] sm:$0xff] %v7643_v10  ;;  %1276 = vst [vmem:[#allocation2 + $0xe0] sm:$0xff] %v7645_v36  ;;  %v1568_v11 = vmul.f32 %v10419_v22, %v7504_v52  ;;  %v1569_v58 = vmul.f32 %v10419_v22, %v7506_v59  ;;  %v1638_v62 = vmul.f32 %v10412_v32, %v7512_v23  ;;  %v7706_v56 = vld [vmem:[#allocation2 + $0x81] sm:$0xff] }
 0x16c   :  { %v1214_v14 = vadd.f32 %v7194_v27, %v1178_v13  ;;  %1277 = vst [vmem:[#allocation2 + $0xe8] sm:$0xff] %v7647_v33  ;;  %v1332_v2 = vmul.f32 %v10420_v17, %v7504_v52  ;;  %v1215_v34 = vadd.f32 %v7194_v27, %v1179_v39  ;;  %1275 = vst [vmem:[#allocation2 + $0xd8] sm:$0xff] %v7650_v44  ;;  %v1367_v27 = vld [vmem:[#allocation2 + $0x79] sm:$0xff] }
 0x16d   :  { %v1639_v40 = vmul.f32 %v10412_v32, %v7514_v3  ;;  %v1333_v43 = vmul.f32 %v10420_v17, %v7506_v59  ;;  %v1600_v61 = vadd.f32 %v1568_v11, %v1530_v24  ;;  %v1601_v51 = vadd.f32 %v1569_v58, %v1531_v37 }
 0x16e   :  { %v7670_v46 = vmax.f32 %v1214_v14, 0.0  ;;  %v7672_v63 = vmax.f32 %v1215_v34, 0.0  ;;  %v7675_v20 = vmul.f32 %v10420_v17, %v1298_v30  ;;  %v7678_v52 = vmul.f32 %v10420_v17, %v1299_v42  ;;  %v7710_v14 = vld [vmem:[#allocation2 + $0x89] sm:$0xff] }
 0x16f   :  { %v1708_v45 = vmul.f32 %v6682_v16, %v7517_v50  ;;  %v1670_v59 = vadd.f32 %v1638_v62, %v1600_v61  ;;  %v1671_v4 = vadd.f32 %v1639_v40, %v1601_v51  ;;  %v1709_v15 = vmul.f32 %v6682_v16, %v7526_v18 }
 0x170   :  { %1278 = vst [vmem:[#allocation2 + $0xf0] sm:$0xff] %v7670_v46  ;;  %v1779_v5 = vmul.f32 %v10399_v19, %v1299_v42  ;;  %1279 = vst [vmem:[#allocation2 + $0xf8] sm:$0xff] %v7672_v63  ;;  %v1778_v60 = vmul.f32 %v10399_v19, %v1298_v30  ;;  %v1848_v55 = vmul.f32 %v10421_v38, %v1366_v9 }
 0x171   :  { %v1400_v54 = vmul.f32 %v10407_v57, %v7512_v23  ;;  %v1401_v47 = vmul.f32 %v10407_v57, %v7514_v3  ;;  %v1740_v26 = vadd.f32 %v1708_v45, %v1670_v59  ;;  %v1741_v21 = vadd.f32 %v1709_v15, %v1671_v4  ;;  %v7702_v23 = vld [vmem:[%s10318_s3 + $0x18] ss:$0 sm:$0xff] }
 0x172   :  { %v1849_v6 = vmul.f32 %v10421_v38, %v1367_v27  ;;  %v1500_v53 = vmul.f32 %v10418_v48, %v7517_v50  ;;  %v1501_v8 = vmul.f32 %v10418_v48, %v7526_v18  ;;  %v1571_v49 = vmul.f32 %v10419_v22, %v1299_v42  ;;  %v1301_v50 = vld [vmem:[#allocation2 + $0x88] sm:$0xff] }
 0x173   :  { %v1432_v41 = vadd.f32 %v1400_v54, %v1332_v2  ;;  %v1433_v29 = vadd.f32 %v1401_v47, %v1333_v43  ;;  %v1810_v0 = vadd.f32 %v1778_v60, %v1740_v26  ;;  %v1811_v12 = vadd.f32 %v1779_v5, %v1741_v21  ;;  %v7712_v42 = vld [vmem:[#allocation2 + $0x82] sm:$0xff]  ;;  %v7728_v5 = vld [vmem:[%s10319_s4 + $0x1] ss:$0 sm:$0xff] }
 0x174   :  { %v1918_v3 = vmul.f32 %v7702_v23, %v1466_v31  ;;  %v1919_v1 = vmul.f32 %v7702_v23, %v1467_v25  ;;  %v1570_v18 = vmul.f32 %v10419_v22, %v1298_v30  ;;  %v1640_v39 = vmul.f32 %v10412_v32, %v1366_v9 }
 0x175   :  { %v1532_v28 = vadd.f32 %v1500_v53, %v1432_v41  ;;  %v1533_v13 = vadd.f32 %v1501_v8, %v1433_v29  ;;  %v1880_v24 = vadd.f32 %v1848_v55, %v1810_v0  ;;  %v1881_v37 = vadd.f32 %v1849_v6, %v1811_v12  ;;  %v1469_v8 = vld [vmem:[#allocation2 + $0x8a] sm:$0xff] }
 0x176   :  { %v1641_v11 = vmul.f32 %v10412_v32, %v1367_v27  ;;  %v1710_v58 = vmul.f32 %v6682_v16, %v1466_v31  ;;  %v1711_v34 = vmul.f32 %v6682_v16, %v1467_v25  ;;  %v1780_v40 = vmul.f32 %v10399_v19, %v1300_v35 }
 0x177   :  { %v1602_v62 = vadd.f32 %v1570_v18, %v1532_v28  ;;  %v1603_v2 = vadd.f32 %v1571_v49, %v1533_v13  ;;  %v1950_v43 = vadd.f32 %v1918_v3, %v1880_v24  ;;  %v1951_v30 = vadd.f32 %v1919_v1, %v1881_v37  ;;  %v1302_v24 = vld [vmem:[#allocation2 + $0x90] sm:$0xff] }
 0x178   :  { %v1781_v61 = vmul.f32 %v10399_v19, %v1301_v50  ;;  %v1850_v51 = vmul.f32 %v10421_v38, %v7706_v56  ;;  %v1851_v4 = vmul.f32 %v10421_v38, %v7710_v14  ;;  %v1920_v15 = vmul.f32 %v7702_v23, %v7712_v42 }
 0x179   :  { %v1672_v45 = vadd.f32 %v1640_v39, %v1602_v62  ;;  %v1673_v59 = vadd.f32 %v1641_v11, %v1603_v2  ;;  %v1986_v60 = vadd.f32 %v7728_v5, %v1950_v43  ;;  %v1987_v55 = vadd.f32 %v7728_v5, %v1951_v30  ;;  %v7747_v11 = vld [vmem:[#allocation2 + $0x91] sm:$0xff] }
 0x17a   :  { %v1402_v54 = vmul.f32 %v10407_v57, %v1366_v9  ;;  %v1403_v47 = vmul.f32 %v10407_v57, %v1367_v27  ;;  %v1502_v6 = vmul.f32 %v10418_v48, %v1466_v31  ;;  %v1503_v53 = vmul.f32 %v10418_v48, %v1467_v25  ;;  %v7751_v43 = vld [vmem:[#allocation2 + $0x92] sm:$0xff] }
 0x17b   :  { %v1742_v26 = vadd.f32 %v1710_v58, %v1672_v45  ;;  %v1743_v21 = vadd.f32 %v1711_v34, %v1673_v59  ;;  %v2018_v41 = vmax.f32 %v1986_v60, 0.0  ;;  %v2019_v29 = vmax.f32 %v1987_v55, 0.0  ;;  %v7749_v58 = vld [vmem:[#allocation2 + $0x99] sm:$0xff]  ;;  %v10422_v59 = vld [vmem:[#allocation26_spill] sm:$0xff] }
 0x17c   :  { %v1434_v49 = vadd.f32 %v1402_v54, %v7675_v20  ;;  %v1435_v0 = vadd.f32 %v1403_v47, %v7678_v52  ;;  %v1572_v1 = vmul.f32 %v10419_v22, %v1300_v35  ;;  %v1573_v9 = vmul.f32 %v10419_v22, %v1301_v50 }
 0x17d   :  { %v1812_v12 = vadd.f32 %v1780_v40, %v1742_v26  ;;  %v1813_v3 = vadd.f32 %v1781_v61, %v1743_v21  ;;  %v2045_v27 = vpack.c.bf16 %v2019_v29, %v2018_v41  ;;  %v1642_v31 = vmul.f32 %v10412_v32, %v7706_v56 }
 0x17e   :  { %v1534_v28 = vadd.f32 %v1502_v6, %v1434_v49  ;;  %v1535_v13 = vadd.f32 %v1503_v53, %v1435_v0  ;;  %v1921_v39 = vmul.f32 %v7702_v23, %v1469_v8  ;;  %v1643_v20 = vmul.f32 %v10412_v32, %v7710_v14 }
 0x17f   :  { %v1882_v25 = vadd.f32 %v1850_v51, %v1812_v12  ;;  %v1883_v18 = vadd.f32 %v1851_v4, %v1813_v3  ;;  %6031 = vmatmul.mubr.bf16.gmra.mrb[8].mxu0 %v2045_v27  ;;  %v1336_v52 = vmul.f32 %v10420_v17, %v1300_v35  ;;  %v1337_v37 = vmul.f32 %v10420_v17, %v1301_v50  ;;  %v7756_v51 = vld [vmem:[#allocation2 + $0x9a] sm:$0xff] }
 0x180   :  { %v1604_v62 = vadd.f32 %v1572_v1, %v1534_v28  ;;  %v1605_v2 = vadd.f32 %v1573_v9, %v1535_v13  ;;  %v1712_v30 = vmul.f32 %v6682_v16, %v7712_v42  ;;  %v1713_v61 = vmul.f32 %v6682_v16, %v1469_v8 }
 0x181   :  { %v1952_v34 = vadd.f32 %v1920_v15, %v1882_v25  ;;  %v1953_v40 = vadd.f32 %v1921_v39, %v1883_v18  ;;  %v1782_v50 = vmul.f32 %v10399_v19, %v1302_v24  ;;  %v1783_v4 = vmul.f32 %v10399_v19, %v10422_v59  ;;  %v1304_v25 = vld [vmem:[#allocation2 + $0xa0] sm:$0xff] }
 0x182   :  { %v1674_v35 = vadd.f32 %v1642_v31, %v1604_v62  ;;  %v1675_v45 = vadd.f32 %v1643_v20, %v1605_v2  ;;  %v1852_v55 = vmul.f32 %v10421_v38, %v7747_v11  ;;  %v1853_v54 = vmul.f32 %v10421_v38, %v7749_v58  ;;  %v1372_v2 = vld [vmem:[#allocation2 + $0xa1] sm:$0xff] }
 0x183   :  { %v1988_v60 = vadd.f32 %v7728_v5, %v1952_v34  ;;  %v1989_v15 = vadd.f32 %v7728_v5, %v1953_v40  ;;  %v1922_v21 = vmul.f32 %v7702_v23, %v7751_v43  ;;  %v1404_v6 = vmul.f32 %v10407_v57, %v7706_v56 }
 0x184   :  { %v1744_v47 = vadd.f32 %v1712_v30, %v1674_v35  ;;  %v1745_v26 = vadd.f32 %v1713_v61, %v1675_v45  ;;  %v1923_v29 = vmul.f32 %v7702_v23, %v7756_v51  ;;  %v1405_v49 = vmul.f32 %v10407_v57, %v7710_v14  ;;  %v10423_v30 = vld [vmem:[#allocation24_spill] sm:$0xff] }
 0x185   :  { %v2020_v53 = vmax.f32 %v1988_v60, 0.0  ;;  %v2021_v41 = vmax.f32 %v1989_v15, 0.0  ;;  %v1436_v3 = vadd.f32 %v1404_v6, %v1336_v52  ;;  %v1504_v1 = vmul.f32 %v10418_v48, %v7712_v42 }
 0x186   :  { %v1814_v0 = vadd.f32 %v1782_v50, %v1744_v47  ;;  %v1815_v12 = vadd.f32 %v1783_v4, %v1745_v26  ;;  %v1437_v27 = vadd.f32 %v1405_v49, %v1337_v37  ;;  %v1505_v28 = vmul.f32 %v10418_v48, %v1469_v8  ;;  %v1472_v4 = vld [vmem:[#allocation2 + $0xa2] sm:$0xff] }
 0x187   :  { %v2046_v9 = vpack.c.bf16 %v2021_v41, %v2020_v53  ;;  %v1574_v56 = vmul.f32 %v10419_v22, %v1302_v24  ;;  %v1536_v18 = vadd.f32 %v1504_v1, %v1436_v3  ;;  %v1644_v39 = vmul.f32 %v10412_v32, %v7747_v11  ;;  %v1473_v53 = vld [vmem:[#allocation2 + $0xaa] sm:$0xff] }
 0x188   :  { %v1884_v13 = vadd.f32 %v1852_v55, %v1814_v0  ;;  %v1885_v31 = vadd.f32 %v1853_v54, %v1815_v12  ;;  %v1338_v14 = vmul.f32 %v10420_v17, %v1302_v24  ;;  %v1537_v20 = vadd.f32 %v1505_v28, %v1437_v27 }
 0x189   :  { %6034 = vmatprep.mubr.bf16.mxu0 %v2046_v9  ;;  %v1575_v42 = vmul.f32 %v10419_v22, %v10422_v59  ;;  %v1645_v52 = vmul.f32 %v10412_v32, %v7749_v58  ;;  %v1339_v8 = vmul.f32 %v10420_v17, %v10422_v59  ;;  %v1606_v34 = vadd.f32 %v1574_v56, %v1536_v18  ;;  %v1373_v59 = vld [vmem:[#allocation2 + $0xa9] sm:$0xff] }
 0x18a   :  { %v1954_v37 = vadd.f32 %v1922_v21, %v1884_v13  ;;  %v1955_v62 = vadd.f32 %v1923_v29, %v1885_v31  ;;  %v7789_v40 = vmul.f32 %v10420_v17, %v1304_v25  ;;  %v7793_v24 = vmul.f32 %v10420_v17, %v10423_v30 }
 0x18b   :  { %v1607_v61 = vadd.f32 %v1575_v42, %v1537_v20  ;;  %v1714_v35 = vmul.f32 %v6682_v16, %v7751_v43  ;;  %v1676_v60 = vadd.f32 %v1644_v39, %v1606_v34  ;;  %v1715_v15 = vmul.f32 %v6682_v16, %v7756_v51  ;;  %v7827_v34 = vld [vmem:[#allocation2 + $0xb9] sm:$0xff] }
 0x18c   :  { %v1990_v45 = vadd.f32 %v7728_v5, %v1954_v37  ;;  %v1991_v50 = vadd.f32 %v7728_v5, %v1955_v62  ;;  %v1784_v54 = vmul.f32 %v10399_v19, %v1304_v25  ;;  %v1785_v47 = vmul.f32 %v10399_v19, %v10423_v30  ;;  %v10424_v62 = vld [vmem:[#allocation18_spill] sm:$0xff] }
 0x18d   :  { %v1677_v55 = vadd.f32 %v1645_v52, %v1607_v61  ;;  %v1854_v26 = vmul.f32 %v10421_v38, %v1372_v2  ;;  %v1746_v41 = vadd.f32 %v1714_v35, %v1676_v60  ;;  %v1406_v29 = vmul.f32 %v10407_v57, %v7747_v11  ;;  %v7818_v52 = vld [vmem:[#allocation2 + $0xb1] sm:$0xff] }
 0x18e   :  { %v2022_v21 = vmax.f32 %v1990_v45, 0.0  ;;  %v2023_v6 = vmax.f32 %v1991_v50, 0.0  ;;  %v1855_v0 = vmul.f32 %v10421_v38, %v1373_v59  ;;  %v1924_v12 = vmul.f32 %v7702_v23, %v1472_v4  ;;  %v7830_v45 = vld [vmem:[#allocation2 + $0xb2] sm:$0xff] }
 0x18f   :  { %v1747_v49 = vadd.f32 %v1715_v15, %v1677_v55  ;;  %v1407_v3 = vmul.f32 %v10407_v57, %v7749_v58  ;;  %v1816_v9 = vadd.f32 %v1784_v54, %v1746_v41  ;;  %v1438_v27 = vadd.f32 %v1406_v29, %v1338_v14  ;;  %v10425_v54 = vld [vmem:[#allocation25_spill] sm:$0xff] }
 0x190   :  { %v2047_v1 = vpack.c.bf16 %v2023_v6, %v2022_v21  ;;  %v1506_v28 = vmul.f32 %v10418_v48, %v7751_v43  ;;  %v1925_v13 = vmul.f32 %v7702_v23, %v1473_v53  ;;  %v1507_v11 = vmul.f32 %v10418_v48, %v7756_v51 }
 0x191   :  { %v1817_v56 = vadd.f32 %v1785_v47, %v1747_v49  ;;  %v1439_v31 = vadd.f32 %v1407_v3, %v1339_v8  ;;  %v1886_v18 = vadd.f32 %v1854_v26, %v1816_v9  ;;  %v1576_v20 = vmul.f32 %v10419_v22, %v1304_v25 }
 0x192   :  { %6035 = vmatmul.mubr.bf16.gmra.mrb[12].mxu0 %v2047_v1  ;;  %v1538_v39 = vadd.f32 %v1506_v28, %v1438_v27  ;;  %v1646_v58 = vmul.f32 %v10412_v32, %v1372_v2  ;;  %v1577_v43 = vmul.f32 %v10419_v22, %v10423_v30  ;;  %v1647_v37 = vmul.f32 %v10412_v32, %v1373_v59 }
 0x193   :  { %v1887_v42 = vadd.f32 %v1855_v0, %v1817_v56  ;;  %v1539_v14 = vadd.f32 %v1507_v11, %v1439_v31  ;;  %v1956_v8 = vadd.f32 %v1924_v12, %v1886_v18  ;;  %v7825_v51 = vmul.f32 %v10420_v17, %v10424_v62  ;;  %v1475_v56 = vld [vmem:[#allocation2 + $0xba] sm:$0xff] }
 0x194   :  { %v1608_v61 = vadd.f32 %v1576_v20, %v1538_v39  ;;  %v1716_v25 = vmul.f32 %v6682_v16, %v1472_v4  ;;  %v1717_v60 = vmul.f32 %v6682_v16, %v1473_v53  ;;  %v1786_v30 = vmul.f32 %v10399_v19, %v10424_v62 }
 0x195   :  { %v1957_v35 = vadd.f32 %v1925_v13, %v1887_v42  ;;  %v1609_v50 = vadd.f32 %v1577_v43, %v1539_v14  ;;  %v1992_v15 = vadd.f32 %v7728_v5, %v1956_v8  ;;  %v1787_v47 = vmul.f32 %v10399_v19, %v10425_v54  ;;  %v7862_v43 = vld [vmem:[#allocation2 + $0xc1] sm:$0xff] }
 0x196   :  { %v1678_v55 = vadd.f32 %v1646_v58, %v1608_v61  ;;  %v1856_v26 = vmul.f32 %v10421_v38, %v7818_v52  ;;  %v1857_v41 = vmul.f32 %v10421_v38, %v7827_v34  ;;  %v1408_v29 = vmul.f32 %v10407_v57, %v1372_v2  ;;  %v7866_v61 = vld [vmem:[#allocation2 + $0xc2] sm:$0xff] }
 0x197   :  { %v1993_v21 = vadd.f32 %v7728_v5, %v1957_v35  ;;  %v1679_v6 = vadd.f32 %v1647_v37, %v1609_v50  ;;  %v2024_v49 = vmax.f32 %v1992_v15, 0.0  ;;  %v1926_v12 = vmul.f32 %v7702_v23, %v7830_v45  ;;  %v7864_v37 = vld [vmem:[#allocation2 + $0xc9] sm:$0xff] }
 0x198   :  { %v1748_v0 = vadd.f32 %v1716_v25, %v1678_v55  ;;  %v1409_v3 = vmul.f32 %v10407_v57, %v1373_v59  ;;  %v1440_v27 = vadd.f32 %v1408_v29, %v7789_v40  ;;  %v1508_v28 = vmul.f32 %v10418_v48, %v1472_v4  ;;  %v10426_v55 = vld [vmem:[#allocation21_spill] sm:$0xff] }
 0x199   :  { %v2025_v1 = vmax.f32 %v1993_v21, 0.0  ;;  %v1749_v9 = vadd.f32 %v1717_v60, %v1679_v6  ;;  %v1509_v11 = vmul.f32 %v10418_v48, %v1473_v53  ;;  %v1578_v2 = vmul.f32 %v10419_v22, %v10424_v62 }
 0x19a   :  { %v1818_v13 = vadd.f32 %v1786_v30, %v1748_v0  ;;  %v1441_v31 = vadd.f32 %v1409_v3, %v7793_v24  ;;  %v1540_v20 = vadd.f32 %v1508_v28, %v1440_v27  ;;  %v1648_v59 = vmul.f32 %v10412_v32, %v7818_v52  ;;  %v7871_v30 = vld [vmem:[#allocation2 + $0xca] sm:$0xff] }
 0x19b   :  { %v2048_v18 = vpack.c.bf16 %v2025_v1, %v2024_v49  ;;  %v1819_v39 = vadd.f32 %v1787_v47, %v1749_v9  ;;  %v1579_v40 = vmul.f32 %v10419_v22, %v10425_v54  ;;  %v1649_v4 = vmul.f32 %v10412_v32, %v7827_v34 }
 0x19c   :  { %v1888_v58 = vadd.f32 %v1856_v26, %v1818_v13  ;;  %v1541_v42 = vadd.f32 %v1509_v11, %v1441_v31  ;;  %v1343_v24 = vmul.f32 %v10420_v17, %v10425_v54  ;;  %v1927_v14 = vmul.f32 %v7702_v23, %v1475_v56 }
 0x19d   :  { %6038 = vmatprep.mubr.bf16.mxu0 %v2048_v18  ;;  %v1889_v53 = vadd.f32 %v1857_v41, %v1819_v39  ;;  %v1610_v8 = vadd.f32 %v1578_v2, %v1540_v20  ;;  %v1718_v35 = vmul.f32 %v6682_v16, %v7830_v45  ;;  %v1719_v50 = vmul.f32 %v6682_v16, %v1475_v56  ;;  %v6233_v2 = vld [vmem:[%s10320_s5 + $0x40] sm:$0xff]  }
 0x19e   :  { %v1958_v62 = vadd.f32 %v1926_v12, %v1888_v58  ;;  %v1611_v25 = vadd.f32 %v1579_v40, %v1541_v42  ;;  %v1788_v54 = vmul.f32 %v10399_v19, %v10426_v55  ;;  %v1789_v47 = vmul.f32 %v10399_v19, %v7604_v7  ;;  %6054 = vmatprep.subr.bf16.mxu1 %v6233_v2 }
 0x19f   :  { %v1959_v60 = vadd.f32 %v1927_v14, %v1889_v53  ;;  %v1680_v15 = vadd.f32 %v1648_v59, %v1610_v8  ;;  %v1858_v6 = vmul.f32 %v10421_v38, %v7862_v43  ;;  %v1859_v41 = vmul.f32 %v10421_v38, %v7864_v37  ;;  %6055 = vmatpush3.bf16.msra.mxu1 %v6233_v2  ;;  %v7913_v8 = vld [vmem:[#allocation2 + $0xd1] sm:$0xff] }
 0x1a0   :  { %v1994_v26 = vadd.f32 %v7728_v5, %v1958_v62  ;;  %v1681_v21 = vadd.f32 %v1649_v4, %v1611_v25  ;;  %v1928_v0 = vmul.f32 %v7702_v23, %v7866_v61  ;;  %v1410_v12 = vmul.f32 %v10407_v57, %v7818_v52 }
 0x1a1   :  { %v1995_v29 = vadd.f32 %v7728_v5, %v1959_v60  ;;  %v1750_v49 = vadd.f32 %v1718_v35, %v1680_v15  ;;  %v1929_v9 = vmul.f32 %v7702_v23, %v7871_v30  ;;  %v1411_v27 = vmul.f32 %v10407_v57, %v7827_v34  ;;  %v6234_v34 = vld [vmem:[%s10320_s5 + $0x48] sm:$0xff]   ;;  %v7919_v60 = vld [vmem:[#allocation2 + $0xd2] sm:$0xff] }
 0x1a2   :  { %v2026_v3 = vmax.f32 %v1994_v26, 0.0  ;;  %v1751_v1 = vadd.f32 %v1719_v50, %v1681_v21  ;;  %v1442_v31 = vadd.f32 %v1410_v12, %v7825_v51  ;;  %v1510_v11 = vmul.f32 %v10418_v48, %v7830_v45  ;;  %v1379_v50 = vld [vmem:[#allocation2 + $0xd9] sm:$0xff]  ;;  %6056 = vmatprep.subr.bf16.mxu1 %v6234_v34 }
 0x1a3   :  { %v2027_v28 = vmax.f32 %v1995_v29, 0.0  ;;  %v1820_v13 = vadd.f32 %v1788_v54, %v1750_v49  ;;  %v1443_v18 = vadd.f32 %v1411_v27, %v1343_v24  ;;  %v1511_v39 = vmul.f32 %v10418_v48, %v1475_v56  ;;  %6057 = vmatpush3.bf16.msra.mxu1 %v6234_v34 }
 0x1a4   :  { %v1821_v52 = vadd.f32 %v1789_v47, %v1751_v1  ;;  %v1580_v20 = vmul.f32 %v10419_v22, %v10426_v55  ;;  %v1542_v58 = vadd.f32 %v1510_v11, %v1442_v31  ;;  %v1650_v45 = vmul.f32 %v10412_v32, %v7862_v43 }
 0x1a5   :  { %v2049_v59 = vpack.c.bf16 %v2027_v28, %v2026_v3  ;;  %v1890_v51 = vadd.f32 %v1858_v6, %v1820_v13  ;;  %v1543_v40 = vadd.f32 %v1511_v39, %v1443_v18  ;;  %v1581_v4 = vmul.f32 %v10419_v22, %v7604_v7  ;;  %v1479_v6 = vld [vmem:[#allocation2 + $0xda] sm:$0xff] }
 0x1a6   :  { %v1891_v42 = vadd.f32 %v1859_v41, %v1821_v52  ;;  %v1651_v56 = vmul.f32 %v10412_v32, %v7864_v37  ;;  %v1344_v24 = vmul.f32 %v10420_v17, %v10426_v55  ;;  %v1345_v53 = vmul.f32 %v10420_v17, %v7604_v7 }
 0x1a7   :  { %6039 = vmatmul.mubr.bf16.gmra.mrb[16].mxu0 %v2049_v59  ;;  %v1960_v14 = vadd.f32 %v1928_v0, %v1890_v51  ;;  %v1612_v62 = vadd.f32 %v1580_v20, %v1542_v58  ;;  %v7917_v35 = vmul.f32 %v10420_v17, %v7643_v10  ;;  %v1613_v15 = vadd.f32 %v1581_v4, %v1543_v40 }
 0x1a8   :  { %v1961_v25 = vadd.f32 %v1929_v9, %v1891_v42  ;;  %v1720_v54 = vmul.f32 %v6682_v16, %v7866_v61  ;;  %v1721_v47 = vmul.f32 %v6682_v16, %v7871_v30  ;;  %v1790_v26 = vmul.f32 %v10399_v19, %v7643_v10 }
 0x1a9   :  { %v1996_v55 = vadd.f32 %v7728_v5, %v1960_v14  ;;  %v1682_v7 = vadd.f32 %v1650_v45, %v1612_v62  ;;  %v1683_v41 = vadd.f32 %v1651_v56, %v1613_v15  ;;  %v1791_v29 = vmul.f32 %v10399_v19, %v7650_v44  ;;  %v1381_v56 = vld [vmem:[#allocation2 + $0xe9] sm:$0xff] }
 0x1aa   :  { %v1997_v21 = vadd.f32 %v7728_v5, %v1961_v25  ;;  %v1860_v49 = vmul.f32 %v10421_v38, %v7913_v8  ;;  %v1861_v12 = vmul.f32 %v10421_v38, %v1379_v50  ;;  %v1930_v3 = vmul.f32 %v7702_v23, %v7919_v60  ;;  %v1480_v14 = vld [vmem:[#allocation2 + $0xe2] sm:$0xff] }
 0x1ab   :  { %v1752_v0 = vadd.f32 %v1720_v54, %v1682_v7  ;;  %v1412_v1 = vmul.f32 %v10407_v57, %v7862_v43  ;;  %v2028_v9 = vmax.f32 %v1996_v55, 0.0  ;;  %v1753_v28 = vadd.f32 %v1721_v47, %v1683_v41 }
 0x1ac   :  { %v2029_v27 = vmax.f32 %v1997_v21, 0.0  ;;  %v1413_v13 = vmul.f32 %v10407_v57, %v7864_v37  ;;  %v1931_v11 = vmul.f32 %v7702_v23, %v1479_v6  ;;  %v1512_v52 = vmul.f32 %v10418_v48, %v7866_v61 }
 0x1ad   :  { %v1822_v31 = vadd.f32 %v1790_v26, %v1752_v0  ;;  %v1444_v2 = vadd.f32 %v1412_v1, %v1344_v24  ;;  %v1823_v39 = vadd.f32 %v1791_v29, %v1753_v28  ;;  %v1513_v34 = vmul.f32 %v10418_v48, %v7871_v30  ;;  %v1481_v28 = vld [vmem:[#allocation2 + $0xea] sm:$0xff] }
 0x1ae   :  { %v2050_v18 = vpack.c.bf16 %v2029_v27, %v2028_v9  ;;  %v1445_v20 = vadd.f32 %v1413_v13, %v1345_v53  ;;  %v1582_v51 = vmul.f32 %v10419_v22, %v7643_v10  ;;  %v1652_v37 = vmul.f32 %v10412_v32, %v7913_v8  ;;  %v1380_v10 = vld [vmem:[#allocation2 + $0xe1] sm:$0xff] }
 0x1af   :  { %v1892_v43 = vadd.f32 %v1860_v49, %v1822_v31  ;;  %v1544_v59 = vadd.f32 %v1512_v52, %v1444_v2  ;;  %v1893_v58 = vadd.f32 %v1861_v12, %v1823_v39  ;;  %v1583_v61 = vmul.f32 %v10419_v22, %v7650_v44 }
 0x1b0   :  { %6042 = vmatprep.mubr.bf16.mxu0 %v2050_v18  ;;  %v1545_v45 = vadd.f32 %v1513_v34, %v1445_v20  ;;  %v1653_v42 = vmul.f32 %v10412_v32, %v1379_v50  ;;  %v1347_v40 = vmul.f32 %v10420_v17, %v7650_v44  ;;  %v7956_v4 = vmul.f32 %v10420_v17, %v7645_v36 }
 0x1b1   :  { %v1962_v30 = vadd.f32 %v1930_v3, %v1892_v43  ;;  %v1614_v24 = vadd.f32 %v1582_v51, %v1544_v59  ;;  %v1963_v53 = vadd.f32 %v1931_v11, %v1893_v58  ;;  %v1722_v25 = vmul.f32 %v6682_v16, %v7919_v60  ;;  %v7989_v51 = vld [vmem:[#allocation2 + $0xf1] sm:$0xff] }
 0x1b2   :  { %v1615_v62 = vadd.f32 %v1583_v61, %v1545_v45  ;;  %v1723_v15 = vmul.f32 %v6682_v16, %v1479_v6  ;;  %v1792_v44 = vmul.f32 %v10399_v19, %v7645_v36  ;;  %v1793_v7 = vmul.f32 %v10399_v19, %v7647_v33 }
 0x1b3   :  { %v1998_v54 = vadd.f32 %v7728_v5, %v1962_v30  ;;  %v1684_v55 = vadd.f32 %v1652_v37, %v1614_v24  ;;  %v1999_v47 = vadd.f32 %v7728_v5, %v1963_v53  ;;  %v1862_v21 = vmul.f32 %v10421_v38, %v1380_v10 }
 0x1b4   :  { %v1685_v26 = vadd.f32 %v1653_v42, %v1615_v62  ;;  %v1863_v41 = vmul.f32 %v10421_v38, %v1381_v56  ;;  %v1932_v49 = vmul.f32 %v7702_v23, %v1480_v14  ;;  %v1414_v0 = vmul.f32 %v10407_v57, %v7913_v8 }
 0x1b5   :  { %v1754_v29 = vadd.f32 %v1722_v25, %v1684_v55  ;;  %v1415_v12 = vmul.f32 %v10407_v57, %v1379_v50  ;;  %v2030_v3 = vmax.f32 %v1998_v54, 0.0  ;;  %v2031_v1 = vmax.f32 %v1999_v47, 0.0 }
 0x1b6   :  { %v1755_v9 = vadd.f32 %v1723_v15, %v1685_v26  ;;  %v1514_v27 = vmul.f32 %v10418_v48, %v7919_v60  ;;  %v1446_v31 = vadd.f32 %v1414_v0, %v7917_v35  ;;  %v1515_v2 = vmul.f32 %v10418_v48, %v1479_v6  ;;  %v1383_v15 = vld [vmem:[#allocation2 + $0xf9] sm:$0xff] }
 0x1b7   :  { %v1824_v13 = vadd.f32 %v1792_v44, %v1754_v29  ;;  %v1447_v11 = vadd.f32 %v1415_v12, %v1347_v40  ;;  %v2051_v52 = vpack.c.bf16 %v2031_v1, %v2030_v3  ;;  %v1584_v8 = vmul.f32 %v10419_v22, %v7645_v36  ;;  %v1482_v29 = vld [vmem:[#allocation2 + $0xf2] sm:$0xff] }
 0x1b8   :  { %v1825_v18 = vadd.f32 %v1793_v7, %v1755_v9  ;;  %v1585_v50 = vmul.f32 %v10419_v22, %v7647_v33  ;;  %v1546_v20 = vadd.f32 %v1514_v27, %v1446_v31  ;;  %v1655_v60 = vmul.f32 %v10412_v32, %v1381_v56 }
 0x1b9   :  { %v1894_v39 = vadd.f32 %v1862_v21, %v1824_v13  ;;  %v1547_v34 = vadd.f32 %v1515_v2, %v1447_v11  ;;  %6043 = vmatmul.mubr.bf16.gmra.mrb[20].mxu0 %v2051_v52  ;;  %v1349_v35 = vmul.f32 %v10420_v17, %v7647_v33  ;;  %v1933_v6 = vmul.f32 %v7702_v23, %v1481_v28 }
 0x1ba   :  { %v1895_v43 = vadd.f32 %v1863_v41, %v1825_v18  ;;  %v7987_v59 = vmul.f32 %v10420_v17, %v7670_v46  ;;  %v1616_v37 = vadd.f32 %v1584_v8, %v1546_v20  ;;  %v1654_v45 = vmul.f32 %v10412_v32, %v1380_v10 }
 0x1bb   :  { %v1964_v36 = vadd.f32 %v1932_v49, %v1894_v39  ;;  %v1617_v58 = vadd.f32 %v1585_v50, %v1547_v34  ;;  %v1724_v42 = vmul.f32 %v6682_v16, %v1480_v14  ;;  %v1725_v40 = vmul.f32 %v6682_v16, %v1481_v28  ;;  %v1483_v49 = vld [vmem:[#allocation2 + $0xfa] sm:$0xff] }
 0x1bc   :  { %v1965_v61 = vadd.f32 %v1933_v6, %v1895_v43  ;;  %v1794_v33 = vmul.f32 %v10399_v19, %v7670_v46  ;;  %v1686_v24 = vadd.f32 %v1654_v45, %v1616_v37  ;;  %v1795_v62 = vmul.f32 %v10399_v19, %v7672_v63 }
 0x1bd   :  { %v2000_v30 = vadd.f32 %v7728_v5, %v1964_v36  ;;  %v1687_v53 = vadd.f32 %v1655_v60, %v1617_v58  ;;  %v1864_v54 = vmul.f32 %v10421_v38, %v7989_v51  ;;  %v1416_v55 = vmul.f32 %v10407_v57, %v1380_v10  ;;  %v1622_v60 = vld [vmem:[#allocation2 + $0x101] sm:$0xff] }
 0x1be   :  { %v2001_v25 = vadd.f32 %v7728_v5, %v1965_v61  ;;  %v1417_v44 = vmul.f32 %v10407_v57, %v1381_v56  ;;  %v1756_v47 = vadd.f32 %v1724_v42, %v1686_v24  ;;  %v1516_v21 = vmul.f32 %v10418_v48, %v1480_v14  ;;  %v6277_v36 = vld [vmem:[#allocation2 + $0x100] sm:$0xff]  ;;  %v1623_v42 = vld [vmem:[#allocation2 + $0x109] sm:$0xff] }
 0x1bf   :  { %v2032_v7 = vmax.f32 %v2000_v30, 0.0  ;;  %v1757_v26 = vadd.f32 %v1725_v40, %v1687_v53  ;;  %v1448_v0 = vadd.f32 %v1416_v55, %v7956_v4  ;;  %v1517_v3 = vmul.f32 %v10418_v48, %v1481_v28 }
 0x1c0   :  { %v2033_v41 = vmax.f32 %v2001_v25, 0.0  ;;  %v1449_v12 = vadd.f32 %v1417_v44, %v1349_v35  ;;  %v1826_v1 = vadd.f32 %v1794_v33, %v1756_v47  ;;  %v1865_v27 = vmul.f32 %v10421_v38, %v1383_v15  ;;  %v1693_v25 = vld [vmem:[#allocation2 + $0x10a] sm:$0xff] }
 0x1c1   :  { %v1827_v9 = vadd.f32 %v1795_v62, %v1757_v26  ;;  %v1586_v10 = vmul.f32 %v10419_v22, %v7670_v46  ;;  %v1548_v13 = vadd.f32 %v1516_v21, %v1448_v0  ;;  %v1587_v14 = vmul.f32 %v10419_v22, %v7672_v63 }
 0x1c2   :  { %v2052_v56 = vpack.c.bf16 %v2033_v41, %v2032_v7  ;;  %v1549_v31 = vadd.f32 %v1517_v3, %v1449_v12  ;;  %v1896_v11 = vadd.f32 %v1864_v54, %v1826_v1  ;;  %v1934_v4 = vmul.f32 %v7702_v23, %v1482_v29 }
 0x1c3   :  { %v1897_v2 = vadd.f32 %v1865_v27, %v1827_v9  ;;  %v1935_v52 = vmul.f32 %v7702_v23, %v1483_v49  ;;  %v1618_v28 = vadd.f32 %v1586_v10, %v1548_v13  ;;  %v1656_v8 = vmul.f32 %v10412_v32, %v7989_v51  ;;  %v1833_v13 = vld [vmem:[#allocation2 + $0x119] sm:$0xff] }
 0x1c4   :  { %6046 = vmatprep.mubr.bf16.mxu0 %v2052_v56  ;;  %v1619_v18 = vadd.f32 %v1587_v14, %v1549_v31  ;;  %v1657_v46 = vmul.f32 %v10412_v32, %v1383_v15  ;;  %v1351_v50 = vmul.f32 %v10420_v17, %v7672_v63  ;;  %v1966_v39 = vadd.f32 %v1934_v4, %v1896_v11  ;;  %v1692_v17 = vld [vmem:[#allocation2 + $0x102] sm:$0xff]  ;;  %v1903_v4 = vld [vmem:[#allocation2 + $0x11a] sm:$0xff] }
 0x1c5   :  { %v1967_v20 = vadd.f32 %v1935_v52, %v1897_v2  ;;  %v1726_v34 = vmul.f32 %v6682_v16, %v1482_v29  ;;  %v1688_v35 = vadd.f32 %v1656_v8, %v1618_v28  ;;  %v1727_v6 = vmul.f32 %v6682_v16, %v1483_v49  ;;  %v1902_v2 = vld [vmem:[#allocation2 + $0x112] sm:$0xff] }
 0x1c6   :  { %v1689_v43 = vadd.f32 %v1657_v46, %v1619_v18  ;;  %v1796_v37 = vmul.f32 %v6277_v36, %v10399_v19  ;;  %v2002_v58 = vadd.f32 %v7728_v5, %v1966_v39  ;;  %v1588_v61 = vmul.f32 %v6277_v36, %v10419_v22 }
 0x1c7   :  { %v2003_v45 = vadd.f32 %v7728_v5, %v1967_v20  ;;  %v1866_v63 = vmul.f32 %v10421_v38, %v1622_v60  ;;  %v1758_v40 = vadd.f32 %v1726_v34, %v1688_v35  ;;  %v1867_v30 = vmul.f32 %v10421_v38, %v1623_v42 }
 0x1c8   :  { %v1759_v33 = vadd.f32 %v1727_v6, %v1689_v43  ;;  %v1936_v24 = vmul.f32 %v7702_v23, %v1692_v17  ;;  %v2034_v53 = vmax.f32 %v2002_v58, 0.0  ;;  %v1418_v19 = vmul.f32 %v10407_v57, %v7989_v51  ;;  %v6235_v6 = vld [vmem:[%s10320_s5 + $0x50] sm:$0xff]  }
 0x1c9   :  { %v2035_v62 = vmax.f32 %v2003_v45, 0.0  ;;  %v1419_v54 = vmul.f32 %v10407_v57, %v1383_v15  ;;  %v1828_v55 = vadd.f32 %v1796_v37, %v1758_v40  ;;  %v1937_v44 = vmul.f32 %v7702_v23, %v1693_v25  ;;  %6058 = vmatprep.subr.bf16.mxu1 %v6235_v6  ;;  %v6237_v45 = vld [vmem:[%s10320_s5 + $0x60] sm:$0xff]  }
 0x1ca   :  { %v1829_v22 = vadd.f32 %v1796_v37, %v1759_v33  ;;  %v1518_v7 = vmul.f32 %v10418_v48, %v1482_v29  ;;  %v1450_v26 = vadd.f32 %v1418_v19, %v7987_v59  ;;  %v1519_v41 = vmul.f32 %v10418_v48, %v1483_v49  ;;  %v1832_v49 = vld [vmem:[#allocation2 + $0x111] sm:$0xff]  ;;  %6059 = vmatpush3.bf16.msra.mxu1 %v6235_v6  ;;  %v10433_v6 = vld [vmem:[#allocation13_spill] sm:$0xff] }
 0x1cb   :  { %v2053_v47 = vpack.c.bf16 %v2035_v62, %v2034_v53  ;;  %v1451_v21 = vadd.f32 %v1419_v54, %v1351_v50  ;;  %v1898_v0 = vadd.f32 %v1866_v63, %v1828_v55  ;;  %v1658_v3 = vmul.f32 %v10412_v32, %v1622_v60  ;;  %v8068_v63 = vld [vmem:[%s10319_s4 + $0x2] ss:$0 sm:$0xff] }
 0x1cc   :  { %v1899_v12 = vadd.f32 %v1867_v30, %v1829_v22  ;;  %v1659_v51 = vmul.f32 %v10412_v32, %v1623_v42  ;;  %v1550_v57 = vadd.f32 %v1518_v7, %v1450_v26  ;;  %v1728_v27 = vmul.f32 %v6682_v16, %v1692_v17  ;;  %v6239_v42 = vld [vmem:[%s10320_s5 + $0x70] sm:$0xff]   ;;  %v6240_v17 = vld [vmem:[%s10320_s5 + $0x78] sm:$0xff]   ;;  %v5783_v7 = vld [vmem:[%s10318_s3 + $0x20] sm:$0xff] }
 0x1cd   :  { %6047 = vmatmul.mubr.bf16.gmra.mrb[24].mxu0 %v2053_v47  ;;  %v1551_v15 = vadd.f32 %v1519_v41, %v1451_v21  ;;  %v1968_v1 = vadd.f32 %v1936_v24, %v1898_v0  ;;  %v1729_v29 = vmul.f32 %v6682_v16, %v1693_v25  ;;  %v1868_v18 = vmul.f32 %v10421_v38, %v1832_v49  ;;  %v10427_v47 = vld [vmem:[#allocation8_spill] sm:$0xff]  ;;  %v10428_v21 = vld [vmem:[#allocation9_spill] sm:$0xff]  ;;  %v10429_v0 = vld [vmem:[#allocation10_spill] sm:$0xff] }
 0x1ce   :  { %v1969_v9 = vadd.f32 %v1937_v44, %v1899_v12  ;;  %v1620_v10 = vadd.f32 %v1588_v61, %v1550_v57  ;;  %v1869_v16 = vmul.f32 %v10421_v38, %v1833_v13  ;;  %v1938_v39 = vmul.f32 %v7702_v23, %v1902_v2 }
 0x1cf   :  { %v1621_v59 = vadd.f32 %v1588_v61, %v1551_v15  ;;  %v2004_v56 = vadd.f32 %v7728_v5, %v1968_v1  ;;  %v1939_v20 = vmul.f32 %v7702_v23, %v1903_v4  ;;  %v8081_v26 = vrot.slane %v5783_v7, %v10427_v47 }
 0x1d0   :  { %v2005_v48 = vadd.f32 %v7728_v5, %v1969_v9  ;;  %v1690_v31 = vadd.f32 %v1658_v3, %v1620_v10  ;;  %v8084_v41 = vrot.slane %v5783_v7, %v10428_v21  ;;  %v8087_v12 = vrot.slane %v5783_v7, %v10429_v0  ;;  %v10430_v3 = vld [vmem:[#allocation11_spill] sm:$0xff] }
 0x1d1   :  { %v1691_v14 = vadd.f32 %v1659_v51, %v1621_v59  ;;  %v2036_v11 = vmax.f32 %v2004_v56, 0.0  ;;  %v8090_v51 = vrot.slane %v5783_v7, %v10430_v3 }
 0x1d2   :  { %v2037_v32 = vmax.f32 %v2005_v48, 0.0  ;;  %v1760_v52 = vadd.f32 %v1728_v27, %v1690_v31 }
 0x1d3   :  { %v1761_v28 = vadd.f32 %v1729_v29, %v1691_v14 }
 0x1d4   :  { %v2054_v8 = vpack.c.bf16 %v2037_v32, %v2036_v11  ;;  %v1830_v46 = vadd.f32 %v1796_v37, %v1760_v52  ;;  %v10431_v52 = vld [vmem:[#allocation12_spill] sm:$0xff] }
 0x1d5   :  { %v1831_v50 = vadd.f32 %v1796_v37, %v1761_v28  ;;  %v6236_v37 = vld [vmem:[%s10320_s5 + $0x58] sm:$0xff]   ;;  %v8102_v28 = vrot.slane %v5783_v7, %v10431_v52 }
 0x1d6   :  { %6050 = vmatprep.mubr.bf16.mxu0 %v2054_v8  ;;  %v1900_v34 = vadd.f32 %v1868_v18, %v1830_v46  ;;  %6060 = vmatprep.subr.bf16.mxu1 %v6236_v37 }
 0x1d7   :  { %v1901_v60 = vadd.f32 %v1869_v16, %v1831_v50  ;;  %6061 = vmatpush3.bf16.msra.mxu1 %v6236_v37  ;;  %v10432_v16 = vld [vmem:[#allocation14_spill] sm:$0xff] }
 0x1d8   :  { %v1970_v35 = vadd.f32 %v1938_v39, %v1900_v34  ;;  %6062 = vmatprep.subr.bf16.mxu1 %v6237_v45  ;;  %v8105_v8 = vrot.slane %v5783_v7, %v10432_v16 }
 0x1d9   :  { %v1971_v43 = vadd.f32 %v1939_v20, %v1901_v60 }
 0x1da   :  { %v2006_v36 = vadd.f32 %v7728_v5, %v1970_v35 }
 0x1db   :  { %v2007_v38 = vadd.f32 %v7728_v5, %v1971_v43  ;;  %v6238_v5 = vld [vmem:[%s10320_s5 + $0x68] sm:$0xff]   ;;  %6063 = vmatpush3.bf16.msra.mxu1 %v6237_v45 }
 0x1dc   :  { %v2038_v58 = vmax.f32 %v2006_v36, 0.0  ;;  %6064 = vmatprep.subr.bf16.mxu1 %v6238_v5  ;;  %v8112_v36 = vrot.slane %v5783_v7, %v10433_v6 }
 0x1dd   :  { %v2039_v23 = vmax.f32 %v2007_v38, 0.0 }
 0x1df   :  { %v2055_v61 = vpack.c.bf16 %v2039_v23, %v2038_v58  ;;  %6065 = vmatpush3.bf16.msra.mxu1 %v6238_v5 }
 0x1e0   :  { %6066 = vmatprep.subr.bf16.mxu1 %v6239_v42 }
 0x1e1   :  { %6051 = vmatmul.mubr.bf16.gmra.mrb[28].mxu0 %v2055_v61 }
 0x1e3   :  { %6067 = vmatpush3.bf16.msra.mxu1 %v6239_v42 }
 0x1e4   :  { %6068 = vmatprep.subr.bf16.mxu1 %v6240_v17 }
 0x1e7   :  { %6069 = vmatpush3.bf16.msra.mxu1 %v6240_v17 }
 0x1f2   :  { %v6024_v40 = vpop.f32.mrb[0].mxu0 }
 0x1f3   :  { %v2168_v33 = vadd.f32 %v6024_v40, %v8068_v63  ;;  %v2159_v30 = vpop.f32.mrb[1].mxu0 }
 0x1f4   :  { %v2160_v24 = vadd.f32 %v8068_v63, %v2159_v30  ;;  %v6025_v53 = vpop.f32.mrb[2].mxu0 }
 0x1f5   :  { %v2288_v62 = vmax.f32 %v2168_v33, 0.0  ;;  %v2171_v25 = vadd.f32 %v6025_v53, %v8068_v63  ;;  %v2162_v19 = vpop.f32.mrb[3].mxu0 }
 0x1f6   :  { %v2286_v54 = vmax.f32 %v2160_v24, 0.0  ;;  %v2163_v55 = vadd.f32 %v8068_v63, %v2162_v19 }
 0x1f7   :  { %2320 = vst [vmem:[#allocation2 + $0x10] sm:$0xff] %v2288_v62  ;;  %v8074_v22 = vmax.f32 %v2171_v25, 0.0  ;;  %v2628_v11 = vmul.f32 %v8090_v51, %v2288_v62  ;;  %v2392_v43 = vmul.f32 %v8081_v26, %v2288_v62 }
 0x1f8   :  { %2318 = vst [vmem:[#allocation2] sm:$0xff] %v2286_v54  ;;  %v2287_v44 = vmax.f32 %v2163_v55, 0.0  ;;  %v2390_v9 = vmul.f32 %v8081_v26, %v2286_v54  ;;  %v10434_v55 = vld [vmem:[#allocation15_spill] sm:$0xff] }
 0x1f9   :  { %2321 = vst [vmem:[#allocation2 + $0x18] sm:$0xff] %v8074_v22  ;;  %v2629_v32 = vmul.f32 %v8090_v51, %v8074_v22 }
 0x1fa   :  { %2319 = vst [vmem:[#allocation2 + $0x8] sm:$0xff] %v2287_v44  ;;  %v2391_v27 = vmul.f32 %v8081_v26, %v2287_v44  ;;  %v8128_v44 = vrot.slane %v5783_v7, %v10434_v55 }
 0x200   :  { %v2424_v18 = vld [vmem:[#allocation2 + $0x11] sm:$0xff] }
 0x201   :  { %v2422_v57 = vld [vmem:[#allocation2 + $0x1] sm:$0xff]  ;;  %v2423_v15 = vld [vmem:[#allocation2 + $0x9] sm:$0xff]  ;;  %v2698_v46 = vmul.f32 %v8102_v28, %v2424_v18  ;;  %v2524_v50 = vld [vmem:[#allocation2 + $0x12] sm:$0xff]  ;;  %v2460_v39 = vmul.f32 %v8084_v41, %v2424_v18 }
 0x202   :  { %v2522_v1 = vld [vmem:[#allocation2 + $0x2] sm:$0xff]  ;;  %v2458_v29 = vmul.f32 %v8084_v41, %v2422_v57  ;;  %v2459_v10 = vmul.f32 %v8084_v41, %v2423_v15  ;;  %v2523_v59 = vld [vmem:[#allocation2 + $0xa] sm:$0xff]  ;;  %v2768_v58 = vmul.f32 %v8105_v8, %v2524_v50  ;;  %v2560_v30 = vmul.f32 %v8087_v12, %v2524_v50 }
 0x203   :  { %v2558_v49 = vmul.f32 %v8087_v12, %v2522_v1  ;;  %v2559_v13 = vmul.f32 %v8087_v12, %v2523_v59  ;;  %v2492_v5 = vadd.f32 %v2460_v39, %v2392_v43  ;;  %v8133_v1 = vld [vmem:[%s10318_s3 + $0x28] ss:$0 sm:$0xff] }
 0x204   :  { %v2490_v56 = vadd.f32 %v2458_v29, %v2390_v9  ;;  %v2491_v48 = vadd.f32 %v2459_v10, %v2391_v27  ;;  %v2393_v9 = vmul.f32 %v8081_v26, %v8074_v22 }
 0x205   :  { %v2592_v25 = vadd.f32 %v2560_v30, %v2492_v5 }
 0x206   :  { %v2590_v31 = vadd.f32 %v2558_v49, %v2490_v56  ;;  %v2591_v14 = vadd.f32 %v2559_v13, %v2491_v48 }
 0x208   :  { %v2660_v2 = vadd.f32 %v2628_v11, %v2590_v31  ;;  %v2661_v4 = vadd.f32 %v2629_v32, %v2591_v14 }
 0x20a   :  { %v2730_v34 = vadd.f32 %v2698_v46, %v2660_v2 }
 0x20c   :  { %v2800_v40 = vadd.f32 %v2768_v58, %v2730_v34 }
 0x219   :  { %v6028_v20 = vpop.f32.mrb[4].mxu0 }
 0x21a   :  { %v2184_v60 = vadd.f32 %v6028_v20, %v8068_v63  ;;  %v2175_v35 = vpop.f32.mrb[5].mxu0 }
 0x21b   :  { %v2176_v38 = vadd.f32 %v8068_v63, %v2175_v35  ;;  %v6029_v37 = vpop.f32.mrb[6].mxu0 }
 0x21c   :  { %v8116_v23 = vmax.f32 %v2184_v60, 0.0  ;;  %v2187_v45 = vadd.f32 %v6029_v37, %v8068_v63  ;;  %v2178_v61 = vpop.f32.mrb[7].mxu0 }
 0x21d   :  { %v2290_v42 = vmax.f32 %v2176_v38, 0.0  ;;  %v2179_v17 = vadd.f32 %v8068_v63, %v2178_v61 }
 0x21e   :  { %2324 = vst [vmem:[#allocation2 + $0x30] sm:$0xff] %v8116_v23  ;;  %v8121_v33 = vmax.f32 %v2187_v45, 0.0  ;;  %v2840_v10 = vmul.f32 %v8112_v36, %v8116_v23  ;;  %v2632_v31 = vmul.f32 %v8090_v51, %v8116_v23 }
 0x21f   :  { %2322 = vst [vmem:[#allocation2 + $0x20] sm:$0xff] %v2290_v42  ;;  %v2291_v24 = vmax.f32 %v2179_v17, 0.0  ;;  %v2630_v53 = vmul.f32 %v8090_v51, %v2290_v42  ;;  %v2838_v62 = vmul.f32 %v8112_v36, %v2290_v42  ;;  %v2394_v7 = vmul.f32 %v8081_v26, %v2290_v42  ;;  %v8160_v42 = vld [vmem:[%s10319_s4 + $0x3] ss:$0 sm:$0xff] }
 0x220   :  { %2325 = vst [vmem:[#allocation2 + $0x38] sm:$0xff] %v8121_v33 }
 0x221   :  { %2323 = vst [vmem:[#allocation2 + $0x28] sm:$0xff] %v2291_v24  ;;  %v2870_v19 = vadd.f32 %v2838_v62, %v2800_v40  ;;  %v2662_v54 = vadd.f32 %v2630_v53, %v2592_v25  ;;  %v2395_v59 = vmul.f32 %v8081_v26, %v2291_v24  ;;  %v2631_v2 = vmul.f32 %v8090_v51, %v2291_v24 }
 0x222   :  { %v2839_v18 = vmul.f32 %v8112_v36, %v2291_v24 }
 0x226   :  { %v2425_v57 = vld [vmem:[#allocation2 + $0x19] sm:$0xff] }
 0x227   :  { %v2525_v15 = vld [vmem:[#allocation2 + $0x1a] sm:$0xff]  ;;  %v2699_v27 = vmul.f32 %v8102_v28, %v2425_v57  ;;  %v2461_v29 = vmul.f32 %v8084_v41, %v2425_v57 }
 0x228   :  { %v2426_v56 = vld [vmem:[#allocation2 + $0x21] sm:$0xff]  ;;  %v2427_v48 = vld [vmem:[#allocation2 + $0x29] sm:$0xff]  ;;  %v2769_v13 = vmul.f32 %v8105_v8, %v2525_v15  ;;  %v2561_v50 = vmul.f32 %v8087_v12, %v2525_v15 }
 0x229   :  { %v2526_v49 = vld [vmem:[#allocation2 + $0x22] sm:$0xff]  ;;  %v2462_v22 = vmul.f32 %v8084_v41, %v2426_v56  ;;  %v2463_v14 = vmul.f32 %v8084_v41, %v2427_v48  ;;  %v2731_v11 = vadd.f32 %v2699_v27, %v2661_v4  ;;  %v2908_v32 = vmul.f32 %v8128_v44, %v2426_v56  ;;  %v2527_v20 = vld [vmem:[#allocation2 + $0x2a] sm:$0xff] }
 0x22a   :  { %v2493_v46 = vadd.f32 %v2461_v29, %v2393_v9  ;;  %v2978_v35 = vmul.f32 %v8133_v1, %v2526_v49  ;;  %v2909_v38 = vmul.f32 %v8128_v44, %v2427_v48  ;;  %v2700_v4 = vmul.f32 %v8102_v28, %v2426_v56 }
 0x22b   :  { %v2494_v39 = vadd.f32 %v2462_v22, %v2394_v7  ;;  %v2801_v34 = vadd.f32 %v2769_v13, %v2731_v11  ;;  %v2940_v60 = vadd.f32 %v2908_v32, %v2870_v19  ;;  %v2495_v43 = vadd.f32 %v2463_v14, %v2395_v59 }
 0x22c   :  { %v2593_v37 = vadd.f32 %v2561_v50, %v2493_v46  ;;  %v2701_v61 = vmul.f32 %v8102_v28, %v2427_v48  ;;  %v2562_v5 = vmul.f32 %v8087_v12, %v2526_v49  ;;  %v2732_v40 = vadd.f32 %v2700_v4, %v2662_v54 }
 0x22d   :  { %v2871_v58 = vadd.f32 %v2839_v18, %v2801_v34  ;;  %v3010_v45 = vadd.f32 %v2978_v35, %v2940_v60  ;;  %v2770_v30 = vmul.f32 %v8105_v8, %v2526_v49  ;;  %v2563_v24 = vmul.f32 %v8087_v12, %v2527_v20 }
 0x22e   :  { %v2663_v17 = vadd.f32 %v2631_v2, %v2593_v37  ;;  %v2979_v62 = vmul.f32 %v8133_v1, %v2527_v20  ;;  %v2594_v25 = vadd.f32 %v2562_v5, %v2494_v39  ;;  %v2633_v19 = vmul.f32 %v8090_v51, %v8121_v33  ;;  %v2428_v2 = vld [vmem:[#allocation2 + $0x31] sm:$0xff] }
 0x22f   :  { %v2941_v53 = vadd.f32 %v2909_v38, %v2871_v58  ;;  %v2771_v15 = vmul.f32 %v8105_v8, %v2527_v20  ;;  %v2802_v9 = vadd.f32 %v2770_v30, %v2732_v40  ;;  %v2595_v27 = vadd.f32 %v2563_v24, %v2495_v43 }
 0x230   :  { %v2733_v57 = vadd.f32 %v2701_v61, %v2663_v17  ;;  %v3046_v7 = vadd.f32 %v8160_v42, %v3010_v45  ;;  %v2664_v54 = vadd.f32 %v2632_v31, %v2594_v25  ;;  %v2841_v56 = vmul.f32 %v8112_v36, %v8121_v33  ;;  %v2528_v31 = vld [vmem:[#allocation2 + $0x32] sm:$0xff] }
 0x231   :  { %v3011_v29 = vadd.f32 %v2979_v62, %v2941_v53  ;;  %v2872_v48 = vadd.f32 %v2840_v10, %v2802_v9  ;;  %v8171_v49 = vadd.f32 %v2633_v19, %v2595_v27  ;;  %v2910_v18 = vmul.f32 %v8128_v44, %v2428_v2 }
 0x232   :  { %v2803_v59 = vadd.f32 %v2771_v15, %v2733_v57  ;;  %v3078_v14 = vmax.f32 %v3046_v7, 0.0  ;;  %v2702_v46 = vmul.f32 %v8102_v28, %v2428_v2  ;;  %v2464_v50 = vmul.f32 %v8084_v41, %v2428_v2 }
 0x233   :  { %v3047_v13 = vadd.f32 %v8160_v42, %v3011_v29  ;;  %v2942_v20 = vadd.f32 %v2910_v18, %v2872_v48  ;;  %v2396_v35 = vmul.f32 %v8081_v26, %v8116_v23  ;;  %v2980_v37 = vmul.f32 %v8133_v1, %v2528_v31 }
 0x234   :  { %v2873_v22 = vadd.f32 %v2841_v56, %v2803_v59  ;;  %v2734_v10 = vadd.f32 %v2702_v46, %v2664_v54  ;;  %v2772_v4 = vmul.f32 %v8105_v8, %v2528_v31  ;;  %v2564_v23 = vmul.f32 %v8087_v12, %v2528_v31 }
 0x235   :  { %v3079_v11 = vmax.f32 %v3047_v13, 0.0  ;;  %v2496_v5 = vadd.f32 %v2464_v50, %v2396_v35  ;;  %v3012_v30 = vadd.f32 %v2980_v37, %v2942_v20  ;;  %v2397_v29 = vmul.f32 %v8081_v26, %v8121_v33 }
 0x236   :  { %v2804_v24 = vadd.f32 %v2772_v4, %v2734_v10 }
 0x237   :  { %v3110_v32 = vpack.c.bf16 %v3079_v11, %v3078_v14  ;;  %v2596_v57 = vadd.f32 %v2564_v23, %v2496_v5  ;;  %v8192_v15 = vadd.f32 %v8160_v42, %v3012_v30 }
 0x239   :  { %6070 = vmatprep.mubr.bf16.mxu1 %v3110_v32  ;;  %v3080_v7 = vmax.f32 %v8192_v15, 0.0 }
 0x252   :  { %v6032_v39 = vpop.f32.mrb[8].mxu0 }
 0x253   :  { %v2200_v34 = vadd.f32 %v6032_v39, %v8068_v63  ;;  %v2191_v60 = vpop.f32.mrb[9].mxu0 }
 0x254   :  { %v2192_v43 = vadd.f32 %v8068_v63, %v2191_v60  ;;  %v6033_v38 = vpop.f32.mrb[10].mxu0 }
 0x255   :  { %v2296_v58 = vmax.f32 %v2200_v34, 0.0  ;;  %v2203_v45 = vadd.f32 %v6033_v38, %v8068_v63  ;;  %v2194_v61 = vpop.f32.mrb[11].mxu0 }
 0x256   :  { %v2294_v17 = vmax.f32 %v2192_v43, 0.0  ;;  %v2195_v40 = vadd.f32 %v8068_v63, %v2194_v61 }
 0x257   :  { %2328 = vst [vmem:[#allocation2 + $0x50] sm:$0xff] %v2296_v58  ;;  %v2297_v53 = vmax.f32 %v2203_v45, 0.0  ;;  %v8198_v54 = vmul.f32 %v8081_v26, %v2296_v58  ;;  %v8201_v59 = vmul.f32 %v8112_v36, %v2296_v58  ;;  %v8213_v33 = vmul.f32 %v8090_v51, %v2296_v58 }
 0x258   :  { %2326 = vst [vmem:[#allocation2 + $0x40] sm:$0xff] %v2294_v17  ;;  %v8186_v62 = vmax.f32 %v2195_v40, 0.0  ;;  %v2842_v25 = vmul.f32 %v8112_v36, %v2294_v17  ;;  %v2634_v19 = vmul.f32 %v8090_v51, %v2294_v17  ;;  %v8204_v13 = vmul.f32 %v8081_v26, %v2294_v17 }
 0x259   :  { %2329 = vst [vmem:[#allocation2 + $0x58] sm:$0xff] %v2297_v53  ;;  %v8207_v14 = vmul.f32 %v8081_v26, %v2297_v53  ;;  %v8210_v11 = vmul.f32 %v8112_v36, %v2297_v53  ;;  %v8220_v46 = vmul.f32 %v8090_v51, %v2297_v53 }
 0x25a   :  { %2327 = vst [vmem:[#allocation2 + $0x48] sm:$0xff] %v8186_v62  ;;  %v2874_v9 = vadd.f32 %v2842_v25, %v2804_v24  ;;  %v2666_v27 = vadd.f32 %v2634_v19, %v2596_v57  ;;  %v2843_v18 = vmul.f32 %v8112_v36, %v8186_v62  ;;  %v2635_v60 = vmul.f32 %v8090_v51, %v8186_v62 }
 0x25f   :  { %v2429_v56 = vld [vmem:[#allocation2 + $0x39] sm:$0xff] }
 0x260   :  { %v2529_v48 = vld [vmem:[#allocation2 + $0x3a] sm:$0xff]  ;;  %v2911_v32 = vmul.f32 %v8128_v44, %v2429_v56  ;;  %v2703_v2 = vmul.f32 %v8102_v28, %v2429_v56  ;;  %v2465_v34 = vmul.f32 %v8084_v41, %v2429_v56 }
 0x261   :  { %v2981_v31 = vmul.f32 %v8133_v1, %v2529_v48  ;;  %v2430_v50 = vld [vmem:[#allocation2 + $0x41] sm:$0xff]  ;;  %v2431_v39 = vld [vmem:[#allocation2 + $0x49] sm:$0xff]  ;;  %v2773_v10 = vmul.f32 %v8105_v8, %v2529_v48  ;;  %v2565_v4 = vmul.f32 %v8087_v12, %v2529_v48 }
 0x262   :  { %v8223_v20 = vld [vmem:[#allocation2 + $0x42] sm:$0xff]  ;;  %v2943_v35 = vadd.f32 %v2911_v32, %v2873_v22  ;;  %v2531_v43 = vld [vmem:[#allocation2 + $0x4a] sm:$0xff]  ;;  %v2735_v38 = vadd.f32 %v2703_v2, %v8171_v49  ;;  %v2912_v37 = vmul.f32 %v8128_v44, %v2430_v50  ;;  %v2913_v58 = vmul.f32 %v8128_v44, %v2431_v39 }
 0x263   :  { %v2982_v45 = vmul.f32 %v8133_v1, %v8223_v20  ;;  %v2497_v61 = vadd.f32 %v2465_v34, %v2397_v29  ;;  %v2704_v5 = vmul.f32 %v8102_v28, %v2430_v50  ;;  %v2983_v22 = vmul.f32 %v8133_v1, %v2531_v43 }
 0x264   :  { %v3013_v40 = vadd.f32 %v2981_v31, %v2943_v35  ;;  %v2805_v30 = vadd.f32 %v2773_v10, %v2735_v38  ;;  %v2944_v24 = vadd.f32 %v2912_v37, %v2874_v9  ;;  %v2705_v25 = vmul.f32 %v8102_v28, %v2431_v39  ;;  %v2432_v37 = vld [vmem:[#allocation2 + $0x51] sm:$0xff] }
 0x265   :  { %v6036_v17 = vpop.f32.mrb[12].mxu0  ;;  %v2597_v23 = vadd.f32 %v2565_v4, %v2497_v61  ;;  %v2736_v19 = vadd.f32 %v2704_v5, %v2666_v27  ;;  %v2774_v10 = vmul.f32 %v8105_v8, %v8223_v20  ;;  %v2532_v4 = vld [vmem:[#allocation2 + $0x52] sm:$0xff]  ;;  %v2775_v61 = vmul.f32 %v8105_v8, %v2531_v43 }
 0x266   :  { %v2216_v49 = vadd.f32 %v6036_v17, %v8068_v63  ;;  %v2207_v53 = vpop.f32.mrb[13].mxu0  ;;  %v3049_v29 = vadd.f32 %v8160_v42, %v3013_v40  ;;  %v2875_v56 = vadd.f32 %v2843_v18, %v2805_v30  ;;  %v3014_v48 = vadd.f32 %v2982_v45, %v2944_v24 }
 0x267   :  { %v2208_v57 = vadd.f32 %v8068_v63, %v2207_v53  ;;  %v6037_v15 = vpop.f32.mrb[14].mxu0  ;;  %v2667_v31 = vadd.f32 %v2635_v60, %v2597_v23  ;;  %v2806_v5 = vadd.f32 %v2774_v10, %v2736_v19  ;;  %v2466_v53 = vmul.f32 %v8084_v41, %v2430_v50 }
 0x268   :  { %v8241_v32 = vmax.f32 %v2216_v49, 0.0  ;;  %v2219_v9 = vadd.f32 %v6037_v15, %v8068_v63  ;;  %v2210_v2 = vpop.f32.mrb[15].mxu0  ;;  %v3081_v35 = vmax.f32 %v3049_v29, 0.0  ;;  %v2945_v38 = vadd.f32 %v2913_v58, %v2875_v56 }
 0x269   :  { %v8246_v34 = vmax.f32 %v2208_v57, 0.0  ;;  %v2211_v27 = vadd.f32 %v8068_v63, %v2210_v2  ;;  %v2737_v45 = vadd.f32 %v2705_v25, %v2667_v31  ;;  %v3050_v30 = vadd.f32 %v8160_v42, %v3014_v48 }
 0x26a   :  { %2332 = vst [vmem:[#allocation2 + $0x70] sm:$0xff] %v8241_v32  ;;  %v8250_v18 = vmax.f32 %v2219_v9, 0.0  ;;  %v3111_v17 = vpack.c.bf16 %v3081_v35, %v3080_v7  ;;  %v3015_v40 = vadd.f32 %v2983_v22, %v2945_v38  ;;  %v2876_v24 = vadd.f32 %v8201_v59, %v2806_v5 }
 0x26b   :  { %2330 = vst [vmem:[#allocation2 + $0x60] sm:$0xff] %v8246_v34  ;;  %v8254_v60 = vmax.f32 %v2211_v27, 0.0  ;;  %v2807_v58 = vadd.f32 %v2775_v61, %v2737_v45  ;;  %v2914_v49 = vmul.f32 %v8128_v44, %v2432_v37  ;;  %v2399_v23 = vmul.f32 %v8081_v26, %v8186_v62 }
 0x26c   :  { %2333 = vst [vmem:[#allocation2 + $0x78] sm:$0xff] %v8250_v18  ;;  %6071 = vmatmul.mubr.bf16.vlgmr.msra.gmra.mrb[0].mxu1 %v3111_v17  ;;  %v3051_v7 = vadd.f32 %v8160_v42, %v3015_v40  ;;  %v2984_v22 = vmul.f32 %v8133_v1, %v2532_v4  ;;  %v2467_v25 = vmul.f32 %v8084_v41, %v2431_v39  ;;  %v3082_v15 = vmax.f32 %v3050_v30, 0.0 }
 0x26d   :  { %2331 = vst [vmem:[#allocation2 + $0x68] sm:$0xff] %v8254_v60  ;;  %v2877_v19 = vadd.f32 %v8210_v11, %v2807_v58  ;;  %v2946_v57 = vadd.f32 %v2914_v49, %v2876_v24  ;;  %v2498_v59 = vadd.f32 %v2466_v53, %v8204_v13  ;;  %v2566_v50 = vmul.f32 %v8087_v12, %v8223_v20 }
 0x26e   :  { %v3083_v29 = vmax.f32 %v3051_v7, 0.0  ;;  %v2499_v56 = vadd.f32 %v2467_v25, %v2399_v23  ;;  %v2567_v48 = vmul.f32 %v8087_v12, %v2531_v43  ;;  %v2706_v2 = vmul.f32 %v8102_v28, %v2432_v37 }
 0x26f   :  { %v3016_v62 = vadd.f32 %v2984_v22, %v2946_v57  ;;  %v2598_v9 = vadd.f32 %v2566_v50, %v2498_v59  ;;  %v2776_v31 = vmul.f32 %v8105_v8, %v2532_v4  ;;  %v2846_v11 = vmul.f32 %v8112_v36, %v8246_v34 }
 0x270   :  { %v3112_v39 = vpack.c.bf16 %v3083_v29, %v3082_v15  ;;  %v2599_v10 = vadd.f32 %v2567_v48, %v2499_v56  ;;  %v2847_v13 = vmul.f32 %v8112_v36, %v8254_v60  ;;  %v2468_v38 = vmul.f32 %v8084_v41, %v2432_v37 }
 0x271   :  { %v3052_v35 = vadd.f32 %v8160_v42, %v3016_v62  ;;  %v2668_v43 = vadd.f32 %v8213_v33, %v2598_v9  ;;  %v2568_v45 = vmul.f32 %v8087_v12, %v2532_v4  ;;  %v2638_v9 = vmul.f32 %v8090_v51, %v8246_v34 }
 0x272   :  { %v2433_v20 = vld [vmem:[#allocation2 + $0x59] sm:$0xff]  ;;  %6074 = vmatprep.mubr.bf16.mxu1 %v3112_v39  ;;  %v2669_v17 = vadd.f32 %v8220_v46, %v2599_v10  ;;  %v2500_v50 = vadd.f32 %v2468_v38, %v8198_v54 }
 0x273   :  { %v2533_v27 = vld [vmem:[#allocation2 + $0x5a] sm:$0xff]  ;;  %v2915_v61 = vmul.f32 %v8128_v44, %v2433_v20  ;;  %v2707_v40 = vmul.f32 %v8102_v28, %v2433_v20  ;;  %v3084_v30 = vmax.f32 %v3052_v35, 0.0  ;;  %v2738_v33 = vadd.f32 %v2706_v2, %v2668_v43 }
 0x274   :  { %v2985_v5 = vmul.f32 %v8133_v1, %v2533_v27  ;;  %v8286_v58 = vld [vmem:[#allocation2 + $0x61] sm:$0xff]  ;;  %v8288_v24 = vld [vmem:[#allocation2 + $0x69] sm:$0xff]  ;;  %v2777_v37 = vmul.f32 %v8105_v8, %v2533_v27  ;;  %v2469_v4 = vmul.f32 %v8084_v41, %v2433_v20  ;;  %v2569_v56 = vmul.f32 %v8087_v12, %v2533_v27 }
 0x275   :  { %v8290_v49 = vld [vmem:[#allocation2 + $0x62] sm:$0xff]  ;;  %v2947_v53 = vadd.f32 %v2915_v61, %v2877_v19  ;;  %v8294_v23 = vld [vmem:[#allocation2 + $0x6a] sm:$0xff]  ;;  %v2739_v7 = vadd.f32 %v2707_v40, %v2669_v17  ;;  %v2916_v46 = vmul.f32 %v8128_v44, %v8286_v58  ;;  %v2917_v22 = vmul.f32 %v8128_v44, %v8288_v24 }
 0x276   :  { %v2808_v25 = vadd.f32 %v2776_v31, %v2738_v33  ;;  %v2986_v57 = vmul.f32 %v8133_v1, %v8290_v49  ;;  %v2987_v59 = vmul.f32 %v8133_v1, %v8294_v23  ;;  %v2501_v29 = vadd.f32 %v2469_v4, %v8207_v14 }
 0x277   :  { %v3017_v15 = vadd.f32 %v2985_v5, %v2947_v53  ;;  %v2809_v19 = vadd.f32 %v2777_v37, %v2739_v7  ;;  %v2600_v62 = vadd.f32 %v2568_v45, %v2500_v50  ;;  %v2639_v2 = vmul.f32 %v8090_v51, %v8254_v60 }
 0x278   :  { %v2878_v48 = vadd.f32 %v2846_v11, %v2808_v25  ;;  %v2601_v10 = vadd.f32 %v2569_v56, %v2501_v29  ;;  %v2708_v54 = vmul.f32 %v8102_v28, %v8286_v58  ;;  %v2709_v11 = vmul.f32 %v8102_v28, %v8288_v24 }
 0x279   :  { %v3053_v31 = vadd.f32 %v8160_v42, %v3017_v15  ;;  %v2879_v39 = vadd.f32 %v2847_v13, %v2809_v19  ;;  %v2670_v14 = vadd.f32 %v2638_v9, %v2600_v62  ;;  %v2778_v27 = vmul.f32 %v8105_v8, %v8290_v49  ;;  %v2436_v19 = vld [vmem:[#allocation2 + $0x71] sm:$0xff] }
 0x27a   :  { %v6040_v20 = vpop.f32.mrb[16].mxu0  ;;  %v2948_v35 = vadd.f32 %v2916_v46, %v2878_v48  ;;  %v2671_v5 = vadd.f32 %v2639_v2, %v2601_v10  ;;  %v2779_v37 = vmul.f32 %v8105_v8, %v8294_v23  ;;  %v2402_v62 = vmul.f32 %v8081_v26, %v8246_v34  ;;  %v2536_v9 = vld [vmem:[#allocation2 + $0x72] sm:$0xff] }
 0x27b   :  { %v2232_v43 = vadd.f32 %v6040_v20, %v8068_v63  ;;  %v2223_v38 = vpop.f32.mrb[17].mxu0  ;;  %v3085_v45 = vmax.f32 %v3053_v31, 0.0  ;;  %v2949_v61 = vadd.f32 %v2917_v22, %v2879_v39  ;;  %v2740_v33 = vadd.f32 %v2708_v54, %v2670_v14 }
 0x27c   :  { %v2224_v13 = vadd.f32 %v8068_v63, %v2223_v38  ;;  %v6041_v17 = vpop.f32.mrb[18].mxu0  ;;  %v3018_v40 = vadd.f32 %v2986_v57, %v2948_v35  ;;  %v2741_v29 = vadd.f32 %v2709_v11, %v2671_v5  ;;  %v2849_v31 = vmul.f32 %v8112_v36, %v8250_v18 }
 0x27d   :  { %v8322_v4 = vmax.f32 %v2232_v43, 0.0  ;;  %v2235_v53 = vadd.f32 %v6041_v17, %v8068_v63  ;;  %v2226_v7 = vpop.f32.mrb[19].mxu0  ;;  %v3113_v46 = vpack.c.bf16 %v3085_v45, %v3084_v30  ;;  %v3019_v25 = vadd.f32 %v2987_v59, %v2949_v61 }
 0x27e   :  { %v8325_v50 = vmax.f32 %v2224_v13, 0.0  ;;  %v2227_v22 = vadd.f32 %v8068_v63, %v2226_v7  ;;  %v3054_v15 = vadd.f32 %v8160_v42, %v3018_v40  ;;  %v2810_v48 = vadd.f32 %v2778_v27, %v2740_v33 }
 0x27f   :  { %2336 = vst [vmem:[#allocation2 + $0x90] sm:$0xff] %v8322_v4  ;;  %v8330_v57 = vmax.f32 %v2235_v53, 0.0  ;;  %6075 = vmatmul.mubr.bf16.gmra.mrb[4].mxu1 %v3113_v46  ;;  %v3055_v56 = vadd.f32 %v8160_v42, %v3019_v25  ;;  %v2848_v30 = vmul.f32 %v8112_v36, %v8241_v32  ;;  %v2811_v2 = vadd.f32 %v2779_v37, %v2741_v29 }
 0x280   :  { %2334 = vst [vmem:[#allocation2 + $0x80] sm:$0xff] %v8325_v50  ;;  %v8336_v59 = vmax.f32 %v2227_v22, 0.0  ;;  %v3086_v39 = vmax.f32 %v3054_v15, 0.0  ;;  %v2918_v20 = vmul.f32 %v8128_v44, %v2436_v19  ;;  %v2403_v35 = vmul.f32 %v8081_v26, %v8254_v60 }
 0x281   :  { %2337 = vst [vmem:[#allocation2 + $0x98] sm:$0xff] %v8330_v57  ;;  %v3087_v10 = vmax.f32 %v3055_v56, 0.0  ;;  %v2880_v54 = vadd.f32 %v2848_v30, %v2810_v48  ;;  %v2404_v34 = vmul.f32 %v8081_v26, %v8241_v32  ;;  %v2881_v14 = vadd.f32 %v2849_v31, %v2811_v2 }
 0x282   :  { %2335 = vst [vmem:[#allocation2 + $0x88] sm:$0xff] %v8336_v59  ;;  %v2470_v11 = vmul.f32 %v8084_v41, %v8286_v58  ;;  %v2988_v38 = vmul.f32 %v8133_v1, %v2536_v9  ;;  %v2471_v45 = vmul.f32 %v8084_v41, %v8288_v24  ;;  %v2405_v61 = vmul.f32 %v8081_v26, %v8250_v18 }
 0x283   :  { %v3114_v27 = vpack.c.bf16 %v3087_v10, %v3086_v39  ;;  %v2950_v43 = vadd.f32 %v2918_v20, %v2880_v54  ;;  %v2570_v60 = vmul.f32 %v8087_v12, %v8290_v49  ;;  %v2571_v13 = vmul.f32 %v8087_v12, %v8294_v23 }
 0x284   :  { %v2502_v5 = vadd.f32 %v2470_v11, %v2402_v62  ;;  %v2503_v58 = vadd.f32 %v2471_v45, %v2403_v35  ;;  %v2640_v40 = vmul.f32 %v8090_v51, %v8241_v32  ;;  %v2641_v33 = vmul.f32 %v8090_v51, %v8250_v18 }
 0x285   :  { %6078 = vmatprep.mubr.bf16.mxu1 %v3114_v27  ;;  %v3020_v17 = vadd.f32 %v2988_v38, %v2950_v43  ;;  %v2710_v37 = vmul.f32 %v8102_v28, %v2436_v19  ;;  %v2780_v53 = vmul.f32 %v8105_v8, %v2536_v9  ;;  %v2850_v49 = vmul.f32 %v8112_v36, %v8325_v50 }
 0x286   :  { %v2602_v24 = vadd.f32 %v2570_v60, %v2502_v5  ;;  %v2603_v25 = vadd.f32 %v2571_v13, %v2503_v58  ;;  %v2851_v22 = vmul.f32 %v8112_v36, %v8336_v59  ;;  %v2472_v32 = vmul.f32 %v8084_v41, %v2436_v19 }
 0x287   :  { %v2437_v7 = vld [vmem:[#allocation2 + $0x79] sm:$0xff]  ;;  %v3056_v23 = vadd.f32 %v8160_v42, %v3020_v17  ;;  %v2572_v13 = vmul.f32 %v8087_v12, %v2536_v9 }
 0x288   :  { %v2537_v46 = vld [vmem:[#allocation2 + $0x7a] sm:$0xff]  ;;  %v2919_v18 = vmul.f32 %v8128_v44, %v2437_v7  ;;  %v2672_v29 = vadd.f32 %v2640_v40, %v2602_v24  ;;  %v2711_v56 = vmul.f32 %v8102_v28, %v2437_v7  ;;  %v2673_v31 = vadd.f32 %v2641_v33, %v2603_v25 }
 0x289   :  { %v2989_v15 = vmul.f32 %v8133_v1, %v2537_v46  ;;  %v3088_v48 = vmax.f32 %v3056_v23, 0.0  ;;  %v8375_v30 = vld [vmem:[#allocation2 + $0x81] sm:$0xff]  ;;  %v8377_v62 = vld [vmem:[#allocation2 + $0x89] sm:$0xff]  ;;  %v2781_v39 = vmul.f32 %v8105_v8, %v2537_v46  ;;  %v2473_v10 = vmul.f32 %v8084_v41, %v2437_v7 }
 0x28a   :  { %v8379_v2 = vld [vmem:[#allocation2 + $0x82] sm:$0xff]  ;;  %v2951_v19 = vadd.f32 %v2919_v18, %v2881_v14  ;;  %v8383_v54 = vld [vmem:[#allocation2 + $0x8a] sm:$0xff]  ;;  %v2742_v20 = vadd.f32 %v2710_v37, %v2672_v29  ;;  %v2920_v35 = vmul.f32 %v8128_v44, %v8375_v30  ;;  %v2921_v11 = vmul.f32 %v8128_v44, %v8377_v62 }
 0x28b   :  { %v2743_v27 = vadd.f32 %v2711_v56, %v2673_v31  ;;  %v2990_v43 = vmul.f32 %v8133_v1, %v8379_v2  ;;  %v2991_v38 = vmul.f32 %v8133_v1, %v8383_v54  ;;  %v2504_v45 = vadd.f32 %v2472_v32, %v2404_v34 }
 0x28c   :  { %v3021_v5 = vadd.f32 %v2989_v15, %v2951_v19  ;;  %v2812_v60 = vadd.f32 %v2780_v53, %v2742_v20  ;;  %v2505_v14 = vadd.f32 %v2473_v10, %v2405_v61  ;;  %v6044_v17 = vpop.f32.mrb[20].mxu0  ;;  %v2573_v40 = vmul.f32 %v8087_v12, %v2537_v46 }
 0x28d   :  { %v2813_v58 = vadd.f32 %v2781_v39, %v2743_v27  ;;  %v2642_v33 = vmul.f32 %v8090_v51, %v8325_v50  ;;  %v2643_v24 = vmul.f32 %v8090_v51, %v8336_v59  ;;  %v2248_v37 = vadd.f32 %v6044_v17, %v8068_v63  ;;  %v2239_v7 = vpop.f32.mrb[21].mxu0 }
 0x28e   :  { %v3057_v34 = vadd.f32 %v8160_v42, %v3021_v5  ;;  %v2882_v23 = vadd.f32 %v2850_v49, %v2812_v60  ;;  %v2604_v53 = vadd.f32 %v2572_v13, %v2504_v45  ;;  %v2240_v61 = vadd.f32 %v8068_v63, %v2239_v7  ;;  %v6045_v9 = vpop.f32.mrb[22].mxu0 }
 0x28f   :  { %v2883_v25 = vadd.f32 %v2851_v22, %v2813_v58  ;;  %v2605_v32 = vadd.f32 %v2573_v40, %v2505_v14  ;;  %v2712_v46 = vmul.f32 %v8102_v28, %v8375_v30  ;;  %v8404_v18 = vmax.f32 %v2248_v37, 0.0  ;;  %v2242_v29 = vpop.f32.mrb[23].mxu0  ;;  %v2440_v58 = vld [vmem:[#allocation2 + $0x91] sm:$0xff] }
 0x290   :  { %v2251_v15 = vadd.f32 %v6045_v9, %v8068_v63  ;;  %v3089_v56 = vmax.f32 %v3057_v34, 0.0  ;;  %v2952_v31 = vadd.f32 %v2920_v35, %v2882_v23  ;;  %v8407_v39 = vmax.f32 %v2240_v61, 0.0  ;;  %v8432_v40 = vld [vmem:[#allocation2 + $0x92] sm:$0xff] }
 0x291   :  { %v2243_v49 = vadd.f32 %v8068_v63, %v2242_v29  ;;  %v2953_v10 = vadd.f32 %v2921_v11, %v2883_v25  ;;  %v2674_v19 = vadd.f32 %v2642_v33, %v2604_v53  ;;  %2340 = vst [vmem:[#allocation2 + $0xb0] sm:$0xff] %v8404_v18  ;;  %v2675_v45 = vadd.f32 %v2643_v24, %v2605_v32 }
 0x292   :  { %v8411_v22 = vmax.f32 %v2251_v15, 0.0  ;;  %v3115_v20 = vpack.c.bf16 %v3089_v56, %v3088_v48  ;;  %v3022_v27 = vadd.f32 %v2990_v43, %v2952_v31  ;;  %2338 = vst [vmem:[#allocation2 + $0xa0] sm:$0xff] %v8407_v39  ;;  %v2713_v35 = vmul.f32 %v8102_v28, %v8377_v62 }
 0x293   :  { %v8414_v5 = vmax.f32 %v2243_v49, 0.0  ;;  %v3023_v60 = vadd.f32 %v2991_v38, %v2953_v10  ;;  %v2744_v14 = vadd.f32 %v2712_v46, %v2674_v19  ;;  %v2406_v11 = vmul.f32 %v8081_v26, %v8325_v50 }
 0x294   :  { %2341 = vst [vmem:[#allocation2 + $0xb8] sm:$0xff] %v8411_v22  ;;  %6079 = vmatmul.mubr.bf16.gmra.mrb[8].mxu1 %v3115_v20  ;;  %v2407_v48 = vmul.f32 %v8081_v26, %v8336_v59  ;;  %v3058_v43 = vadd.f32 %v8160_v42, %v3022_v27  ;;  %v2782_v13 = vmul.f32 %v8105_v8, %v8379_v2 }
 0x295   :  { %2339 = vst [vmem:[#allocation2 + $0xa8] sm:$0xff] %v8414_v5  ;;  %v3059_v38 = vadd.f32 %v8160_v42, %v3023_v60  ;;  %v8430_v17 = vmul.f32 %v8081_v26, %v8322_v4  ;;  %v2745_v50 = vadd.f32 %v2713_v35, %v2675_v45  ;;  %v2783_v59 = vmul.f32 %v8105_v8, %v8383_v54 }
 0x296   :  { %v8438_v33 = vmul.f32 %v8081_v26, %v8330_v57  ;;  %v2814_v24 = vadd.f32 %v2782_v13, %v2744_v14  ;;  %v2852_v37 = vmul.f32 %v8112_v36, %v8322_v4  ;;  %v2853_v7 = vmul.f32 %v8112_v36, %v8330_v57 }
 0x297   :  { %v3090_v34 = vmax.f32 %v3058_v43, 0.0  ;;  %v3091_v23 = vmax.f32 %v3059_v38, 0.0  ;;  %v2815_v53 = vadd.f32 %v2783_v59, %v2745_v50  ;;  %v2474_v61 = vmul.f32 %v8084_v41, %v8375_v30 }
 0x298   :  { %v2884_v9 = vadd.f32 %v2852_v37, %v2814_v24  ;;  %v2922_v25 = vmul.f32 %v8128_v44, %v2440_v58  ;;  %v2992_v32 = vmul.f32 %v8133_v1, %v8432_v40  ;;  %v2475_v46 = vmul.f32 %v8084_v41, %v8377_v62 }
 0x299   :  { %v3116_v15 = vpack.c.bf16 %v3091_v23, %v3090_v34  ;;  %v2885_v29 = vadd.f32 %v2853_v7, %v2815_v53  ;;  %v2506_v56 = vadd.f32 %v2474_v61, %v2406_v11  ;;  %v2574_v31 = vmul.f32 %v8087_v12, %v8379_v2  ;;  %v2441_v49 = vld [vmem:[#allocation2 + $0x99] sm:$0xff] }
 0x29a   :  { %v8453_v10 = vld [vmem:[#allocation2 + $0x9a] sm:$0xff]  ;;  %v2954_v19 = vadd.f32 %v2922_v25, %v2884_v9  ;;  %v2507_v30 = vadd.f32 %v2475_v46, %v2407_v48  ;;  %v2575_v20 = vmul.f32 %v8087_v12, %v8383_v54  ;;  %v2644_v27 = vmul.f32 %v8090_v51, %v8322_v4 }
 0x29b   :  { %6082 = vmatprep.mubr.bf16.mxu1 %v3116_v15  ;;  %v2923_v62 = vmul.f32 %v8128_v44, %v2441_v49  ;;  %v2606_v45 = vadd.f32 %v2574_v31, %v2506_v56  ;;  %v2645_v60 = vmul.f32 %v8090_v51, %v8330_v57  ;;  %v2714_v2 = vmul.f32 %v8102_v28, %v2440_v58 }
 0x29c   :  { %v2993_v35 = vmul.f32 %v8133_v1, %v8453_v10  ;;  %v3024_v14 = vadd.f32 %v2992_v32, %v2954_v19  ;;  %v8465_v11 = vld [vmem:[#allocation2 + $0xa1] sm:$0xff]  ;;  %v8467_v48 = vld [vmem:[#allocation2 + $0xa9] sm:$0xff]  ;;  %v2607_v54 = vadd.f32 %v2575_v20, %v2507_v30  ;;  %v2715_v4 = vmul.f32 %v8102_v28, %v2441_v49 }
 0x29d   :  { %v2955_v43 = vadd.f32 %v2923_v62, %v2885_v29  ;;  %v8470_v13 = vld [vmem:[#allocation2 + $0xa2] sm:$0xff]  ;;  %v8472_v38 = vld [vmem:[#allocation2 + $0xaa] sm:$0xff]  ;;  %v2676_v50 = vadd.f32 %v2644_v27, %v2606_v45  ;;  %v2784_v57 = vmul.f32 %v8105_v8, %v8432_v40  ;;  %v2785_v59 = vmul.f32 %v8105_v8, %v8453_v10 }
 0x29e   :  { %v3060_v24 = vadd.f32 %v8160_v42, %v3024_v14  ;;  %v2677_v37 = vadd.f32 %v2645_v60, %v2607_v54  ;;  %v2854_v7 = vmul.f32 %v8112_v36, %v8407_v39  ;;  %v2855_v34 = vmul.f32 %v8112_v36, %v8414_v5 }
 0x29f   :  { %v3025_v23 = vadd.f32 %v2993_v35, %v2955_v43  ;;  %v2746_v53 = vadd.f32 %v2714_v2, %v2676_v50  ;;  %v2924_v61 = vmul.f32 %v8128_v44, %v8465_v11  ;;  %v2925_v9 = vmul.f32 %v8128_v44, %v8467_v48 }
 0x2a0   :  { %v6048_v25 = vpop.f32.mrb[24].mxu0  ;;  %v3092_v32 = vmax.f32 %v3060_v24, 0.0  ;;  %v2747_v46 = vadd.f32 %v2715_v4, %v2677_v37  ;;  %v2994_v15 = vmul.f32 %v8133_v1, %v8470_v13  ;;  %v2995_v29 = vmul.f32 %v8133_v1, %v8472_v38 }
 0x2a1   :  { %v2264_v56 = vadd.f32 %v6048_v25, %v8068_v63  ;;  %v2255_v31 = vpop.f32.mrb[25].mxu0  ;;  %v3061_v19 = vadd.f32 %v8160_v42, %v3025_v23  ;;  %v2816_v30 = vadd.f32 %v2784_v57, %v2746_v53  ;;  %v2476_v20 = vmul.f32 %v8084_v41, %v2440_v58  ;;  %v8506_v58 = vld [vmem:[%s10319_s4 + $0x2] ss:$0 sm:$0xff] }
 0x2a2   :  { %v2256_v27 = vadd.f32 %v8068_v63, %v2255_v31  ;;  %v6049_v62 = vpop.f32.mrb[26].mxu0  ;;  %v2817_v45 = vadd.f32 %v2785_v59, %v2747_v46  ;;  %v2477_v60 = vmul.f32 %v8084_v41, %v2441_v49  ;;  %v2576_v2 = vmul.f32 %v8087_v12, %v8432_v40 }
 0x2a3   :  { %v8498_v35 = vmax.f32 %v2264_v56, 0.0  ;;  %v2267_v14 = vadd.f32 %v6049_v62, %v8068_v63  ;;  %v2258_v54 = vpop.f32.mrb[27].mxu0  ;;  %v3093_v4 = vmax.f32 %v3061_v19, 0.0  ;;  %v2886_v43 = vadd.f32 %v2854_v7, %v2816_v30 }
 0x2a4   :  { %v8501_v50 = vmax.f32 %v2256_v27, 0.0  ;;  %v2259_v57 = vadd.f32 %v8506_v58, %v2258_v54  ;;  %v2887_v49 = vadd.f32 %v2855_v34, %v2817_v45  ;;  %v2508_v59 = vadd.f32 %v2476_v20, %v8430_v17 }
 0x2a5   :  { %2344 = vst [vmem:[#allocation2 + $0xd0] sm:$0xff] %v8498_v35  ;;  %v8511_v40 = vmax.f32 %v2267_v14, 0.0  ;;  %v3117_v63 = vpack.c.bf16 %v3093_v4, %v3092_v32  ;;  %v2956_v24 = vadd.f32 %v2924_v61, %v2886_v43  ;;  %v2509_v37 = vadd.f32 %v2477_v60, %v8438_v33  ;;  %v8555_v43 = vld [vmem:[#allocation2 + $0xb2] sm:$0xff] }
 0x2a6   :  { %2342 = vst [vmem:[#allocation2 + $0xc0] sm:$0xff] %v8501_v50  ;;  %v8515_v7 = vmax.f32 %v2259_v57, 0.0  ;;  %v2957_v23 = vadd.f32 %v2925_v9, %v2887_v49  ;;  %v2577_v53 = vmul.f32 %v8087_v12, %v8453_v10  ;;  %v2608_v25 = vadd.f32 %v2576_v2, %v2508_v59 }
 0x2a7   :  { %2345 = vst [vmem:[#allocation2 + $0xd8] sm:$0xff] %v8511_v40  ;;  %6083 = vmatmul.mubr.bf16.gmra.mrb[12].mxu1 %v3117_v63  ;;  %v3026_v17 = vadd.f32 %v2994_v15, %v2956_v24  ;;  %v2646_v34 = vmul.f32 %v8090_v51, %v8407_v39  ;;  %v2716_v61 = vmul.f32 %v8102_v28, %v8465_v11 }
 0x2a8   :  { %2343 = vst [vmem:[#allocation2 + $0xc8] sm:$0xff] %v8515_v7  ;;  %v2410_v33 = vmul.f32 %v8081_v26, %v8407_v39  ;;  %v3027_v9 = vadd.f32 %v2995_v29, %v2957_v23  ;;  %v2609_v32 = vadd.f32 %v2577_v53, %v2509_v37  ;;  %v2647_v10 = vmul.f32 %v8090_v51, %v8414_v5  ;;  %v8541_v29 = vld [vmem:[#allocation2 + $0xb1] sm:$0xff] }
 0x2a9   :  { %v2411_v46 = vmul.f32 %v8081_v26, %v8414_v5  ;;  %v3062_v15 = vadd.f32 %v8160_v42, %v3026_v17  ;;  %v8534_v56 = vmul.f32 %v8081_v26, %v8404_v18  ;;  %v2678_v31 = vadd.f32 %v2646_v34, %v2608_v25 }
 0x2aa   :  { %v3063_v19 = vadd.f32 %v8160_v42, %v3027_v9  ;;  %v8539_v39 = vmul.f32 %v8081_v26, %v8411_v22  ;;  %v2679_v30 = vadd.f32 %v2647_v10, %v2609_v32  ;;  %v2717_v20 = vmul.f32 %v8102_v28, %v8467_v48 }
 0x2ab   :  { %v2748_v5 = vadd.f32 %v2716_v61, %v2678_v31  ;;  %v2786_v27 = vmul.f32 %v8105_v8, %v8470_v13  ;;  %v2787_v62 = vmul.f32 %v8105_v8, %v8472_v38  ;;  %v2856_v45 = vmul.f32 %v8112_v36, %v8404_v18 }
 0x2ac   :  { %v3094_v60 = vmax.f32 %v3062_v15, 0.0  ;;  %v3095_v2 = vmax.f32 %v3063_v19, 0.0  ;;  %v2749_v14 = vadd.f32 %v2717_v20, %v2679_v30  ;;  %v2478_v54 = vmul.f32 %v8084_v41, %v8465_v11 }
 0x2ad   :  { %v8553_v4 = vld [vmem:[#allocation2 + $0xb9] sm:$0xff]  ;;  %v2818_v57 = vadd.f32 %v2786_v27, %v2748_v5  ;;  %v2857_v49 = vmul.f32 %v8112_v36, %v8411_v22  ;;  %v2926_v59 = vmul.f32 %v8128_v44, %v8541_v29  ;;  %v2479_v63 = vmul.f32 %v8084_v41, %v8467_v48 }
 0x2ae   :  { %v3118_v24 = vpack.c.bf16 %v3095_v2, %v3094_v60  ;;  %v2819_v37 = vadd.f32 %v2787_v62, %v2749_v14  ;;  %v2927_v23 = vmul.f32 %v8128_v44, %v8553_v4  ;;  %v2578_v11 = vmul.f32 %v8087_v12, %v8470_v13  ;;  %v8567_v53 = vld [vmem:[#allocation2 + $0xba] sm:$0xff] }
 0x2af   :  { %v2888_v25 = vadd.f32 %v2856_v45, %v2818_v57  ;;  %v2510_v17 = vadd.f32 %v2478_v54, %v2410_v33  ;;  %v2511_v34 = vadd.f32 %v2479_v63, %v2411_v46  ;;  %v2579_v61 = vmul.f32 %v8087_v12, %v8472_v38  ;;  %v8577_v15 = vld [vmem:[#allocation2 + $0xc1] sm:$0xff] }
 0x2b0   :  { %6086 = vmatprep.mubr.bf16.mxu1 %v3118_v24  ;;  %v2889_v9 = vadd.f32 %v2857_v49, %v2819_v37  ;;  %v2996_v48 = vmul.f32 %v8133_v1, %v8555_v43  ;;  %v2648_v32 = vmul.f32 %v8090_v51, %v8404_v18  ;;  %v2649_v10 = vmul.f32 %v8090_v51, %v8411_v22  ;;  %v8587_v22 = vld [vmem:[#allocation2 + $0xc9] sm:$0xff] }
 0x2b1   :  { %v2958_v13 = vadd.f32 %v2926_v59, %v2888_v25  ;;  %v2610_v31 = vadd.f32 %v2578_v11, %v2510_v17  ;;  %v2611_v33 = vadd.f32 %v2579_v61, %v2511_v34  ;;  %v2719_v46 = vmul.f32 %v8102_v28, %v8553_v4  ;;  %v8589_v5 = vld [vmem:[#allocation2 + $0xc2] sm:$0xff] }
 0x2b2   :  { %v2959_v38 = vadd.f32 %v2927_v23, %v2889_v9  ;;  %v2997_v19 = vmul.f32 %v8133_v1, %v8567_v53  ;;  %v2718_v30 = vmul.f32 %v8102_v28, %v8541_v29  ;;  %v2788_v18 = vmul.f32 %v8105_v8, %v8555_v43  ;;  %v8608_v17 = vld [vmem:[%s10318_s3 + $0x28] ss:$0 sm:$0xff] }
 0x2b3   :  { %v3028_v20 = vadd.f32 %v2996_v48, %v2958_v13  ;;  %v2680_v27 = vadd.f32 %v2648_v32, %v2610_v31  ;;  %v2681_v62 = vadd.f32 %v2649_v10, %v2611_v33  ;;  %v2789_v45 = vmul.f32 %v8105_v8, %v8567_v53 }
 0x2b4   :  { %v6052_v60 = vpop.f32.mrb[28].mxu0  ;;  %v3029_v2 = vadd.f32 %v2997_v19, %v2959_v38  ;;  %v2858_v1 = vmul.f32 %v8112_v36, %v8501_v50  ;;  %v2859_v14 = vmul.f32 %v8112_v36, %v8515_v7  ;;  %v2928_v54 = vmul.f32 %v8128_v44, %v8577_v15  ;;  %v2547_v38 = vld [vmem:[#allocation2 + $0xca] sm:$0xff] }
 0x2b5   :  { %v2280_v57 = vadd.f32 %v8506_v58, %v6052_v60  ;;  %v2271_v49 = vpop.f32.mrb[29].mxu0  ;;  %v3064_v59 = vadd.f32 %v8160_v42, %v3028_v20  ;;  %v2750_v63 = vadd.f32 %v2718_v30, %v2680_v27  ;;  %v2751_v24 = vadd.f32 %v2719_v46, %v2681_v62 }
 0x2b6   :  { %v2272_v37 = vadd.f32 %v8506_v58, %v2271_v49  ;;  %v6053_v23 = vpop.f32.mrb[30].mxu0  ;;  %v3065_v11 = vadd.f32 %v8160_v42, %v3029_v2  ;;  %v2929_v25 = vmul.f32 %v8128_v44, %v8587_v22  ;;  %v2998_v34 = vmul.f32 %v8608_v17, %v8589_v5 }
 0x2b7   :  { %v8612_v61 = vmax.f32 %v2280_v57, 0.0  ;;  %v2283_v9 = vadd.f32 %v8506_v58, %v6053_v23  ;;  %v2274_v48 = vpop.f32.mrb[31].mxu0  ;;  %v3096_v32 = vmax.f32 %v3064_v59, 0.0  ;;  %v2820_v10 = vadd.f32 %v2788_v18, %v2750_v63  ;;  %v2448_v23 = vld [vmem:[#allocation2 + $0xd1] sm:$0xff] }
 0x2b8   :  { %v8615_v13 = vmax.f32 %v2272_v37, 0.0  ;;  %v2275_v42 = vadd.f32 %v8506_v58, %v2274_v48  ;;  %v3097_v31 = vmax.f32 %v3065_v11, 0.0  ;;  %v2821_v33 = vadd.f32 %v2789_v45, %v2751_v24  ;;  %v8654_v24 = vld [vmem:[%s10319_s4 + $0x3] ss:$0 sm:$0xff] }
 0x2b9   :  { %2348 = vst [vmem:[#allocation2 + $0xf0] sm:$0xff] %v8612_v61  ;;  %v8619_v46 = vmax.f32 %v2283_v9, 0.0  ;;  %v2890_v19 = vadd.f32 %v2858_v1, %v2820_v10  ;;  %v2480_v30 = vmul.f32 %v8084_v41, %v8541_v29  ;;  %v2481_v20 = vmul.f32 %v8084_v41, %v8553_v4  ;;  %v2548_v9 = vld [vmem:[#allocation2 + $0xd2] sm:$0xff] }
 0x2ba   :  { %2346 = vst [vmem:[#allocation2 + $0xe0] sm:$0xff] %v8615_v13  ;;  %v8626_v18 = vmax.f32 %v2275_v42, 0.0  ;;  %v3119_v27 = vpack.c.bf16 %v3097_v31, %v3096_v32  ;;  %v2891_v58 = vadd.f32 %v2859_v14, %v2821_v33  ;;  %v2580_v62 = vmul.f32 %v8087_v12, %v8555_v43 }
 0x2bb   :  { %2349 = vst [vmem:[#allocation2 + $0xf8] sm:$0xff] %v8619_v46  ;;  %v2960_v45 = vadd.f32 %v2928_v54, %v2890_v19  ;;  %v2512_v60 = vadd.f32 %v2480_v30, %v8534_v56  ;;  %v2513_v2 = vadd.f32 %v2481_v20, %v8539_v39  ;;  %v2581_v29 = vmul.f32 %v8087_v12, %v8567_v53 }
 0x2bc   :  { %2347 = vst [vmem:[#allocation2 + $0xe8] sm:$0xff] %v8626_v18  ;;  %6087 = vmatmul.mubr.bf16.gmra.mrb[16].mxu1 %v3119_v27  ;;  %v2961_v4 = vadd.f32 %v2929_v25, %v2891_v58  ;;  %v2999_v1 = vmul.f32 %v8608_v17, %v2547_v38  ;;  %v2650_v14 = vmul.f32 %v8090_v51, %v8501_v50 }
 0x2bd   :  { %v2651_v43 = vmul.f32 %v8090_v51, %v8515_v7  ;;  %v3030_v54 = vadd.f32 %v2998_v34, %v2960_v45  ;;  %v2612_v57 = vadd.f32 %v2580_v62, %v2512_v60  ;;  %v2613_v56 = vadd.f32 %v2581_v29, %v2513_v2 }
 0x2be   :  { %v2720_v39 = vmul.f32 %v8102_v28, %v8577_v15  ;;  %v2414_v53 = vmul.f32 %v8081_v26, %v8501_v50  ;;  %v2415_v49 = vmul.f32 %v8081_v26, %v8515_v7  ;;  %v3031_v59 = vadd.f32 %v2999_v1, %v2961_v4 }
 0x2bf   :  { %v8649_v63 = vmul.f32 %v8081_v26, %v8498_v35  ;;  %v3066_v37 = vadd.f32 %v8654_v24, %v3030_v54  ;;  %v2682_v11 = vadd.f32 %v2650_v14, %v2612_v57  ;;  %v2683_v25 = vadd.f32 %v2651_v43, %v2613_v56 }
 0x2c0   :  { %v2721_v50 = vmul.f32 %v8102_v28, %v8587_v22  ;;  %v3067_v7 = vadd.f32 %v8654_v24, %v3031_v59  ;;  %v8662_v34 = vmul.f32 %v8081_v26, %v8511_v40  ;;  %v2790_v48 = vmul.f32 %v8105_v8, %v8589_v5 }
 0x2c1   :  { %v2791_v32 = vmul.f32 %v8105_v8, %v2547_v38  ;;  %v2449_v10 = vld [vmem:[#allocation2 + $0xd9] sm:$0xff]  ;;  %v2752_v42 = vadd.f32 %v2720_v39, %v2682_v11  ;;  %v2860_v33 = vmul.f32 %v8112_v36, %v8498_v35  ;;  %v2861_v19 = vmul.f32 %v8112_v36, %v8511_v40 }
 0x2c2   :  { %v2753_v31 = vadd.f32 %v2721_v50, %v2683_v25  ;;  %v3098_v30 = vmax.f32 %v3066_v37, 0.0  ;;  %v3099_v20 = vmax.f32 %v3067_v7, 0.0  ;;  %v2930_v27 = vmul.f32 %v8128_v44, %v2448_v23  ;;  %v2549_v62 = vld [vmem:[#allocation2 + $0xda] sm:$0xff] }
 0x2c3   :  { %v2482_v58 = vmul.f32 %v8084_v41, %v8577_v15  ;;  %v2822_v45 = vadd.f32 %v2790_v48, %v2752_v42  ;;  %v3000_v2 = vmul.f32 %v8608_v17, %v2548_v9  ;;  %v2483_v29 = vmul.f32 %v8084_v41, %v8587_v22  ;;  %v8686_v25 = vld [vmem:[#allocation2 + $0xe1] sm:$0xff] }
 0x2c4   :  { %v2823_v60 = vadd.f32 %v2791_v32, %v2753_v31  ;;  %v3120_v4 = vpack.c.bf16 %v3099_v20, %v3098_v30  ;;  %v2931_v1 = vmul.f32 %v8128_v44, %v2449_v10  ;;  %v2582_v43 = vmul.f32 %v8087_v12, %v8589_v5 }
 0x2c5   :  { %v2514_v14 = vadd.f32 %v2482_v58, %v2414_v53  ;;  %v2892_v54 = vadd.f32 %v2860_v33, %v2822_v45  ;;  %v2515_v56 = vadd.f32 %v2483_v29, %v2415_v49  ;;  %v2583_v15 = vmul.f32 %v8087_v12, %v2547_v38  ;;  %v2451_v49 = vld [vmem:[#allocation2 + $0xe9] sm:$0xff] }
 0x2c6   :  { %v2893_v57 = vadd.f32 %v2861_v19, %v2823_v60  ;;  %6090 = vmatprep.mubr.bf16.mxu1 %v3120_v4  ;;  %v3001_v39 = vmul.f32 %v8608_v17, %v2549_v62  ;;  %v2652_v37 = vmul.f32 %v8090_v51, %v8498_v35  ;;  %v2653_v22 = vmul.f32 %v8090_v51, %v8511_v40  ;;  %v2550_v40 = vld [vmem:[#allocation2 + $0xe2] sm:$0xff] }
 0x2c7   :  { %v2614_v59 = vadd.f32 %v2582_v43, %v2514_v14  ;;  %v2962_v11 = vadd.f32 %v2930_v27, %v2892_v54  ;;  %v2615_v5 = vadd.f32 %v2583_v15, %v2515_v56  ;;  %v2723_v50 = vmul.f32 %v8102_v28, %v2449_v10  ;;  %v2551_v15 = vld [vmem:[#allocation2 + $0xea] sm:$0xff] }
 0x2c8   :  { %v2963_v53 = vadd.f32 %v2931_v1, %v2893_v57  ;;  %v8691_v38 = vmul.f32 %v8081_v26, %v8615_v13  ;;  %v2722_v48 = vmul.f32 %v8102_v28, %v2448_v23  ;;  %v2792_v35 = vmul.f32 %v8105_v8, %v2548_v9 }
 0x2c9   :  { %v2684_v7 = vadd.f32 %v2652_v37, %v2614_v59  ;;  %v3032_v32 = vadd.f32 %v3000_v2, %v2962_v11  ;;  %v2685_v31 = vadd.f32 %v2653_v22, %v2615_v5  ;;  %v2793_v33 = vmul.f32 %v8105_v8, %v2549_v62 }
 0x2ca   :  { %v3033_v42 = vadd.f32 %v3001_v39, %v2963_v53  ;;  %v2862_v30 = vmul.f32 %v8112_v36, %v8615_v13  ;;  %v2863_v20 = vmul.f32 %v8112_v36, %v8626_v18  ;;  %v2932_v27 = vmul.f32 %v8128_v44, %v8686_v25 }
 0x2cb   :  { %v2754_v19 = vadd.f32 %v2722_v48, %v2684_v7  ;;  %v3068_v58 = vadd.f32 %v8654_v24, %v3032_v32  ;;  %v2755_v60 = vadd.f32 %v2723_v50, %v2685_v31  ;;  %v2933_v2 = vmul.f32 %v8128_v44, %v2451_v49 }
 0x2cc   :  { %v3069_v45 = vadd.f32 %v8654_v24, %v3033_v42  ;;  %v3002_v4 = vmul.f32 %v8608_v17, %v2550_v40  ;;  %v2484_v1 = vmul.f32 %v8084_v41, %v2448_v23  ;;  %v2485_v14 = vmul.f32 %v8084_v41, %v2449_v10 }
 0x2cd   :  { %v2824_v29 = vadd.f32 %v2792_v35, %v2754_v19  ;;  %v3100_v43 = vmax.f32 %v3068_v58, 0.0  ;;  %v2825_v57 = vadd.f32 %v2793_v33, %v2755_v60  ;;  %v2584_v56 = vmul.f32 %v8087_v12, %v2548_v9  ;;  %v8725_v35 = vld [vmem:[#allocation2 + $0xf1] sm:$0xff] }
 0x2ce   :  { %v3101_v54 = vmax.f32 %v3069_v45, 0.0  ;;  %v2516_v59 = vadd.f32 %v2484_v1, %v8649_v63  ;;  %v2517_v37 = vadd.f32 %v2485_v14, %v8662_v34  ;;  %v2585_v22 = vmul.f32 %v8087_v12, %v2549_v62 }
 0x2cf   :  { %v2894_v39 = vadd.f32 %v2862_v30, %v2824_v29  ;;  %v2895_v53 = vadd.f32 %v2863_v20, %v2825_v57  ;;  %v2654_v23 = vmul.f32 %v8090_v51, %v8615_v13  ;;  %v2655_v10 = vmul.f32 %v8090_v51, %v8626_v18 }
 0x2d0   :  { %v3121_v11 = vpack.c.bf16 %v3101_v54, %v3100_v43  ;;  %v2616_v50 = vadd.f32 %v2584_v56, %v2516_v59  ;;  %v2617_v7 = vadd.f32 %v2585_v22, %v2517_v37  ;;  %v2724_v9 = vmul.f32 %v8102_v28, %v8686_v25  ;;  %v2553_v59 = vld [vmem:[#allocation2 + $0xfa] sm:$0xff] }
 0x2d1   :  { %v2964_v5 = vadd.f32 %v2932_v27, %v2894_v39  ;;  %v2419_v63 = vmul.f32 %v8081_v26, %v8626_v18  ;;  %v2965_v34 = vadd.f32 %v2933_v2, %v2895_v53  ;;  %v3003_v62 = vmul.f32 %v8608_v17, %v2551_v15  ;;  %v2453_v2 = vld [vmem:[#allocation2 + $0xf9] sm:$0xff] }
 0x2d2   :  { %6091 = vmatmul.mubr.bf16.gmra.mrb[20].mxu1 %v3121_v11  ;;  %v8723_v48 = vmul.f32 %v8081_v26, %v8612_v61  ;;  %v2686_v32 = vadd.f32 %v2654_v23, %v2616_v50  ;;  %v2687_v42 = vadd.f32 %v2655_v10, %v2617_v7  ;;  %v2725_v31 = vmul.f32 %v8102_v28, %v2451_v49  ;;  %v2552_v39 = vld [vmem:[#allocation2 + $0xf2] sm:$0xff] }
 0x2d3   :  { %v3034_v13 = vadd.f32 %v3002_v4, %v2964_v5  ;;  %v3035_v33 = vadd.f32 %v3003_v62, %v2965_v34  ;;  %v2794_v19 = vmul.f32 %v8105_v8, %v2550_v40  ;;  %v2795_v30 = vmul.f32 %v8105_v8, %v2551_v15 }
 0x2d4   :  { %v2864_v18 = vmul.f32 %v8112_v36, %v8612_v61  ;;  %v2756_v27 = vadd.f32 %v2724_v9, %v2686_v32  ;;  %v2757_v58 = vadd.f32 %v2725_v31, %v2687_v42  ;;  %v2865_v45 = vmul.f32 %v8112_v36, %v8619_v46 }
 0x2d5   :  { %v3070_v20 = vadd.f32 %v8654_v24, %v3034_v13  ;;  %v3071_v60 = vadd.f32 %v8654_v24, %v3035_v33  ;;  %v2934_v29 = vmul.f32 %v8128_v44, %v8725_v35  ;;  %v2486_v4 = vmul.f32 %v8084_v41, %v8686_v25 }
 0x2d6   :  { %v2487_v1 = vmul.f32 %v8084_v41, %v2451_v49  ;;  %v2826_v43 = vadd.f32 %v2794_v19, %v2756_v27  ;;  %v2827_v54 = vadd.f32 %v2795_v30, %v2757_v58  ;;  %v2586_v57 = vmul.f32 %v8087_v12, %v2550_v40  ;;  %v2692_v30 = vld [vmem:[#allocation2 + $0x101] sm:$0xff] }
 0x2d7   :  { %v3102_v14 = vmax.f32 %v3070_v20, 0.0  ;;  %v3103_v56 = vmax.f32 %v3071_v60, 0.0  ;;  %v2518_v37 = vadd.f32 %v2486_v4, %v8691_v38  ;;  %v2587_v11 = vmul.f32 %v8087_v12, %v2551_v15  ;;  %v6241_v15 = vld [vmem:[%s10320_s5 + $0x80] sm:$0xff]  }
 0x2d8   :  { %v2519_v22 = vadd.f32 %v2487_v1, %v2419_v63  ;;  %v2896_v53 = vadd.f32 %v2864_v18, %v2826_v43  ;;  %v2897_v23 = vadd.f32 %v2865_v45, %v2827_v54  ;;  %v2935_v10 = vmul.f32 %v8128_v44, %v2453_v2  ;;  %6102 = vmatprep.subr.bf16.mxu0 %v6241_v15  ;;  %v6281_v58 = vld [vmem:[#allocation2 + $0x100] sm:$0xff] }
 0x2d9   :  { %v2656_v25 = vmul.f32 %v8090_v51, %v8612_v61  ;;  %v3122_v49 = vpack.c.bf16 %v3103_v56, %v3102_v14  ;;  %v2618_v5 = vadd.f32 %v2586_v57, %v2518_v37  ;;  %v2657_v40 = vmul.f32 %v8090_v51, %v8619_v46  ;;  %v6242_v61 = vld [vmem:[%s10320_s5 + $0x88] sm:$0xff]   ;;  %6103 = vmatpush3.bf16.msra.mxu0 %v6241_v15 }
 0x2da   :  { %v2619_v50 = vadd.f32 %v2587_v11, %v2519_v22  ;;  %v2966_v7 = vadd.f32 %v2934_v29, %v2896_v53  ;;  %v2967_v9 = vadd.f32 %v2935_v10, %v2897_v23  ;;  %v3004_v38 = vmul.f32 %v8608_v17, %v2552_v39  ;;  %v2762_v4 = vld [vmem:[#allocation2 + $0x102] sm:$0xff]  ;;  %6104 = vmatprep.subr.bf16.mxu0 %v6242_v61  ;;  %v2763_v37 = vld [vmem:[#allocation2 + $0x10a] sm:$0xff] }
 0x2db   :  { %v3005_v63 = vmul.f32 %v8608_v17, %v2553_v59  ;;  %6094 = vmatprep.mubr.bf16.mxu1 %v3122_v49  ;;  %v2688_v34 = vadd.f32 %v2656_v25, %v2618_v5  ;;  %v2726_v13 = vmul.f32 %v8102_v28, %v8725_v35  ;;  %v2727_v32 = vmul.f32 %v8102_v28, %v2453_v2 }
 0x2dc   :  { %v2689_v62 = vadd.f32 %v2657_v40, %v2619_v50  ;;  %v2421_v42 = vmul.f32 %v8081_v26, %v8619_v46  ;;  %v3036_v31 = vadd.f32 %v3004_v38, %v2966_v7  ;;  %v2796_v19 = vmul.f32 %v8105_v8, %v2552_v39  ;;  %v2693_v46 = vld [vmem:[#allocation2 + $0x109] sm:$0xff] }
 0x2dd   :  { %v3037_v33 = vadd.f32 %v3005_v63, %v2967_v9  ;;  %v2758_v18 = vadd.f32 %v2726_v13, %v2688_v34  ;;  %v2797_v27 = vmul.f32 %v8105_v8, %v2553_v59  ;;  %v2866_v45 = vmul.f32 %v6281_v58, %v8112_v36  ;;  %6105 = vmatpush3.bf16.msra.mxu0 %v6242_v61 }
 0x2de   :  { %v2759_v20 = vadd.f32 %v2727_v32, %v2689_v62  ;;  %v3072_v60 = vadd.f32 %v8654_v24, %v3036_v31  ;;  %v2658_v26 = vmul.f32 %v6281_v58, %v8090_v51  ;;  %v2936_v1 = vmul.f32 %v8128_v44, %v2692_v30  ;;  %v2903_v62 = vld [vmem:[#allocation2 + $0x119] sm:$0xff] }
 0x2df   :  { %v3073_v29 = vadd.f32 %v8654_v24, %v3037_v33  ;;  %v2828_v14 = vadd.f32 %v2796_v19, %v2758_v18  ;;  %v2937_v54 = vmul.f32 %v8128_v44, %v2693_v46  ;;  %v3006_v57 = vmul.f32 %v8608_v17, %v2762_v4  ;;  %v2972_v31 = vld [vmem:[#allocation2 + $0x112] sm:$0xff]  ;;  %v2973_v33 = vld [vmem:[#allocation2 + $0x11a] sm:$0xff] }
 0x2e0   :  { %v2829_v43 = vadd.f32 %v2797_v27, %v2759_v20  ;;  %v3104_v56 = vmax.f32 %v3072_v60, 0.0  ;;  %v2488_v22 = vmul.f32 %v8084_v41, %v8725_v35  ;;  %v2489_v11 = vmul.f32 %v8084_v41, %v2453_v2 }
 0x2e1   :  { %v3105_v36 = vmax.f32 %v3073_v29, 0.0  ;;  %v2898_v51 = vadd.f32 %v2866_v45, %v2828_v14  ;;  %v3007_v23 = vmul.f32 %v8608_v17, %v2763_v37  ;;  %v2588_v10 = vmul.f32 %v8087_v12, %v2552_v39 }
 0x2e2   :  { %v2899_v53 = vadd.f32 %v2866_v45, %v2829_v43  ;;  %v2520_v49 = vadd.f32 %v2488_v22, %v8723_v48  ;;  %v2521_v5 = vadd.f32 %v2489_v11, %v2421_v42  ;;  %v2589_v50 = vmul.f32 %v8087_v12, %v2553_v59  ;;  %v2902_v59 = vld [vmem:[#allocation2 + $0x111] sm:$0xff]  ;;  %v8811_v22 = vld [vmem:[%s10319_s4 + $0x4] ss:$0 sm:$0xff] }
 0x2e3   :  { %v3123_v25 = vpack.c.bf16 %v3105_v36, %v3104_v56  ;;  %v2968_v40 = vadd.f32 %v2936_v1, %v2898_v51  ;;  %v2728_v35 = vmul.f32 %v8102_v28, %v2692_v30  ;;  %v2729_v41 = vmul.f32 %v8102_v28, %v2693_v46  ;;  %v6244_v1 = vld [vmem:[%s10320_s5 + $0x98] sm:$0xff]   ;;  %v6246_v36 = vld [vmem:[%s10320_s5 + $0xa8] sm:$0xff]  }
 0x2e4   :  { %v2969_v7 = vadd.f32 %v2937_v54, %v2899_v53  ;;  %v2620_v2 = vadd.f32 %v2588_v10, %v2520_v49  ;;  %v2621_v9 = vadd.f32 %v2589_v50, %v2521_v5  ;;  %v2798_v39 = vmul.f32 %v8105_v8, %v2762_v4  ;;  %v6243_v4 = vld [vmem:[%s10320_s5 + $0x90] sm:$0xff]  }
 0x2e5   :  { %6095 = vmatmul.mubr.bf16.gmra.mrb[24].mxu1 %v3123_v25  ;;  %v3038_v38 = vadd.f32 %v3006_v57, %v2968_v40  ;;  %v2799_v15 = vmul.f32 %v8105_v8, %v2763_v37  ;;  %v2938_v18 = vmul.f32 %v8128_v44, %v2902_v59  ;;  %v2939_v8 = vmul.f32 %v8128_v44, %v2903_v62  ;;  %v6248_v37 = vld [vmem:[%s10320_s5 + $0xb8] sm:$0xff]  }
 0x2e6   :  { %v3039_v63 = vadd.f32 %v3007_v23, %v2969_v7  ;;  %v2690_v61 = vadd.f32 %v2658_v26, %v2620_v2  ;;  %v2691_v48 = vadd.f32 %v2658_v26, %v2621_v9  ;;  %v3008_v60 = vmul.f32 %v8608_v17, %v2972_v31  ;;  %6106 = vmatprep.subr.bf16.mxu0 %v6243_v4 }
 0x2e7   :  { %v3074_v34 = vadd.f32 %v8654_v24, %v3038_v38  ;;  %v3009_v29 = vmul.f32 %v8608_v17, %v2973_v33  ;;  %6107 = vmatpush3.bf16.msra.mxu0 %v6243_v4  ;;  %v6245_v17 = vld [vmem:[%s10320_s5 + $0xa0] sm:$0xff]  }
 0x2e8   :  { %v3075_v12 = vadd.f32 %v8654_v24, %v3039_v63  ;;  %v2760_v13 = vadd.f32 %v2728_v35, %v2690_v61  ;;  %v2761_v32 = vadd.f32 %v2729_v41, %v2691_v48  ;;  %6108 = vmatprep.subr.bf16.mxu0 %v6244_v1  ;;  %v5812_v41 = vld [vmem:[%s10318_s3 + $0x30] sm:$0xff] }
 0x2e9   :  { %v3106_v42 = vmax.f32 %v3074_v34, 0.0  ;;  %v8824_v2 = vrot.slane %v5812_v41, %v10427_v47  ;;  %v8827_v9 = vrot.slane %v5812_v41, %v10428_v21  ;;  %v8830_v38 = vrot.slane %v5812_v41, %v10429_v0 }
 0x2ea   :  { %v3107_v28 = vmax.f32 %v3075_v12, 0.0  ;;  %v2830_v19 = vadd.f32 %v2798_v39, %v2760_v13  ;;  %v2831_v30 = vadd.f32 %v2799_v15, %v2761_v32  ;;  %v8833_v39 = vrot.slane %v5812_v41, %v10430_v3 }
 0x2eb   :  { %6109 = vmatpush3.bf16.msra.mxu0 %v6244_v1  ;;  %v8842_v31 = vrot.slane %v5812_v41, %v10431_v52  ;;  %v8845_v33 = vrot.slane %v5812_v41, %v10432_v16 }
 0x2ec   :  { %v3124_v20 = vpack.c.bf16 %v3107_v28, %v3106_v42  ;;  %v2900_v27 = vadd.f32 %v2866_v45, %v2830_v19  ;;  %v2901_v58 = vadd.f32 %v2866_v45, %v2831_v30  ;;  %6110 = vmatprep.subr.bf16.mxu0 %v6245_v17 }
 0x2ee   :  { %6098 = vmatprep.mubr.bf16.mxu1 %v3124_v20  ;;  %v2970_v26 = vadd.f32 %v2938_v18, %v2900_v27  ;;  %v2971_v46 = vadd.f32 %v2939_v8, %v2901_v58  ;;  %v8850_v58 = vrot.slane %v5812_v41, %v10433_v6 }
 0x2ef   :  { %6111 = vmatpush3.bf16.msra.mxu0 %v6245_v17 }
 0x2f0   :  { %v3040_v14 = vadd.f32 %v3008_v60, %v2970_v26  ;;  %v3041_v44 = vadd.f32 %v3009_v29, %v2971_v46  ;;  %6112 = vmatprep.subr.bf16.mxu0 %v6246_v36 }
 0x2f2   :  { %v3076_v45 = vadd.f32 %v8654_v24, %v3040_v14  ;;  %v3077_v43 = vadd.f32 %v8654_v24, %v3041_v44  ;;  %v6247_v24 = vld [vmem:[%s10320_s5 + $0xb0] sm:$0xff]  }
 0x2f3   :  { %6113 = vmatpush3.bf16.msra.mxu0 %v6246_v36 }
 0x2f4   :  { %v3108_v54 = vmax.f32 %v3076_v45, 0.0  ;;  %v3109_v57 = vmax.f32 %v3077_v43, 0.0  ;;  %6114 = vmatprep.subr.bf16.mxu0 %v6247_v24 }
 0x2f6   :  { %v3125_v56 = vpack.c.bf16 %v3109_v57, %v3108_v54 }
 0x2f7   :  { %6115 = vmatpush3.bf16.msra.mxu0 %v6247_v24 }
 0x2f8   :  { %6099 = vmatmul.mubr.bf16.gmra.mrb[28].mxu1 %v3125_v56  ;;  %6116 = vmatprep.subr.bf16.mxu0 %v6248_v37 }
 0x2fb   :  { %6117 = vmatpush3.bf16.msra.mxu0 %v6248_v37 }
 0x33f   :  { %v6072_v11 = vpop.f32.mrb[0].mxu1 }
 0x340   :  { %v3239_v51 = vadd.f32 %v6072_v11, %v8811_v22  ;;  %v3230_v53 = vpop.f32.mrb[1].mxu1 }
 0x341   :  { %v3231_v23 = vadd.f32 %v8811_v22, %v3230_v53  ;;  %v6073_v10 = vpop.f32.mrb[2].mxu1 }
 0x342   :  { %v3359_v25 = vmax.f32 %v3239_v51, 0.0  ;;  %v3242_v49 = vadd.f32 %v6073_v10, %v8811_v22  ;;  %v3233_v5 = vpop.f32.mrb[3].mxu1 }
 0x343   :  { %v3357_v50 = vmax.f32 %v3231_v23, 0.0  ;;  %v3234_v40 = vadd.f32 %v8811_v22, %v3233_v5 }
 0x344   :  { %3391 = vst [vmem:[#allocation2 + $0x10] sm:$0xff] %v3359_v25  ;;  %v8817_v7 = vmax.f32 %v3242_v49, 0.0  ;;  %v3463_v15 = vmul.f32 %v8824_v2, %v3359_v25  ;;  %v3699_v46 = vmul.f32 %v8833_v39, %v3359_v25 }
 0x345   :  { %3389 = vst [vmem:[#allocation2] sm:$0xff] %v3357_v50  ;;  %v3358_v35 = vmax.f32 %v3234_v40, 0.0  ;;  %v3461_v59 = vmul.f32 %v8824_v2, %v3357_v50 }
 0x346   :  { %3392 = vst [vmem:[#allocation2 + $0x18] sm:$0xff] %v8817_v7  ;;  %v3700_v45 = vmul.f32 %v8833_v39, %v8817_v7 }
 0x347   :  { %3390 = vst [vmem:[#allocation2 + $0x8] sm:$0xff] %v3358_v35  ;;  %v3462_v62 = vmul.f32 %v8824_v2, %v3358_v35  ;;  %v8871_v35 = vrot.slane %v5812_v41, %v10434_v55 }
 0x34d   :  { %v3495_v63 = vld [vmem:[#allocation2 + $0x11] sm:$0xff] }
 0x34e   :  { %v3493_v61 = vld [vmem:[#allocation2 + $0x1] sm:$0xff]  ;;  %v3494_v48 = vld [vmem:[#allocation2 + $0x9] sm:$0xff]  ;;  %v3531_v34 = vmul.f32 %v8827_v9, %v3495_v63  ;;  %v3595_v28 = vld [vmem:[#allocation2 + $0x12] sm:$0xff]  ;;  %v3769_v56 = vmul.f32 %v8842_v31, %v3495_v63  ;;  %v3464_v63 = vmul.f32 %v8824_v2, %v8817_v7 }
 0x34f   :  { %v3593_v12 = vld [vmem:[#allocation2 + $0x2] sm:$0xff]  ;;  %v3529_v13 = vmul.f32 %v8827_v9, %v3493_v61  ;;  %v3530_v32 = vmul.f32 %v8827_v9, %v3494_v48  ;;  %v3594_v42 = vld [vmem:[#allocation2 + $0xa] sm:$0xff]  ;;  %v3631_v26 = vmul.f32 %v8830_v38, %v3595_v28  ;;  %v3839_v25 = vmul.f32 %v8845_v33, %v3595_v28  ;;  %v8880_v61 = vld [vmem:[%s10318_s3 + $0x38] ss:$0 sm:$0xff] }
 0x350   :  { %v3563_v19 = vadd.f32 %v3531_v34, %v3463_v15  ;;  %v3629_v20 = vmul.f32 %v8830_v38, %v3593_v12  ;;  %v3630_v27 = vmul.f32 %v8830_v38, %v3594_v42 }
 0x351   :  { %v3561_v18 = vadd.f32 %v3529_v13, %v3461_v59  ;;  %v3562_v8 = vadd.f32 %v3530_v32, %v3462_v62 }
 0x352   :  { %v6076_v30 = vpop.f32.mrb[4].mxu1  ;;  %v3663_v57 = vadd.f32 %v3631_v26, %v3563_v19 }
 0x353   :  { %v3255_v60 = vadd.f32 %v6076_v30, %v8811_v22  ;;  %v3246_v29 = vpop.f32.mrb[5].mxu1  ;;  %v3661_v14 = vadd.f32 %v3629_v20, %v3561_v18  ;;  %v3662_v44 = vadd.f32 %v3630_v27, %v3562_v8 }
 0x354   :  { %v3247_v4 = vadd.f32 %v8811_v22, %v3246_v29  ;;  %v6077_v1 = vpop.f32.mrb[6].mxu1 }
 0x355   :  { %v8858_v43 = vmax.f32 %v3255_v60, 0.0  ;;  %v3258_v17 = vadd.f32 %v6077_v1, %v8811_v22  ;;  %v3249_v54 = vpop.f32.mrb[7].mxu1  ;;  %v3731_v37 = vadd.f32 %v3699_v46, %v3661_v14  ;;  %v3732_v11 = vadd.f32 %v3700_v45, %v3662_v44 }
 0x356   :  { %v3361_v36 = vmax.f32 %v3247_v4, 0.0  ;;  %v3250_v24 = vadd.f32 %v8811_v22, %v3249_v54 }
 0x357   :  { %3395 = vst [vmem:[#allocation2 + $0x30] sm:$0xff] %v8858_v43  ;;  %v8864_v51 = vmax.f32 %v3258_v17, 0.0  ;;  %v3801_v10 = vadd.f32 %v3769_v56, %v3731_v37  ;;  %v3911_v15 = vmul.f32 %v8850_v58, %v8858_v43  ;;  %v8889_v41 = vmul.f32 %v8833_v39, %v8858_v43 }
 0x358   :  { %3393 = vst [vmem:[#allocation2 + $0x20] sm:$0xff] %v3361_v36  ;;  %v3362_v53 = vmax.f32 %v3250_v24, 0.0  ;;  %v3701_v23 = vmul.f32 %v8833_v39, %v3361_v36  ;;  %v3909_v50 = vmul.f32 %v8850_v58, %v3361_v36  ;;  %v3465_v48 = vmul.f32 %v8824_v2, %v3361_v36 }
 0x359   :  { %3396 = vst [vmem:[#allocation2 + $0x38] sm:$0xff] %v8864_v51  ;;  %v3871_v5 = vadd.f32 %v3839_v25, %v3801_v10  ;;  %v8885_v59 = vmul.f32 %v8850_v58, %v8864_v51  ;;  %v8893_v7 = vmul.f32 %v8833_v39, %v8864_v51  ;;  %v8922_v10 = vld [vmem:[%s10319_s4 + $0x5] ss:$0 sm:$0xff] }
 0x35a   :  { %3394 = vst [vmem:[#allocation2 + $0x28] sm:$0xff] %v3362_v53  ;;  %v3733_v49 = vadd.f32 %v3701_v23, %v3663_v57  ;;  %v3466_v62 = vmul.f32 %v8824_v2, %v3362_v53  ;;  %v3702_v32 = vmul.f32 %v8833_v39, %v3362_v53  ;;  %v3910_v60 = vmul.f32 %v8850_v58, %v3362_v53 }
 0x35b   :  { %v3941_v40 = vadd.f32 %v3909_v50, %v3871_v5 }
 0x35f   :  { %v3496_v34 = vld [vmem:[#allocation2 + $0x19] sm:$0xff] }
 0x360   :  { %v3596_v12 = vld [vmem:[#allocation2 + $0x1a] sm:$0xff]  ;;  %v3532_v13 = vmul.f32 %v8827_v9, %v3496_v34  ;;  %v3770_v42 = vmul.f32 %v8842_v31, %v3496_v34  ;;  %v8899_v28 = vld [vmem:[#allocation2 + $0x31] sm:$0xff] }
 0x361   :  { %v8901_v19 = vld [vmem:[#allocation2 + $0x32] sm:$0xff]  ;;  %v3497_v30 = vld [vmem:[#allocation2 + $0x21] sm:$0xff]  ;;  %v3498_v18 = vld [vmem:[#allocation2 + $0x29] sm:$0xff]  ;;  %v3632_v20 = vmul.f32 %v8830_v38, %v3596_v12  ;;  %v3840_v27 = vmul.f32 %v8845_v33, %v3596_v12  ;;  %v3981_v29 = vmul.f32 %v8871_v35, %v8899_v28 }
 0x362   :  { %v3597_v8 = vld [vmem:[#allocation2 + $0x22] sm:$0xff]  ;;  %v3564_v26 = vadd.f32 %v3532_v13, %v3464_v63  ;;  %v3598_v46 = vld [vmem:[#allocation2 + $0x2a] sm:$0xff]  ;;  %v3771_v4 = vmul.f32 %v8842_v31, %v3497_v30  ;;  %v3802_v1 = vadd.f32 %v3770_v42, %v3732_v11  ;;  %v4051_v14 = vmul.f32 %v8880_v61, %v8901_v19 }
 0x363   :  { %v3772_v44 = vmul.f32 %v8842_v31, %v3498_v18  ;;  %v3841_v45 = vmul.f32 %v8845_v33, %v3597_v8  ;;  %v3842_v17 = vmul.f32 %v8845_v33, %v3598_v46  ;;  %v3979_v54 = vmul.f32 %v8871_v35, %v3497_v30 }
 0x364   :  { %v3664_v57 = vadd.f32 %v3632_v20, %v3564_v26  ;;  %v3872_v56 = vadd.f32 %v3840_v27, %v3802_v1  ;;  %v3980_v36 = vmul.f32 %v8871_v35, %v3498_v18  ;;  %v4049_v24 = vmul.f32 %v8880_v61, %v3597_v8 }
 0x365   :  { %v4011_v37 = vadd.f32 %v3979_v54, %v3941_v40  ;;  %v3803_v53 = vadd.f32 %v3771_v4, %v3733_v49  ;;  %v3533_v11 = vmul.f32 %v8827_v9, %v3497_v30  ;;  %v3534_v23 = vmul.f32 %v8827_v9, %v3498_v18 }
 0x366   :  { %v3734_v25 = vadd.f32 %v3702_v32, %v3664_v57  ;;  %v3942_v5 = vadd.f32 %v3910_v60, %v3872_v56  ;;  %v4050_v50 = vmul.f32 %v8880_v61, %v3598_v46  ;;  %v3633_v63 = vmul.f32 %v8830_v38, %v3597_v8 }
 0x367   :  { %v6080_v34 = vpop.f32.mrb[8].mxu1  ;;  %v4081_v12 = vadd.f32 %v4049_v24, %v4011_v37  ;;  %v3873_v13 = vadd.f32 %v3841_v45, %v3803_v53  ;;  %v3565_v40 = vadd.f32 %v3533_v11, %v3465_v48  ;;  %v3634_v49 = vmul.f32 %v8830_v38, %v3598_v46 }
 0x368   :  { %v3271_v42 = vadd.f32 %v6080_v34, %v8811_v22  ;;  %v3262_v30 = vpop.f32.mrb[9].mxu1  ;;  %v4012_v18 = vadd.f32 %v3980_v36, %v3942_v5  ;;  %v3804_v20 = vadd.f32 %v3772_v44, %v3734_v25  ;;  %v3566_v27 = vadd.f32 %v3534_v23, %v3466_v62 }
 0x369   :  { %v3263_v26 = vadd.f32 %v8811_v22, %v3262_v30  ;;  %v6081_v32 = vpop.f32.mrb[10].mxu1  ;;  %v4117_v60 = vadd.f32 %v8922_v10, %v4081_v12  ;;  %v3943_v4 = vadd.f32 %v3911_v15, %v3873_v13  ;;  %v3665_v1 = vadd.f32 %v3633_v63, %v3565_v40 }
 0x36a   :  { %v8930_v8 = vmax.f32 %v3271_v42, 0.0  ;;  %v3274_v45 = vadd.f32 %v6081_v32, %v8811_v22  ;;  %v3265_v48 = vpop.f32.mrb[11].mxu1  ;;  %v4082_v54 = vadd.f32 %v4050_v50, %v4012_v18  ;;  %v3874_v46 = vadd.f32 %v3842_v17, %v3804_v20 }
 0x36b   :  { %v3365_v57 = vmax.f32 %v3263_v26, 0.0  ;;  %v3266_v56 = vadd.f32 %v8811_v22, %v3265_v48  ;;  %v4013_v36 = vadd.f32 %v3981_v29, %v3943_v4  ;;  %v3535_v62 = vmul.f32 %v8827_v9, %v8899_v28 }
 0x36c   :  { %3399 = vst [vmem:[#allocation2 + $0x50] sm:$0xff] %v8930_v8  ;;  %v8937_v44 = vmax.f32 %v3274_v45, 0.0  ;;  %v4118_v15 = vadd.f32 %v8922_v10, %v4082_v54  ;;  %v3944_v24 = vadd.f32 %v8885_v59, %v3874_v46  ;;  %v3666_v37 = vadd.f32 %v3634_v49, %v3566_v27 }
 0x36d   :  { %3397 = vst [vmem:[#allocation2 + $0x40] sm:$0xff] %v3365_v57  ;;  %v3366_v53 = vmax.f32 %v3266_v56, 0.0  ;;  %v4083_v11 = vadd.f32 %v4051_v14, %v4013_v36  ;;  %v3735_v17 = vadd.f32 %v8889_v41, %v3665_v1  ;;  %v3773_v29 = vmul.f32 %v8842_v31, %v8899_v28 }
 0x36e   :  { %3400 = vst [vmem:[#allocation2 + $0x58] sm:$0xff] %v8937_v44  ;;  %v4149_v23 = vmax.f32 %v4117_v60, 0.0  ;;  %v4150_v25 = vmax.f32 %v4118_v15, 0.0  ;;  %v3736_v5 = vadd.f32 %v8893_v7, %v3666_v37  ;;  %v3467_v50 = vmul.f32 %v8824_v2, %v8858_v43 }
 0x36f   :  { %3398 = vst [vmem:[#allocation2 + $0x48] sm:$0xff] %v3366_v53  ;;  %v3805_v59 = vadd.f32 %v3773_v29, %v3735_v17  ;;  %v3843_v63 = vmul.f32 %v8845_v33, %v8901_v19  ;;  %v8951_v41 = vadd.f32 %v8922_v10, %v4083_v11  ;;  %v3635_v28 = vmul.f32 %v8830_v38, %v8901_v19 }
 0x370   :  { %v4181_v14 = vpack.c.bf16 %v4150_v25, %v4149_v23  ;;  %v3567_v34 = vadd.f32 %v3535_v62, %v3467_v50  ;;  %v3913_v13 = vmul.f32 %v8850_v58, %v3365_v57  ;;  %v3705_v7 = vmul.f32 %v8833_v39, %v3365_v57 }
 0x371   :  { %v3875_v12 = vadd.f32 %v3843_v63, %v3805_v59  ;;  %v8958_v43 = vmul.f32 %v8824_v2, %v3365_v57  ;;  %v3468_v40 = vmul.f32 %v8824_v2, %v8864_v51  ;;  %v8963_v42 = vmul.f32 %v8824_v2, %v3366_v53 }
 0x372   :  { %6118 = vmatprep.mubr.bf16.mxu0 %v4181_v14  ;;  %v3667_v49 = vadd.f32 %v3635_v28, %v3567_v34  ;;  %v3914_v30 = vmul.f32 %v8850_v58, %v3366_v53  ;;  %v8968_v19 = vmul.f32 %v8824_v2, %v8930_v8  ;;  %v4151_v26 = vmax.f32 %v8951_v41, 0.0 }
 0x373   :  { %v3945_v18 = vadd.f32 %v3913_v13, %v3875_v12  ;;  %v8973_v32 = vmul.f32 %v8824_v2, %v8937_v44  ;;  %v3706_v51 = vmul.f32 %v8833_v39, %v3366_v53  ;;  %v3915_v54 = vmul.f32 %v8850_v58, %v8930_v8 }
 0x374   :  { %v3500_v20 = vld [vmem:[#allocation2 + $0x39] sm:$0xff]  ;;  %v3737_v60 = vadd.f32 %v3705_v7, %v3667_v49 }
 0x375   :  { %v3600_v27 = vld [vmem:[#allocation2 + $0x3a] sm:$0xff]  ;;  %v3982_v4 = vmul.f32 %v8871_v35, %v3500_v20  ;;  %v3774_v45 = vmul.f32 %v8842_v31, %v3500_v20  ;;  %v8979_v48 = vld [vmem:[#allocation2 + $0x51] sm:$0xff]  ;;  %v3536_v62 = vmul.f32 %v8827_v9, %v3500_v20 }
 0x376   :  { %v4052_v1 = vmul.f32 %v8880_v61, %v3600_v27  ;;  %v3501_v46 = vld [vmem:[#allocation2 + $0x41] sm:$0xff]  ;;  %v3502_v57 = vld [vmem:[#allocation2 + $0x49] sm:$0xff]  ;;  %v3844_v36 = vmul.f32 %v8845_v33, %v3600_v27  ;;  %v3636_v15 = vmul.f32 %v8830_v38, %v3600_v27  ;;  %v3985_v37 = vmul.f32 %v8871_v35, %v8979_v48 }
 0x377   :  { %v3601_v56 = vld [vmem:[#allocation2 + $0x42] sm:$0xff]  ;;  %v4014_v53 = vadd.f32 %v3982_v4, %v3944_v24  ;;  %v3602_v11 = vld [vmem:[#allocation2 + $0x4a] sm:$0xff]  ;;  %v3806_v17 = vadd.f32 %v3774_v45, %v3736_v5  ;;  %v3983_v29 = vmul.f32 %v8871_v35, %v3501_v46  ;;  %v3984_v23 = vmul.f32 %v8871_v35, %v3502_v57 }
 0x378   :  { %v4053_v25 = vmul.f32 %v8880_v61, %v3601_v56  ;;  %v4054_v50 = vmul.f32 %v8880_v61, %v3602_v11  ;;  %v3568_v59 = vadd.f32 %v3536_v62, %v3468_v40  ;;  %v3775_v63 = vmul.f32 %v8842_v31, %v3501_v46 }
 0x379   :  { %v4084_v14 = vadd.f32 %v4052_v1, %v4014_v53  ;;  %v3876_v41 = vadd.f32 %v3844_v36, %v3806_v17  ;;  %v4015_v34 = vadd.f32 %v3983_v29, %v3945_v18  ;;  %v3776_v28 = vmul.f32 %v8842_v31, %v3502_v57 }
 0x37a   :  { %v6084_v12 = vpop.f32.mrb[12].mxu1  ;;  %v3668_v24 = vadd.f32 %v3636_v15, %v3568_v59  ;;  %v3807_v13 = vadd.f32 %v3775_v63, %v3737_v60  ;;  %v3845_v5 = vmul.f32 %v8845_v33, %v3601_v56  ;;  %v3846_v7 = vmul.f32 %v8845_v33, %v3602_v11  ;;  %v3603_v59 = vld [vmem:[#allocation2 + $0x52] sm:$0xff] }
 0x37b   :  { %v3287_v49 = vadd.f32 %v6084_v12, %v8811_v22  ;;  %v3278_v20 = vpop.f32.mrb[13].mxu1  ;;  %v4120_v27 = vadd.f32 %v8922_v10, %v4084_v14  ;;  %v3946_v40 = vadd.f32 %v3914_v30, %v3876_v41  ;;  %v4085_v4 = vadd.f32 %v4053_v25, %v4015_v34 }
 0x37c   :  { %v3279_v1 = vadd.f32 %v8811_v22, %v3278_v20  ;;  %v6085_v45 = vpop.f32.mrb[14].mxu1  ;;  %v3738_v18 = vadd.f32 %v3706_v51, %v3668_v24  ;;  %v3877_v36 = vadd.f32 %v3845_v5, %v3807_v13  ;;  %v3537_v62 = vmul.f32 %v8827_v9, %v3501_v46 }
 0x37d   :  { %v9000_v15 = vmax.f32 %v3287_v49, 0.0  ;;  %v3290_v60 = vadd.f32 %v6085_v45, %v8811_v22  ;;  %v3281_v53 = vpop.f32.mrb[15].mxu1  ;;  %v4152_v17 = vmax.f32 %v4120_v27, 0.0  ;;  %v4016_v29 = vadd.f32 %v3984_v23, %v3946_v40 }
 0x37e   :  { %v3369_v63 = vmax.f32 %v3279_v1, 0.0  ;;  %v3282_v14 = vadd.f32 %v8811_v22, %v3281_v53  ;;  %v4121_v30 = vadd.f32 %v8922_v10, %v4085_v4  ;;  %v3808_v25 = vadd.f32 %v3776_v28, %v3738_v18 }
 0x37f   :  { %3403 = vst [vmem:[#allocation2 + $0x70] sm:$0xff] %v9000_v15  ;;  %v9006_v51 = vmax.f32 %v3290_v60, 0.0  ;;  %v4182_v41 = vpack.c.bf16 %v4152_v17, %v4151_v26  ;;  %v4086_v46 = vadd.f32 %v4054_v50, %v4016_v29  ;;  %v3947_v34 = vadd.f32 %v3915_v54, %v3877_v36 }
 0x380   :  { %3401 = vst [vmem:[#allocation2 + $0x60] sm:$0xff] %v3369_v63  ;;  %v3370_v12 = vmax.f32 %v3282_v14, 0.0  ;;  %v3878_v24 = vadd.f32 %v3846_v7, %v3808_v25  ;;  %v3916_v23 = vmul.f32 %v8850_v58, %v8937_v44  ;;  %v4055_v13 = vmul.f32 %v8880_v61, %v3603_v59 }
 0x381   :  { %3404 = vst [vmem:[#allocation2 + $0x78] sm:$0xff] %v9006_v51  ;;  %6119 = vmatmul.mubr.bf16.vlgmr.msra.gmra.mrb[32].mxu0 %v4182_v41  ;;  %v4122_v28 = vadd.f32 %v8922_v10, %v4086_v46  ;;  %v4017_v5 = vadd.f32 %v3985_v37, %v3947_v34  ;;  %v3538_v49 = vmul.f32 %v8827_v9, %v3502_v57  ;;  %v4153_v54 = vmax.f32 %v4121_v30, 0.0 }
 0x382   :  { %v3569_v26 = vadd.f32 %v3537_v62, %v8958_v43  ;;  %3402 = vst [vmem:[#allocation2 + $0x68] sm:$0xff] %v3370_v12  ;;  %v3948_v50 = vadd.f32 %v3916_v23, %v3878_v24  ;;  %v3637_v7 = vmul.f32 %v8830_v38, %v3601_v56  ;;  %v3707_v20 = vmul.f32 %v8833_v39, %v8930_v8 }
 0x383   :  { %v4154_v27 = vmax.f32 %v4122_v28, 0.0  ;;  %v4087_v40 = vadd.f32 %v4055_v13, %v4017_v5  ;;  %v3570_v4 = vadd.f32 %v3538_v49, %v8963_v42  ;;  %v3638_v1 = vmul.f32 %v8830_v38, %v3602_v11 }
 0x384   :  { %v9021_v37 = vmul.f32 %v8824_v2, %v3369_v63  ;;  %v9024_v57 = vmul.f32 %v8824_v2, %v3370_v12  ;;  %v3669_v43 = vadd.f32 %v3637_v7, %v3569_v26  ;;  %v3708_v45 = vmul.f32 %v8833_v39, %v8937_v44 }
 0x385   :  { %v4183_v56 = vpack.c.bf16 %v4154_v27, %v4153_v54  ;;  %v9029_v18 = vadd.f32 %v8922_v10, %v4087_v40  ;;  %v3670_v8 = vadd.f32 %v3638_v1, %v3570_v4  ;;  %v3777_v42 = vmul.f32 %v8842_v31, %v8979_v48 }
 0x386   :  { %v3739_v36 = vadd.f32 %v3707_v20, %v3669_v43  ;;  %v3847_v11 = vmul.f32 %v8845_v33, %v3603_v59  ;;  %v3917_v62 = vmul.f32 %v8850_v58, %v3369_v63  ;;  %v3539_v60 = vmul.f32 %v8827_v9, %v8979_v48 }
 0x387   :  { %6122 = vmatprep.mubr.bf16.mxu0 %v4183_v56  ;;  %v3504_v53 = vld [vmem:[#allocation2 + $0x59] sm:$0xff]  ;;  %v4155_v44 = vmax.f32 %v9029_v18, 0.0  ;;  %v3740_v29 = vadd.f32 %v3708_v45, %v3670_v8  ;;  %v3918_v14 = vmul.f32 %v8850_v58, %v3370_v12  ;;  %v3639_v30 = vmul.f32 %v8830_v38, %v3603_v59 }
 0x388   :  { %v3604_v17 = vld [vmem:[#allocation2 + $0x5a] sm:$0xff]  ;;  %v3986_v25 = vmul.f32 %v8871_v35, %v3504_v53  ;;  %v3778_v41 = vmul.f32 %v8842_v31, %v3504_v53  ;;  %v3809_v46 = vadd.f32 %v3777_v42, %v3739_v36  ;;  %v3709_v34 = vmul.f32 %v8833_v39, %v3369_v63 }
 0x389   :  { %v4056_v24 = vmul.f32 %v8880_v61, %v3604_v17  ;;  %v9044_v48 = vld [vmem:[#allocation2 + $0x61] sm:$0xff]  ;;  %v9046_v23 = vld [vmem:[#allocation2 + $0x69] sm:$0xff]  ;;  %v3848_v13 = vmul.f32 %v8845_v33, %v3604_v17  ;;  %v3540_v28 = vmul.f32 %v8827_v9, %v3504_v53  ;;  %v3571_v5 = vadd.f32 %v3539_v60, %v8968_v19 }
 0x38a   :  { %v4018_v59 = vadd.f32 %v3986_v25, %v3948_v50  ;;  %v9051_v49 = vld [vmem:[#allocation2 + $0x62] sm:$0xff]  ;;  %v9053_v26 = vld [vmem:[#allocation2 + $0x6a] sm:$0xff]  ;;  %v3810_v54 = vadd.f32 %v3778_v41, %v3740_v29  ;;  %v3879_v7 = vadd.f32 %v3847_v11, %v3809_v46  ;;  %v3987_v63 = vmul.f32 %v8871_v35, %v9044_v48 }
 0x38b   :  { %v3988_v20 = vmul.f32 %v8871_v35, %v9046_v23  ;;  %v3572_v27 = vadd.f32 %v3540_v28, %v8973_v32  ;;  %v3640_v40 = vmul.f32 %v8830_v38, %v3604_v17  ;;  %v3710_v4 = vmul.f32 %v8833_v39, %v3370_v12 }
 0x38c   :  { %v4088_v19 = vadd.f32 %v4056_v24, %v4018_v59  ;;  %v3880_v50 = vadd.f32 %v3848_v13, %v3810_v54  ;;  %v3949_v1 = vadd.f32 %v3917_v62, %v3879_v7  ;;  %v3671_v43 = vadd.f32 %v3639_v30, %v3571_v5 }
 0x38d   :  { %v4057_v45 = vmul.f32 %v8880_v61, %v9051_v49  ;;  %v4058_v56 = vmul.f32 %v8880_v61, %v9053_v26  ;;  %v3672_v18 = vadd.f32 %v3640_v40, %v3572_v27  ;;  %v3779_v8 = vmul.f32 %v8842_v31, %v9044_v48  ;;  %v3507_v27 = vld [vmem:[#allocation2 + $0x71] sm:$0xff] }
 0x38e   :  { %v4124_v32 = vadd.f32 %v8922_v10, %v4088_v19  ;;  %v3950_v42 = vadd.f32 %v3918_v14, %v3880_v50  ;;  %v4019_v36 = vadd.f32 %v3987_v63, %v3949_v1  ;;  %v3741_v11 = vadd.f32 %v3709_v34, %v3671_v43  ;;  %v3607_v43 = vld [vmem:[#allocation2 + $0x72] sm:$0xff] }
 0x38f   :  { %v6088_v12 = vpop.f32.mrb[16].mxu1  ;;  %v3742_v60 = vadd.f32 %v3710_v4, %v3672_v18  ;;  %v3780_v62 = vmul.f32 %v8842_v31, %v9046_v23  ;;  %v3849_v53 = vmul.f32 %v8845_v33, %v9051_v49  ;;  %v3850_v17 = vmul.f32 %v8845_v33, %v9053_v26 }
 0x390   :  { %v3303_v29 = vadd.f32 %v6088_v12, %v8811_v22  ;;  %v3294_v30 = vpop.f32.mrb[17].mxu1  ;;  %v4156_v25 = vmax.f32 %v4124_v32, 0.0  ;;  %v4020_v41 = vadd.f32 %v3988_v20, %v3950_v42  ;;  %v4089_v46 = vadd.f32 %v4057_v45, %v4019_v36 }
 0x391   :  { %v3295_v14 = vadd.f32 %v8811_v22, %v3294_v30  ;;  %v6089_v34 = vpop.f32.mrb[18].mxu1  ;;  %v3811_v24 = vadd.f32 %v3779_v8, %v3741_v11  ;;  %v3812_v13 = vadd.f32 %v3780_v62, %v3742_v60  ;;  %v3919_v28 = vmul.f32 %v8850_v58, %v9000_v15 }
 0x392   :  { %v9079_v5 = vmax.f32 %v3303_v29, 0.0  ;;  %v3306_v59 = vadd.f32 %v6089_v34, %v8811_v22  ;;  %v3297_v54 = vpop.f32.mrb[19].mxu1  ;;  %v4184_v7 = vpack.c.bf16 %v4156_v25, %v4155_v44  ;;  %v4090_v63 = vadd.f32 %v4058_v56, %v4020_v41 }
 0x393   :  { %v3373_v40 = vmax.f32 %v3295_v14, 0.0  ;;  %v3298_v20 = vadd.f32 %v8811_v22, %v3297_v54  ;;  %v4125_v4 = vadd.f32 %v8922_v10, %v4089_v46  ;;  %v3881_v19 = vadd.f32 %v3849_v53, %v3811_v24 }
 0x394   :  { %3407 = vst [vmem:[#allocation2 + $0x90] sm:$0xff] %v9079_v5  ;;  %v9085_v50 = vmax.f32 %v3306_v59, 0.0  ;;  %6123 = vmatmul.mubr.bf16.gmra.mrb[36].mxu0 %v4184_v7  ;;  %v4126_v1 = vadd.f32 %v8922_v10, %v4090_v63  ;;  %v3882_v45 = vadd.f32 %v3850_v17, %v3812_v13  ;;  %v3920_v44 = vmul.f32 %v8850_v58, %v9006_v51 }
 0x395   :  { %3405 = vst [vmem:[#allocation2 + $0x80] sm:$0xff] %v3373_v40  ;;  %v9090_v56 = vmax.f32 %v3298_v20, 0.0  ;;  %v4157_v18 = vmax.f32 %v4125_v4, 0.0  ;;  %v3951_v8 = vadd.f32 %v3919_v28, %v3881_v19  ;;  %v3989_v32 = vmul.f32 %v8871_v35, %v3507_v27 }
 0x396   :  { %3408 = vst [vmem:[#allocation2 + $0x98] sm:$0xff] %v9085_v50  ;;  %v4158_v42 = vmax.f32 %v4126_v1, 0.0  ;;  %v3952_v36 = vadd.f32 %v3920_v44, %v3882_v45  ;;  %v3541_v11 = vmul.f32 %v8827_v9, %v9044_v48  ;;  %v3542_v12 = vmul.f32 %v8827_v9, %v9046_v23 }
 0x397   :  { %3406 = vst [vmem:[#allocation2 + $0x88] sm:$0xff] %v9090_v56  ;;  %v3475_v60 = vmul.f32 %v8824_v2, %v9000_v15  ;;  %v4021_v62 = vadd.f32 %v3989_v32, %v3951_v8  ;;  %v4059_v53 = vmul.f32 %v8880_v61, %v3607_v43  ;;  %v3641_v17 = vmul.f32 %v8830_v38, %v9051_v49 }
 0x398   :  { %v4185_v29 = vpack.c.bf16 %v4158_v42, %v4157_v18  ;;  %v3573_v30 = vadd.f32 %v3541_v11, %v9021_v37  ;;  %v3574_v25 = vadd.f32 %v3542_v12, %v9024_v57  ;;  %v3642_v48 = vmul.f32 %v8830_v38, %v9053_v26 }
 0x399   :  { %v3476_v23 = vmul.f32 %v8824_v2, %v9006_v51  ;;  %v4091_v41 = vadd.f32 %v4059_v53, %v4021_v62  ;;  %v9111_v46 = vmul.f32 %v8824_v2, %v3373_v40  ;;  %v9115_v14 = vmul.f32 %v8824_v2, %v9090_v56 }
 0x39a   :  { %6126 = vmatprep.mubr.bf16.mxu0 %v4185_v29  ;;  %v3673_v49 = vadd.f32 %v3641_v17, %v3573_v30  ;;  %v3674_v34 = vadd.f32 %v3642_v48, %v3574_v25  ;;  %v3711_v37 = vmul.f32 %v8833_v39, %v9000_v15  ;;  %v3712_v57 = vmul.f32 %v8833_v39, %v9006_v51 }
 0x39b   :  { %v4127_v26 = vadd.f32 %v8922_v10, %v4091_v41  ;;  %v3781_v24 = vmul.f32 %v8842_v31, %v3507_v27  ;;  %v3851_v13 = vmul.f32 %v8845_v33, %v3607_v43  ;;  %v3543_v28 = vmul.f32 %v8827_v9, %v3507_v27 }
 0x39c   :  { %v3508_v59 = vld [vmem:[#allocation2 + $0x79] sm:$0xff]  ;;  %v3743_v7 = vadd.f32 %v3711_v37, %v3673_v49  ;;  %v3744_v63 = vadd.f32 %v3712_v57, %v3674_v34  ;;  %v3921_v20 = vmul.f32 %v8850_v58, %v3373_v40  ;;  %v3922_v15 = vmul.f32 %v8850_v58, %v9090_v56 }
 0x39d   :  { %v3608_v54 = vld [vmem:[#allocation2 + $0x7a] sm:$0xff]  ;;  %v3990_v4 = vmul.f32 %v8871_v35, %v3508_v59  ;;  %v3782_v51 = vmul.f32 %v8842_v31, %v3508_v59  ;;  %v3643_v19 = vmul.f32 %v8830_v38, %v3607_v43  ;;  %v3713_v1 = vmul.f32 %v8833_v39, %v3373_v40 }
 0x39e   :  { %v4060_v45 = vmul.f32 %v8880_v61, %v3608_v54  ;;  %v9133_v27 = vld [vmem:[#allocation2 + $0x81] sm:$0xff]  ;;  %v9135_v44 = vld [vmem:[#allocation2 + $0x89] sm:$0xff]  ;;  %v3813_v18 = vadd.f32 %v3781_v24, %v3743_v7  ;;  %v3544_v8 = vmul.f32 %v8827_v9, %v3508_v59  ;;  %v3575_v32 = vadd.f32 %v3543_v28, %v3475_v60 }
 0x39f   :  { %v4022_v42 = vadd.f32 %v3990_v4, %v3952_v36  ;;  %v4159_v11 = vmax.f32 %v4127_v26, 0.0  ;;  %v9138_v12 = vld [vmem:[#allocation2 + $0x82] sm:$0xff]  ;;  %v3814_v62 = vadd.f32 %v3782_v51, %v3744_v63  ;;  %v3852_v53 = vmul.f32 %v8845_v33, %v3608_v54  ;;  %v9145_v25 = vld [vmem:[#allocation2 + $0x8a] sm:$0xff] }
 0x3a0   :  { %v3883_v43 = vadd.f32 %v3851_v13, %v3813_v18  ;;  %v3991_v40 = vmul.f32 %v8871_v35, %v9133_v27  ;;  %v3992_v17 = vmul.f32 %v8871_v35, %v9135_v44  ;;  %v3576_v29 = vadd.f32 %v3544_v8, %v3476_v23 }
 0x3a1   :  { %v4092_v30 = vadd.f32 %v4060_v45, %v4022_v42  ;;  %v3884_v48 = vadd.f32 %v3852_v53, %v3814_v62  ;;  %v3644_v36 = vmul.f32 %v8830_v38, %v3608_v54  ;;  %v3675_v60 = vadd.f32 %v3643_v19, %v3575_v32 }
 0x3a2   :  { %v3953_v41 = vadd.f32 %v3921_v20, %v3883_v43  ;;  %v4061_v49 = vmul.f32 %v8880_v61, %v9138_v12  ;;  %v3714_v34 = vmul.f32 %v8833_v39, %v9090_v56  ;;  %v3783_v37 = vmul.f32 %v8842_v31, %v9133_v27  ;;  %v3511_v43 = vld [vmem:[#allocation2 + $0x91] sm:$0xff] }
 0x3a3   :  { %v4128_v57 = vadd.f32 %v8922_v10, %v4092_v30  ;;  %v3954_v23 = vadd.f32 %v3922_v15, %v3884_v48  ;;  %v3676_v26 = vadd.f32 %v3644_v36, %v3576_v29  ;;  %v3745_v24 = vadd.f32 %v3713_v1, %v3675_v60  ;;  %v3611_v60 = vld [vmem:[#allocation2 + $0x92] sm:$0xff] }
 0x3a4   :  { %v4023_v28 = vadd.f32 %v3991_v40, %v3953_v41  ;;  %v4062_v59 = vmul.f32 %v8880_v61, %v9145_v25  ;;  %v3784_v54 = vmul.f32 %v8842_v31, %v9135_v44  ;;  %v3853_v7 = vmul.f32 %v8845_v33, %v9138_v12 }
 0x3a5   :  { %v6092_v13 = vpop.f32.mrb[20].mxu1  ;;  %v4160_v20 = vmax.f32 %v4128_v57, 0.0  ;;  %v4024_v4 = vadd.f32 %v3992_v17, %v3954_v23  ;;  %v3746_v51 = vadd.f32 %v3714_v34, %v3676_v26  ;;  %v3815_v45 = vadd.f32 %v3783_v37, %v3745_v24 }
 0x3a6   :  { %v3319_v56 = vadd.f32 %v6092_v13, %v8811_v22  ;;  %v3310_v63 = vpop.f32.mrb[21].mxu1  ;;  %v4093_v1 = vadd.f32 %v4061_v49, %v4023_v28  ;;  %v3854_v18 = vmul.f32 %v8845_v33, %v9145_v25  ;;  %v3924_v37 = vmul.f32 %v8850_v58, %v9085_v50 }
 0x3a7   :  { %v3311_v15 = vadd.f32 %v8811_v22, %v3310_v63  ;;  %v6093_v19 = vpop.f32.mrb[22].mxu1  ;;  %v4186_v62 = vpack.c.bf16 %v4160_v20, %v4159_v11  ;;  %v4094_v53 = vadd.f32 %v4062_v59, %v4024_v4  ;;  %v3816_v30 = vadd.f32 %v3784_v54, %v3746_v51 }
 0x3a8   :  { %v9165_v8 = vmax.f32 %v3319_v56, 0.0  ;;  %v3322_v32 = vadd.f32 %v6093_v19, %v8811_v22  ;;  %v3313_v42 = vpop.f32.mrb[23].mxu1  ;;  %v4129_v29 = vadd.f32 %v8922_v10, %v4093_v1  ;;  %v3885_v41 = vadd.f32 %v3853_v7, %v3815_v45 }
 0x3a9   :  { %v9168_v40 = vmax.f32 %v3311_v15, 0.0  ;;  %v3314_v17 = vadd.f32 %v8811_v22, %v3313_v42  ;;  %6127 = vmatmul.mubr.bf16.gmra.mrb[40].mxu0 %v4186_v62  ;;  %v4130_v36 = vadd.f32 %v8922_v10, %v4094_v53  ;;  %v3923_v11 = vmul.f32 %v8850_v58, %v9079_v5 }
 0x3aa   :  { %3411 = vst [vmem:[#allocation2 + $0xb0] sm:$0xff] %v9165_v8  ;;  %v9173_v48 = vmax.f32 %v3322_v32, 0.0  ;;  %v3886_v34 = vadd.f32 %v3854_v18, %v3816_v30  ;;  %v3993_v57 = vmul.f32 %v8871_v35, %v3511_v43  ;;  %v4161_v23 = vmax.f32 %v4129_v29, 0.0 }
 0x3ab   :  { %3409 = vst [vmem:[#allocation2 + $0xa0] sm:$0xff] %v9168_v40  ;;  %v9179_v49 = vmax.f32 %v3314_v17, 0.0  ;;  %v4162_v26 = vmax.f32 %v4130_v36, 0.0  ;;  %v3955_v24 = vadd.f32 %v3923_v11, %v3885_v41  ;;  %v3545_v13 = vmul.f32 %v8827_v9, %v9133_v27 }
 0x3ac   :  { %3412 = vst [vmem:[#allocation2 + $0xb8] sm:$0xff] %v9173_v48  ;;  %v3479_v28 = vmul.f32 %v8824_v2, %v9079_v5  ;;  %v3956_v59 = vadd.f32 %v3924_v37, %v3886_v34  ;;  %v4063_v54 = vmul.f32 %v8880_v61, %v3611_v60  ;;  %v3546_v7 = vmul.f32 %v8827_v9, %v9135_v44 }
 0x3ad   :  { %3410 = vst [vmem:[#allocation2 + $0xa8] sm:$0xff] %v9179_v49  ;;  %v4187_v56 = vpack.c.bf16 %v4162_v26, %v4161_v23  ;;  %v4025_v63 = vadd.f32 %v3993_v57, %v3955_v24  ;;  %v3577_v20 = vadd.f32 %v3545_v13, %v9111_v46  ;;  %v3645_v4 = vmul.f32 %v8830_v38, %v9138_v12 }
 0x3ae   :  { %v3480_v27 = vmul.f32 %v8824_v2, %v9085_v50  ;;  %v3578_v51 = vadd.f32 %v3546_v7, %v9115_v14  ;;  %v3646_v15 = vmul.f32 %v8830_v38, %v9145_v25  ;;  %v3715_v19 = vmul.f32 %v8833_v39, %v9079_v5 }
 0x3af   :  { %6130 = vmatprep.mubr.bf16.mxu0 %v4187_v56  ;;  %v4095_v44 = vadd.f32 %v4063_v54, %v4025_v63  ;;  %v3677_v1 = vadd.f32 %v3645_v4, %v3577_v20  ;;  %v3716_v46 = vmul.f32 %v8833_v39, %v9085_v50  ;;  %v3785_v45 = vmul.f32 %v8842_v31, %v3511_v43 }
 0x3b0   :  { %v3678_v12 = vadd.f32 %v3646_v15, %v3578_v51  ;;  %v3855_v18 = vmul.f32 %v8845_v33, %v3611_v60  ;;  %v3925_v14 = vmul.f32 %v8850_v58, %v9168_v40  ;;  %v3926_v25 = vmul.f32 %v8850_v58, %v9179_v49 }
 0x3b1   :  { %v4131_v5 = vadd.f32 %v8922_v10, %v4095_v44  ;;  %v3747_v62 = vadd.f32 %v3715_v19, %v3677_v1  ;;  %v3547_v53 = vmul.f32 %v8827_v9, %v3511_v43  ;;  %v3647_v50 = vmul.f32 %v8830_v38, %v3611_v60 }
 0x3b2   :  { %v3512_v32 = vld [vmem:[#allocation2 + $0x99] sm:$0xff]  ;;  %v3748_v30 = vadd.f32 %v3716_v46, %v3678_v12  ;;  %v3717_v46 = vmul.f32 %v8833_v39, %v9168_v40 }
 0x3b3   :  { %v3612_v42 = vld [vmem:[#allocation2 + $0x9a] sm:$0xff]  ;;  %v3994_v17 = vmul.f32 %v8871_v35, %v3512_v32  ;;  %v3786_v36 = vmul.f32 %v8842_v31, %v3512_v32  ;;  %v4163_v41 = vmax.f32 %v4131_v5, 0.0  ;;  %v3817_v57 = vadd.f32 %v3785_v45, %v3747_v62 }
 0x3b4   :  { %v4064_v29 = vmul.f32 %v8880_v61, %v3612_v42  ;;  %v9217_v11 = vld [vmem:[#allocation2 + $0xa1] sm:$0xff]  ;;  %v9219_v34 = vld [vmem:[#allocation2 + $0xa9] sm:$0xff]  ;;  %v3856_v23 = vmul.f32 %v8845_v33, %v3612_v42  ;;  %v3548_v43 = vmul.f32 %v8827_v9, %v3512_v32  ;;  %v3579_v20 = vadd.f32 %v3547_v53, %v3479_v28 }
 0x3b5   :  { %v9221_v37 = vld [vmem:[#allocation2 + $0xa2] sm:$0xff]  ;;  %v4026_v60 = vadd.f32 %v3994_v17, %v3956_v59  ;;  %v9225_v26 = vld [vmem:[#allocation2 + $0xaa] sm:$0xff]  ;;  %v3818_v24 = vadd.f32 %v3786_v36, %v3748_v30  ;;  %v3995_v13 = vmul.f32 %v8871_v35, %v9217_v11  ;;  %v3996_v54 = vmul.f32 %v8871_v35, %v9219_v34 }
 0x3b6   :  { %v3887_v7 = vadd.f32 %v3855_v18, %v3817_v57  ;;  %v4065_v56 = vmul.f32 %v8880_v61, %v9221_v37  ;;  %v4066_v63 = vmul.f32 %v8880_v61, %v9225_v26  ;;  %v3580_v59 = vadd.f32 %v3548_v43, %v3480_v27  ;;  %v9245_v27 = vld [vmem:[%s10319_s4 + $0x4] ss:$0 sm:$0xff] }
 0x3b7   :  { %v4096_v4 = vadd.f32 %v4064_v29, %v4026_v60  ;;  %v3888_v51 = vadd.f32 %v3856_v23, %v3818_v24  ;;  %v3648_v15 = vmul.f32 %v8830_v38, %v3612_v42  ;;  %v3679_v1 = vadd.f32 %v3647_v50, %v3579_v20 }
 0x3b8   :  { %v6096_v19 = vpop.f32.mrb[24].mxu1  ;;  %v3957_v44 = vadd.f32 %v3925_v14, %v3887_v7  ;;  %v3718_v45 = vmul.f32 %v8833_v39, %v9179_v49  ;;  %v3787_v50 = vmul.f32 %v8842_v31, %v9217_v11  ;;  %v3788_v7 = vmul.f32 %v8842_v31, %v9219_v34 }
 0x3b9   :  { %v3335_v12 = vadd.f32 %v6096_v19, %v8811_v22  ;;  %v3326_v18 = vpop.f32.mrb[25].mxu1  ;;  %v4132_v32 = vadd.f32 %v8922_v10, %v4096_v4  ;;  %v3958_v28 = vadd.f32 %v3926_v25, %v3888_v51  ;;  %v3680_v5 = vadd.f32 %v3648_v15, %v3580_v59  ;;  %v3515_v51 = vld [vmem:[#allocation2 + $0xb1] sm:$0xff] }
 0x3ba   :  { %v3327_v14 = vadd.f32 %v9245_v27, %v3326_v18  ;;  %v6097_v42 = vpop.f32.mrb[26].mxu1  ;;  %v4027_v62 = vadd.f32 %v3995_v13, %v3957_v44  ;;  %v3749_v53 = vadd.f32 %v3717_v46, %v3679_v1  ;;  %v3858_v15 = vmul.f32 %v8845_v33, %v9225_v26  ;;  %v3615_v1 = vld [vmem:[#allocation2 + $0xb2] sm:$0xff] }
 0x3bb   :  { %v9250_v17 = vmax.f32 %v3335_v12, 0.0  ;;  %v3338_v22 = vadd.f32 %v9245_v27, %v6097_v42  ;;  %v3329_v29 = vpop.f32.mrb[27].mxu1  ;;  %v4164_v25 = vmax.f32 %v4132_v32, 0.0  ;;  %v4028_v30 = vadd.f32 %v3996_v54, %v3958_v28 }
 0x3bc   :  { %v9253_v36 = vmax.f32 %v3327_v14, 0.0  ;;  %v3330_v57 = vadd.f32 %v9245_v27, %v3329_v29  ;;  %v4097_v23 = vadd.f32 %v4065_v56, %v4027_v62  ;;  %v3750_v43 = vadd.f32 %v3718_v45, %v3680_v5 }
 0x3bd   :  { %3415 = vst [vmem:[#allocation2 + $0xd0] sm:$0xff] %v9250_v17  ;;  %v9257_v60 = vmax.f32 %v3338_v22, 0.0  ;;  %v4188_v24 = vpack.c.bf16 %v4164_v25, %v4163_v41  ;;  %v4098_v13 = vadd.f32 %v4066_v63, %v4028_v30  ;;  %v3819_v4 = vadd.f32 %v3787_v50, %v3749_v53 }
 0x3be   :  { %3413 = vst [vmem:[#allocation2 + $0xc0] sm:$0xff] %v9253_v36  ;;  %v9262_v20 = vmax.f32 %v3330_v57, 0.0  ;;  %v4133_v54 = vadd.f32 %v8922_v10, %v4097_v23  ;;  %v3857_v56 = vmul.f32 %v8845_v33, %v9221_v37  ;;  %v3481_v41 = vmul.f32 %v8824_v2, %v9168_v40 }
 0x3bf   :  { %3416 = vst [vmem:[#allocation2 + $0xd8] sm:$0xff] %v9257_v60  ;;  %6131 = vmatmul.mubr.bf16.gmra.mrb[44].mxu0 %v4188_v24  ;;  %v4134_v63 = vadd.f32 %v8922_v10, %v4098_v13  ;;  %v3820_v59 = vadd.f32 %v3788_v7, %v3750_v43  ;;  %v3482_v19 = vmul.f32 %v8824_v2, %v9179_v49 }
 0x3c0   :  { %3414 = vst [vmem:[#allocation2 + $0xc8] sm:$0xff] %v9262_v20  ;;  %v9278_v44 = vmul.f32 %v8824_v2, %v9165_v8  ;;  %v3889_v46 = vadd.f32 %v3857_v56, %v3819_v4  ;;  %v3927_v40 = vmul.f32 %v8850_v58, %v9165_v8  ;;  %v4165_v45 = vmax.f32 %v4133_v54, 0.0 }
 0x3c1   :  { %v4166_v12 = vmax.f32 %v4134_v63, 0.0  ;;  %v3890_v18 = vadd.f32 %v3858_v15, %v3820_v59  ;;  %v3928_v32 = vmul.f32 %v8850_v58, %v9173_v48  ;;  %v3997_v5 = vmul.f32 %v8871_v35, %v3515_v51 }
 0x3c2   :  { %v3959_v28 = vadd.f32 %v3927_v40, %v3889_v46  ;;  %v3549_v49 = vmul.f32 %v8827_v9, %v9217_v11  ;;  %v3550_v14 = vmul.f32 %v8827_v9, %v9219_v34  ;;  %v3484_v62 = vmul.f32 %v8824_v2, %v9173_v48 }
 0x3c3   :  { %v4189_v42 = vpack.c.bf16 %v4166_v12, %v4165_v45  ;;  %v3960_v53 = vadd.f32 %v3928_v32, %v3890_v18  ;;  %v4067_v50 = vmul.f32 %v8880_v61, %v3615_v1  ;;  %v3649_v30 = vmul.f32 %v8830_v38, %v9221_v37 }
 0x3c4   :  { %v4029_v22 = vadd.f32 %v3997_v5, %v3959_v28  ;;  %v3581_v29 = vadd.f32 %v3549_v49, %v3481_v41  ;;  %v3582_v25 = vadd.f32 %v3550_v14, %v3482_v19  ;;  %v3650_v11 = vmul.f32 %v8830_v38, %v9225_v26  ;;  %v9326_v5 = vld [vmem:[%s10318_s3 + $0x38] ss:$0 sm:$0xff] }
 0x3c5   :  { %6134 = vmatprep.mubr.bf16.mxu0 %v4189_v42  ;;  %v3516_v57 = vld [vmem:[#allocation2 + $0xb9] sm:$0xff]  ;;  %v3719_v34 = vmul.f32 %v8833_v39, %v9165_v8  ;;  %v3720_v43 = vmul.f32 %v8833_v39, %v9173_v48  ;;  %v3789_v24 = vmul.f32 %v8842_v31, %v3515_v51  ;;  %v3859_v37 = vmul.f32 %v8845_v33, %v3615_v1 }
 0x3c6   :  { %v3616_v23 = vld [vmem:[#allocation2 + $0xba] sm:$0xff]  ;;  %v3998_v13 = vmul.f32 %v8871_v35, %v3516_v57  ;;  %v4099_v7 = vadd.f32 %v4067_v50, %v4029_v22  ;;  %v3681_v54 = vadd.f32 %v3649_v30, %v3581_v29  ;;  %v3682_v8 = vadd.f32 %v3650_v11, %v3582_v25 }
 0x3c7   :  { %v4068_v4 = vmul.f32 %v8880_v61, %v3616_v23  ;;  %v9304_v56 = vld [vmem:[#allocation2 + $0xc1] sm:$0xff]  ;;  %v9306_v41 = vld [vmem:[#allocation2 + $0xc9] sm:$0xff]  ;;  %v3790_v63 = vmul.f32 %v8842_v31, %v3516_v57  ;;  %v3929_v48 = vmul.f32 %v8850_v58, %v9253_v36  ;;  %v3860_v61 = vmul.f32 %v8845_v33, %v3616_v23 }
 0x3c8   :  { %v9308_v26 = vld [vmem:[#allocation2 + $0xc2] sm:$0xff]  ;;  %v4030_v59 = vadd.f32 %v3998_v13, %v3960_v53  ;;  %v4135_v15 = vadd.f32 %v8922_v10, %v4099_v7  ;;  %v9314_v19 = vld [vmem:[#allocation2 + $0xca] sm:$0xff]  ;;  %v3751_v46 = vadd.f32 %v3719_v34, %v3681_v54  ;;  %v3752_v40 = vadd.f32 %v3720_v43, %v3682_v8 }
 0x3c9   :  { %v3930_v45 = vmul.f32 %v8850_v58, %v9262_v20  ;;  %v3999_v12 = vmul.f32 %v8871_v35, %v9304_v56  ;;  %v4000_v18 = vmul.f32 %v8871_v35, %v9306_v41  ;;  %v4069_v49 = vmul.f32 %v9326_v5, %v9308_v26 }
 0x3ca   :  { %v4100_v32 = vadd.f32 %v4068_v4, %v4030_v59  ;;  %v3821_v28 = vadd.f32 %v3789_v24, %v3751_v46  ;;  %v4070_v14 = vmul.f32 %v9326_v5, %v9314_v19  ;;  %v4167_v42 = vmax.f32 %v4135_v15, 0.0 }
 0x3cb   :  { %v3822_v53 = vadd.f32 %v3790_v63, %v3752_v40  ;;  %v3551_v50 = vmul.f32 %v8827_v9, %v3515_v51  ;;  %v3552_v22 = vmul.f32 %v8827_v9, %v3516_v57  ;;  %v6100_v29 = vpop.f32.mrb[28].mxu1  ;;  %v3651_v11 = vmul.f32 %v8830_v38, %v3615_v1 }
 0x3cc   :  { %v4136_v25 = vadd.f32 %v8922_v10, %v4100_v32  ;;  %v3891_v30 = vadd.f32 %v3859_v37, %v3821_v28  ;;  %v3652_v34 = vmul.f32 %v8830_v38, %v3616_v23  ;;  %v3351_v43 = vadd.f32 %v9245_v27, %v6100_v29  ;;  %v3342_v24 = vpop.f32.mrb[29].mxu1 }
 0x3cd   :  { %v3892_v13 = vadd.f32 %v3860_v61, %v3822_v53  ;;  %v3583_v7 = vadd.f32 %v3551_v50, %v9278_v44  ;;  %v3584_v54 = vadd.f32 %v3552_v22, %v3484_v62  ;;  %v3343_v4 = vadd.f32 %v9245_v27, %v3342_v24  ;;  %v6101_v51 = vpop.f32.mrb[30].mxu1  ;;  %v9365_v50 = vld [vmem:[%s10319_s4 + $0x5] ss:$0 sm:$0xff] }
 0x3ce   :  { %v4168_v8 = vmax.f32 %v4136_v25, 0.0  ;;  %v3961_v57 = vadd.f32 %v3929_v48, %v3891_v30  ;;  %v3721_v10 = vmul.f32 %v8833_v39, %v9253_v36  ;;  %v9342_v37 = vmax.f32 %v3351_v43, 0.0  ;;  %v3345_v23 = vpop.f32.mrb[31].mxu1  ;;  %v3519_v30 = vld [vmem:[#allocation2 + $0xd1] sm:$0xff] }
 0x3cf   :  { %v3354_v1 = vadd.f32 %v9245_v27, %v6101_v51  ;;  %v3962_v63 = vadd.f32 %v3930_v45, %v3892_v13  ;;  %v3683_v59 = vadd.f32 %v3651_v11, %v3583_v7  ;;  %v9345_v15 = vmax.f32 %v3343_v4, 0.0  ;;  %v3619_v11 = vld [vmem:[#allocation2 + $0xd2] sm:$0xff] }
 0x3d0   :  { %v3346_v44 = vadd.f32 %v9245_v27, %v3345_v23  ;;  %v4190_v62 = vpack.c.bf16 %v4168_v8, %v4167_v42  ;;  %v4031_v46 = vadd.f32 %v3999_v12, %v3961_v57  ;;  %3419 = vst [vmem:[#allocation2 + $0xf0] sm:$0xff] %v9342_v37  ;;  %v3684_v40 = vadd.f32 %v3652_v34, %v3584_v54 }
 0x3d1   :  { %v9349_v61 = vmax.f32 %v3354_v1, 0.0  ;;  %v4032_v48 = vadd.f32 %v4000_v18, %v3962_v63  ;;  %v3722_v32 = vmul.f32 %v8833_v39, %v9262_v20  ;;  %3417 = vst [vmem:[#allocation2 + $0xe0] sm:$0xff] %v9345_v15  ;;  %v3753_v53 = vadd.f32 %v3721_v10, %v3683_v59 }
 0x3d2   :  { %v9354_v28 = vmax.f32 %v3346_v44, 0.0  ;;  %6135 = vmatmul.mubr.bf16.gmra.mrb[48].mxu0 %v4190_v62  ;;  %v4101_v45 = vadd.f32 %v4069_v49, %v4031_v46  ;;  %v3791_v27 = vmul.f32 %v8842_v31, %v9304_v56  ;;  %v3792_v18 = vmul.f32 %v8842_v31, %v9306_v41 }
 0x3d3   :  { %3420 = vst [vmem:[#allocation2 + $0xf8] sm:$0xff] %v9349_v61  ;;  %v4102_v12 = vadd.f32 %v4070_v14, %v4032_v48  ;;  %v3754_v42 = vadd.f32 %v3722_v32, %v3684_v40  ;;  %v3861_v29 = vmul.f32 %v8845_v33, %v9308_v26  ;;  %v3485_v14 = vmul.f32 %v8824_v2, %v9253_v36 }
 0x3d4   :  { %3418 = vst [vmem:[#allocation2 + $0xe8] sm:$0xff] %v9354_v28  ;;  %v4137_v49 = vadd.f32 %v9365_v50, %v4101_v45  ;;  %v3823_v22 = vadd.f32 %v3791_v27, %v3753_v53  ;;  %v3862_v43 = vmul.f32 %v8845_v33, %v9314_v19  ;;  %v3486_v24 = vmul.f32 %v8824_v2, %v9262_v20 }
 0x3d5   :  { %v4138_v25 = vadd.f32 %v9365_v50, %v4102_v12  ;;  %v3824_v34 = vadd.f32 %v3792_v18, %v3754_v42  ;;  %v3931_v54 = vmul.f32 %v8850_v58, %v9250_v17  ;;  %v3932_v36 = vmul.f32 %v8850_v58, %v9257_v60 }
 0x3d6   :  { %v4169_v13 = vmax.f32 %v4137_v49, 0.0  ;;  %v3893_v7 = vadd.f32 %v3861_v29, %v3823_v22  ;;  %v3553_v8 = vmul.f32 %v8827_v9, %v9304_v56  ;;  %v4001_v10 = vmul.f32 %v8871_v35, %v3519_v30 }
 0x3d7   :  { %v4170_v4 = vmax.f32 %v4138_v25, 0.0  ;;  %v3894_v51 = vadd.f32 %v3862_v43, %v3824_v34  ;;  %v4071_v1 = vmul.f32 %v9326_v5, %v3619_v11  ;;  %v3554_v20 = vmul.f32 %v8827_v9, %v9306_v41 }
 0x3d8   :  { %v3963_v57 = vadd.f32 %v3931_v54, %v3893_v7  ;;  %v3520_v63 = vld [vmem:[#allocation2 + $0xd9] sm:$0xff]  ;;  %v3585_v62 = vadd.f32 %v3553_v8, %v3485_v14  ;;  %v3653_v46 = vmul.f32 %v8830_v38, %v9308_v26  ;;  %v3654_v32 = vmul.f32 %v8830_v38, %v9314_v19 }
 0x3d9   :  { %v4191_v23 = vpack.c.bf16 %v4170_v4, %v4169_v13  ;;  %v3620_v59 = vld [vmem:[#allocation2 + $0xda] sm:$0xff]  ;;  %v3964_v44 = vadd.f32 %v3932_v36, %v3894_v51  ;;  %v4002_v48 = vmul.f32 %v8871_v35, %v3520_v63  ;;  %v3586_v56 = vadd.f32 %v3554_v20, %v3486_v24 }
 0x3da   :  { %v4033_v40 = vadd.f32 %v4001_v10, %v3963_v57  ;;  %v4072_v45 = vmul.f32 %v9326_v5, %v3620_v59  ;;  %v3685_v53 = vadd.f32 %v3653_v46, %v3585_v62  ;;  %v3723_v41 = vmul.f32 %v8833_v39, %v9250_v17 }
 0x3db   :  { %6138 = vmatprep.mubr.bf16.mxu0 %v4191_v23  ;;  %v3724_v27 = vmul.f32 %v8833_v39, %v9257_v60  ;;  %v4034_v12 = vadd.f32 %v4002_v48, %v3964_v44  ;;  %v3686_v26 = vadd.f32 %v3654_v32, %v3586_v56  ;;  %v3794_v18 = vmul.f32 %v8842_v31, %v3520_v63  ;;  %v3521_v22 = vld [vmem:[#allocation2 + $0xe1] sm:$0xff]  ;;  %v3522_v24 = vld [vmem:[#allocation2 + $0xe9] sm:$0xff] }
 0x3dc   :  { %v4103_v42 = vadd.f32 %v4071_v1, %v4033_v40  ;;  %v3487_v49 = vmul.f32 %v8824_v2, %v9250_v17  ;;  %v3488_v19 = vmul.f32 %v8824_v2, %v9257_v60  ;;  %v3755_v29 = vadd.f32 %v3723_v41, %v3685_v53  ;;  %v3621_v57 = vld [vmem:[#allocation2 + $0xe2] sm:$0xff]  ;;  %v3622_v40 = vld [vmem:[#allocation2 + $0xea] sm:$0xff] }
 0x3dd   :  { %v3793_v14 = vmul.f32 %v8842_v31, %v3519_v30  ;;  %v4104_v25 = vadd.f32 %v4072_v45, %v4034_v12  ;;  %v9406_v43 = vmul.f32 %v8824_v2, %v9345_v15  ;;  %v3756_v13 = vadd.f32 %v3724_v27, %v3686_v26 }
 0x3de   :  { %v4139_v34 = vadd.f32 %v9365_v50, %v4103_v42  ;;  %v3863_v54 = vmul.f32 %v8845_v33, %v3619_v11  ;;  %v3864_v17 = vmul.f32 %v8845_v33, %v3620_v59  ;;  %v3933_v60 = vmul.f32 %v8850_v58, %v9345_v15 }
 0x3df   :  { %v3825_v7 = vadd.f32 %v3793_v14, %v3755_v29  ;;  %v4140_v4 = vadd.f32 %v9365_v50, %v4104_v25  ;;  %v3826_v51 = vadd.f32 %v3794_v18, %v3756_v13  ;;  %v3934_v36 = vmul.f32 %v8850_v58, %v9354_v28  ;;  %v9430_v14 = vld [vmem:[#allocation2 + $0xf1] sm:$0xff]  ;;  %v3524_v25 = vld [vmem:[#allocation2 + $0xf9] sm:$0xff] }
 0x3e0   :  { %v4003_v8 = vmul.f32 %v8871_v35, %v3521_v22  ;;  %v4004_v1 = vmul.f32 %v8871_v35, %v3522_v24  ;;  %v3555_v20 = vmul.f32 %v8827_v9, %v3519_v30  ;;  %v3556_v23 = vmul.f32 %v8827_v9, %v3520_v63 }
 0x3e1   :  { %v3895_v10 = vadd.f32 %v3863_v54, %v3825_v7  ;;  %v4171_v44 = vmax.f32 %v4139_v34, 0.0  ;;  %v4172_v62 = vmax.f32 %v4140_v4, 0.0  ;;  %v3896_v46 = vadd.f32 %v3864_v17, %v3826_v51  ;;  %v9438_v4 = vld [vmem:[#allocation2 + $0xf2] sm:$0xff] }
 0x3e2   :  { %v3655_v48 = vmul.f32 %v8830_v38, %v3619_v11  ;;  %v3587_v32 = vadd.f32 %v3555_v20, %v3487_v49  ;;  %v3588_v45 = vadd.f32 %v3556_v23, %v3488_v19  ;;  %v3656_v53 = vmul.f32 %v8830_v38, %v3620_v59 }
 0x3e3   :  { %v3965_v56 = vadd.f32 %v3933_v60, %v3895_v10  ;;  %v4192_v41 = vpack.c.bf16 %v4172_v62, %v4171_v44  ;;  %v3966_v27 = vadd.f32 %v3934_v36, %v3896_v46  ;;  %v4073_v12 = vmul.f32 %v9326_v5, %v3621_v57  ;;  %v3624_v62 = vld [vmem:[#allocation2 + $0xfa] sm:$0xff] }
 0x3e4   :  { %v3725_v30 = vmul.f32 %v8833_v39, %v9345_v15  ;;  %v3687_v63 = vadd.f32 %v3655_v48, %v3587_v32  ;;  %v3688_v26 = vadd.f32 %v3656_v53, %v3588_v45  ;;  %v3726_v18 = vmul.f32 %v8833_v39, %v9354_v28 }
 0x3e5   :  { %v4035_v42 = vadd.f32 %v4003_v8, %v3965_v56  ;;  %6139 = vmatmul.mubr.bf16.gmra.mrb[52].mxu0 %v4192_v41  ;;  %v3490_v11 = vmul.f32 %v8824_v2, %v9354_v28  ;;  %v4036_v49 = vadd.f32 %v4004_v1, %v3966_v27  ;;  %v4074_v59 = vmul.f32 %v9326_v5, %v3622_v40 }
 0x3e6   :  { %v3795_v19 = vmul.f32 %v8842_v31, %v3521_v22  ;;  %v3757_v15 = vadd.f32 %v3725_v30, %v3687_v63  ;;  %v3758_v34 = vadd.f32 %v3726_v18, %v3688_v26  ;;  %v3796_v13 = vmul.f32 %v8842_v31, %v3522_v24 }
 0x3e7   :  { %v4105_v29 = vadd.f32 %v4073_v12, %v4035_v42  ;;  %v4106_v7 = vadd.f32 %v4074_v59, %v4036_v49  ;;  %v3865_v54 = vmul.f32 %v8845_v33, %v3621_v57  ;;  %v3866_v17 = vmul.f32 %v8845_v33, %v3622_v40 }
 0x3e8   :  { %v3935_v28 = vmul.f32 %v8850_v58, %v9342_v37  ;;  %v3827_v51 = vadd.f32 %v3795_v19, %v3757_v15  ;;  %v3828_v36 = vadd.f32 %v3796_v13, %v3758_v34  ;;  %v3936_v8 = vmul.f32 %v8850_v58, %v9349_v61  ;;  %v6250_v15 = vld [vmem:[%s10320_s5 + $0xc8] sm:$0xff]  }
 0x3e9   :  { %v4141_v60 = vadd.f32 %v9365_v50, %v4105_v29  ;;  %v4142_v10 = vadd.f32 %v9365_v50, %v4106_v7  ;;  %v4005_v1 = vmul.f32 %v8871_v35, %v9430_v14  ;;  %v4006_v20 = vmul.f32 %v8871_v35, %v3524_v25  ;;  %v6249_v29 = vld [vmem:[%s10320_s5 + $0xc0] sm:$0xff]  }
 0x3ea   :  { %v3557_v23 = vmul.f32 %v8827_v9, %v3521_v22  ;;  %v3897_v46 = vadd.f32 %v3865_v54, %v3827_v51  ;;  %v3898_v48 = vadd.f32 %v3866_v17, %v3828_v36  ;;  %v3558_v56 = vmul.f32 %v8827_v9, %v3522_v24  ;;  %6150 = vmatprep.subr.bf16.mxu1 %v6249_v29  ;;  %v3763_v51 = vld [vmem:[#allocation2 + $0x101] sm:$0xff] }
 0x3eb   :  { %v4173_v44 = vmax.f32 %v4141_v60, 0.0  ;;  %v4174_v32 = vmax.f32 %v4142_v10, 0.0  ;;  %v4075_v45 = vmul.f32 %v9326_v5, %v9438_v4  ;;  %v3657_v41 = vmul.f32 %v8830_v38, %v3621_v57  ;;  %6151 = vmatpush3.bf16.msra.mxu1 %v6249_v29 }
 0x3ec   :  { %v3589_v53 = vadd.f32 %v3557_v23, %v9406_v43  ;;  %v3967_v27 = vadd.f32 %v3935_v28, %v3897_v46  ;;  %v3968_v12 = vadd.f32 %v3936_v8, %v3898_v48  ;;  %v3590_v30 = vadd.f32 %v3558_v56, %v3490_v11  ;;  %v9477_v8 = vld [vmem:[#allocation2 + $0x100] sm:$0xff]  ;;  %6152 = vmatprep.subr.bf16.mxu1 %v6250_v15 }
 0x3ed   :  { %v3658_v42 = vmul.f32 %v8830_v38, %v3622_v40  ;;  %v4193_v22 = vpack.c.bf16 %v4174_v32, %v4173_v44  ;;  %v4076_v63 = vmul.f32 %v9326_v5, %v3624_v62  ;;  %v3727_v24 = vmul.f32 %v8833_v39, %v9342_v37  ;;  %v3833_v56 = vld [vmem:[#allocation2 + $0x102] sm:$0xff] }
 0x3ee   :  { %v3689_v26 = vadd.f32 %v3657_v41, %v3589_v53  ;;  %v4037_v18 = vadd.f32 %v4005_v1, %v3967_v27  ;;  %v4038_v49 = vadd.f32 %v4006_v20, %v3968_v12  ;;  %v3728_v43 = vmul.f32 %v8833_v39, %v9349_v61  ;;  %v3764_v20 = vld [vmem:[#allocation2 + $0x109] sm:$0xff] }
 0x3ef   :  { %v3690_v59 = vadd.f32 %v3658_v42, %v3590_v30  ;;  %6142 = vmatprep.mubr.bf16.mxu0 %v4193_v22  ;;  %v3491_v57 = vmul.f32 %v8824_v2, %v9342_v37  ;;  %v3492_v40 = vmul.f32 %v8824_v2, %v9349_v61  ;;  %v3797_v19 = vmul.f32 %v8842_v31, %v9430_v14  ;;  %v3834_v53 = vld [vmem:[#allocation2 + $0x10a] sm:$0xff] }
 0x3f0   :  { %v3759_v11 = vadd.f32 %v3727_v24, %v3689_v26  ;;  %v4107_v34 = vadd.f32 %v4075_v45, %v4037_v18  ;;  %v4108_v13 = vadd.f32 %v4076_v63, %v4038_v49  ;;  %v3798_v37 = vmul.f32 %v8842_v31, %v3524_v25  ;;  %6153 = vmatpush3.bf16.msra.mxu1 %v6250_v15 }
 0x3f1   :  { %v3760_v7 = vadd.f32 %v3728_v43, %v3690_v59  ;;  %v3560_v54 = vmul.f32 %v8827_v9, %v3524_v25  ;;  %v3867_v61 = vmul.f32 %v8845_v33, %v9438_v4  ;;  %v3868_v17 = vmul.f32 %v8845_v33, %v3624_v62 }
 0x3f2   :  { %v3829_v2 = vadd.f32 %v3797_v19, %v3759_v11  ;;  %v4143_v28 = vadd.f32 %v9365_v50, %v4107_v34  ;;  %v4144_v60 = vadd.f32 %v9365_v50, %v4108_v13  ;;  %v3937_v10 = vmul.f32 %v9477_v8, %v8850_v58  ;;  %v3974_v11 = vld [vmem:[#allocation2 + $0x119] sm:$0xff] }
 0x3f3   :  { %v3830_v36 = vadd.f32 %v3798_v37, %v3760_v7  ;;  %v3660_v25 = vmul.f32 %v8830_v38, %v3624_v62  ;;  %v3729_v1 = vmul.f32 %v9477_v8, %v8833_v39  ;;  %v4007_v44 = vmul.f32 %v8871_v35, %v3763_v51  ;;  %v4044_v34 = vld [vmem:[#allocation2 + $0x11a] sm:$0xff] }
 0x3f4   :  { %v3899_v23 = vadd.f32 %v3867_v61, %v3829_v2  ;;  %v4175_v46 = vmax.f32 %v4143_v28, 0.0  ;;  %v4176_v48 = vmax.f32 %v4144_v60, 0.0  ;;  %v4008_v45 = vmul.f32 %v8871_v35, %v3764_v20  ;;  %v4043_v2 = vld [vmem:[#allocation2 + $0x112] sm:$0xff] }
 0x3f5   :  { %v3900_v32 = vadd.f32 %v3868_v17, %v3830_v36  ;;  %v4077_v58 = vmul.f32 %v9326_v5, %v3833_v56  ;;  %v3559_v62 = vmul.f32 %v8827_v9, %v9430_v14  ;;  %v3592_v27 = vadd.f32 %v3560_v54, %v3492_v40 }
 0x3f6   :  { %v3969_v41 = vadd.f32 %v3937_v10, %v3899_v23  ;;  %v4194_v39 = vpack.c.bf16 %v4176_v48, %v4175_v46  ;;  %v3800_v12 = vmul.f32 %v8842_v31, %v3764_v20  ;;  %v4078_v42 = vmul.f32 %v9326_v5, %v3834_v53  ;;  %v6251_v23 = vld [vmem:[%s10320_s5 + $0xd0] sm:$0xff]  }
 0x3f7   :  { %v3970_v30 = vadd.f32 %v3937_v10, %v3900_v32  ;;  %v3591_v63 = vadd.f32 %v3559_v62, %v3491_v57  ;;  %v3659_v26 = vmul.f32 %v8830_v38, %v9438_v4  ;;  %v3692_v24 = vadd.f32 %v3660_v25, %v3592_v27  ;;  %v3973_v4 = vld [vmem:[#allocation2 + $0x111] sm:$0xff]  ;;  %6154 = vmatprep.subr.bf16.mxu1 %v6251_v23 }
 0x3f8   :  { %v4039_v22 = vadd.f32 %v4007_v44, %v3969_v41  ;;  %6143 = vmatmul.mubr.bf16.gmra.mrb[56].mxu0 %v4194_v39  ;;  %v3799_v18 = vmul.f32 %v8842_v31, %v3763_v51  ;;  %v3870_v9 = vmul.f32 %v8845_v33, %v3834_v53  ;;  %v3869_v19 = vmul.f32 %v8845_v33, %v3833_v56  ;;  %v6252_v44 = vld [vmem:[%s10320_s5 + $0xd8] sm:$0xff]   ;;  %v9526_v41 = vld [vmem:[%s10319_s4 + $0x6] ss:$0 sm:$0xff] }
 0x3f9   :  { %v4040_v49 = vadd.f32 %v4008_v45, %v3970_v30  ;;  %v3691_v59 = vadd.f32 %v3659_v26, %v3591_v63  ;;  %v3762_v43 = vadd.f32 %v3729_v1, %v3692_v24  ;;  %v4010_v37 = vmul.f32 %v8871_v35, %v3974_v11  ;;  %6155 = vmatpush3.bf16.msra.mxu1 %v6251_v23  ;;  %v6254_v45 = vld [vmem:[%s10320_s5 + $0xe8] sm:$0xff]   ;;  %v6256_v53 = vld [vmem:[%s10320_s5 + $0xf8] sm:$0xff]  }
 0x3fa   :  { %v4109_v14 = vadd.f32 %v4077_v58, %v4039_v22  ;;  %v4009_v28 = vmul.f32 %v8871_v35, %v3973_v4  ;;  %v4080_v33 = vmul.f32 %v9326_v5, %v4044_v34  ;;  %v4079_v25 = vmul.f32 %v9326_v5, %v4043_v2  ;;  %6156 = vmatprep.subr.bf16.mxu1 %v6252_v44  ;;  %v6253_v5 = vld [vmem:[%s10320_s5 + $0xe0] sm:$0xff]  }
 0x3fb   :  { %v4110_v40 = vadd.f32 %v4078_v42, %v4040_v49  ;;  %v3761_v57 = vadd.f32 %v3729_v1, %v3691_v59  ;;  %v3832_v15 = vadd.f32 %v3800_v12, %v3762_v43 }
 0x3fc   :  { %v4145_v29 = vadd.f32 %v9365_v50, %v4109_v14 }
 0x3fd   :  { %v4146_v38 = vadd.f32 %v9365_v50, %v4110_v40  ;;  %v3831_v31 = vadd.f32 %v3799_v18, %v3761_v57  ;;  %v3902_v7 = vadd.f32 %v3870_v9, %v3832_v15  ;;  %6157 = vmatpush3.bf16.msra.mxu1 %v6252_v44  ;;  %v5841_v18 = vld [vmem:[%s10318_s3 + $0x40] sm:$0xff] }
 0x3fe   :  { %v4177_v13 = vmax.f32 %v4145_v29, 0.0  ;;  %6158 = vmatprep.subr.bf16.mxu1 %v6253_v5  ;;  %v9539_v49 = vrot.slane %v5841_v18, %v10428_v21  ;;  %v9542_v9 = vrot.slane %v5841_v18, %v10427_v47  ;;  %v9545_v14 = vrot.slane %v5841_v18, %v10429_v0 }
 0x3ff   :  { %v4178_v54 = vmax.f32 %v4146_v38, 0.0  ;;  %v3901_v61 = vadd.f32 %v3869_v19, %v3831_v31  ;;  %v3972_v17 = vadd.f32 %v3937_v10, %v3902_v7  ;;  %v9548_v43 = vrot.slane %v5841_v18, %v10430_v3 }
 0x400   :  { %v9556_v0 = vrot.slane %v5841_v18, %v10431_v52 }
 0x401   :  { %v4195_v60 = vpack.c.bf16 %v4178_v54, %v4177_v13  ;;  %v3971_v51 = vadd.f32 %v3937_v10, %v3901_v61  ;;  %v4042_v36 = vadd.f32 %v4010_v37, %v3972_v17  ;;  %6159 = vmatpush3.bf16.msra.mxu1 %v6253_v5  ;;  %v9562_v37 = vrot.slane %v5841_v18, %v10432_v16 }
 0x402   :  { %6160 = vmatprep.subr.bf16.mxu1 %v6254_v45 }
 0x403   :  { %6146 = vmatprep.mubr.bf16.mxu0 %v4195_v60  ;;  %v4041_v1 = vadd.f32 %v4009_v28, %v3971_v51  ;;  %v4112_v20 = vadd.f32 %v4080_v33, %v4042_v36  ;;  %v9569_v51 = vrot.slane %v5841_v18, %v10433_v6 }
 0x405   :  { %v4111_v46 = vadd.f32 %v4079_v25, %v4041_v1  ;;  %v4148_v35 = vadd.f32 %v9365_v50, %v4112_v20  ;;  %6161 = vmatpush3.bf16.msra.mxu1 %v6254_v45 }
 0x407   :  { %v4147_v10 = vadd.f32 %v9365_v50, %v4111_v46  ;;  %v4180_v48 = vmax.f32 %v4148_v35, 0.0  ;;  %v6255_v50 = vld [vmem:[%s10320_s5 + $0xf0] sm:$0xff]  }
 0x408   :  { %6162 = vmatprep.subr.bf16.mxu1 %v6255_v50 }
 0x409   :  { %v4179_v56 = vmax.f32 %v4147_v10, 0.0  ;;  %6163 = vmatpush3.bf16.msra.mxu1 %v6255_v50 }
 0x40a   :  { %6164 = vmatprep.subr.bf16.mxu1 %v6256_v53 }
 0x40b   :  { %v4196_v32 = vpack.c.bf16 %v4180_v48, %v4179_v56 }
 0x40d   :  { %6147 = vmatmul.mubr.bf16.gmra.mrb[60].mxu0 %v4196_v32  ;;  %6165 = vmatpush3.bf16.msra.mxu1 %v6256_v53 }
 0x40e   :  { %6198 = vmatprep.subr.bf16.mxu1 %v9477_v8 }
 0x454   :  { %v6120_v58 = vpop.f32.mrb[32].mxu0 }
 0x455   :  { %v4310_v62 = vadd.f32 %v6120_v58, %v9526_v41  ;;  %v4301_v27 = vpop.f32.mrb[33].mxu0 }
 0x456   :  { %v4302_v39 = vadd.f32 %v9526_v41, %v4301_v27  ;;  %v6121_v12 = vpop.f32.mrb[34].mxu0 }
 0x457   :  { %v4430_v30 = vmax.f32 %v4310_v62, 0.0  ;;  %v4313_v42 = vadd.f32 %v6121_v12, %v9526_v41  ;;  %v4304_v22 = vpop.f32.mrb[35].mxu0 }
 0x458   :  { %v4428_v63 = vmax.f32 %v4302_v39, 0.0  ;;  %v4305_v26 = vadd.f32 %v9526_v41, %v4304_v22  ;;  %v9586_v39 = vrot.slane %v5841_v18, %v10434_v55 }
 0x459   :  { %4462 = vst [vmem:[#allocation2 + $0x10] sm:$0xff] %v4430_v30  ;;  %v9532_v8 = vmax.f32 %v4313_v42, 0.0  ;;  %v4534_v3 = vmul.f32 %v9542_v9, %v4430_v30  ;;  %v4770_v61 = vmul.f32 %v9548_v43, %v4430_v30  ;;  %v9593_v30 = vld [vmem:[%s10318_s3 + $0x48] ss:$0 sm:$0xff] }
 0x45a   :  { %4460 = vst [vmem:[#allocation2] sm:$0xff] %v4428_v63  ;;  %v4429_v24 = vmax.f32 %v4305_v26, 0.0  ;;  %v4532_v57 = vmul.f32 %v9542_v9, %v4428_v63 }
 0x45b   :  { %4463 = vst [vmem:[#allocation2 + $0x18] sm:$0xff] %v9532_v8  ;;  %v4771_v60 = vmul.f32 %v9548_v43, %v9532_v8  ;;  %v4535_v12 = vmul.f32 %v9542_v9, %v9532_v8 }
 0x45c   :  { %4461 = vst [vmem:[#allocation2 + $0x8] sm:$0xff] %v4429_v24  ;;  %v4533_v21 = vmul.f32 %v9542_v9, %v4429_v24 }
 0x462   :  { %v4566_v59 = vld [vmem:[#allocation2 + $0x11] sm:$0xff] }
 0x463   :  { %v4564_v40 = vld [vmem:[#allocation2 + $0x1] sm:$0xff]  ;;  %v4565_v11 = vld [vmem:[#allocation2 + $0x9] sm:$0xff]  ;;  %v4602_v19 = vmul.f32 %v9539_v49, %v4566_v59  ;;  %v4666_v13 = vld [vmem:[#allocation2 + $0x12] sm:$0xff]  ;;  %v4840_v1 = vmul.f32 %v9556_v0, %v4566_v59 }
 0x464   :  { %v4664_v29 = vld [vmem:[#allocation2 + $0x2] sm:$0xff]  ;;  %v4600_v15 = vmul.f32 %v9539_v49, %v4564_v40  ;;  %v4601_v47 = vmul.f32 %v9539_v49, %v4565_v11  ;;  %v4665_v38 = vld [vmem:[#allocation2 + $0xa] sm:$0xff]  ;;  %v4702_v16 = vmul.f32 %v9545_v14, %v4666_v13  ;;  %v4910_v32 = vmul.f32 %v9562_v37, %v4666_v13 }
 0x465   :  { %v4700_v31 = vmul.f32 %v9545_v14, %v4664_v29  ;;  %v4701_v7 = vmul.f32 %v9545_v14, %v4665_v38  ;;  %v4634_v2 = vadd.f32 %v4602_v19, %v4534_v3 }
 0x466   :  { %v4632_v4 = vadd.f32 %v4600_v15, %v4532_v57  ;;  %v4633_v34 = vadd.f32 %v4601_v47, %v4533_v21 }
 0x467   :  { %v6124_v54 = vpop.f32.mrb[36].mxu0  ;;  %v4734_v5 = vadd.f32 %v4702_v16, %v4634_v2 }
 0x468   :  { %v4326_v17 = vadd.f32 %v6124_v54, %v9526_v41  ;;  %v4317_v52 = vpop.f32.mrb[37].mxu0  ;;  %v4732_v28 = vadd.f32 %v4700_v31, %v4632_v4  ;;  %v4733_v33 = vadd.f32 %v4701_v7, %v4633_v34 }
 0x469   :  { %v4318_v36 = vadd.f32 %v9526_v41, %v4317_v52  ;;  %v6125_v25 = vpop.f32.mrb[38].mxu0 }
 0x46a   :  { %v9574_v20 = vmax.f32 %v4326_v17, 0.0  ;;  %v4329_v23 = vadd.f32 %v6125_v25, %v9526_v41  ;;  %v4320_v44 = vpop.f32.mrb[39].mxu0  ;;  %v4802_v46 = vadd.f32 %v4770_v61, %v4732_v28  ;;  %v4803_v35 = vadd.f32 %v4771_v60, %v4733_v33 }
 0x46b   :  { %v4432_v10 = vmax.f32 %v4318_v36, 0.0  ;;  %v4321_v48 = vadd.f32 %v9526_v41, %v4320_v44 }
 0x46c   :  { %4466 = vst [vmem:[#allocation2 + $0x30] sm:$0xff] %v9574_v20  ;;  %v9579_v6 = vmax.f32 %v4329_v23, 0.0  ;;  %v4872_v56 = vadd.f32 %v4840_v1, %v4802_v46  ;;  %v4982_v22 = vmul.f32 %v9569_v51, %v9574_v20  ;;  %v4774_v55 = vmul.f32 %v9548_v43, %v9574_v20 }
 0x46d   :  { %4464 = vst [vmem:[#allocation2 + $0x20] sm:$0xff] %v4432_v10  ;;  %v4433_v45 = vmax.f32 %v4321_v48, 0.0  ;;  %v4772_v50 = vmul.f32 %v9548_v43, %v4432_v10  ;;  %v4980_v58 = vmul.f32 %v9569_v51, %v4432_v10  ;;  %v4536_v42 = vmul.f32 %v9542_v9, %v4432_v10 }
 0x46e   :  { %4467 = vst [vmem:[#allocation2 + $0x38] sm:$0xff] %v9579_v6  ;;  %v4942_v53 = vadd.f32 %v4910_v32, %v4872_v56  ;;  %v9600_v63 = vmul.f32 %v9569_v51, %v9579_v6  ;;  %v4775_v40 = vmul.f32 %v9548_v43, %v9579_v6 }
 0x46f   :  { %4465 = vst [vmem:[#allocation2 + $0x28] sm:$0xff] %v4433_v45  ;;  %v4804_v62 = vadd.f32 %v4772_v50, %v4734_v5  ;;  %v4537_v26 = vmul.f32 %v9542_v9, %v4433_v45  ;;  %v4773_v18 = vmul.f32 %v9548_v43, %v4433_v45  ;;  %v4981_v59 = vmul.f32 %v9569_v51, %v4433_v45 }
 0x470   :  { %v5012_v27 = vadd.f32 %v4980_v58, %v4942_v53 }
 0x474   :  { %v4567_v8 = vld [vmem:[#allocation2 + $0x19] sm:$0xff] }
 0x475   :  { %v4667_v24 = vld [vmem:[#allocation2 + $0x1a] sm:$0xff]  ;;  %v4603_v11 = vmul.f32 %v9539_v49, %v4567_v8  ;;  %v4841_v29 = vmul.f32 %v9556_v0, %v4567_v8  ;;  %v9613_v21 = vld [vmem:[#allocation2 + $0x31] sm:$0xff] }
 0x476   :  { %v4703_v19 = vmul.f32 %v9545_v14, %v4667_v24  ;;  %v4911_v57 = vmul.f32 %v9562_v37, %v4667_v24  ;;  %v9615_v15 = vld [vmem:[#allocation2 + $0x32] sm:$0xff]  ;;  %v4568_v47 = vld [vmem:[#allocation2 + $0x21] sm:$0xff]  ;;  %v4569_v38 = vld [vmem:[#allocation2 + $0x29] sm:$0xff]  ;;  %v5052_v4 = vmul.f32 %v9586_v39, %v9613_v21  ;;  %v4844_v13 = vmul.f32 %v9556_v0, %v9613_v21 }
 0x477   :  { %v4668_v3 = vld [vmem:[#allocation2 + $0x22] sm:$0xff]  ;;  %v5122_v34 = vmul.f32 %v9593_v30, %v9615_v15  ;;  %v4914_v31 = vmul.f32 %v9562_v37, %v9615_v15  ;;  %v4604_v7 = vmul.f32 %v9539_v49, %v4568_v47  ;;  %v4605_v54 = vmul.f32 %v9539_v49, %v4569_v38  ;;  %v4669_v61 = vld [vmem:[#allocation2 + $0x2a] sm:$0xff] }
 0x478   :  { %v4635_v2 = vadd.f32 %v4603_v11, %v4535_v12  ;;  %v4704_v17 = vmul.f32 %v9545_v14, %v4668_v3  ;;  %v4705_v52 = vmul.f32 %v9545_v14, %v4669_v61  ;;  %v4842_v28 = vmul.f32 %v9556_v0, %v4568_v47 }
 0x479   :  { %v4843_v33 = vmul.f32 %v9556_v0, %v4569_v38  ;;  %v4873_v60 = vadd.f32 %v4841_v29, %v4803_v35  ;;  %v4636_v36 = vadd.f32 %v4604_v7, %v4536_v42  ;;  %v4637_v25 = vadd.f32 %v4605_v54, %v4537_v26 }
 0x47a   :  { %v4735_v16 = vadd.f32 %v4703_v19, %v4635_v2  ;;  %v4912_v1 = vmul.f32 %v9562_v37, %v4668_v3  ;;  %v4874_v23 = vadd.f32 %v4842_v28, %v4804_v62  ;;  %v4913_v44 = vmul.f32 %v9562_v37, %v4669_v61  ;;  %v9640_v62 = vld [vmem:[%s10319_s4 + $0x7] ss:$0 sm:$0xff] }
 0x47b   :  { %v4943_v46 = vadd.f32 %v4911_v57, %v4873_v60  ;;  %v5050_v10 = vmul.f32 %v9586_v39, %v4568_v47  ;;  %v4736_v48 = vadd.f32 %v4704_v17, %v4636_v36  ;;  %v4737_v5 = vadd.f32 %v4705_v52, %v4637_v25 }
 0x47c   :  { %v4805_v56 = vadd.f32 %v4773_v18, %v4735_v16  ;;  %v5051_v32 = vmul.f32 %v9586_v39, %v4569_v38  ;;  %v6128_v45 = vpop.f32.mrb[40].mxu0  ;;  %v4944_v50 = vadd.f32 %v4912_v1, %v4874_v23  ;;  %v5120_v58 = vmul.f32 %v9593_v30, %v4668_v3 }
 0x47d   :  { %v5013_v53 = vadd.f32 %v4981_v59, %v4943_v46  ;;  %v5082_v35 = vadd.f32 %v5050_v10, %v5012_v27  ;;  %v4342_v12 = vadd.f32 %v6128_v45, %v9526_v41  ;;  %v4333_v42 = vpop.f32.mrb[41].mxu0  ;;  %v5121_v8 = vmul.f32 %v9593_v30, %v4669_v61 }
 0x47e   :  { %v4875_v26 = vadd.f32 %v4843_v33, %v4805_v56  ;;  %v4806_v24 = vadd.f32 %v4774_v55, %v4736_v48  ;;  %v4334_v18 = vadd.f32 %v9526_v41, %v4333_v42  ;;  %v6129_v11 = vpop.f32.mrb[42].mxu0  ;;  %v5014_v19 = vadd.f32 %v4982_v22, %v4944_v50 }
 0x47f   :  { %v5083_v59 = vadd.f32 %v5051_v32, %v5013_v53  ;;  %v5152_v27 = vadd.f32 %v5120_v58, %v5082_v35  ;;  %v4438_v29 = vmax.f32 %v4342_v12, 0.0  ;;  %v4345_v57 = vadd.f32 %v6129_v11, %v9526_v41  ;;  %v4336_v47 = vpop.f32.mrb[43].mxu0 }
 0x480   :  { %v4945_v38 = vadd.f32 %v4913_v44, %v4875_v26  ;;  %v4807_v3 = vadd.f32 %v4775_v40, %v4737_v5  ;;  %v4436_v7 = vmax.f32 %v4334_v18, 0.0  ;;  %v4337_v54 = vadd.f32 %v9526_v41, %v4336_v47 }
 0x481   :  { %v5153_v2 = vadd.f32 %v5121_v8, %v5083_v59  ;;  %v5188_v17 = vadd.f32 %v9640_v62, %v5152_v27  ;;  %4470 = vst [vmem:[#allocation2 + $0x50] sm:$0xff] %v4438_v29  ;;  %v4439_v55 = vmax.f32 %v4345_v57, 0.0  ;;  %v5084_v52 = vadd.f32 %v5052_v4, %v5014_v19 }
 0x482   :  { %v5015_v61 = vadd.f32 %v9600_v63, %v4945_v38  ;;  %v4876_v22 = vadd.f32 %v4844_v13, %v4806_v24  ;;  %4468 = vst [vmem:[#allocation2 + $0x40] sm:$0xff] %v4436_v7  ;;  %v4437_v28 = vmax.f32 %v4337_v54, 0.0  ;;  %v4984_v40 = vmul.f32 %v9569_v51, %v4436_v7 }
 0x483   :  { %v5189_v33 = vadd.f32 %v9640_v62, %v5153_v2  ;;  %4471 = vst [vmem:[#allocation2 + $0x58] sm:$0xff] %v4439_v55  ;;  %v5154_v60 = vadd.f32 %v5122_v34, %v5084_v52  ;;  %v5220_v25 = vmax.f32 %v5188_v17, 0.0  ;;  %v4538_v63 = vmul.f32 %v9542_v9, %v9574_v20 }
 0x484   :  { %v4946_v36 = vadd.f32 %v4914_v31, %v4876_v22  ;;  %4469 = vst [vmem:[#allocation2 + $0x48] sm:$0xff] %v4437_v28  ;;  %v4539_v4 = vmul.f32 %v9542_v9, %v9579_v6  ;;  %v4606_v34 = vmul.f32 %v9539_v49, %v9613_v21  ;;  %v4540_v13 = vmul.f32 %v9542_v9, %v4436_v7 }
 0x485   :  { %v5221_v16 = vmax.f32 %v5189_v33, 0.0  ;;  %v9651_v1 = vadd.f32 %v9640_v62, %v5154_v60  ;;  %v4541_v31 = vmul.f32 %v9542_v9, %v4437_v28  ;;  %v9662_v46 = vmul.f32 %v9548_v43, %v4436_v7 }
 0x486   :  { %v5016_v23 = vadd.f32 %v4984_v40, %v4946_v36  ;;  %v9665_v10 = vmul.f32 %v9548_v43, %v4437_v28  ;;  %v4985_v48 = vmul.f32 %v9569_v51, %v4437_v28  ;;  %v4542_v20 = vmul.f32 %v9542_v9, %v4438_v29 }
 0x487   :  { %v5252_v44 = vpack.c.bf16 %v5221_v16, %v5220_v25  ;;  %v9670_v6 = vmul.f32 %v9542_v9, %v4439_v55  ;;  %v4706_v21 = vmul.f32 %v9545_v14, %v9615_v15  ;;  %v5222_v32 = vmax.f32 %v9651_v1, 0.0 }
 0x488   :  { %v9676_v45 = vmul.f32 %v9548_v43, %v4438_v29  ;;  %v9679_v50 = vmul.f32 %v9548_v43, %v4439_v55  ;;  %v9682_v53 = vmul.f32 %v9569_v51, %v4438_v29  ;;  %v4638_v15 = vadd.f32 %v4606_v34, %v4538_v63 }
 0x489   :  { %6166 = vmatprep.mubr.bf16.mxu1 %v5252_v44  ;;  %v4571_v5 = vld [vmem:[#allocation2 + $0x39] sm:$0xff]  ;;  %v9691_v26 = vmul.f32 %v9569_v51, %v4439_v55 }
 0x48a   :  { %v4671_v56 = vld [vmem:[#allocation2 + $0x3a] sm:$0xff]  ;;  %v5053_v35 = vmul.f32 %v9586_v39, %v4571_v5  ;;  %v4845_v58 = vmul.f32 %v9556_v0, %v4571_v5  ;;  %v9686_v12 = vld [vmem:[#allocation2 + $0x51] sm:$0xff]  ;;  %v4607_v59 = vmul.f32 %v9539_v49, %v4571_v5 }
 0x48b   :  { %v9688_v42 = vld [vmem:[#allocation2 + $0x52] sm:$0xff]  ;;  %v5123_v8 = vmul.f32 %v9593_v30, %v4671_v56  ;;  %v4572_v24 = vld [vmem:[#allocation2 + $0x41] sm:$0xff]  ;;  %v4573_v18 = vld [vmem:[#allocation2 + $0x49] sm:$0xff]  ;;  %v4915_v19 = vmul.f32 %v9562_v37, %v4671_v56  ;;  %v4610_v27 = vmul.f32 %v9539_v49, %v9686_v12  ;;  %v4707_v7 = vmul.f32 %v9545_v14, %v4671_v56 }
 0x48c   :  { %v4672_v11 = vld [vmem:[#allocation2 + $0x42] sm:$0xff]  ;;  %v5085_v29 = vadd.f32 %v5053_v35, %v5015_v61  ;;  %v4608_v57 = vmul.f32 %v9539_v49, %v4572_v24  ;;  %v4609_v47 = vmul.f32 %v9539_v49, %v4573_v18  ;;  %v4673_v38 = vld [vmem:[#allocation2 + $0x4a] sm:$0xff]  ;;  %v4877_v17 = vadd.f32 %v4845_v58, %v4807_v3 }
 0x48d   :  { %v4708_v54 = vmul.f32 %v9545_v14, %v4672_v11  ;;  %v4709_v2 = vmul.f32 %v9545_v14, %v4673_v38  ;;  %v4710_v55 = vmul.f32 %v9545_v14, %v9688_v42  ;;  %v4846_v28 = vmul.f32 %v9556_v0, %v4572_v24 }
 0x48e   :  { %v5155_v52 = vadd.f32 %v5123_v8, %v5085_v29  ;;  %v4640_v22 = vadd.f32 %v4608_v57, %v4540_v13  ;;  %v4847_v61 = vmul.f32 %v9556_v0, %v4573_v18  ;;  %v4641_v33 = vadd.f32 %v4609_v47, %v4541_v31 }
 0x48f   :  { %v4916_v60 = vmul.f32 %v9562_v37, %v4672_v11  ;;  %v4947_v36 = vadd.f32 %v4915_v19, %v4877_v17  ;;  %v5054_v40 = vmul.f32 %v9586_v39, %v4572_v24  ;;  %v4917_v16 = vmul.f32 %v9562_v37, %v4673_v38 }
 0x490   :  { %v5191_v25 = vadd.f32 %v9640_v62, %v5155_v52  ;;  %v5055_v3 = vmul.f32 %v9586_v39, %v4573_v18  ;;  %v5124_v1 = vmul.f32 %v9593_v30, %v4672_v11  ;;  %v5125_v13 = vmul.f32 %v9593_v30, %v4673_v38 }
 0x491   :  { %v5017_v63 = vadd.f32 %v4985_v48, %v4947_v36  ;;  %v5086_v34 = vadd.f32 %v5054_v40, %v5016_v23  ;;  %v4639_v5 = vadd.f32 %v4607_v59, %v4539_v4  ;;  %v4642_v58 = vadd.f32 %v4610_v27, %v4542_v20 }
 0x492   :  { %v6132_v44 = vpop.f32.mrb[44].mxu0  ;;  %v5223_v35 = vmax.f32 %v5191_v25, 0.0  ;;  %v4738_v8 = vadd.f32 %v4706_v21, %v4638_v15  ;;  %v4740_v17 = vadd.f32 %v4708_v54, %v4640_v22  ;;  %v4741_v21 = vadd.f32 %v4709_v2, %v4641_v33 }
 0x493   :  { %v4358_v31 = vadd.f32 %v6132_v44, %v9526_v41  ;;  %v4349_v56 = vpop.f32.mrb[45].mxu0  ;;  %v5087_v29 = vadd.f32 %v5055_v3, %v5017_v63  ;;  %v5156_v57 = vadd.f32 %v5124_v1, %v5086_v34  ;;  %v4739_v18 = vadd.f32 %v4707_v7, %v4639_v5 }
 0x494   :  { %v4350_v24 = vadd.f32 %v9526_v41, %v4349_v56  ;;  %v6133_v19 = vpop.f32.mrb[46].mxu0  ;;  %v5253_v23 = vpack.c.bf16 %v5223_v35, %v5222_v32  ;;  %v4808_v15 = vadd.f32 %v9662_v46, %v4738_v8  ;;  %v4742_v32 = vadd.f32 %v4710_v55, %v4642_v58 }
 0x495   :  { %v4442_v47 = vmax.f32 %v4358_v31, 0.0  ;;  %v4361_v11 = vadd.f32 %v6133_v19, %v9526_v41  ;;  %v4352_v48 = vpop.f32.mrb[47].mxu0  ;;  %v5157_v59 = vadd.f32 %v5125_v13, %v5087_v29  ;;  %v5192_v52 = vadd.f32 %v9640_v62, %v5156_v57 }
 0x496   :  { %v4440_v38 = vmax.f32 %v4350_v24, 0.0  ;;  %v4353_v4 = vadd.f32 %v9526_v41, %v4352_v48  ;;  %6167 = vmatmul.mubr.bf16.vlgmr.msra.gmra.mrb[32].mxu1 %v5253_v23  ;;  %v4809_v27 = vadd.f32 %v9665_v10, %v4739_v18  ;;  %v4848_v54 = vmul.f32 %v9556_v0, %v9686_v12 }
 0x497   :  { %4474 = vst [vmem:[#allocation2 + $0x70] sm:$0xff] %v4442_v47  ;;  %v4443_v20 = vmax.f32 %v4361_v11, 0.0  ;;  %v5193_v36 = vadd.f32 %v9640_v62, %v5157_v59  ;;  %v5224_v22 = vmax.f32 %v5192_v52, 0.0  ;;  %v4878_v40 = vadd.f32 %v4846_v28, %v4808_v15 }
 0x498   :  { %4472 = vst [vmem:[#allocation2 + $0x60] sm:$0xff] %v4440_v38  ;;  %v4441_v7 = vmax.f32 %v4353_v4, 0.0  ;;  %v4879_v25 = vadd.f32 %v4847_v61, %v4809_v27  ;;  %v4918_v3 = vmul.f32 %v9562_v37, %v9688_v42  ;;  %v5056_v46 = vmul.f32 %v9586_v39, %v9686_v12 }
 0x499   :  { %4475 = vst [vmem:[#allocation2 + $0x78] sm:$0xff] %v4443_v20  ;;  %v5225_v2 = vmax.f32 %v5193_v36, 0.0  ;;  %v5126_v10 = vmul.f32 %v9593_v30, %v9688_v42  ;;  %v4780_v55 = vmul.f32 %v9548_v43, %v4440_v38  ;;  %v4948_v33 = vadd.f32 %v4916_v60, %v4878_v40 }
 0x49a   :  { %4473 = vst [vmem:[#allocation2 + $0x68] sm:$0xff] %v4441_v7  ;;  %v4949_v1 = vadd.f32 %v4917_v16, %v4879_v25  ;;  %v4544_v44 = vmul.f32 %v9542_v9, %v4440_v38  ;;  %v4810_v28 = vadd.f32 %v9676_v45, %v4740_v17  ;;  %v4545_v63 = vmul.f32 %v9542_v9, %v4441_v7 }
 0x49b   :  { %v5254_v61 = vpack.c.bf16 %v5225_v2, %v5224_v22  ;;  %v9735_v34 = vmul.f32 %v9548_v43, %v4441_v7  ;;  %v4811_v13 = vadd.f32 %v9679_v50, %v4741_v21  ;;  %v5018_v12 = vadd.f32 %v9682_v53, %v4948_v33 }
 0x49c   :  { %v5019_v42 = vadd.f32 %v9691_v26, %v4949_v1  ;;  %v4880_v5 = vadd.f32 %v4848_v54, %v4810_v28  ;;  %v4988_v60 = vmul.f32 %v9569_v51, %v4440_v38  ;;  %v4989_v16 = vmul.f32 %v9569_v51, %v4441_v7 }
 0x49d   :  { %6170 = vmatprep.mubr.bf16.mxu1 %v5254_v61  ;;  %v9743_v45 = vmul.f32 %v9542_v9, %v4442_v47  ;;  %v9746_v31 = vmul.f32 %v9542_v9, %v4443_v20  ;;  %v9748_v56 = vadd.f32 %v4780_v55, %v4742_v32  ;;  %v5088_v58 = vadd.f32 %v5056_v46, %v5018_v12 }
 0x49e   :  { %v4950_v53 = vadd.f32 %v4918_v3, %v4880_v5  ;;  %v9751_v26 = vmul.f32 %v9548_v43, %v4442_v47  ;;  %v9754_v8 = vmul.f32 %v9548_v43, %v4443_v20  ;;  %v9759_v29 = vmul.f32 %v9569_v51, %v4442_v47 }
 0x49f   :  { %v4575_v35 = vld [vmem:[#allocation2 + $0x59] sm:$0xff]  ;;  %v9762_v57 = vmul.f32 %v9569_v51, %v4443_v20  ;;  %v5158_v48 = vadd.f32 %v5126_v10, %v5088_v58 }
 0x4a0   :  { %v4675_v50 = vld [vmem:[#allocation2 + $0x5a] sm:$0xff]  ;;  %v4611_v24 = vmul.f32 %v9539_v49, %v4575_v35  ;;  %v4849_v18 = vmul.f32 %v9556_v0, %v4575_v35  ;;  %v5057_v11 = vmul.f32 %v9586_v39, %v4575_v35  ;;  %v5020_v4 = vadd.f32 %v4988_v60, %v4950_v53  ;;  %v4578_v5 = vld [vmem:[#allocation2 + $0x71] sm:$0xff] }
 0x4a1   :  { %v4711_v19 = vmul.f32 %v9545_v14, %v4675_v50  ;;  %v4576_v23 = vld [vmem:[#allocation2 + $0x61] sm:$0xff]  ;;  %v4577_v17 = vld [vmem:[#allocation2 + $0x69] sm:$0xff]  ;;  %v4919_v52 = vmul.f32 %v9562_v37, %v4675_v50  ;;  %v5127_v27 = vmul.f32 %v9593_v30, %v4675_v50  ;;  %v5194_v7 = vadd.f32 %v9640_v62, %v5158_v48 }
 0x4a2   :  { %v4676_v38 = vld [vmem:[#allocation2 + $0x62] sm:$0xff]  ;;  %v4643_v59 = vadd.f32 %v4611_v24, %v9670_v6  ;;  %v4612_v21 = vmul.f32 %v9539_v49, %v4576_v23  ;;  %v4613_v47 = vmul.f32 %v9539_v49, %v4577_v17  ;;  %v4677_v15 = vld [vmem:[#allocation2 + $0x6a] sm:$0xff]  ;;  %v5089_v20 = vadd.f32 %v5057_v11, %v5019_v42 }
 0x4a3   :  { %v4712_v36 = vmul.f32 %v9545_v14, %v4676_v38  ;;  %v4713_v22 = vmul.f32 %v9545_v14, %v4677_v15  ;;  %v4850_v6 = vmul.f32 %v9556_v0, %v4576_v23  ;;  %v4851_v2 = vmul.f32 %v9556_v0, %v4577_v17 }
 0x4a4   :  { %v4644_v32 = vadd.f32 %v4612_v21, %v4544_v44  ;;  %v4645_v54 = vadd.f32 %v4613_v47, %v4545_v63  ;;  %v4743_v25 = vadd.f32 %v4711_v19, %v4643_v59  ;;  %v5159_v3 = vadd.f32 %v5127_v27, %v5089_v20 }
 0x4a5   :  { %v6136_v40 = vpop.f32.mrb[48].mxu0  ;;  %v4881_v46 = vadd.f32 %v4849_v18, %v4811_v13  ;;  %v5226_v33 = vmax.f32 %v5194_v7, 0.0  ;;  %v4920_v28 = vmul.f32 %v9562_v37, %v4676_v38  ;;  %v5058_v42 = vmul.f32 %v9586_v39, %v4576_v23 }
 0x4a6   :  { %v4374_v10 = vadd.f32 %v6136_v40, %v9526_v41  ;;  %v4365_v55 = vpop.f32.mrb[49].mxu0  ;;  %v4744_v1 = vadd.f32 %v4712_v36, %v4644_v32  ;;  %v5195_v63 = vadd.f32 %v9640_v62, %v5159_v3  ;;  %v4745_v50 = vadd.f32 %v4713_v22, %v4645_v54 }
 0x4a7   :  { %v4366_v44 = vadd.f32 %v9526_v41, %v4365_v55  ;;  %v6137_v61 = vpop.f32.mrb[50].mxu0  ;;  %v4951_v12 = vadd.f32 %v4919_v52, %v4881_v46  ;;  %v5059_v58 = vmul.f32 %v9586_v39, %v4577_v17  ;;  %v5090_v48 = vadd.f32 %v5058_v42, %v5020_v4  ;;  %v4678_v52 = vld [vmem:[#allocation2 + $0x72] sm:$0xff] }
 0x4a8   :  { %v9781_v60 = vmax.f32 %v4374_v10, 0.0  ;;  %v4377_v13 = vadd.f32 %v6137_v61, %v9526_v41  ;;  %v4368_v35 = vpop.f32.mrb[51].mxu0  ;;  %v5227_v19 = vmax.f32 %v5195_v63, 0.0  ;;  %v5128_v23 = vmul.f32 %v9593_v30, %v4676_v38 }
 0x4a9   :  { %v4444_v53 = vmax.f32 %v4366_v44, 0.0  ;;  %v4369_v24 = vadd.f32 %v9526_v41, %v4368_v35  ;;  %v5021_v18 = vadd.f32 %v4989_v16, %v4951_v12  ;;  %v4614_v59 = vmul.f32 %v9539_v49, %v4578_v5 }
 0x4aa   :  { %4478 = vst [vmem:[#allocation2 + $0x90] sm:$0xff] %v9781_v60  ;;  %v9787_v11 = vmax.f32 %v4377_v13, 0.0  ;;  %v5255_v47 = vpack.c.bf16 %v5227_v19, %v5226_v33  ;;  %v5129_v17 = vmul.f32 %v9593_v30, %v4677_v15  ;;  %v4921_v16 = vmul.f32 %v9562_v37, %v4677_v15 }
 0x4ab   :  { %4476 = vst [vmem:[#allocation2 + $0x80] sm:$0xff] %v4444_v53  ;;  %v4445_v21 = vmax.f32 %v4369_v24, 0.0  ;;  %v5091_v20 = vadd.f32 %v5059_v58, %v5021_v18  ;;  %v5160_v27 = vadd.f32 %v5128_v23, %v5090_v48  ;;  %v4646_v7 = vadd.f32 %v4614_v59, %v9743_v45 }
 0x4ac   :  { %4479 = vst [vmem:[#allocation2 + $0x98] sm:$0xff] %v9787_v11  ;;  %v4813_v4 = vadd.f32 %v9735_v34, %v4743_v25  ;;  %6171 = vmatmul.mubr.bf16.gmra.mrb[36].mxu1 %v5255_v47  ;;  %v4714_v36 = vmul.f32 %v9545_v14, %v4678_v52  ;;  %v4852_v32 = vmul.f32 %v9556_v0, %v4578_v5 }
 0x4ad   :  { %4477 = vst [vmem:[#allocation2 + $0x88] sm:$0xff] %v4445_v21  ;;  %v5161_v38 = vadd.f32 %v5129_v17, %v5091_v20  ;;  %v4882_v54 = vadd.f32 %v4850_v6, %v9748_v56  ;;  %v5196_v22 = vadd.f32 %v9640_v62, %v5160_v27  ;;  %v4922_v3 = vmul.f32 %v9562_v37, %v4678_v52 }
 0x4ae   :  { %v4883_v40 = vadd.f32 %v4851_v2, %v4813_v4  ;;  %v5060_v15 = vmul.f32 %v9586_v39, %v4578_v5  ;;  %v9803_v46 = vadd.f32 %v4714_v36, %v4646_v7  ;;  %v5130_v25 = vmul.f32 %v9593_v30, %v4678_v52 }
 0x4af   :  { %v5197_v45 = vadd.f32 %v9640_v62, %v5161_v38  ;;  %v4952_v34 = vadd.f32 %v4920_v28, %v4882_v54  ;;  %v5228_v10 = vmax.f32 %v5196_v22, 0.0  ;;  %v4548_v33 = vmul.f32 %v9542_v9, %v4444_v53 }
 0x4b0   :  { %v4953_v55 = vadd.f32 %v4921_v16, %v4883_v40  ;;  %v4549_v56 = vmul.f32 %v9542_v9, %v4445_v21  ;;  %v4814_v44 = vadd.f32 %v9751_v26, %v4744_v1  ;;  %v4815_v61 = vadd.f32 %v9754_v8, %v4745_v50 }
 0x4b1   :  { %v5229_v6 = vmax.f32 %v5197_v45, 0.0  ;;  %v5022_v2 = vadd.f32 %v9759_v29, %v4952_v34  ;;  %v9813_v28 = vmul.f32 %v9548_v43, %v4444_v53  ;;  %v9816_v5 = vmul.f32 %v9548_v43, %v4445_v21 }
 0x4b2   :  { %v4579_v63 = vld [vmem:[#allocation2 + $0x79] sm:$0xff]  ;;  %v5023_v42 = vadd.f32 %v9762_v57, %v4953_v55  ;;  %v4992_v13 = vmul.f32 %v9569_v51, %v4444_v53  ;;  %v4993_v29 = vmul.f32 %v9569_v51, %v4445_v21  ;;  %v9823_v26 = vmul.f32 %v9542_v9, %v9781_v60 }
 0x4b3   :  { %v4679_v12 = vld [vmem:[#allocation2 + $0x7a] sm:$0xff]  ;;  %v5256_v35 = vpack.c.bf16 %v5229_v6, %v5228_v10  ;;  %v4615_v58 = vmul.f32 %v9539_v49, %v4579_v63  ;;  %v4853_v57 = vmul.f32 %v9556_v0, %v4579_v63  ;;  %v5061_v1 = vmul.f32 %v9586_v39, %v4579_v63 }
 0x4b4   :  { %v4715_v8 = vmul.f32 %v9545_v14, %v4679_v12  ;;  %v5092_v50 = vadd.f32 %v5060_v15, %v5022_v2  ;;  %v4580_v24 = vld [vmem:[#allocation2 + $0x81] sm:$0xff]  ;;  %v4581_v19 = vld [vmem:[#allocation2 + $0x89] sm:$0xff]  ;;  %v4923_v48 = vmul.f32 %v9562_v37, %v4679_v12  ;;  %v5131_v47 = vmul.f32 %v9593_v30, %v4679_v12 }
 0x4b5   :  { %v4680_v18 = vld [vmem:[#allocation2 + $0x82] sm:$0xff]  ;;  %6174 = vmatprep.mubr.bf16.mxu1 %v5256_v35  ;;  %v4647_v53 = vadd.f32 %v4615_v58, %v9746_v31  ;;  %v4616_v23 = vmul.f32 %v9539_v49, %v4580_v24  ;;  %v4617_v59 = vmul.f32 %v9539_v49, %v4581_v19  ;;  %v4681_v52 = vld [vmem:[#allocation2 + $0x8a] sm:$0xff]  ;;  %v5093_v21 = vadd.f32 %v5061_v1, %v5023_v42 }
 0x4b6   :  { %v5162_v20 = vadd.f32 %v5130_v25, %v5092_v50  ;;  %v4716_v17 = vmul.f32 %v9545_v14, %v4680_v18  ;;  %v4717_v7 = vmul.f32 %v9545_v14, %v4681_v52  ;;  %v4854_v4 = vmul.f32 %v9556_v0, %v4580_v24 }
 0x4b7   :  { %v4648_v16 = vadd.f32 %v4616_v23, %v4548_v33  ;;  %v4649_v27 = vadd.f32 %v4617_v59, %v4549_v56  ;;  %v5163_v31 = vadd.f32 %v5131_v47, %v5093_v21  ;;  %v4884_v36 = vadd.f32 %v4852_v32, %v4814_v44 }
 0x4b8   :  { %v5198_v38 = vadd.f32 %v9640_v62, %v5162_v20  ;;  %v4885_v54 = vadd.f32 %v4853_v57, %v4815_v61  ;;  %v6140_v22 = vpop.f32.mrb[52].mxu0  ;;  %v4747_v40 = vadd.f32 %v4715_v8, %v4647_v53  ;;  %v4855_v34 = vmul.f32 %v9556_v0, %v4581_v19  ;;  %v4582_v8 = vld [vmem:[#allocation2 + $0x91] sm:$0xff] }
 0x4b9   :  { %v9837_v15 = vadd.f32 %v4716_v17, %v4648_v16  ;;  %v9839_v45 = vadd.f32 %v4717_v7, %v4649_v27  ;;  %v4390_v25 = vadd.f32 %v6140_v22, %v9526_v41  ;;  %v4381_v10 = vpop.f32.mrb[53].mxu0  ;;  %v5199_v55 = vadd.f32 %v9640_v62, %v5163_v31  ;;  %v4682_v53 = vld [vmem:[#allocation2 + $0x92] sm:$0xff] }
 0x4ba   :  { %v4924_v33 = vmul.f32 %v9562_v37, %v4680_v18  ;;  %v4954_v56 = vadd.f32 %v4922_v3, %v4884_v36  ;;  %v4382_v6 = vadd.f32 %v9526_v41, %v4381_v10  ;;  %v6141_v32 = vpop.f32.mrb[54].mxu0  ;;  %v5230_v2 = vmax.f32 %v5198_v38, 0.0 }
 0x4bb   :  { %v4955_v44 = vadd.f32 %v4923_v48, %v4885_v54  ;;  %v5062_v61 = vmul.f32 %v9586_v39, %v4580_v24  ;;  %v9847_v63 = vmax.f32 %v4390_v25, 0.0  ;;  %v4393_v12 = vadd.f32 %v6141_v32, %v9526_v41  ;;  %v4384_v42 = vpop.f32.mrb[55].mxu0 }
 0x4bc   :  { %v5231_v35 = vmax.f32 %v5199_v55, 0.0  ;;  %v5024_v58 = vadd.f32 %v4992_v13, %v4954_v56  ;;  %v9850_v57 = vmax.f32 %v4382_v6, 0.0  ;;  %v4385_v1 = vadd.f32 %v9526_v41, %v4384_v42 }
 0x4bd   :  { %v5025_v3 = vadd.f32 %v4993_v29, %v4955_v44  ;;  %v5063_v50 = vmul.f32 %v9586_v39, %v4581_v19  ;;  %4482 = vst [vmem:[#allocation2 + $0xb0] sm:$0xff] %v9847_v63  ;;  %v9855_v48 = vmax.f32 %v4393_v12, 0.0  ;;  %v5132_v59 = vmul.f32 %v9593_v30, %v4680_v18 }
 0x4be   :  { %v5257_v24 = vpack.c.bf16 %v5231_v35, %v5230_v2  ;;  %v5094_v23 = vadd.f32 %v5062_v61, %v5024_v58  ;;  %4480 = vst [vmem:[#allocation2 + $0xa0] sm:$0xff] %v9850_v57  ;;  %v9859_v13 = vmax.f32 %v4385_v1, 0.0  ;;  %v5133_v47 = vmul.f32 %v9593_v30, %v4681_v52 }
 0x4bf   :  { %v5095_v21 = vadd.f32 %v5063_v50, %v5025_v3  ;;  %v4618_v29 = vmul.f32 %v9539_v49, %v4582_v8  ;;  %4483 = vst [vmem:[#allocation2 + $0xb8] sm:$0xff] %v9855_v48  ;;  %v4925_v19 = vmul.f32 %v9562_v37, %v4681_v52  ;;  %v4551_v17 = vmul.f32 %v9542_v9, %v9787_v11 }
 0x4c0   :  { %6175 = vmatmul.mubr.bf16.gmra.mrb[40].mxu1 %v5257_v24  ;;  %v5164_v20 = vadd.f32 %v5132_v59, %v5094_v23  ;;  %v4718_v18 = vmul.f32 %v9545_v14, %v4682_v53  ;;  %4481 = vst [vmem:[#allocation2 + $0xa8] sm:$0xff] %v9859_v13  ;;  %v4816_v7 = vadd.f32 %v9813_v28, %v9803_v46 }
 0x4c1   :  { %v5165_v16 = vadd.f32 %v5133_v47, %v5095_v21  ;;  %v4650_v27 = vadd.f32 %v4618_v29, %v9823_v26  ;;  %v4817_v31 = vadd.f32 %v9816_v5, %v4747_v40  ;;  %v4786_v52 = vmul.f32 %v9548_v43, %v9781_v60 }
 0x4c2   :  { %v5200_v38 = vadd.f32 %v9640_v62, %v5164_v20  ;;  %v4787_v36 = vmul.f32 %v9548_v43, %v9787_v11  ;;  %v4856_v54 = vmul.f32 %v9556_v0, %v4582_v8  ;;  %v4886_v25 = vadd.f32 %v4854_v4, %v4816_v7 }
 0x4c3   :  { %v5201_v22 = vadd.f32 %v9640_v62, %v5165_v16  ;;  %v4887_v10 = vadd.f32 %v4855_v34, %v4817_v31  ;;  %v9881_v26 = vmul.f32 %v9562_v37, %v4682_v53  ;;  %v9883_v28 = vadd.f32 %v4718_v18, %v4650_v27 }
 0x4c4   :  { %v5232_v46 = vmax.f32 %v5200_v38, 0.0  ;;  %v4994_v5 = vmul.f32 %v9569_v51, %v9781_v60  ;;  %v4995_v40 = vmul.f32 %v9569_v51, %v9787_v11  ;;  %v4956_v56 = vadd.f32 %v4924_v33, %v4886_v25 }
 0x4c5   :  { %v5233_v55 = vmax.f32 %v5201_v22, 0.0  ;;  %v4957_v6 = vadd.f32 %v4925_v19, %v4887_v10  ;;  %v5064_v32 = vmul.f32 %v9586_v39, %v4582_v8  ;;  %v4583_v2 = vld [vmem:[#allocation2 + $0x99] sm:$0xff]  ;;  %v5134_v34 = vmul.f32 %v9593_v30, %v4682_v53 }
 0x4c6   :  { %v4683_v4 = vld [vmem:[#allocation2 + $0x9a] sm:$0xff]  ;;  %v4552_v44 = vmul.f32 %v9542_v9, %v9850_v57  ;;  %v4553_v61 = vmul.f32 %v9542_v9, %v9859_v13  ;;  %v4818_v60 = vadd.f32 %v4786_v52, %v9837_v15  ;;  %v4619_v11 = vmul.f32 %v9539_v49, %v4583_v2 }
 0x4c7   :  { %v5258_v12 = vpack.c.bf16 %v5233_v55, %v5232_v46  ;;  %v9899_v33 = vmul.f32 %v9548_v43, %v9850_v57  ;;  %v9903_v42 = vmul.f32 %v9548_v43, %v9859_v13  ;;  %v4719_v35 = vmul.f32 %v9545_v14, %v4683_v4  ;;  %v4584_v3 = vld [vmem:[#allocation2 + $0xa1] sm:$0xff]  ;;  %v4585_v50 = vld [vmem:[#allocation2 + $0xa9] sm:$0xff] }
 0x4c8   :  { %v5026_v58 = vadd.f32 %v4994_v5, %v4956_v56  ;;  %v5027_v8 = vadd.f32 %v4995_v40, %v4957_v6  ;;  %v5065_v1 = vmul.f32 %v9586_v39, %v4583_v2  ;;  %v4684_v15 = vld [vmem:[#allocation2 + $0xa2] sm:$0xff]  ;;  %v4651_v53 = vadd.f32 %v4619_v11, %v4551_v17  ;;  %v4685_v21 = vld [vmem:[#allocation2 + $0xaa] sm:$0xff] }
 0x4c9   :  { %6178 = vmatprep.mubr.bf16.mxu1 %v5258_v12  ;;  %v4857_v24 = vmul.f32 %v9556_v0, %v4583_v2  ;;  %v4620_v23 = vmul.f32 %v9539_v49, %v4584_v3  ;;  %v4621_v59 = vmul.f32 %v9539_v49, %v4585_v50  ;;  %v4927_v47 = vmul.f32 %v9562_v37, %v4683_v4  ;;  %v9926_v2 = vld [vmem:[%s10319_s4 + $0x6] ss:$0 sm:$0xff] }
 0x4ca   :  { %v5096_v29 = vadd.f32 %v5064_v32, %v5026_v58  ;;  %v5097_v19 = vadd.f32 %v5065_v1, %v5027_v8  ;;  %v5135_v20 = vmul.f32 %v9593_v30, %v4683_v4  ;;  %v4720_v27 = vmul.f32 %v9545_v14, %v4684_v15  ;;  %v4586_v1 = vld [vmem:[#allocation2 + $0xb1] sm:$0xff] }
 0x4cb   :  { %v4652_v18 = vadd.f32 %v4620_v23, %v4552_v44  ;;  %v4653_v16 = vadd.f32 %v4621_v59, %v4553_v61  ;;  %v4819_v7 = vadd.f32 %v4787_v36, %v9839_v45  ;;  %v6144_v17 = vpop.f32.mrb[56].mxu0  ;;  %v4751_v31 = vadd.f32 %v4719_v35, %v4651_v53 }
 0x4cc   :  { %v5166_v38 = vadd.f32 %v5134_v34, %v5096_v29  ;;  %v5167_v52 = vadd.f32 %v5135_v20, %v5097_v19  ;;  %v4721_v22 = vmul.f32 %v9545_v14, %v4685_v21  ;;  %v4406_v25 = vadd.f32 %v6144_v17, %v9526_v41  ;;  %v4397_v10 = vpop.f32.mrb[57].mxu0  ;;  %v4686_v29 = vld [vmem:[#allocation2 + $0xb2] sm:$0xff] }
 0x4cd   :  { %v4858_v46 = vmul.f32 %v9556_v0, %v4584_v3  ;;  %v4859_v5 = vmul.f32 %v9556_v0, %v4585_v50  ;;  %v4888_v40 = vadd.f32 %v4856_v54, %v4818_v60  ;;  %v4398_v55 = vadd.f32 %v9526_v41, %v4397_v10  ;;  %v6145_v56 = vpop.f32.mrb[58].mxu0 }
 0x4ce   :  { %v5202_v6 = vadd.f32 %v9640_v62, %v5166_v38  ;;  %v5203_v45 = vadd.f32 %v9640_v62, %v5167_v52  ;;  %v4889_v36 = vadd.f32 %v4857_v24, %v4819_v7  ;;  %v9921_v32 = vmax.f32 %v4406_v25, 0.0  ;;  %v4400_v34 = vpop.f32.mrb[59].mxu0 }
 0x4cf   :  { %v4409_v4 = vadd.f32 %v9926_v2, %v6145_v56  ;;  %v9929_v44 = vadd.f32 %v4720_v27, %v4652_v18  ;;  %v9931_v54 = vadd.f32 %v4721_v22, %v4653_v16  ;;  %v9933_v41 = vmax.f32 %v4398_v55, 0.0 }
 0x4d0   :  { %v4401_v61 = vadd.f32 %v9926_v2, %v4400_v34  ;;  %v5234_v60 = vmax.f32 %v5202_v6, 0.0  ;;  %v5235_v12 = vmax.f32 %v5203_v45, 0.0  ;;  %4486 = vst [vmem:[#allocation2 + $0xd0] sm:$0xff] %v9921_v32  ;;  %v4958_v35 = vadd.f32 %v9881_v26, %v4888_v40 }
 0x4d1   :  { %v9937_v11 = vmax.f32 %v4409_v4, 0.0  ;;  %v4959_v58 = vadd.f32 %v4927_v47, %v4889_v36  ;;  %v4996_v8 = vmul.f32 %v9569_v51, %v9850_v57  ;;  %4484 = vst [vmem:[#allocation2 + $0xc0] sm:$0xff] %v9933_v41  ;;  %v4928_v23 = vmul.f32 %v9562_v37, %v4684_v15 }
 0x4d2   :  { %v9943_v53 = vmax.f32 %v4401_v61, 0.0  ;;  %v5259_v24 = vpack.c.bf16 %v5235_v12, %v5234_v60  ;;  %v4997_v59 = vmul.f32 %v9569_v51, %v9859_v13  ;;  %v4929_v26 = vmul.f32 %v9562_v37, %v4685_v21 }
 0x4d3   :  { %4487 = vst [vmem:[#allocation2 + $0xd8] sm:$0xff] %v9937_v11  ;;  %v5028_v47 = vadd.f32 %v4996_v8, %v4958_v35  ;;  %v5066_v19 = vmul.f32 %v9586_v39, %v4584_v3  ;;  %v5067_v57 = vmul.f32 %v9586_v39, %v4585_v50  ;;  %v5136_v18 = vmul.f32 %v9593_v30, %v4684_v15 }
 0x4d4   :  { %4485 = vst [vmem:[#allocation2 + $0xc8] sm:$0xff] %v9943_v53  ;;  %6179 = vmatmul.mubr.bf16.gmra.mrb[44].mxu1 %v5259_v24  ;;  %v5029_v20 = vadd.f32 %v4997_v59, %v4959_v58  ;;  %v4554_v16 = vmul.f32 %v9542_v9, %v9847_v63  ;;  %v4622_v13 = vmul.f32 %v9539_v49, %v4586_v1 }
 0x4d5   :  { %v5098_v27 = vadd.f32 %v5066_v19, %v5028_v47  ;;  %v5137_v7 = vmul.f32 %v9593_v30, %v4685_v21  ;;  %v4555_v17 = vmul.f32 %v9542_v9, %v9855_v48  ;;  %v4722_v3 = vmul.f32 %v9545_v14, %v4686_v29 }
 0x4d6   :  { %v5099_v50 = vadd.f32 %v5067_v57, %v5029_v20  ;;  %v4654_v38 = vadd.f32 %v4622_v13, %v4554_v16  ;;  %v4820_v52 = vadd.f32 %v9899_v33, %v9883_v28  ;;  %v4821_v15 = vadd.f32 %v9903_v42, %v4751_v31 }
 0x4d7   :  { %v5168_v22 = vadd.f32 %v5136_v18, %v5098_v27  ;;  %v4790_v25 = vmul.f32 %v9548_v43, %v9847_v63  ;;  %v4791_v10 = vmul.f32 %v9548_v43, %v9855_v48  ;;  %v9969_v21 = vmul.f32 %v9556_v0, %v4586_v1 }
 0x4d8   :  { %v5169_v40 = vadd.f32 %v5137_v7, %v5099_v50  ;;  %v4890_v55 = vadd.f32 %v4858_v46, %v4820_v52  ;;  %v4891_v56 = vadd.f32 %v4859_v5, %v4821_v15  ;;  %v9972_v6 = vmul.f32 %v9562_v37, %v4686_v29  ;;  %v4587_v33 = vld [vmem:[#allocation2 + $0xb9] sm:$0xff]  ;;  %v10006_v7 = vld [vmem:[%s10318_s3 + $0x48] ss:$0 sm:$0xff] }
 0x4d9   :  { %v5204_v28 = vadd.f32 %v9640_v62, %v5168_v22  ;;  %v4687_v42 = vld [vmem:[#allocation2 + $0xba] sm:$0xff]  ;;  %v9975_v31 = vadd.f32 %v4722_v3, %v4654_v38  ;;  %v4998_v45 = vmul.f32 %v9569_v51, %v9847_v63  ;;  %v4999_v36 = vmul.f32 %v9569_v51, %v9855_v48 }
 0x4da   :  { %v5205_v4 = vadd.f32 %v9640_v62, %v5169_v40  ;;  %v4623_v46 = vmul.f32 %v9539_v49, %v4587_v33  ;;  %v5068_v5 = vmul.f32 %v9586_v39, %v4586_v1  ;;  %v5138_v34 = vmul.f32 %v9593_v30, %v4686_v29 }
 0x4db   :  { %v5236_v61 = vmax.f32 %v5204_v28, 0.0  ;;  %v4723_v60 = vmul.f32 %v9545_v14, %v4687_v42  ;;  %v4960_v12 = vadd.f32 %v4928_v23, %v4890_v55  ;;  %v4961_v35 = vadd.f32 %v4929_v26, %v4891_v56  ;;  %v9986_v58 = vld [vmem:[#allocation2 + $0xc1] sm:$0xff]  ;;  %v9988_v8 = vld [vmem:[#allocation2 + $0xc9] sm:$0xff] }
 0x4dc   :  { %v5237_v63 = vmax.f32 %v5205_v4, 0.0  ;;  %v4655_v24 = vadd.f32 %v4623_v46, %v4555_v17  ;;  %v4861_v48 = vmul.f32 %v9556_v0, %v4587_v33  ;;  %v4931_v59 = vmul.f32 %v9562_v37, %v4687_v42  ;;  %v4688_v29 = vld [vmem:[#allocation2 + $0xc2] sm:$0xff]  ;;  %v4689_v23 = vld [vmem:[#allocation2 + $0xca] sm:$0xff] }
 0x4dd   :  { %v5030_v47 = vadd.f32 %v4998_v45, %v4960_v12  ;;  %v5031_v19 = vadd.f32 %v4999_v36, %v4961_v35  ;;  %v5069_v1 = vmul.f32 %v9586_v39, %v4587_v33  ;;  %v4556_v30 = vmul.f32 %v9542_v9, %v9933_v41 }
 0x4de   :  { %v5260_v26 = vpack.c.bf16 %v5237_v63, %v5236_v61  ;;  %v4557_v57 = vmul.f32 %v9542_v9, %v9943_v53  ;;  %v4624_v20 = vmul.f32 %v9539_v49, %v9986_v58  ;;  %v4625_v18 = vmul.f32 %v9539_v49, %v9988_v8 }
 0x4df   :  { %v10001_v16 = vadd.f32 %v4723_v60, %v4655_v24  ;;  %v5100_v13 = vadd.f32 %v5068_v5, %v5030_v47  ;;  %v5101_v27 = vadd.f32 %v5069_v1, %v5031_v19  ;;  %v5139_v17 = vmul.f32 %v10006_v7, %v4687_v42 }
 0x4e0   :  { %6182 = vmatprep.mubr.bf16.mxu1 %v5260_v26  ;;  %v4656_v3 = vadd.f32 %v4624_v20, %v4556_v30  ;;  %v4657_v50 = vadd.f32 %v4625_v18, %v4557_v57  ;;  %v4724_v38 = vmul.f32 %v9545_v14, %v4688_v29  ;;  %v4725_v52 = vmul.f32 %v9545_v14, %v4689_v23  ;;  %v6148_v15 = vpop.f32.mrb[60].mxu0  ;;  %v4590_v26 = vld [vmem:[#allocation2 + $0xd1] sm:$0xff] }
 0x4e1   :  { %v5170_v22 = vadd.f32 %v5138_v34, %v5100_v13  ;;  %v5171_v40 = vadd.f32 %v5139_v17, %v5101_v27  ;;  %v4822_v55 = vadd.f32 %v4790_v25, %v9929_v44  ;;  %v4823_v56 = vadd.f32 %v4791_v10, %v9931_v54  ;;  %v4413_v33 = vpop.f32.mrb[61].mxu0  ;;  %v4690_v13 = vld [vmem:[#allocation2 + $0xd2] sm:$0xff] }
 0x4e2   :  { %v4422_v28 = vadd.f32 %v9926_v2, %v6148_v15  ;;  %v10014_v45 = vadd.f32 %v4724_v38, %v4656_v3  ;;  %v4792_v42 = vmul.f32 %v9548_v43, %v9933_v41  ;;  %v4793_v36 = vmul.f32 %v9548_v43, %v9943_v53  ;;  %v6149_v46 = vpop.f32.mrb[62].mxu0 }
 0x4e3   :  { %v4414_v4 = vadd.f32 %v9926_v2, %v4413_v33  ;;  %v5206_v5 = vadd.f32 %v9640_v62, %v5170_v22  ;;  %v5207_v44 = vadd.f32 %v9640_v62, %v5171_v40  ;;  %v10023_v25 = vadd.f32 %v4725_v52, %v4657_v50  ;;  %v4416_v34 = vpop.f32.mrb[63].mxu0 }
 0x4e4   :  { %v10025_v54 = vmax.f32 %v4422_v28, 0.0  ;;  %v4425_v10 = vadd.f32 %v9926_v2, %v6149_v46  ;;  %v4892_v61 = vadd.f32 %v9969_v21, %v4822_v55  ;;  %v4893_v60 = vadd.f32 %v4861_v48, %v4823_v56 }
 0x4e5   :  { %v10029_v12 = vmax.f32 %v4414_v4, 0.0  ;;  %v4417_v35 = vadd.f32 %v9926_v2, %v4416_v34  ;;  %v5238_v63 = vmax.f32 %v5206_v5, 0.0  ;;  %v5239_v24 = vmax.f32 %v5207_v44, 0.0 }
 0x4e6   :  { %4490 = vst [vmem:[#allocation2 + $0xf0] sm:$0xff] %v10025_v54  ;;  %v10033_v47 = vmax.f32 %v4425_v10, 0.0  ;;  %v4862_v62 = vmul.f32 %v9556_v0, %v9986_v58  ;;  %v4863_v19 = vmul.f32 %v9556_v0, %v9988_v8  ;;  %v4962_v1 = vadd.f32 %v9972_v6, %v4892_v61 }
 0x4e7   :  { %4488 = vst [vmem:[#allocation2 + $0xe0] sm:$0xff] %v10029_v12  ;;  %v10041_v21 = vmax.f32 %v4417_v35, 0.0  ;;  %v5261_v48 = vpack.c.bf16 %v5239_v24, %v5238_v63  ;;  %v4963_v2 = vadd.f32 %v4931_v59, %v4893_v60  ;;  %v5000_v30 = vmul.f32 %v9569_v51, %v9933_v41 }
 0x4e8   :  { %4491 = vst [vmem:[#allocation2 + $0xf8] sm:$0xff] %v10033_v47  ;;  %v4932_v57 = vmul.f32 %v9562_v37, %v4688_v29  ;;  %v4933_v20 = vmul.f32 %v9562_v37, %v4689_v23  ;;  %v5001_v18 = vmul.f32 %v9569_v51, %v9943_v53  ;;  %v5070_v6 = vmul.f32 %v9586_v39, %v9986_v58 }
 0x4e9   :  { %4489 = vst [vmem:[#allocation2 + $0xe8] sm:$0xff] %v10041_v21  ;;  %6183 = vmatmul.mubr.bf16.gmra.mrb[48].mxu1 %v5261_v48  ;;  %v5032_v59 = vadd.f32 %v5000_v30, %v4962_v1  ;;  %v5071_v41 = vmul.f32 %v9586_v39, %v9988_v8  ;;  %v5140_v27 = vmul.f32 %v10006_v7, %v4688_v29 }
 0x4ea   :  { %v5141_v17 = vmul.f32 %v10006_v7, %v4689_v23  ;;  %v5033_v3 = vadd.f32 %v5001_v18, %v4963_v2  ;;  %v4558_v50 = vmul.f32 %v9542_v9, %v9921_v32  ;;  %v4559_v53 = vmul.f32 %v9542_v9, %v9937_v11 }
 0x4eb   :  { %v4626_v58 = vmul.f32 %v9539_v49, %v4590_v26  ;;  %v5102_v38 = vadd.f32 %v5070_v6, %v5032_v59  ;;  %v4726_v52 = vmul.f32 %v9545_v14, %v4690_v13  ;;  %v4824_v15 = vadd.f32 %v4792_v42, %v9975_v31  ;;  %v10078_v42 = vld [vmem:[%s10319_s4 + $0x7] ss:$0 sm:$0xff] }
 0x4ec   :  { %v4825_v8 = vadd.f32 %v4793_v36, %v10001_v16  ;;  %v5103_v22 = vadd.f32 %v5071_v41, %v5033_v3  ;;  %v4794_v23 = vmul.f32 %v9548_v43, %v9921_v32  ;;  %v4795_v40 = vmul.f32 %v9548_v43, %v9937_v11 }
 0x4ed   :  { %v4658_v29 = vadd.f32 %v4626_v58, %v4558_v50  ;;  %v5172_v55 = vadd.f32 %v5140_v27, %v5102_v38  ;;  %v4864_v56 = vmul.f32 %v9556_v0, %v4590_v26  ;;  %v4894_v28 = vadd.f32 %v4862_v62, %v4824_v15 }
 0x4ee   :  { %v4895_v33 = vadd.f32 %v4863_v19, %v4825_v8  ;;  %v5173_v4 = vadd.f32 %v5141_v17, %v5103_v22  ;;  %v4591_v46 = vld [vmem:[#allocation2 + $0xd9] sm:$0xff]  ;;  %v4934_v31 = vmul.f32 %v9562_v37, %v4690_v13  ;;  %v5002_v16 = vmul.f32 %v9569_v51, %v9921_v32 }
 0x4ef   :  { %v4691_v5 = vld [vmem:[#allocation2 + $0xda] sm:$0xff]  ;;  %v10070_v44 = vadd.f32 %v4726_v52, %v4658_v29  ;;  %v5208_v36 = vadd.f32 %v10078_v42, %v5172_v55  ;;  %v4627_v10 = vmul.f32 %v9539_v49, %v4591_v46  ;;  %v5003_v34 = vmul.f32 %v9569_v51, %v9937_v11 }
 0x4f0   :  { %v5072_v61 = vmul.f32 %v9586_v39, %v4590_v26  ;;  %v5209_v60 = vadd.f32 %v10078_v42, %v5173_v4  ;;  %v4727_v35 = vmul.f32 %v9545_v14, %v4691_v5  ;;  %v4964_v63 = vadd.f32 %v4932_v57, %v4894_v28  ;;  %v4592_v24 = vld [vmem:[#allocation2 + $0xe1] sm:$0xff]  ;;  %v4593_v2 = vld [vmem:[#allocation2 + $0xe9] sm:$0xff] }
 0x4f1   :  { %v4965_v32 = vadd.f32 %v4933_v20, %v4895_v33  ;;  %v5240_v62 = vmax.f32 %v5208_v36, 0.0  ;;  %v4659_v19 = vadd.f32 %v4627_v10, %v4559_v53  ;;  %v4865_v1 = vmul.f32 %v9556_v0, %v4591_v46  ;;  %v4692_v26 = vld [vmem:[#allocation2 + $0xe2] sm:$0xff]  ;;  %v4693_v27 = vld [vmem:[#allocation2 + $0xea] sm:$0xff] }
 0x4f2   :  { %v5073_v48 = vmul.f32 %v9586_v39, %v4591_v46  ;;  %v5241_v30 = vmax.f32 %v5209_v60, 0.0  ;;  %v5034_v18 = vadd.f32 %v5002_v16, %v4964_v63  ;;  %v5142_v11 = vmul.f32 %v10006_v7, %v4690_v13 }
 0x4f3   :  { %v5035_v6 = vadd.f32 %v5003_v34, %v4965_v32  ;;  %v5143_v59 = vmul.f32 %v10006_v7, %v4691_v5  ;;  %v4560_v57 = vmul.f32 %v9542_v9, %v10029_v12  ;;  %v4561_v20 = vmul.f32 %v9542_v9, %v10041_v21 }
 0x4f4   :  { %v4628_v41 = vmul.f32 %v9539_v49, %v4592_v24  ;;  %v5262_v17 = vpack.c.bf16 %v5241_v30, %v5240_v62  ;;  %v5104_v3 = vadd.f32 %v5072_v61, %v5034_v18  ;;  %v4629_v53 = vmul.f32 %v9539_v49, %v4593_v2  ;;  %v4694_v30 = vld [vmem:[#allocation2 + $0xf2] sm:$0xff] }
 0x4f5   :  { %v5105_v50 = vadd.f32 %v5073_v48, %v5035_v6  ;;  %v4759_v58 = vadd.f32 %v4727_v35, %v4659_v19  ;;  %v4935_v13 = vmul.f32 %v9562_v37, %v4691_v5  ;;  %v4728_v52 = vmul.f32 %v9545_v14, %v4692_v26  ;;  %v4595_v48 = vld [vmem:[#allocation2 + $0xf9] sm:$0xff] }
 0x4f6   :  { %v4660_v38 = vadd.f32 %v4628_v41, %v4560_v57  ;;  %6186 = vmatprep.mubr.bf16.mxu1 %v5262_v17  ;;  %v5174_v15 = vadd.f32 %v5142_v11, %v5104_v3  ;;  %v4661_v22 = vadd.f32 %v4629_v53, %v4561_v20  ;;  %v4729_v29 = vmul.f32 %v9545_v14, %v4693_v27  ;;  %v4695_v11 = vld [vmem:[#allocation2 + $0xfa] sm:$0xff] }
 0x4f7   :  { %v5175_v8 = vadd.f32 %v5143_v59, %v5105_v50  ;;  %v4796_v55 = vmul.f32 %v9548_v43, %v10029_v12  ;;  %v4797_v28 = vmul.f32 %v9548_v43, %v10041_v21  ;;  %v4826_v33 = vadd.f32 %v4794_v23, %v10014_v45  ;;  %v4594_v23 = vld [vmem:[#allocation2 + $0xf1] sm:$0xff] }
 0x4f8   :  { %v4827_v4 = vadd.f32 %v4795_v40, %v10023_v25  ;;  %v5210_v46 = vadd.f32 %v10078_v42, %v5174_v15  ;;  %v10108_v16 = vadd.f32 %v4728_v52, %v4660_v38  ;;  %v4866_v36 = vmul.f32 %v9556_v0, %v4592_v24 }
 0x4f9   :  { %v5211_v5 = vadd.f32 %v10078_v42, %v5175_v8  ;;  %v10111_v10 = vadd.f32 %v4729_v29, %v4661_v22  ;;  %v4867_v34 = vmul.f32 %v9556_v0, %v4593_v2  ;;  %v4896_v61 = vadd.f32 %v4864_v56, %v4826_v33 }
 0x4fa   :  { %v4897_v60 = vadd.f32 %v4865_v1, %v4827_v4  ;;  %v5242_v35 = vmax.f32 %v5210_v46, 0.0  ;;  %v4936_v45 = vmul.f32 %v9562_v37, %v4692_v26  ;;  %v4937_v25 = vmul.f32 %v9562_v37, %v4693_v27 }
 0x4fb   :  { %v5243_v63 = vmax.f32 %v5211_v5, 0.0  ;;  %v4966_v40 = vadd.f32 %v4934_v31, %v4896_v61  ;;  %v5004_v62 = vmul.f32 %v9569_v51, %v10029_v12  ;;  %v5005_v19 = vmul.f32 %v9569_v51, %v10041_v21 }
 0x4fc   :  { %v4967_v32 = vadd.f32 %v4935_v13, %v4897_v60  ;;  %v5074_v56 = vmul.f32 %v9586_v39, %v4592_v24  ;;  %v5075_v1 = vmul.f32 %v9586_v39, %v4593_v2  ;;  %v5144_v6 = vmul.f32 %v10006_v7, %v4692_v26  ;;  %v4834_v60 = vld [vmem:[#allocation2 + $0x101] sm:$0xff] }
 0x4fd   :  { %v5263_v18 = vpack.c.bf16 %v5243_v63, %v5242_v35  ;;  %v5036_v59 = vadd.f32 %v5004_v62, %v4966_v40  ;;  %v4562_v31 = vmul.f32 %v9542_v9, %v10025_v54  ;;  %v4630_v12 = vmul.f32 %v9539_v49, %v4594_v23 }
 0x4fe   :  { %v5037_v57 = vadd.f32 %v5005_v19, %v4967_v32  ;;  %v5145_v21 = vmul.f32 %v10006_v7, %v4693_v27  ;;  %v4563_v20 = vmul.f32 %v9542_v9, %v10033_v47  ;;  %v4631_v24 = vmul.f32 %v9539_v49, %v4595_v48  ;;  %v4904_v19 = vld [vmem:[#allocation2 + $0x102] sm:$0xff] }
 0x4ff   :  { %6187 = vmatmul.mubr.bf16.gmra.mrb[52].mxu1 %v5263_v18  ;;  %v4730_v2 = vmul.f32 %v9545_v14, %v4694_v30  ;;  %v5106_v41 = vadd.f32 %v5074_v56, %v5036_v59  ;;  %v4662_v17 = vadd.f32 %v4630_v12, %v4562_v31  ;;  %v4731_v3 = vmul.f32 %v9545_v14, %v4695_v11  ;;  %v4905_v18 = vld [vmem:[#allocation2 + $0x10a] sm:$0xff] }
 0x500   :  { %v5107_v26 = vadd.f32 %v5075_v1, %v5037_v57  ;;  %v4663_v50 = vadd.f32 %v4631_v24, %v4563_v20  ;;  %v4798_v53 = vmul.f32 %v9548_v43, %v10025_v54  ;;  %v4828_v13 = vadd.f32 %v4796_v55, %v10070_v44 }
 0x501   :  { %v4829_v38 = vadd.f32 %v4797_v28, %v4759_v58  ;;  %v5176_v27 = vadd.f32 %v5144_v6, %v5106_v41  ;;  %v4799_v9 = vmul.f32 %v9548_v43, %v10033_v47  ;;  %v4868_v49 = vmul.f32 %v9556_v0, %v4594_v23 }
 0x502   :  { %v5177_v52 = vadd.f32 %v5145_v21, %v5107_v26  ;;  %v4762_v15 = vadd.f32 %v4730_v2, %v4662_v17  ;;  %v4869_v8 = vmul.f32 %v9556_v0, %v4595_v48  ;;  %v4898_v22 = vadd.f32 %v4866_v36, %v4828_v13  ;;  %v5044_v17 = vld [vmem:[#allocation2 + $0x111] sm:$0xff] }
 0x503   :  { %v4899_v29 = vadd.f32 %v4867_v34, %v4829_v38  ;;  %v5212_v14 = vadd.f32 %v10078_v42, %v5176_v27  ;;  %v4763_v4 = vadd.f32 %v4731_v3, %v4663_v50  ;;  %v4938_v44 = vmul.f32 %v9562_v37, %v4694_v30 }
 0x504   :  { %v5213_v33 = vadd.f32 %v10078_v42, %v5177_v52  ;;  %v4968_v58 = vadd.f32 %v4936_v45, %v4898_v22  ;;  %v5006_v28 = vmul.f32 %v9569_v51, %v10025_v54  ;;  %v5007_v46 = vmul.f32 %v9569_v51, %v10033_v47  ;;  %v5114_v22 = vld [vmem:[#allocation2 + $0x112] sm:$0xff] }
 0x505   :  { %v4969_v55 = vadd.f32 %v4937_v25, %v4899_v29  ;;  %v5244_v5 = vmax.f32 %v5212_v14, 0.0  ;;  %v4939_v36 = vmul.f32 %v9562_v37, %v4695_v11  ;;  %v5076_v34 = vmul.f32 %v9586_v39, %v4594_v23  ;;  %v4835_v25 = vld [vmem:[#allocation2 + $0x109] sm:$0xff]  ;;  %v10153_v23 = vld [vmem:[#allocation2 + $0x100] sm:$0xff] }
 0x506   :  { %v5245_v61 = vmax.f32 %v5213_v33, 0.0  ;;  %v5038_v35 = vadd.f32 %v5006_v28, %v4968_v58  ;;  %v5077_v40 = vmul.f32 %v9586_v39, %v4595_v48  ;;  %v5146_v45 = vmul.f32 %v10006_v7, %v4694_v30  ;;  %v5115_v29 = vld [vmem:[#allocation2 + $0x11a] sm:$0xff] }
 0x507   :  { %v5039_v63 = vadd.f32 %v5007_v46, %v4969_v55  ;;  %v5147_v54 = vmul.f32 %v10006_v7, %v4695_v11  ;;  %v4830_v62 = vadd.f32 %v4798_v53, %v10108_v16  ;;  %v4831_v47 = vadd.f32 %v4799_v9, %v10111_v10 }
 0x508   :  { %v5264_v32 = vpack.c.bf16 %v5245_v61, %v5244_v5  ;;  %v5108_v56 = vadd.f32 %v5076_v34, %v5038_v35  ;;  %v4800_v6 = vmul.f32 %v10153_v23, %v9548_v43  ;;  %v4870_v48 = vmul.f32 %v9556_v0, %v4834_v60 }
 0x509   :  { %v5109_v1 = vadd.f32 %v5077_v40, %v5039_v63  ;;  %v4871_v30 = vmul.f32 %v9556_v0, %v4835_v25  ;;  %v4900_v59 = vadd.f32 %v4868_v49, %v4830_v62  ;;  %v4901_v11 = vadd.f32 %v4869_v8, %v4831_v47 }
 0x50a   :  { %6190 = vmatprep.mubr.bf16.mxu1 %v5264_v32  ;;  %v5008_v16 = vmul.f32 %v10153_v23, %v9569_v51  ;;  %v5178_v10 = vadd.f32 %v5146_v45, %v5108_v56  ;;  %v4940_v31 = vmul.f32 %v9562_v37, %v4904_v19  ;;  %v4941_v12 = vmul.f32 %v9562_v37, %v4905_v18  ;;  %v5045_v37 = vld [vmem:[#allocation2 + $0x119] sm:$0xff] }
 0x50b   :  { %v5179_v57 = vadd.f32 %v5147_v54, %v5109_v1  ;;  %v4970_v21 = vadd.f32 %v4938_v44, %v4900_v59  ;;  %v4971_v20 = vadd.f32 %v4939_v36, %v4901_v11  ;;  %v5078_v43 = vmul.f32 %v9586_v39, %v4834_v60 }
 0x50c   :  { %v5079_v24 = vmul.f32 %v9586_v39, %v4835_v25  ;;  %v5214_v2 = vadd.f32 %v10078_v42, %v5178_v10  ;;  %v4832_v41 = vadd.f32 %v4800_v6, %v4762_v15  ;;  %v4833_v26 = vadd.f32 %v4800_v6, %v4763_v4 }
 0x50d   :  { %v5215_v0 = vadd.f32 %v10078_v42, %v5179_v57  ;;  %v5040_v51 = vadd.f32 %v5008_v16, %v4970_v21  ;;  %v5041_v3 = vadd.f32 %v5008_v16, %v4971_v20  ;;  %v5148_v50 = vmul.f32 %v10006_v7, %v4904_v19  ;;  %v10193_v21 = vld.sshfl [vmem:[%s10317_s2] sm:$0x11 pattern:$0x75316420] }
 0x50e   :  { %v5149_v53 = vmul.f32 %v10006_v7, %v4905_v18  ;;  %v5246_v13 = vmax.f32 %v5214_v2, 0.0  ;;  %v4902_v27 = vadd.f32 %v4870_v48, %v4832_v41  ;;  %v4903_v52 = vadd.f32 %v4871_v30, %v4833_v26 }
 0x50f   :  { %v5247_v38 = vmax.f32 %v5215_v0, 0.0  ;;  %v5110_v9 = vadd.f32 %v5078_v43, %v5040_v51  ;;  %v5111_v49 = vadd.f32 %v5079_v24, %v5041_v3  ;;  %v5080_v8 = vmul.f32 %v9586_v39, %v5044_v17  ;;  %v6257_v51 = vld [vmem:[%s10321_s6] sm:$0xff]  }
 0x510   :  { %v4972_v14 = vadd.f32 %v4940_v31, %v4902_v27  ;;  %v4973_v33 = vadd.f32 %v4941_v12, %v4903_v52  ;;  %v5081_v4 = vmul.f32 %v9586_v39, %v5045_v37  ;;  %v5150_v46 = vmul.f32 %v10006_v7, %v5114_v22  ;;  %6199 = vmatpush3.bf16.msra.mxu1 %v6257_v51 }
 0x511   :  { %v5265_v15 = vpack.c.bf16 %v5247_v38, %v5246_v13  ;;  %v5180_v44 = vadd.f32 %v5148_v50, %v5110_v9  ;;  %v5181_v58 = vadd.f32 %v5149_v53, %v5111_v49  ;;  %v5151_v5 = vmul.f32 %v10006_v7, %v5115_v29  ;;  %v10180_v7 = vld [vmem:[%s10319_s4 + $0x8] ss:$0 sm:$0xff]  ;;  %v10435_v9 = vld [vmem:[#allocation7_spill] sm:$0xff]  ;;  %6200 = vmatprep.subr.bf16.mxu1 %v10153_v23 }
 0x512   :  { %v5042_v55 = vadd.f32 %v5008_v16, %v4972_v14  ;;  %v5043_v28 = vadd.f32 %v5008_v16, %v4973_v33  ;;  %v6316_v0 = vmov 1966171168   ;;  %v5556_v50 = vcombine.high %v10193_v21, %v10193_v21  ;;  %v6258_v38 = vld [vmem:[%s10321_s6 + $0x8] sm:$0xff]   ;;  %v6259_v14 = vld [vmem:[%s10321_s6 + $0x10] sm:$0xff]   ;;  %v6260_v33 = vld [vmem:[%s10321_s6 + $0x18] sm:$0xff]  }
 0x513   :  { %6191 = vmatmul.mubr.bf16.gmra.mrb[56].mxu1 %v5265_v15  ;;  %v5216_v61 = vadd.f32 %v10078_v42, %v5180_v44  ;;  %v5217_v36 = vadd.f32 %v10078_v42, %v5181_v58  ;;  %v5558_v41 = vunpack.c.l.s4 %v6316_v0 }
 0x514   :  { %v5112_v34 = vadd.f32 %v5080_v8, %v5042_v55  ;;  %v5113_v60 = vadd.f32 %v5081_v4, %v5043_v28  ;;  %6201 = vmatpush3.bf16.msra.mxu1 %v6258_v38  ;;  %v6261_v4 = vld [vmem:[%s10321_s6 + $0x20] sm:$0xff]  }
 0x515   :  { %v5248_v35 = vmax.f32 %v5216_v61, 0.0  ;;  %v5249_v63 = vmax.f32 %v5217_v36, 0.0  ;;  %v5559_v53 = vunpack.c.0.s8 %v5558_v41  ;;  %6202 = vmatprep.subr.bf16.mxu1 %v10153_v23 }
 0x516   :  { %v5182_v40 = vadd.f32 %v5150_v46, %v5112_v34  ;;  %v5183_v45 = vadd.f32 %v5151_v5, %v5113_v60  ;;  %v6262_v5 = vld [vmem:[%s10321_s6 + $0x28] sm:$0xff]  }
 0x517   :  { %v5266_v39 = vpack.c.bf16 %v5249_v63, %v5248_v35  ;;  %v10208_v49 = vsub.s32 %v5559_v53, %v10435_v9 }
 0x518   :  { %v5218_v25 = vadd.f32 %v10078_v42, %v5182_v40  ;;  %v5219_v32 = vadd.f32 %v10078_v42, %v5183_v45  ;;  %6203 = vmatpush3.bf16.msra.mxu1 %v6259_v14 }
 0x519   :  { %6194 = vmatprep.mubr.bf16.mxu1 %v5266_v39  ;;  %v5563_v29 = vrot.slane %v10193_v21, %v10208_v49  ;;  %v5570_v15 = vrot.slane %v5556_v50, %v10208_v49  ;;  %6204 = vmatprep.subr.bf16.mxu1 %v10153_v23 }
 0x51a   :  { %v5250_v54 = vmax.f32 %v5218_v25, 0.0  ;;  %v5251_v62 = vmax.f32 %v5219_v32, 0.0 }
 0x51b   :  { %5605 = vmatprep.mubr.bf16.mxu0 %v5570_v15 }
 0x51c   :  { %v5267_v47 = vpack.c.bf16 %v5251_v62, %v5250_v54  ;;  %6205 = vmatpush3.bf16.msra.mxu1 %v6260_v33 }
 0x51d   :  { %6206 = vmatprep.subr.bf16.mxu1 %v10153_v23 }
 0x51e   :  { %6195 = vmatmul.mubr.bf16.gmra.mrb[60].mxu1 %v5267_v47 }
 0x51f   :  { %6214 = vmatprep.mubr.msk.bf16.mxu1 %vm6317_vm1, %v10153_v23 }
 0x520   :  { %6207 = vmatpush3.bf16.msra.mxu1 %v6261_v4 }
 0x521   :  { %6208 = vmatprep.subr.bf16.mxu1 %v10153_v23 }
 0x524   :  { %6209 = vmatpush3.bf16.msra.mxu1 %v6262_v5 }
 0x525   :  { %6210 = vmatprep.subr.bf16.mxu1 %v10153_v23 }
 0x569   :  { %v6168_v19 = vpop.f32.mrb[32].mxu1 }
 0x56a   :  { %v5381_v18 = vadd.f32 %v6168_v19, %v10180_v7  ;;  %v5372_v56 = vpop.f32.mrb[33].mxu1 }
 0x56b   :  { %v5373_v1 = vadd.f32 %v10180_v7, %v5372_v56  ;;  %v6169_v6 = vpop.f32.mrb[34].mxu1 }
 0x56c   :  { %v5384_v48 = vadd.f32 %v6169_v6, %v10180_v7  ;;  %v5375_v42 = vpop.f32.mrb[35].mxu1  ;;  %v5501_v59 = vmax.f32 %v5381_v18, 0.0 }
 0x56d   :  { %v5376_v30 = vadd.f32 %v10180_v7, %v5375_v42  ;;  %v5499_v16 = vmax.f32 %v5373_v1, 0.0 }
 0x56e   :  { %v5502_v11 = vmax.f32 %v5384_v48, 0.0 }
 0x56f   :  { %v5500_v10 = vmax.f32 %v5376_v30, 0.0 }
 0x570   :  { %v10186_v57 = vpack.c.bf16 %v5502_v11, %v5501_v59 }
 0x571   :  { %v10188_v31 = vpack.c.bf16 %v5500_v10, %v5499_v16 }
 0x57f   :  { %v6172_v12 = vpop.f32.mrb[36].mxu1 }
 0x580   :  { %v5397_v20 = vadd.f32 %v6172_v12, %v10180_v7  ;;  %v5388_v43 = vpop.f32.mrb[37].mxu1 }
 0x581   :  { %v5389_v24 = vadd.f32 %v10180_v7, %v5388_v43  ;;  %v6173_v2 = vpop.f32.mrb[38].mxu1 }
 0x582   :  { %v5400_v26 = vadd.f32 %v6173_v2, %v10180_v7  ;;  %v5391_v17 = vpop.f32.mrb[39].mxu1  ;;  %v5505_v37 = vmax.f32 %v5397_v20, 0.0 }
 0x583   :  { %v5392_v3 = vadd.f32 %v10180_v7, %v5391_v17  ;;  %v5503_v27 = vmax.f32 %v5389_v24, 0.0 }
 0x584   :  { %v5506_v13 = vmax.f32 %v5400_v26, 0.0 }
 0x585   :  { %v5504_v52 = vmax.f32 %v5392_v3, 0.0 }
 0x586   :  { %v10211_v8 = vpack.c.bf16 %v5506_v13, %v5505_v37 }
 0x587   :  { %v10213_v22 = vpack.c.bf16 %v5504_v52, %v5503_v27 }
 0x593   :  { %v6176_v44 = vpop.f32.mrb[40].mxu1 }
 0x594   :  { %v5413_v58 = vadd.f32 %v6176_v44, %v10180_v7  ;;  %v5404_v55 = vpop.f32.mrb[41].mxu1 }
 0x595   :  { %v5405_v28 = vadd.f32 %v10180_v7, %v5404_v55  ;;  %v6177_v46 = vpop.f32.mrb[42].mxu1 }
 0x596   :  { %v5416_v61 = vadd.f32 %v6177_v46, %v10180_v7  ;;  %v5407_v36 = vpop.f32.mrb[43].mxu1  ;;  %v5509_v60 = vmax.f32 %v5413_v58, 0.0 }
 0x597   :  { %v5408_v34 = vadd.f32 %v10180_v7, %v5407_v36  ;;  %v5507_v63 = vmax.f32 %v5405_v28, 0.0 }
 0x598   :  { %v5510_v35 = vmax.f32 %v5416_v61, 0.0 }
 0x599   :  { %v5508_v40 = vmax.f32 %v5408_v34, 0.0 }
 0x59a   :  { %v10238_v45 = vpack.c.bf16 %v5510_v35, %v5509_v60 }
 0x59b   :  { %v10241_v39 = vpack.c.bf16 %v5508_v40, %v5507_v63 }
 0x5a7   :  { %v6180_v25 = vpop.f32.mrb[44].mxu1 }
 0x5a8   :  { %v5429_v32 = vadd.f32 %v6180_v25, %v10180_v7  ;;  %v5420_v54 = vpop.f32.mrb[45].mxu1 }
 0x5a9   :  { %v5421_v62 = vadd.f32 %v10180_v7, %v5420_v54  ;;  %v6181_v47 = vpop.f32.mrb[46].mxu1 }
 0x5aa   :  { %v5432_v19 = vadd.f32 %v6181_v47, %v10180_v7  ;;  %v5423_v18 = vpop.f32.mrb[47].mxu1  ;;  %v5513_v1 = vmax.f32 %v5429_v32, 0.0 }
 0x5ab   :  { %v5424_v56 = vadd.f32 %v10180_v7, %v5423_v18  ;;  %v5511_v48 = vmax.f32 %v5421_v62, 0.0 }
 0x5ac   :  { %v5514_v6 = vmax.f32 %v5432_v19, 0.0 }
 0x5ad   :  { %v5512_v42 = vmax.f32 %v5424_v56, 0.0 }
 0x5ae   :  { %v10247_v30 = vpack.c.bf16 %v5514_v6, %v5513_v1 }
 0x5af   :  { %v10249_v59 = vpack.c.bf16 %v5512_v42, %v5511_v48 }
 0x5bc   :  { %v6184_v11 = vpop.f32.mrb[48].mxu1 }
 0x5bd   :  { %v5445_v16 = vadd.f32 %v6184_v11, %v10180_v7  ;;  %v5436_v10 = vpop.f32.mrb[49].mxu1 }
 0x5be   :  { %v5437_v12 = vadd.f32 %v10180_v7, %v5436_v10  ;;  %v6185_v20 = vpop.f32.mrb[50].mxu1  ;;  %v10436_v10 = vld [vmem:[#allocation6_spill] sm:$0xff] }
 0x5bf   :  { %v5448_v43 = vadd.f32 %v6185_v20, %v10180_v7  ;;  %v5439_v24 = vpop.f32.mrb[51].mxu1  ;;  %v5517_v0 = vmax.f32 %v5445_v16, 0.0  ;;  %v5631_v20 = vld [vmem:[%s10322_s7] sm:$0x1]  ;;  %vm5720_vm3 = vcmp.ge.s32.totalorder %v10436_v10, 64 }
 0x5c0   :  { %v5440_v2 = vadd.f32 %v10180_v7, %v5439_v24  ;;  %v5515_v26 = vmax.f32 %v5437_v12, 0.0  ;;  %v5721_v12 = vand.u32 63, %v10436_v10 }
 0x5c1   :  { %v5518_v41 = vmax.f32 %v5448_v43, 0.0 }
 0x5c2   :  { %v5516_v17 = vmax.f32 %v5440_v2, 0.0  ;;  %vm5722_vm2 = vcmp.lt.s32.totalorder %v5721_v12, 10 }
 0x5c3   :  { %v5541_v51 = vpack.c.bf16 %v5518_v41, %v5517_v0 }
 0x5c4   :  { %v5540_v3 = vpack.c.bf16 %v5516_v17, %v5515_v26 }
 0x5c6   :  { %5975 = vmatprep.subr.bf16.mxu0 %v5540_v3 }
 0x5c7   :  { %5976 = vmatpush3.bf16.msra.mxu0 %v10188_v31 }
 0x5c8   :  { %5977 = vmatprep.subr.bf16.mxu0 %v5541_v51 }
 0x5cb   :  { %5978 = vmatpush3.bf16.msra.mxu0 %v10186_v57 }
 0x5d2   :  { %v6188_v50 = vpop.f32.mrb[52].mxu1 }
 0x5d3   :  { %v5461_v53 = vadd.f32 %v6188_v50, %v10180_v7  ;;  %v5452_v37 = vpop.f32.mrb[53].mxu1 }
 0x5d4   :  { %v5453_v13 = vadd.f32 %v10180_v7, %v5452_v37  ;;  %v6189_v38 = vpop.f32.mrb[54].mxu1 }
 0x5d5   :  { %v5464_v27 = vadd.f32 %v6189_v38, %v10180_v7  ;;  %v5455_v52 = vpop.f32.mrb[55].mxu1  ;;  %v5521_v15 = vmax.f32 %v5461_v53, 0.0 }
 0x5d6   :  { %v5456_v9 = vadd.f32 %v10180_v7, %v5455_v52  ;;  %v5519_v33 = vmax.f32 %v5453_v13, 0.0 }
 0x5d7   :  { %v5522_v14 = vmax.f32 %v5464_v27, 0.0 }
 0x5d8   :  { %v5520_v4 = vmax.f32 %v5456_v9, 0.0 }
 0x5d9   :  { %v5543_v31 = vpack.c.bf16 %v5522_v14, %v5521_v15 }
 0x5da   :  { %v5542_v44 = vpack.c.bf16 %v5520_v4, %v5519_v33 }
 0x5dc   :  { %5979 = vmatprep.subr.bf16.mxu0 %v5542_v44 }
 0x5dd   :  { %5980 = vmatpush3.bf16.msra.mxu0 %v10213_v22 }
 0x5de   :  { %5981 = vmatprep.subr.bf16.mxu0 %v5543_v31 }
 0x5e1   :  { %5982 = vmatpush3.bf16.msra.mxu0 %v10211_v8 }
 0x5e6   :  { %v6192_v57 = vpop.f32.mrb[56].mxu1 }
 0x5e7   :  { %v5477_v58 = vadd.f32 %v6192_v57, %v10180_v7  ;;  %v5468_v55 = vpop.f32.mrb[57].mxu1 }
 0x5e8   :  { %v5469_v28 = vadd.f32 %v10180_v7, %v5468_v55  ;;  %v6193_v46 = vpop.f32.mrb[58].mxu1 }
 0x5e9   :  { %v5480_v5 = vadd.f32 %v6193_v46, %v10180_v7  ;;  %v5471_v61 = vpop.f32.mrb[59].mxu1  ;;  %v5525_v34 = vmax.f32 %v5477_v58, 0.0 }
 0x5ea   :  { %v5472_v36 = vadd.f32 %v10180_v7, %v5471_v61  ;;  %v5523_v35 = vmax.f32 %v5469_v28, 0.0 }
 0x5eb   :  { %v5526_v60 = vmax.f32 %v5480_v5, 0.0 }
 0x5ec   :  { %v5524_v63 = vmax.f32 %v5472_v36, 0.0 }
 0x5ed   :  { %v5545_v22 = vpack.c.bf16 %v5526_v60, %v5525_v34 }
 0x5ee   :  { %v5544_v40 = vpack.c.bf16 %v5524_v63, %v5523_v35 }
 0x5f0   :  { %5983 = vmatprep.subr.bf16.mxu0 %v5544_v40 }
 0x5f1   :  { %5984 = vmatpush3.bf16.msra.mxu0 %v10241_v39  ;;  %v6196_v8 = vpop.f32.mrb[60].mxu1 }
 0x5f2   :  { %5985 = vmatprep.subr.bf16.mxu0 %v5545_v22  ;;  %v5493_v25 = vadd.f32 %v6196_v8, %v10180_v7  ;;  %v5484_v32 = vpop.f32.mrb[61].mxu1 }
 0x5f3   :  { %v5485_v54 = vadd.f32 %v10180_v7, %v5484_v32  ;;  %v6197_v62 = vpop.f32.mrb[62].mxu1 }
 0x5f4   :  { %v5496_v47 = vadd.f32 %v6197_v62, %v10180_v7  ;;  %v5487_v19 = vpop.f32.mrb[63].mxu1  ;;  %v5529_v56 = vmax.f32 %v5493_v25, 0.0 }
 0x5f5   :  { %5986 = vmatpush3.bf16.msra.mxu0 %v10238_v45  ;;  %v5488_v18 = vadd.f32 %v10180_v7, %v5487_v19  ;;  %v5527_v6 = vmax.f32 %v5485_v54, 0.0  ;;  %v6263_v7 = vld [vmem:[%s10321_s6 + $0x30] sm:$0xff]   ;;  %v6264_v45 = vld [vmem:[%s10321_s6 + $0x38] sm:$0xff]   ;;  %s6318_s6 = smov [#allocation3]  }
 0x5f6   :  { %v5530_v1 = vmax.f32 %v5496_v47, 0.0  ;;  %6211 = vmatpush3.bf16.msra.mxu1 %v6263_v7  ;;  %s5760_s7 = sshll.u32 %s6318_s6, 4  ;;  %s5761_s7 = int_to_ptr.vmem [resolvable:$true] %s5760_s7 }
 0x5f7   :  { %v5528_v48 = vmax.f32 %v5488_v18, 0.0  ;;  %6212 = vmatprep.subr.bf16.mxu1 %v10153_v23  ;;  %s6290_s22 = scalar_lea.vmem %s5761_s7, 16  ;;  %s6294_s23 = scalar_lea.vmem %s5761_s7, 32 }
 0x5f8   :  { %v5547_v39 = vpack.c.bf16 %v5530_v1, %v5529_v56  ;;  %p6291_p0 = scmp.ne.s32.totalorder %s5761_s7, %s6290_s22  ;;  %p6295_p1 = scmp.lt.s32.totalorder %s5761_s7, %s5761_s7 }
 0x5f9   :  { %v5546_v42 = vpack.c.bf16 %v5528_v48, %v5527_v6  ;;  %p6296_p2 = scmp.lt.s32.totalorder %s6294_s23, %s6290_s22 }
 0x5fa   :  { %6213 = vmatpush3.bf16.msra.mxu1 %v6264_v45 }
 0x5fb   :  { %5987 = vmatprep.subr.bf16.mxu0 %v5546_v42  ;;  %p6297_p3 = por %p6296_p2, %p6295_p1 }
 0x5fc   :  { %5988 = vmatpush3.bf16.msra.mxu0 %v10249_v59 }
 0x5fd   :  { %5989 = vmatprep.subr.bf16.mxu0 %v5547_v39  ;;  %p6298_p4 = pnand %p6297_p3, %p6291_p0 }
 0x600   :  { %5990 = vmatpush3.bf16.msra.mxu0 %v10247_v30 }
 0x603   :  { %5606 = vmatmul.mubr.bf16.vlgmr.msra.gmra.mrb[64].mxu0 %v5563_v29 }
 0x6d6   :  { %v5991_v30 = vpop.f32.mrb[64].mxu0 }
 0x6d7   :  { %v5992_v59 = vpop.f32.mrb[65].mxu0 }
 0x6d8   :  { %v5993_v11 = vadd.f32 %v5992_v59, %v5991_v30  ;;  %v5994_v21 = vpop.f32.mrb[66].mxu0 }
 0x6d9   :  { %v5995_v49 = vpop.f32.mrb[67].mxu0 }
 0x6da   :  { %v5613_v29 = vmul.f32 0.027777778, %v5993_v11 }
 0x6dc   :  { %v5614_v16 = vpack.c.bf16 %v5613_v29, %v5613_v29 }
 0x6de   :  { %6215 = vmatmul.mubr.bf16.vlgmr.msra.gmra.mrb[64].mxu1 %v5614_v16 }
 0x7b1   :  { %v5714_v43 = vpop.f32.mrb[64].mxu1 }
 0x7b2   :  { %v5715_v24 = vadd.f32 %v5714_v43, %v5631_v20  ;;  %v6216_v23 = vpop.f32.mrb[65].mxu1 }
 0x7b3   :  { %v5717_v2 = vpop.f32.mrb[66].mxu1 }
 0x7b4   :  { %v5723_v0 = vsel %vm5722_vm2, %v5715_v24, -1e+30  ;;  %v6217_v41 = vpop.f32.mrb[67].mxu1 }
 0x7b5   :  { %v5725_v26 = vsel %vm5720_vm3, %v5723_v0, -1e+30  ;;  %v5724_v17 = vsel %vm5720_vm3, -1e+30, %v5723_v0 }
 0x7b6   :  { %v5730_v51 = vsel %vm5726_vm4, %v5725_v26, -inf  ;;  %v5727_v3 = vsel %vm5726_vm4, %v5724_v17, -inf }
 0x7b7   :  { %5731 = vmax.xlane.f32.xlu1 %v5730_v51  ;;  %5728 = vmax.xlane.f32.xlu0 %v5727_v3 }
 0x844   :  { %v5732_v50 = vpop.xlane.xlu1 %5731  ;;  %v5729_v53 = vpop.xlane.xlu0 %5728 }
 0x845   :  { %v5741_v37 = vsub.f32 %v5725_v26, %v5732_v50  ;;  %v5733_v13 = vsub.f32 %v5724_v17, %v5729_v53  ;;  %v5749_v44 = vsel %vm5720_vm3, %v5732_v50, %v5729_v53 }
 0x846   :  { %v5751_v28 = vsub.f32 %v5715_v24, %v5749_v44 }
 0x847   :  { %v5734_v38 = vmul.f32 1.442695, %v5733_v13  ;;  %v5742_v27 = vmul.f32 1.442695, %v5741_v37 }
 0x849   :  { %6265 = vpow2.f32 %v5734_v38 }
 0x84a   :  { %6267 = vpow2.f32 %v5742_v27 }
 0x853   :  { %v6266_v52 = vpop.eup %6265 }
 0x854   :  { %v5736_v9 = vsel %vm5726_vm4, %v6266_v52, 0.0  ;;  %v6268_v15 = vpop.eup %6267 }
 0x855   :  { %5737 = vadd.xlane.f32.xlu0 %v5736_v9  ;;  %v5744_v14 = vsel %vm5726_vm4, %v6268_v15, 0.0 }
 0x859   :  { %5745 = vadd.xlane.f32.xlu0 %v5744_v14 }
 0x8e2   :  { %v5738_v33 = vpop.xlane.xlu0 %5737 }
 0x8e3   :  { %6269 = vlog2.f32 %v5738_v33 }
 0x8e6   :  { %v5746_v4 = vpop.xlane.xlu0 %5745 }
 0x8e7   :  { %6271 = vlog2.f32 %v5746_v4 }
 0x8ed   :  { %v6270_v31 = vpop.eup %6269 }
 0x8ee   :  { %v5740_v58 = vmul.f32 0.6931472, %v6270_v31 }
 0x8f1   :  { %v6272_v57 = vpop.eup %6271 }
 0x8f2   :  { %v5748_v55 = vmul.f32 0.6931472, %v6272_v57 }
 0x8f4   :  { %v5750_v46 = vsel %vm5720_vm3, %v5748_v55, %v5740_v58 }
 0x8f5   :  { %v5752_v5 = vsub.f32 %v5751_v28, %v5750_v46 }
 0x8f7   :  { %5753 = vst [vmem:[#allocation3] sm:$0x1] %v5752_v5 }
 0x8f8   :  { %6301 = shalt.err (!%p6298_p4)
}
 0x8f9   :  { %s6302_s3 = scalar_lea.hbm %s10323_s8, 16 }
 0x8fa   :  { %p6303_p5 = scmp.ne.s32.totalorder %s10323_s8, %s6302_s3  ;;  %p6306_p6 = scmp.lt.u32.totalorder %s6302_s3, %s10323_s8 }
 0x8fc   :  { %p6308_p7 = pnand %p6306_p6, %p6303_p5 }
 0x8fe   :  { %6311 = shalt.err (!%p6308_p7)
}
 0x8ff   :  { %5763 = dma.vmem_to_hbm [thread:$0]  %s5761_s7, 16, %s10323_s8, [#allocation4]  }
 0x900   :  { %6312 = dma.done.wait [#allocation4], 16  }
 0x901   :  { %6313 = vsyncadd [#allocation4], 4294967280 }
 0x902   :  { %5767 = vsyncpa [#allocation4], 1 }

</bundles_post_ra>
